<compile_context>
chip_gen: v7x
topology: tpu7x:2x2x1
jax: 0.10.0
libtpu: 0.0.40
codegen_flags: <defaults>
</compile_context>

<pallas_src>
import functools

import jax
import jax.numpy as jnp
from jax.experimental import pallas as pl
from jax.experimental.pallas import tpu as pltpu


_VMEM_BUDGET = 36 << 20   # per-step working-set target (fits v7x's 64 MiB VMEM)
_VMEM_LIMIT = 48 << 20    # scoped VMEM cap handed to Mosaic (safe on v5e/v6e/v7x)


def _round_up(x, m):
    return (x + m - 1) // m * m


# ----------------------------------------------------------------------------
# Pallas kernels.
# ----------------------------------------------------------------------------
def _mm_bias_kernel(x_ref, w_ref, b_ref, o_ref):
    acc = jnp.dot(x_ref[...], w_ref[...], preferred_element_type=jnp.float32)
    o_ref[...] = (acc + b_ref[...]).astype(o_ref.dtype)


def _mm_bias_add_kernel(x_ref, w_ref, b_ref, a_ref, o_ref):
    # Fused: 1x1 conv + bias + FPN top-down residual add (add operand is bf16).
    acc = jnp.dot(x_ref[...], w_ref[...], preferred_element_type=jnp.float32)
    o_ref[...] = (acc + b_ref[...] + a_ref[...].astype(jnp.float32)).astype(o_ref.dtype)


def _conv3x3_kernel(x_ref, w_ref, b_ref, o_ref, *, wp, lout, relu_in):
    """3x3 conv row-block via in-kernel im2col with K-packed column taps.

    x_ref : (1, 1, (Hblk+3)*wp, C) bf16 -- padded row block (3-row halo),
                                           row pitch wp is a multiple of 8
    w_ref : (3, 3*C, Cout)          bf16 -- K-packed: w[di, dj*C+ci, co]
    b_ref : (1, Cout)               f32
    o_ref : (1, 1, Hblk*wp, Cout)

    For row tap di the three dj-shifted views of the flat tile are concatenated
    along the channel (lane) dim -> one (lout, 3C) x (3C, Cout) MXU dot.  The
    three taps are chained into a single f32 value (register/MRB accumulation,
    no VMEM scratch read-modify-write), then bias-added and stored once.
    """
    def tap(di):
        views = [x_ref[0, 0, pl.ds(di * wp + dj, lout), :] for dj in range(3)]
        p = jnp.concatenate(views, axis=-1)            # (lout, 3C), bf16
        if relu_in:
            p = jnp.maximum(p, 0.0)                    # fused ReLU (P6 -> P7)
        return jnp.dot(p, w_ref[di], preferred_element_type=jnp.float32)

    acc = tap(0) + tap(1) + tap(2)
    o_ref[0, 0, :, :] = (acc + b_ref[...]).astype(o_ref.dtype)


# ----------------------------------------------------------------------------
# Pallas wrappers.
# ----------------------------------------------------------------------------
def _pick_tm(m, k, n, out_bytes, has_add):
    """Largest M tile (1024 -> 128) that yields >=2 grid steps and fits the
    per-generation VMEM budget (double-buffered x/add/out + resident weights)."""
    resident = k * n * 2 + n * 4
    for t in (1024, 512, 256, 128):
        step = 2 * (t * k * 2 + t * n * out_bytes + (t * n * 2 if has_add else 0))
        if m >= 2 * t and resident + step <= _VMEM_BUDGET:
            return t
    return m  # small M: block == full dim (keeps the (8,128) rule legal)


def matmul_bias(x, w, b, add=None, out_dtype=jnp.bfloat16):
    """o = x @ w + b (+ add).  x:(M,K) bf16, w:(K,N) bf16, b:(N,) f32.

    Full-K, full-N (lane-dense) blocks, M tiled with a cdiv grid (tail blocks
    are masked by Pallas), M axis marked parallel for megacore / 2-TC sharding.
    """
    m, k = x.shape
    n = w.shape[1]
    x = x.astype(jnp.bfloat16)
    w = w.astype(jnp.bfloat16)
    b2 = b.reshape(1, n).astype(jnp.float32)
    out_bytes = jnp.dtype(out_dtype).itemsize
    tm = _pick_tm(m, k, n, out_bytes, add is not None)
    grid = (pl.cdiv(m, tm),)

    in_specs = [
        pl.BlockSpec((tm, k), lambda i: (i, 0)),
        pl.BlockSpec((k, n), lambda i: (0, 0)),
        pl.BlockSpec((1, n), lambda i: (0, 0)),
    ]
    args = [x, w, b2]
    if add is None:
        kernel = _mm_bias_kernel
    else:
        kernel = _mm_bias_add_kernel
        in_specs.append(pl.BlockSpec((tm, n), lambda i: (i, 0)))
        args.append(add.astype(jnp.bfloat16))

    return pl.pallas_call(
        kernel,
        out_shape=jax.ShapeDtypeStruct((m, n), out_dtype),
        grid_spec=pltpu.PrefetchScalarGridSpec(
            num_scalar_prefetch=0,
            grid=grid,
            in_specs=in_specs,
            out_specs=pl.BlockSpec((tm, n), lambda i: (i, 0)),
        ),
        compiler_params=pltpu.CompilerParams(
            dimension_semantics=("parallel",),
            vmem_limit_bytes=_VMEM_LIMIT),
    )(*args)


def conv1x1_nhwc(x, w, b, add=None, out_dtype=jnp.bfloat16):
    """1x1 conv on NHWC; optionally fuses the FPN top-down add into the kernel.
    w is pre-stored as (C_in, C_out) -- no per-forward weight transpose."""
    n, h, wd, c = x.shape
    cout = w.shape[1]
    xm = x.reshape(n * h * wd, c)
    am = None if add is None else add.reshape(n * h * wd, cout)
    om = matmul_bias(xm, w, b, add=am, out_dtype=out_dtype)
    return om.reshape(n, h, wd, cout)


def _pick_hblk(h, wp, c, cout, out_bytes):
    """Largest row block giving >=2 grid steps within the VMEM budget."""
    resident = 9 * c * cout * 2 + cout * 4
    def step_bytes(hb):
        x_blk = (hb + 3) * wp * c * 2          # bf16 padded input block, x2 buffers
        o_blk = hb * wp * cout * out_bytes     # output block, x2 buffers
        live = hb * wp * cout * 4 + hb * wp * 3 * c * 2   # f32 acc + K-packed patch
        return 2 * (x_blk + o_blk) + live
    for nb in range(2, h + 1):
        hb = -(-h // nb)
        if resident + step_bytes(hb) <= _VMEM_BUDGET:
            return hb
    return 1


def conv3x3_nhwc(x, w3, b, stride=1, relu_in=False, out_dtype=jnp.float32):
    """3x3 conv, padding=1, NHWC, bf16 activations, f32 MXU accumulation.

    w3: (3, 3*C_in, C_out), K-packed over the column taps:
        w3[di, dj*C_in + ci, co] == torch_weight[co, ci, di, dj].

    stride=2 (P6/P7 only) reuses the stride-1 result and subsamples.
    # TODO(synk): true strided compute for P6/P7 (4x less MXU work on those
    # tiny levels) needs a non-flat row layout; not worth it at these sizes.
    """
    n, h, wd, c = x.shape
    cout = w3.shape[-1]
    wp = _round_up(wd + 2, 8)        # sublane-aligned row pitch: di*wp slice
                                     # starts land on sublane boundaries
    out_bytes = jnp.dtype(out_dtype).itemsize
    hblk = _pick_hblk(h, wp, c, cout, out_bytes)
    nblk = pl.cdiv(h, hblk)
    lin = (hblk + 3) * wp
    lout = hblk * wp

    xb = x.astype(jnp.bfloat16)      # bf16 end-to-end: half the DMA / VMEM
    rows_total = nblk * hblk + 3     # 1 top pad + rows + bottom pad
    xp = jnp.pad(xb, ((0, 0), (1, rows_total - 1 - h),
                      (1, wp - wd - 1), (0, 0)))
    # Overlapping row blocks (3-row halo) built once in XLA so every Pallas
    # block stays a plain rectangular tile driven by standard BlockSpecs.
    xblk = jnp.stack([xp[:, i * hblk:i * hblk + hblk + 3] for i in range(nblk)],
                     axis=1).reshape(n, nblk, lin, c)
    b2 = b.reshape(1, cout).astype(jnp.float32)

    kernel = functools.partial(_conv3x3_kernel, wp=wp, lout=lout, relu_in=relu_in)
    of = pl.pallas_call(
        kernel,
        out_shape=jax.ShapeDtypeStruct((n, nblk, lout, cout), out_dtype),
        grid_spec=pltpu.PrefetchScalarGridSpec(
            num_scalar_prefetch=0,
            grid=(n, nblk),
            in_specs=[
                pl.BlockSpec((1, 1, lin, c), lambda i, j: (i, j, 0, 0)),
                pl.BlockSpec((3, 3 * c, cout), lambda i, j: (0, 0, 0)),
                pl.BlockSpec((1, cout), lambda i, j: (0, 0)),
            ],
            out_specs=pl.BlockSpec((1, 1, lout, cout), lambda i, j: (i, j, 0, 0)),
        ),
        compiler_params=pltpu.CompilerParams(
            dimension_semantics=("parallel", "parallel"),
            vmem_limit_bytes=_VMEM_LIMIT),
    )(xblk, w3.astype(jnp.bfloat16), b2)

    # Drop garbage rows (row-block padding) and wrap-around / pitch-pad columns.
    o = of.reshape(n, nblk * hblk, wp, cout)[:, :h, :wd, :]
    if stride == 2:
        o = o[:, ::2, ::2, :]
    return o


# ----------------------------------------------------------------------------
# Layout helpers (pure XLA glue on small tensors).
# ----------------------------------------------------------------------------
def nearest_resize_nhwc(x, out_h, out_w):
    """F.interpolate(mode='nearest', size=...) in NHWC.  Integer upscales use a
    reshape/broadcast repeat (no gather); general sizes fall back to gather.
    # TODO(synk): fully fusing the 2x upsample into the lateral kernel (i//2
    # index_map on the add operand) would remove this HBM round trip entirely.
    """
    n, h, w, c = x.shape
    if out_h % h == 0 and out_w % w == 0:
        rh, rw = out_h // h, out_w // w
        y = jnp.broadcast_to(x[:, :, None, :, None, :], (n, h, rh, w, rw, c))
        return y.reshape(n, out_h, out_w, c)
    ih = (jnp.arange(out_h) * h // out_h).astype(jnp.int32)
    iw = (jnp.arange(out_w) * w // out_w).astype(jnp.int32)
    return x[:, ih[:, None], iw[None, :], :]


def _space_to_depth_nhwc(x, p):
    n, h, w, c = x.shape
    x = x.reshape(n, h // p, p, w // p, p, c)
    x = jnp.transpose(x, (0, 1, 3, 2, 4, 5))
    return x.reshape(n, h // p, w // p, p * p * c)


# ----------------------------------------------------------------------------
# Parameter init (deterministic, synthetic) -- weights stored in final layouts
# (bf16, pre-transposed / K-packed) so the forward pass is just DMAs + matmuls.
# ----------------------------------------------------------------------------
def init_backbone_fpn_params(key, in_channels_list, out_channel,
                             extra_type="maxpool"):
    keys = iter(jax.random.split(key, 64))
    bf = jnp.bfloat16

    # body stand-in: patch-4 embed then three stride-2 stages.
    body, prev_c, patch = [], 3, 4
    for c in in_channels_list:
        k_in = patch * patch * prev_c
        body.append({
            "w": (jax.random.normal(next(keys), (k_in, c), jnp.float32) * 0.05).astype(bf),
            "b": jax.random.normal(next(keys), (c,), jnp.float32) * 0.01,
        })
        prev_c, patch = c, 2

    params = {"body": body}
    params["inner_w"] = [
        (jax.random.normal(next(keys), (c, out_channel), jnp.float32) * 0.05).astype(bf)
        for c in in_channels_list]
    params["inner_b"] = [
        jax.random.normal(next(keys), (out_channel,), jnp.float32) * 0.01
        for _ in in_channels_list]
    # 3x3 output-conv weights, K-packed (3, 3*Cin, Cout).
    params["layer_w"] = [
        (jax.random.normal(next(keys), (3, 3 * out_channel, out_channel),
                           jnp.float32) * 0.05).astype(bf)
        for _ in in_channels_list]
    params["layer_b"] = [
        jax.random.normal(next(keys), (out_channel,), jnp.float32) * 0.01
        for _ in in_channels_list]

    if extra_type == "last":
        # LastLevelP6P7(2048, 256): in != out -> P6 reads the backbone C5.
        params["p6_w"] = (jax.random.normal(
            next(keys), (3, 3 * in_channels_list[-1], 256),
            jnp.float32) * 0.05).astype(bf)
        params["p6_b"] = jax.random.normal(next(keys), (256,), jnp.float32) * 0.01
        params["p7_w"] = (jax.random.normal(
            next(keys), (3, 3 * 256, 256), jnp.float32) * 0.05).astype(bf)
        params["p7_b"] = jax.random.normal(next(keys), (256,), jnp.float32) * 0.01
    return params


# ----------------------------------------------------------------------------
# Forward passes (all NHWC / bf16 internally).
# ----------------------------------------------------------------------------
def body_forward(x_nhwc, body_params):
    """Stand-in DenseNetLayerGetter: space-to-depth + linear projection per
    stage -> stride-4/8/16/32 bf16 NHWC feature maps."""
    feats, cur = [], x_nhwc
    for i, st in enumerate(body_params):
        p = 4 if i == 0 else 2
        n, h, w, c = cur.shape
        xm = _space_to_depth_nhwc(cur, p).reshape(
            n * (h // p) * (w // p), p * p * c)
        cout = st["w"].shape[1]
        om = matmul_bias(xm, st["w"], st["b"], out_dtype=jnp.bfloat16)
        cur = om.reshape(n, h // p, w // p, cout)
        feats.append(cur)
    return feats


def fpn_forward(feats, params, extra_type):
    """torchvision-style FPN: lateral 1x1 convs (top-down add fused in-kernel),
    bf16 nearest upsample, 3x3 output convs, extra level.
    # TODO(synk): at toy sizes wall time is pallas_call dispatch bound; a
    # per-level lateral+3x3 fusion would remove one HBM round trip per level."""
    names = [str(i) for i in range(len(feats))]

    # Laterals stay bf16: they feed the bf16 3x3 conv and the broadcast
    # upsample (the largest activations in the model -- half the HBM traffic).
    last_inner = conv1x1_nhwc(feats[-1], params["inner_w"][-1],
                              params["inner_b"][-1], out_dtype=jnp.bfloat16)
    results = [conv3x3_nhwc(last_inner, params["layer_w"][-1],
                            params["layer_b"][-1])]

    for idx in range(len(feats) - 2, -1, -1):
        lat = feats[idx]
        oh, ow = lat.shape[1], lat.shape[2]
        top_down = nearest_resize_nhwc(last_inner, oh, ow)
        last_inner = conv1x1_nhwc(lat, params["inner_w"][idx],
                                  params["inner_b"][idx], add=top_down,
                                  out_dtype=jnp.bfloat16)
        results.insert(0, conv3x3_nhwc(last_inner, params["layer_w"][idx],
                                       params["layer_b"][idx]))

    if extra_type == "maxpool":
        # MaxpoolOnP5: F.max_pool2d(P5, kernel=1, stride=2) == subsample.
        results.append(results[-1][:, ::2, ::2, :])
        names.append("pool")
    elif extra_type == "last":
        # LastLevelP6P7: P6 = conv3x3/s2 on C5; P7 = conv3x3/s2 on relu(P6),
        # with the ReLU fused into P7's conv patch load.
        p6 = conv3x3_nhwc(feats[-1], params["p6_w"], params["p6_b"], stride=2)
        p7 = conv3x3_nhwc(p6, params["p7_w"], params["p7_b"], stride=2,
                          relu_in=True)
        results.extend([p6, p7])
        names.extend(["p6", "p7"])
    return dict(zip(names, results))


@functools.partial(jax.jit, static_argnames=("extra_type",))
def backbone_with_fpn_forward(x_nchw, params, extra_type="maxpool"):
    # Single layout change at the boundary: NCHW -> NHWC (+ bf16 for the MXU).
    x = jnp.transpose(x_nchw, (0, 2, 3, 1)).astype(jnp.bfloat16)
    feats = body_forward(x, params["body"])
    outs = fpn_forward(feats, params, extra_type)
    # Final outputs back to NCHW f32 to match the PyTorch module.
    return {k: jnp.transpose(v, (0, 3, 1, 2)) for k, v in outs.items()}


# ----------------------------------------------------------------------------
if __name__ == "__main__":
    key = jax.random.PRNGKey(0)
    k_in, k_par = jax.random.split(key)

    # DenseNet-ish stage channels (kept small) and a lane-dense FPN width.
    in_channels_list = [128, 256, 512, 512]
    out_channel = 128
    N, C, H, W = 2, 3, 64, 64          # strides 4/8/16/32 -> 16, 8, 4, 2

    x = jax.random.normal(k_in, (N, C, H, W), jnp.float32)
    params = init_backbone_fpn_params(k_par, in_channels_list, out_channel,
                                      extra_type="maxpool")

    out = backbone_with_fpn_forward(x, params, extra_type="maxpool")
    jax.block_until_ready(out)

    # sanity: shapes match torchvision FPN + maxpool extra level
    assert out["0"].shape == (N, out_channel, 16, 16)
    assert out["1"].shape == (N, out_channel, 8, 8)
    assert out["2"].shape == (N, out_channel, 4, 4)
    assert out["3"].shape == (N, out_channel, 2, 2)
    assert out["pool"].shape == (N, out_channel, 1, 1)
    assert bool(jnp.isfinite(out["0"]).all())
    print("KERNEL_OK")
</pallas_src>

<mosaic_0001>
module attributes {stable_mosaic.version = 11 : i64} {
  func.func @_mm_bias_kernel(%arg0: i32, %arg1: memref<256x48xbf16, #tpu.memory_space<vmem>>, %arg2: memref<48x128xbf16, #tpu.memory_space<vmem>>, %arg3: memref<1x128xf32, #tpu.memory_space<vmem>>, %arg4: memref<256x128xbf16, #tpu.memory_space<vmem>>) attributes {dimension_semantics = [#tpu.dimension_semantics<parallel>], iteration_bounds = array<i64: 2>, scalar_prefetch = 0 : i64, scratch_operands = 0 : i64, tpu.core_type = #tpu.core_type<tc>, window_params = [{transform_indices = @transform_0, window_bounds = array<i64: 256, 48>}, {pipeline_mode = #tpu.pipeline_mode<synchronous>, transform_indices = @transform_1, window_bounds = array<i64: 48, 128>}, {pipeline_mode = #tpu.pipeline_mode<synchronous>, transform_indices = @transform_2, window_bounds = array<i64: 1, 128>}, {transform_indices = @transform_3, window_bounds = array<i64: 256, 128>}]} {
    %c0 = arith.constant 0 : index
    %c0_0 = arith.constant 0 : index
    %0 = vector.load %arg1[%c0, %c0_0] : memref<256x48xbf16, #tpu.memory_space<vmem>>, vector<256x48xbf16>
    %c0_1 = arith.constant 0 : index
    %c0_2 = arith.constant 0 : index
    %1 = vector.load %arg2[%c0_1, %c0_2] : memref<48x128xbf16, #tpu.memory_space<vmem>>, vector<48x128xbf16>
    %cst = arith.constant dense<0.000000e+00> : vector<256x128xf32>
    %2 = tpu.matmul %0, %1, %cst {dimension_numbers = #tpu.dot_dimension_numbers<[1], [0], [0], [1], [0, 0, 1, 1], [], []>} : vector<256x48xbf16>, vector<48x128xbf16>, vector<256x128xf32> -> vector<256x128xf32>
    %c0_3 = arith.constant 0 : index
    %c0_4 = arith.constant 0 : index
    %3 = vector.load %arg3[%c0_3, %c0_4] : memref<1x128xf32, #tpu.memory_space<vmem>>, vector<1x128xf32>
    %4 = vector.broadcast %3 : vector<1x128xf32> to vector<256x128xf32>
    %5 = arith.addf %2, %4 : vector<256x128xf32>
    %6 = arith.truncf %5 : vector<256x128xf32> to vector<256x128xbf16>
    %c0_5 = arith.constant 0 : index
    %c0_6 = arith.constant 0 : index
    %7 = vector.load %arg4[%c0_5, %c0_6] : memref<256x128xbf16, #tpu.memory_space<vmem>>, vector<256x128xbf16>
    tpu.vector_store %arg4[%c0_5, %c0_6], %6 {strides = array<i32>} : memref<256x128xbf16, #tpu.memory_space<vmem>>, vector<256x128xbf16>,
    return
  }
  func.func @transform_0(%arg0: i32) -> (i32, i32) {
    %c0_i32 = arith.constant 0 : i32
    %c0_i32_0 = arith.constant 0 : i32
    return %arg0, %c0_i32 : i32, i32
  }
  func.func @transform_1(%arg0: i32) -> (i32, i32) {
    %c0_i32 = arith.constant 0 : i32
    %c0_i32_0 = arith.constant 0 : i32
    %c0_i32_1 = arith.constant 0 : i32
    return %c0_i32, %c0_i32_0 : i32, i32
  }
  func.func @transform_2(%arg0: i32) -> (i32, i32) {
    %c0_i32 = arith.constant 0 : i32
    %c0_i32_0 = arith.constant 0 : i32
    %c0_i32_1 = arith.constant 0 : i32
    return %c0_i32, %c0_i32_0 : i32, i32
  }
  func.func @transform_3(%arg0: i32) -> (i32, i32) {
    %c0_i32 = arith.constant 0 : i32
    %c0_i32_0 = arith.constant 0 : i32
    return %arg0, %c0_i32 : i32, i32
  }
}

module attributes {stable_mosaic.version = 11 : i64} {
  func.func @_mm_bias_kernel(%arg0: i32, %arg1: memref<128x512xbf16, #tpu.memory_space<vmem>>, %arg2: memref<512x256xbf16, #tpu.memory_space<vmem>>, %arg3: memref<1x256xf32, #tpu.memory_space<vmem>>, %arg4: memref<128x256xbf16, #tpu.memory_space<vmem>>) attributes {dimension_semantics = [#tpu.dimension_semantics<parallel>], iteration_bounds = array<i64: 1>, scalar_prefetch = 0 : i64, scratch_operands = 0 : i64, tpu.core_type = #tpu.core_type<tc>, window_params = [{transform_indices = @transform_0, window_bounds = array<i64: 128, 512>}, {pipeline_mode = #tpu.pipeline_mode<synchronous>, transform_indices = @transform_1, window_bounds = array<i64: 512, 256>}, {pipeline_mode = #tpu.pipeline_mode<synchronous>, transform_indices = @transform_2, window_bounds = array<i64: 1, 256>}, {transform_indices = @transform_3, window_bounds = array<i64: 128, 256>}]} {
    %c0 = arith.constant 0 : index
    %c0_0 = arith.constant 0 : index
    %0 = vector.load %arg1[%c0, %c0_0] : memref<128x512xbf16, #tpu.memory_space<vmem>>, vector<128x512xbf16>
    %c0_1 = arith.constant 0 : index
    %c0_2 = arith.constant 0 : index
    %1 = vector.load %arg2[%c0_1, %c0_2] : memref<512x256xbf16, #tpu.memory_space<vmem>>, vector<512x256xbf16>
    %cst = arith.constant dense<0.000000e+00> : vector<128x256xf32>
    %2 = tpu.matmul %0, %1, %cst {dimension_numbers = #tpu.dot_dimension_numbers<[1], [0], [0], [1], [0, 0, 1, 1], [], []>} : vector<128x512xbf16>, vector<512x256xbf16>, vector<128x256xf32> -> vector<128x256xf32>
    %c0_3 = arith.constant 0 : index
    %c0_4 = arith.constant 0 : index
    %3 = vector.load %arg3[%c0_3, %c0_4] : memref<1x256xf32, #tpu.memory_space<vmem>>, vector<1x256xf32>
    %4 = vector.broadcast %3 : vector<1x256xf32> to vector<128x256xf32>
    %5 = arith.addf %2, %4 : vector<128x256xf32>
    %6 = arith.truncf %5 : vector<128x256xf32> to vector<128x256xbf16>
    %c0_5 = arith.constant 0 : index
    %c0_6 = arith.constant 0 : index
    %7 = vector.load %arg4[%c0_5, %c0_6] : memref<128x256xbf16, #tpu.memory_space<vmem>>, vector<128x256xbf16>
    tpu.vector_store %arg4[%c0_5, %c0_6], %6 {strides = array<i32>} : memref<128x256xbf16, #tpu.memory_space<vmem>>, vector<128x256xbf16>,
    return
  }
  func.func @transform_0(%arg0: i32) -> (i32, i32) {
    %c0_i32 = arith.constant 0 : i32
    %c0_i32_0 = arith.constant 0 : i32
    return %arg0, %c0_i32 : i32, i32
  }
  func.func @transform_1(%arg0: i32) -> (i32, i32) {
    %c0_i32 = arith.constant 0 : i32
    %c0_i32_0 = arith.constant 0 : i32
    %c0_i32_1 = arith.constant 0 : i32
    return %c0_i32, %c0_i32_0 : i32, i32
  }
  func.func @transform_2(%arg0: i32) -> (i32, i32) {
    %c0_i32 = arith.constant 0 : i32
    %c0_i32_0 = arith.constant 0 : i32
    %c0_i32_1 = arith.constant 0 : i32
    return %c0_i32, %c0_i32_0 : i32, i32
  }
  func.func @transform_3(%arg0: i32) -> (i32, i32) {
    %c0_i32 = arith.constant 0 : i32
    %c0_i32_0 = arith.constant 0 : i32
    return %arg0, %c0_i32 : i32, i32
  }
}

module attributes {stable_mosaic.version = 11 : i64} {
  func.func @_mm_bias_kernel(%arg0: i32, %arg1: memref<32x1024xbf16, #tpu.memory_space<vmem>>, %arg2: memref<1024x512xbf16, #tpu.memory_space<vmem>>, %arg3: memref<1x512xf32, #tpu.memory_space<vmem>>, %arg4: memref<32x512xbf16, #tpu.memory_space<vmem>>) attributes {dimension_semantics = [#tpu.dimension_semantics<parallel>], iteration_bounds = array<i64: 1>, scalar_prefetch = 0 : i64, scratch_operands = 0 : i64, tpu.core_type = #tpu.core_type<tc>, window_params = [{transform_indices = @transform_0, window_bounds = array<i64: 32, 1024>}, {pipeline_mode = #tpu.pipeline_mode<synchronous>, transform_indices = @transform_1, window_bounds = array<i64: 1024, 512>}, {pipeline_mode = #tpu.pipeline_mode<synchronous>, transform_indices = @transform_2, window_bounds = array<i64: 1, 512>}, {transform_indices = @transform_3, window_bounds = array<i64: 32, 512>}]} {
    %c0 = arith.constant 0 : index
    %c0_0 = arith.constant 0 : index
    %0 = vector.load %arg1[%c0, %c0_0] : memref<32x1024xbf16, #tpu.memory_space<vmem>>, vector<32x1024xbf16>
    %c0_1 = arith.constant 0 : index
    %c0_2 = arith.constant 0 : index
    %1 = vector.load %arg2[%c0_1, %c0_2] : memref<1024x512xbf16, #tpu.memory_space<vmem>>, vector<1024x512xbf16>
    %cst = arith.constant dense<0.000000e+00> : vector<32x512xf32>
    %2 = tpu.matmul %0, %1, %cst {dimension_numbers = #tpu.dot_dimension_numbers<[1], [0], [0], [1], [0, 0, 1, 1], [], []>} : vector<32x1024xbf16>, vector<1024x512xbf16>, vector<32x512xf32> -> vector<32x512xf32>
    %c0_3 = arith.constant 0 : index
    %c0_4 = arith.constant 0 : index
    %3 = vector.load %arg3[%c0_3, %c0_4] : memref<1x512xf32, #tpu.memory_space<vmem>>, vector<1x512xf32>
    %4 = vector.broadcast %3 : vector<1x512xf32> to vector<32x512xf32>
    %5 = arith.addf %2, %4 : vector<32x512xf32>
    %6 = arith.truncf %5 : vector<32x512xf32> to vector<32x512xbf16>
    %c0_5 = arith.constant 0 : index
    %c0_6 = arith.constant 0 : index
    %7 = vector.load %arg4[%c0_5, %c0_6] : memref<32x512xbf16, #tpu.memory_space<vmem>>, vector<32x512xbf16>
    tpu.vector_store %arg4[%c0_5, %c0_6], %6 {strides = array<i32>} : memref<32x512xbf16, #tpu.memory_space<vmem>>, vector<32x512xbf16>,
    return
  }
  func.func @transform_0(%arg0: i32) -> (i32, i32) {
    %c0_i32 = arith.constant 0 : i32
    %c0_i32_0 = arith.constant 0 : i32
    return %arg0, %c0_i32 : i32, i32
  }
  func.func @transform_1(%arg0: i32) -> (i32, i32) {
    %c0_i32 = arith.constant 0 : i32
    %c0_i32_0 = arith.constant 0 : i32
    %c0_i32_1 = arith.constant 0 : i32
    return %c0_i32, %c0_i32_0 : i32, i32
  }
  func.func @transform_2(%arg0: i32) -> (i32, i32) {
    %c0_i32 = arith.constant 0 : i32
    %c0_i32_0 = arith.constant 0 : i32
    %c0_i32_1 = arith.constant 0 : i32
    return %c0_i32, %c0_i32_0 : i32, i32
  }
  func.func @transform_3(%arg0: i32) -> (i32, i32) {
    %c0_i32 = arith.constant 0 : i32
    %c0_i32_0 = arith.constant 0 : i32
    return %arg0, %c0_i32 : i32, i32
  }
}

module attributes {stable_mosaic.version = 11 : i64} {
  func.func @_mm_bias_kernel(%arg0: i32, %arg1: memref<8x512xbf16, #tpu.memory_space<vmem>>, %arg2: memref<512x128xbf16, #tpu.memory_space<vmem>>, %arg3: memref<1x128xf32, #tpu.memory_space<vmem>>, %arg4: memref<8x128xbf16, #tpu.memory_space<vmem>>) attributes {dimension_semantics = [#tpu.dimension_semantics<parallel>], iteration_bounds = array<i64: 1>, scalar_prefetch = 0 : i64, scratch_operands = 0 : i64, tpu.core_type = #tpu.core_type<tc>, window_params = [{transform_indices = @transform_0, window_bounds = array<i64: 8, 512>}, {pipeline_mode = #tpu.pipeline_mode<synchronous>, transform_indices = @transform_1, window_bounds = array<i64: 512, 128>}, {pipeline_mode = #tpu.pipeline_mode<synchronous>, transform_indices = @transform_2, window_bounds = array<i64: 1, 128>}, {transform_indices = @transform_3, window_bounds = array<i64: 8, 128>}]} {
    %c0 = arith.constant 0 : index
    %c0_0 = arith.constant 0 : index
    %0 = vector.load %arg1[%c0, %c0_0] : memref<8x512xbf16, #tpu.memory_space<vmem>>, vector<8x512xbf16>
    %c0_1 = arith.constant 0 : index
    %c0_2 = arith.constant 0 : index
    %1 = vector.load %arg2[%c0_1, %c0_2] : memref<512x128xbf16, #tpu.memory_space<vmem>>, vector<512x128xbf16>
    %cst = arith.constant dense<0.000000e+00> : vector<8x128xf32>
    %2 = tpu.matmul %0, %1, %cst {dimension_numbers = #tpu.dot_dimension_numbers<[1], [0], [0], [1], [0, 0, 1, 1], [], []>} : vector<8x512xbf16>, vector<512x128xbf16>, vector<8x128xf32> -> vector<8x128xf32>
    %c0_3 = arith.constant 0 : index
    %c0_4 = arith.constant 0 : index
    %3 = vector.load %arg3[%c0_3, %c0_4] : memref<1x128xf32, #tpu.memory_space<vmem>>, vector<1x128xf32>
    %4 = vector.broadcast %3 : vector<1x128xf32> to vector<8x128xf32>
    %5 = arith.addf %2, %4 : vector<8x128xf32>
    %6 = arith.truncf %5 : vector<8x128xf32> to vector<8x128xbf16>
    %c0_5 = arith.constant 0 : index
    %c0_6 = arith.constant 0 : index
    %7 = vector.load %arg4[%c0_5, %c0_6] : memref<8x128xbf16, #tpu.memory_space<vmem>>, vector<8x128xbf16>
    tpu.vector_store %arg4[%c0_5, %c0_6], %6 {strides = array<i32>} : memref<8x128xbf16, #tpu.memory_space<vmem>>, vector<8x128xbf16>,
    return
  }
  func.func @transform_0(%arg0: i32) -> (i32, i32) {
    %c0_i32 = arith.constant 0 : i32
    %c0_i32_0 = arith.constant 0 : i32
    return %arg0, %c0_i32 : i32, i32
  }
  func.func @transform_1(%arg0: i32) -> (i32, i32) {
    %c0_i32 = arith.constant 0 : i32
    %c0_i32_0 = arith.constant 0 : i32
    %c0_i32_1 = arith.constant 0 : i32
    return %c0_i32, %c0_i32_0 : i32, i32
  }
  func.func @transform_2(%arg0: i32) -> (i32, i32) {
    %c0_i32 = arith.constant 0 : i32
    %c0_i32_0 = arith.constant 0 : i32
    %c0_i32_1 = arith.constant 0 : i32
    return %c0_i32, %c0_i32_0 : i32, i32
  }
  func.func @transform_3(%arg0: i32) -> (i32, i32) {
    %c0_i32 = arith.constant 0 : i32
    %c0_i32_0 = arith.constant 0 : i32
    return %arg0, %c0_i32 : i32, i32
  }
}

module attributes {stable_mosaic.version = 11 : i64} {
  func.func @_mm_bias_kernel(%arg0: i32, %arg1: memref<8x2048xbf16, #tpu.memory_space<vmem>>, %arg2: memref<2048x512xbf16, #tpu.memory_space<vmem>>, %arg3: memref<1x512xf32, #tpu.memory_space<vmem>>, %arg4: memref<8x512xbf16, #tpu.memory_space<vmem>>) attributes {dimension_semantics = [#tpu.dimension_semantics<parallel>], iteration_bounds = array<i64: 1>, scalar_prefetch = 0 : i64, scratch_operands = 0 : i64, tpu.core_type = #tpu.core_type<tc>, window_params = [{transform_indices = @transform_0, window_bounds = array<i64: 8, 2048>}, {pipeline_mode = #tpu.pipeline_mode<synchronous>, transform_indices = @transform_1, window_bounds = array<i64: 2048, 512>}, {pipeline_mode = #tpu.pipeline_mode<synchronous>, transform_indices = @transform_2, window_bounds = array<i64: 1, 512>}, {transform_indices = @transform_3, window_bounds = array<i64: 8, 512>}]} {
    %c0 = arith.constant 0 : index
    %c0_0 = arith.constant 0 : index
    %0 = vector.load %arg1[%c0, %c0_0] : memref<8x2048xbf16, #tpu.memory_space<vmem>>, vector<8x2048xbf16>
    %c0_1 = arith.constant 0 : index
    %c0_2 = arith.constant 0 : index
    %1 = vector.load %arg2[%c0_1, %c0_2] : memref<2048x512xbf16, #tpu.memory_space<vmem>>, vector<2048x512xbf16>
    %cst = arith.constant dense<0.000000e+00> : vector<8x512xf32>
    %2 = tpu.matmul %0, %1, %cst {dimension_numbers = #tpu.dot_dimension_numbers<[1], [0], [0], [1], [0, 0, 1, 1], [], []>} : vector<8x2048xbf16>, vector<2048x512xbf16>, vector<8x512xf32> -> vector<8x512xf32>
    %c0_3 = arith.constant 0 : index
    %c0_4 = arith.constant 0 : index
    %3 = vector.load %arg3[%c0_3, %c0_4] : memref<1x512xf32, #tpu.memory_space<vmem>>, vector<1x512xf32>
    %4 = vector.broadcast %3 : vector<1x512xf32> to vector<8x512xf32>
    %5 = arith.addf %2, %4 : vector<8x512xf32>
    %6 = arith.truncf %5 : vector<8x512xf32> to vector<8x512xbf16>
    %c0_5 = arith.constant 0 : index
    %c0_6 = arith.constant 0 : index
    %7 = vector.load %arg4[%c0_5, %c0_6] : memref<8x512xbf16, #tpu.memory_space<vmem>>, vector<8x512xbf16>
    tpu.vector_store %arg4[%c0_5, %c0_6], %6 {strides = array<i32>} : memref<8x512xbf16, #tpu.memory_space<vmem>>, vector<8x512xbf16>,
    return
  }
  func.func @transform_0(%arg0: i32) -> (i32, i32) {
    %c0_i32 = arith.constant 0 : i32
    %c0_i32_0 = arith.constant 0 : i32
    return %arg0, %c0_i32 : i32, i32
  }
  func.func @transform_1(%arg0: i32) -> (i32, i32) {
    %c0_i32 = arith.constant 0 : i32
    %c0_i32_0 = arith.constant 0 : i32
    %c0_i32_1 = arith.constant 0 : i32
    return %c0_i32, %c0_i32_0 : i32, i32
  }
  func.func @transform_2(%arg0: i32) -> (i32, i32) {
    %c0_i32 = arith.constant 0 : i32
    %c0_i32_0 = arith.constant 0 : i32
    %c0_i32_1 = arith.constant 0 : i32
    return %c0_i32, %c0_i32_0 : i32, i32
  }
  func.func @transform_3(%arg0: i32) -> (i32, i32) {
    %c0_i32 = arith.constant 0 : i32
    %c0_i32_0 = arith.constant 0 : i32
    return %arg0, %c0_i32 : i32, i32
  }
}

module attributes {stable_mosaic.version = 11 : i64} {
  func.func @_mm_bias_add_kernel(%arg0: i32, %arg1: memref<32x512xbf16, #tpu.memory_space<vmem>>, %arg2: memref<512x128xbf16, #tpu.memory_space<vmem>>, %arg3: memref<1x128xf32, #tpu.memory_space<vmem>>, %arg4: memref<32x128xbf16, #tpu.memory_space<vmem>>, %arg5: memref<32x128xbf16, #tpu.memory_space<vmem>>) attributes {dimension_semantics = [#tpu.dimension_semantics<parallel>], iteration_bounds = array<i64: 1>, scalar_prefetch = 0 : i64, scratch_operands = 0 : i64, tpu.core_type = #tpu.core_type<tc>, window_params = [{transform_indices = @transform_0, window_bounds = array<i64: 32, 512>}, {pipeline_mode = #tpu.pipeline_mode<synchronous>, transform_indices = @transform_1, window_bounds = array<i64: 512, 128>}, {pipeline_mode = #tpu.pipeline_mode<synchronous>, transform_indices = @transform_2, window_bounds = array<i64: 1, 128>}, {transform_indices = @transform_3, window_bounds = array<i64: 32, 128>}, {transform_indices = @transform_4, window_bounds = array<i64: 32, 128>}]} {
    %c0 = arith.constant 0 : index
    %c0_0 = arith.constant 0 : index
    %0 = vector.load %arg1[%c0, %c0_0] : memref<32x512xbf16, #tpu.memory_space<vmem>>, vector<32x512xbf16>
    %c0_1 = arith.constant 0 : index
    %c0_2 = arith.constant 0 : index
    %1 = vector.load %arg2[%c0_1, %c0_2] : memref<512x128xbf16, #tpu.memory_space<vmem>>, vector<512x128xbf16>
    %cst = arith.constant dense<0.000000e+00> : vector<32x128xf32>
    %2 = tpu.matmul %0, %1, %cst {dimension_numbers = #tpu.dot_dimension_numbers<[1], [0], [0], [1], [0, 0, 1, 1], [], []>} : vector<32x512xbf16>, vector<512x128xbf16>, vector<32x128xf32> -> vector<32x128xf32>
    %c0_3 = arith.constant 0 : index
    %c0_4 = arith.constant 0 : index
    %3 = vector.load %arg3[%c0_3, %c0_4] : memref<1x128xf32, #tpu.memory_space<vmem>>, vector<1x128xf32>
    %4 = vector.broadcast %3 : vector<1x128xf32> to vector<32x128xf32>
    %5 = arith.addf %2, %4 : vector<32x128xf32>
    %c0_5 = arith.constant 0 : index
    %c0_6 = arith.constant 0 : index
    %6 = vector.load %arg4[%c0_5, %c0_6] : memref<32x128xbf16, #tpu.memory_space<vmem>>, vector<32x128xbf16>
    %7 = arith.extf %6 : vector<32x128xbf16> to vector<32x128xf32>
    %8 = arith.addf %5, %7 : vector<32x128xf32>
    %9 = arith.truncf %8 : vector<32x128xf32> to vector<32x128xbf16>
    %c0_7 = arith.constant 0 : index
    %c0_8 = arith.constant 0 : index
    %10 = vector.load %arg5[%c0_7, %c0_8] : memref<32x128xbf16, #tpu.memory_space<vmem>>, vector<32x128xbf16>
    tpu.vector_store %arg5[%c0_7, %c0_8], %9 {strides = array<i32>} : memref<32x128xbf16, #tpu.memory_space<vmem>>, vector<32x128xbf16>,
    return
  }
  func.func @transform_0(%arg0: i32) -> (i32, i32) {
    %c0_i32 = arith.constant 0 : i32
    %c0_i32_0 = arith.constant 0 : i32
    return %arg0, %c0_i32 : i32, i32
  }
  func.func @transform_1(%arg0: i32) -> (i32, i32) {
    %c0_i32 = arith.constant 0 : i32
    %c0_i32_0 = arith.constant 0 : i32
    %c0_i32_1 = arith.constant 0 : i32
    return %c0_i32, %c0_i32_0 : i32, i32
  }
  func.func @transform_2(%arg0: i32) -> (i32, i32) {
    %c0_i32 = arith.constant 0 : i32
    %c0_i32_0 = arith.constant 0 : i32
    %c0_i32_1 = arith.constant 0 : i32
    return %c0_i32, %c0_i32_0 : i32, i32
  }
  func.func @transform_3(%arg0: i32) -> (i32, i32) {
    %c0_i32 = arith.constant 0 : i32
    %c0_i32_0 = arith.constant 0 : i32
    return %arg0, %c0_i32 : i32, i32
  }
  func.func @transform_4(%arg0: i32) -> (i32, i32) {
    %c0_i32 = arith.constant 0 : i32
    %c0_i32_0 = arith.constant 0 : i32
    return %arg0, %c0_i32 : i32, i32
  }
}

module attributes {stable_mosaic.version = 11 : i64} {
  func.func @_conv3x3_kernel(%arg0: i32, %arg1: i32, %arg2: memref<1x1x32x128xbf16, #tpu.memory_space<vmem>>, %arg3: memref<3x384x128xbf16, #tpu.memory_space<vmem>>, %arg4: memref<1x128xf32, #tpu.memory_space<vmem>>, %arg5: memref<1x1x8x128xf32, #tpu.memory_space<vmem>>) attributes {dimension_semantics = [#tpu.dimension_semantics<parallel>, #tpu.dimension_semantics<parallel>], iteration_bounds = array<i64: 2, 2>, scalar_prefetch = 0 : i64, scratch_operands = 0 : i64, tpu.core_type = #tpu.core_type<tc>, window_params = [{transform_indices = @transform_0, window_bounds = array<i64: 1, 1, 32, 128>}, {pipeline_mode = #tpu.pipeline_mode<synchronous>, transform_indices = @transform_1, window_bounds = array<i64: 3, 384, 128>}, {pipeline_mode = #tpu.pipeline_mode<synchronous>, transform_indices = @transform_2, window_bounds = array<i64: 1, 128>}, {transform_indices = @transform_3, window_bounds = array<i64: 1, 1, 8, 128>}]} {
    %c0 = arith.constant 0 : index
    %c0_0 = arith.constant 0 : index
    %c0_1 = arith.constant 0 : index
    %c0_2 = arith.constant 0 : index
    %0 = vector.load %arg2[%c0, %c0_0, %c0_1, %c0_2] : memref<1x1x32x128xbf16, #tpu.memory_space<vmem>>, vector<1x1x8x128xbf16>
    %1 = vector.shape_cast %0 : vector<1x1x8x128xbf16> to vector<8x128xbf16>
    %c0_3 = arith.constant 0 : index
    %c0_4 = arith.constant 0 : index
    %c1 = arith.constant 1 : index
    %c0_5 = arith.constant 0 : index
    %2 = vector.load %arg2[%c0_3, %c0_4, %c1, %c0_5] : memref<1x1x32x128xbf16, #tpu.memory_space<vmem>>, vector<1x1x8x128xbf16>
    %3 = vector.shape_cast %2 : vector<1x1x8x128xbf16> to vector<8x128xbf16>
    %c0_6 = arith.constant 0 : index
    %c0_7 = arith.constant 0 : index
    %c2 = arith.constant 2 : index
    %c0_8 = arith.constant 0 : index
    %4 = vector.load %arg2[%c0_6, %c0_7, %c2, %c0_8] : memref<1x1x32x128xbf16, #tpu.memory_space<vmem>>, vector<1x1x8x128xbf16>
    %5 = vector.shape_cast %4 : vector<1x1x8x128xbf16> to vector<8x128xbf16>
    %6 = tpu.concatenate %1, %3, %5 in 1 : vector<8x128xbf16>, vector<8x128xbf16>, vector<8x128xbf16> -> vector<8x384xbf16>
    %c0_9 = arith.constant 0 : index
    %c0_10 = arith.constant 0 : index
    %c0_11 = arith.constant 0 : index
    %7 = vector.load %arg3[%c0_9, %c0_10, %c0_11] : memref<3x384x128xbf16, #tpu.memory_space<vmem>>, vector<1x384x128xbf16>
    %8 = vector.shape_cast %7 : vector<1x384x128xbf16> to vector<384x128xbf16>
    %cst = arith.constant dense<0.000000e+00> : vector<8x128xf32>
    %9 = tpu.matmul %6, %8, %cst {dimension_numbers = #tpu.dot_dimension_numbers<[1], [0], [0], [1], [0, 0, 1, 1], [], []>} : vector<8x384xbf16>, vector<384x128xbf16>, vector<8x128xf32> -> vector<8x128xf32>
    %c0_12 = arith.constant 0 : index
    %c0_13 = arith.constant 0 : index
    %c8 = arith.constant 8 : index
    %c0_14 = arith.constant 0 : index
    %10 = vector.load %arg2[%c0_12, %c0_13, %c8, %c0_14] : memref<1x1x32x128xbf16, #tpu.memory_space<vmem>>, vector<1x1x8x128xbf16>
    %11 = vector.shape_cast %10 : vector<1x1x8x128xbf16> to vector<8x128xbf16>
    %c0_15 = arith.constant 0 : index
    %c0_16 = arith.constant 0 : index
    %c9 = arith.constant 9 : index
    %c0_17 = arith.constant 0 : index
    %12 = vector.load %arg2[%c0_15, %c0_16, %c9, %c0_17] : memref<1x1x32x128xbf16, #tpu.memory_space<vmem>>, vector<1x1x8x128xbf16>
    %13 = vector.shape_cast %12 : vector<1x1x8x128xbf16> to vector<8x128xbf16>
    %c0_18 = arith.constant 0 : index
    %c0_19 = arith.constant 0 : index
    %c10 = arith.constant 10 : index
    %c0_20 = arith.constant 0 : index
    %14 = vector.load %arg2[%c0_18, %c0_19, %c10, %c0_20] : memref<1x1x32x128xbf16, #tpu.memory_space<vmem>>, vector<1x1x8x128xbf16>
    %15 = vector.shape_cast %14 : vector<1x1x8x128xbf16> to vector<8x128xbf16>
    %16 = tpu.concatenate %11, %13, %15 in 1 : vector<8x128xbf16>, vector<8x128xbf16>, vector<8x128xbf16> -> vector<8x384xbf16>
    %c1_21 = arith.constant 1 : index
    %c0_22 = arith.constant 0 : index
    %c0_23 = arith.constant 0 : index
    %17 = vector.load %arg3[%c1_21, %c0_22, %c0_23] : memref<3x384x128xbf16, #tpu.memory_space<vmem>>, vector<1x384x128xbf16>
    %18 = vector.shape_cast %17 : vector<1x384x128xbf16> to vector<384x128xbf16>
    %cst_24 = arith.constant dense<0.000000e+00> : vector<8x128xf32>
    %19 = tpu.matmul %16, %18, %cst_24 {dimension_numbers = #tpu.dot_dimension_numbers<[1], [0], [0], [1], [0, 0, 1, 1], [], []>} : vector<8x384xbf16>, vector<384x128xbf16>, vector<8x128xf32> -> vector<8x128xf32>
    %20 = arith.addf %9, %19 : vector<8x128xf32>
    %c0_25 = arith.constant 0 : index
    %c0_26 = arith.constant 0 : index
    %c16 = arith.constant 16 : index
    %c0_27 = arith.constant 0 : index
    %21 = vector.load %arg2[%c0_25, %c0_26, %c16, %c0_27] : memref<1x1x32x128xbf16, #tpu.memory_space<vmem>>, vector<1x1x8x128xbf16>
    %22 = vector.shape_cast %21 : vector<1x1x8x128xbf16> to vector<8x128xbf16>
    %c0_28 = arith.constant 0 : index
    %c0_29 = arith.constant 0 : index
    %c17 = arith.constant 17 : index
    %c0_30 = arith.constant 0 : index
    %23 = vector.load %arg2[%c0_28, %c0_29, %c17, %c0_30] : memref<1x1x32x128xbf16, #tpu.memory_space<vmem>>, vector<1x1x8x128xbf16>
    %24 = vector.shape_cast %23 : vector<1x1x8x128xbf16> to vector<8x128xbf16>
    %c0_31 = arith.constant 0 : index
    %c0_32 = arith.constant 0 : index
    %c18 = arith.constant 18 : index
    %c0_33 = arith.constant 0 : index
    %25 = vector.load %arg2[%c0_31, %c0_32, %c18, %c0_33] : memref<1x1x32x128xbf16, #tpu.memory_space<vmem>>, vector<1x1x8x128xbf16>
    %26 = vector.shape_cast %25 : vector<1x1x8x128xbf16> to vector<8x128xbf16>
    %27 = tpu.concatenate %22, %24, %26 in 1 : vector<8x128xbf16>, vector<8x128xbf16>, vector<8x128xbf16> -> vector<8x384xbf16>
    %c2_34 = arith.constant 2 : index
    %c0_35 = arith.constant 0 : index
    %c0_36 = arith.constant 0 : index
    %28 = vector.load %arg3[%c2_34, %c0_35, %c0_36] : memref<3x384x128xbf16, #tpu.memory_space<vmem>>, vector<1x384x128xbf16>
    %29 = vector.shape_cast %28 : vector<1x384x128xbf16> to vector<384x128xbf16>
    %cst_37 = arith.constant dense<0.000000e+00> : vector<8x128xf32>
    %30 = tpu.matmul %27, %29, %cst_37 {dimension_numbers = #tpu.dot_dimension_numbers<[1], [0], [0], [1], [0, 0, 1, 1], [], []>} : vector<8x384xbf16>, vector<384x128xbf16>, vector<8x128xf32> -> vector<8x128xf32>
    %31 = arith.addf %20, %30 : vector<8x128xf32>
    %c0_38 = arith.constant 0 : index
    %c0_39 = arith.constant 0 : index
    %32 = vector.load %arg4[%c0_38, %c0_39] : memref<1x128xf32, #tpu.memory_space<vmem>>, vector<1x128xf32>
    %33 = vector.broadcast %32 : vector<1x128xf32> to vector<8x128xf32>
    %34 = arith.addf %31, %33 : vector<8x128xf32>
    %c0_40 = arith.constant 0 : index
    %c0_41 = arith.constant 0 : index
    %c0_42 = arith.constant 0 : index
    %c0_43 = arith.constant 0 : index
    %35 = vector.load %arg5[%c0_40, %c0_41, %c0_42, %c0_43] : memref<1x1x8x128xf32, #tpu.memory_space<vmem>>, vector<1x1x8x128xf32>
    %36 = vector.shape_cast %35 : vector<1x1x8x128xf32> to vector<8x128xf32>
    %37 = vector.shape_cast %34 : vector<8x128xf32> to vector<1x1x8x128xf32>
    tpu.vector_store %arg5[%c0_40, %c0_41, %c0_42, %c0_43], %37 {strides = array<i32>} : memref<1x1x8x128xf32, #tpu.memory_space<vmem>>, vector<1x1x8x128xf32>,
    return
  }
  func.func @transform_0(%arg0: i32, %arg1: i32) -> (i32, i32, i32, i32) {
    %c0_i32 = arith.constant 0 : i32
    %c0_i32_0 = arith.constant 0 : i32
    %c0_i32_1 = arith.constant 0 : i32
    return %arg0, %arg1, %c0_i32, %c0_i32_0 : i32, i32, i32, i32
  }
  func.func @transform_1(%arg0: i32, %arg1: i32) -> (i32, i32, i32) {
    %c0_i32 = arith.constant 0 : i32
    %c0_i32_0 = arith.constant 0 : i32
    %c0_i32_1 = arith.constant 0 : i32
    %c0_i32_2 = arith.constant 0 : i32
    return %c0_i32, %c0_i32_0, %c0_i32_1 : i32, i32, i32
  }
  func.func @transform_2(%arg0: i32, %arg1: i32) -> (i32, i32) {
    %c0_i32 = arith.constant 0 : i32
    %c0_i32_0 = arith.constant 0 : i32
    %c0_i32_1 = arith.constant 0 : i32
    return %c0_i32, %c0_i32_0 : i32, i32
  }
  func.func @transform_3(%arg0: i32, %arg1: i32) -> (i32, i32, i32, i32) {
    %c0_i32 = arith.constant 0 : i32
    %c0_i32_0 = arith.constant 0 : i32
    %c0_i32_1 = arith.constant 0 : i32
    return %arg0, %arg1, %c0_i32, %c0_i32_0 : i32, i32, i32, i32
  }
}

module attributes {stable_mosaic.version = 11 : i64} {
  func.func @_mm_bias_add_kernel(%arg0: i32, %arg1: memref<128x256xbf16, #tpu.memory_space<vmem>>, %arg2: memref<256x128xbf16, #tpu.memory_space<vmem>>, %arg3: memref<1x128xf32, #tpu.memory_space<vmem>>, %arg4: memref<128x128xbf16, #tpu.memory_space<vmem>>, %arg5: memref<128x128xbf16, #tpu.memory_space<vmem>>) attributes {dimension_semantics = [#tpu.dimension_semantics<parallel>], iteration_bounds = array<i64: 1>, scalar_prefetch = 0 : i64, scratch_operands = 0 : i64, tpu.core_type = #tpu.core_type<tc>, window_params = [{transform_indices = @transform_0, window_bounds = array<i64: 128, 256>}, {pipeline_mode = #tpu.pipeline_mode<synchronous>, transform_indices = @transform_1, window_bounds = array<i64: 256, 128>}, {pipeline_mode = #tpu.pipeline_mode<synchronous>, transform_indices = @transform_2, window_bounds = array<i64: 1, 128>}, {transform_indices = @transform_3, window_bounds = array<i64: 128, 128>}, {transform_indices = @transform_4, window_bounds = array<i64: 128, 128>}]} {
    %c0 = arith.constant 0 : index
    %c0_0 = arith.constant 0 : index
    %0 = vector.load %arg1[%c0, %c0_0] : memref<128x256xbf16, #tpu.memory_space<vmem>>, vector<128x256xbf16>
    %c0_1 = arith.constant 0 : index
    %c0_2 = arith.constant 0 : index
    %1 = vector.load %arg2[%c0_1, %c0_2] : memref<256x128xbf16, #tpu.memory_space<vmem>>, vector<256x128xbf16>
    %cst = arith.constant dense<0.000000e+00> : vector<128x128xf32>
    %2 = tpu.matmul %0, %1, %cst {dimension_numbers = #tpu.dot_dimension_numbers<[1], [0], [0], [1], [0, 0, 1, 1], [], []>} : vector<128x256xbf16>, vector<256x128xbf16>, vector<128x128xf32> -> vector<128x128xf32>
    %c0_3 = arith.constant 0 : index
    %c0_4 = arith.constant 0 : index
    %3 = vector.load %arg3[%c0_3, %c0_4] : memref<1x128xf32, #tpu.memory_space<vmem>>, vector<1x128xf32>
    %4 = vector.broadcast %3 : vector<1x128xf32> to vector<128x128xf32>
    %5 = arith.addf %2, %4 : vector<128x128xf32>
    %c0_5 = arith.constant 0 : index
    %c0_6 = arith.constant 0 : index
    %6 = vector.load %arg4[%c0_5, %c0_6] : memref<128x128xbf16, #tpu.memory_space<vmem>>, vector<128x128xbf16>
    %7 = arith.extf %6 : vector<128x128xbf16> to vector<128x128xf32>
    %8 = arith.addf %5, %7 : vector<128x128xf32>
    %9 = arith.truncf %8 : vector<128x128xf32> to vector<128x128xbf16>
    %c0_7 = arith.constant 0 : index
    %c0_8 = arith.constant 0 : index
    %10 = vector.load %arg5[%c0_7, %c0_8] : memref<128x128xbf16, #tpu.memory_space<vmem>>, vector<128x128xbf16>
    tpu.vector_store %arg5[%c0_7, %c0_8], %9 {strides = array<i32>} : memref<128x128xbf16, #tpu.memory_space<vmem>>, vector<128x128xbf16>,
    return
  }
  func.func @transform_0(%arg0: i32) -> (i32, i32) {
    %c0_i32 = arith.constant 0 : i32
    %c0_i32_0 = arith.constant 0 : i32
    return %arg0, %c0_i32 : i32, i32
  }
  func.func @transform_1(%arg0: i32) -> (i32, i32) {
    %c0_i32 = arith.constant 0 : i32
    %c0_i32_0 = arith.constant 0 : i32
    %c0_i32_1 = arith.constant 0 : i32
    return %c0_i32, %c0_i32_0 : i32, i32
  }
  func.func @transform_2(%arg0: i32) -> (i32, i32) {
    %c0_i32 = arith.constant 0 : i32
    %c0_i32_0 = arith.constant 0 : i32
    %c0_i32_1 = arith.constant 0 : i32
    return %c0_i32, %c0_i32_0 : i32, i32
  }
  func.func @transform_3(%arg0: i32) -> (i32, i32) {
    %c0_i32 = arith.constant 0 : i32
    %c0_i32_0 = arith.constant 0 : i32
    return %arg0, %c0_i32 : i32, i32
  }
  func.func @transform_4(%arg0: i32) -> (i32, i32) {
    %c0_i32 = arith.constant 0 : i32
    %c0_i32_0 = arith.constant 0 : i32
    return %arg0, %c0_i32 : i32, i32
  }
}

module attributes {stable_mosaic.version = 11 : i64} {
  func.func @_conv3x3_kernel(%arg0: i32, %arg1: i32, %arg2: memref<1x1x40x128xbf16, #tpu.memory_space<vmem>>, %arg3: memref<3x384x128xbf16, #tpu.memory_space<vmem>>, %arg4: memref<1x128xf32, #tpu.memory_space<vmem>>, %arg5: memref<1x1x16x128xf32, #tpu.memory_space<vmem>>) attributes {dimension_semantics = [#tpu.dimension_semantics<parallel>, #tpu.dimension_semantics<parallel>], iteration_bounds = array<i64: 2, 2>, scalar_prefetch = 0 : i64, scratch_operands = 0 : i64, tpu.core_type = #tpu.core_type<tc>, window_params = [{transform_indices = @transform_0, window_bounds = array<i64: 1, 1, 40, 128>}, {pipeline_mode = #tpu.pipeline_mode<synchronous>, transform_indices = @transform_1, window_bounds = array<i64: 3, 384, 128>}, {pipeline_mode = #tpu.pipeline_mode<synchronous>, transform_indices = @transform_2, window_bounds = array<i64: 1, 128>}, {transform_indices = @transform_3, window_bounds = array<i64: 1, 1, 16, 128>}]} {
    %c0 = arith.constant 0 : index
    %c0_0 = arith.constant 0 : index
    %c0_1 = arith.constant 0 : index
    %c0_2 = arith.constant 0 : index
    %0 = vector.load %arg2[%c0, %c0_0, %c0_1, %c0_2] : memref<1x1x40x128xbf16, #tpu.memory_space<vmem>>, vector<1x1x16x128xbf16>
    %1 = vector.shape_cast %0 : vector<1x1x16x128xbf16> to vector<16x128xbf16>
    %c0_3 = arith.constant 0 : index
    %c0_4 = arith.constant 0 : index
    %c1 = arith.constant 1 : index
    %c0_5 = arith.constant 0 : index
    %2 = vector.load %arg2[%c0_3, %c0_4, %c1, %c0_5] : memref<1x1x40x128xbf16, #tpu.memory_space<vmem>>, vector<1x1x16x128xbf16>
    %3 = vector.shape_cast %2 : vector<1x1x16x128xbf16> to vector<16x128xbf16>
    %c0_6 = arith.constant 0 : index
    %c0_7 = arith.constant 0 : index
    %c2 = arith.constant 2 : index
    %c0_8 = arith.constant 0 : index
    %4 = vector.load %arg2[%c0_6, %c0_7, %c2, %c0_8] : memref<1x1x40x128xbf16, #tpu.memory_space<vmem>>, vector<1x1x16x128xbf16>
    %5 = vector.shape_cast %4 : vector<1x1x16x128xbf16> to vector<16x128xbf16>
    %6 = tpu.concatenate %1, %3, %5 in 1 : vector<16x128xbf16>, vector<16x128xbf16>, vector<16x128xbf16> -> vector<16x384xbf16>
    %c0_9 = arith.constant 0 : index
    %c0_10 = arith.constant 0 : index
    %c0_11 = arith.constant 0 : index
    %7 = vector.load %arg3[%c0_9, %c0_10, %c0_11] : memref<3x384x128xbf16, #tpu.memory_space<vmem>>, vector<1x384x128xbf16>
    %8 = vector.shape_cast %7 : vector<1x384x128xbf16> to vector<384x128xbf16>
    %cst = arith.constant dense<0.000000e+00> : vector<16x128xf32>
    %9 = tpu.matmul %6, %8, %cst {dimension_numbers = #tpu.dot_dimension_numbers<[1], [0], [0], [1], [0, 0, 1, 1], [], []>} : vector<16x384xbf16>, vector<384x128xbf16>, vector<16x128xf32> -> vector<16x128xf32>
    %c0_12 = arith.constant 0 : index
    %c0_13 = arith.constant 0 : index
    %c8 = arith.constant 8 : index
    %c0_14 = arith.constant 0 : index
    %10 = vector.load %arg2[%c0_12, %c0_13, %c8, %c0_14] : memref<1x1x40x128xbf16, #tpu.memory_space<vmem>>, vector<1x1x16x128xbf16>
    %11 = vector.shape_cast %10 : vector<1x1x16x128xbf16> to vector<16x128xbf16>
    %c0_15 = arith.constant 0 : index
    %c0_16 = arith.constant 0 : index
    %c9 = arith.constant 9 : index
    %c0_17 = arith.constant 0 : index
    %12 = vector.load %arg2[%c0_15, %c0_16, %c9, %c0_17] : memref<1x1x40x128xbf16, #tpu.memory_space<vmem>>, vector<1x1x16x128xbf16>
    %13 = vector.shape_cast %12 : vector<1x1x16x128xbf16> to vector<16x128xbf16>
    %c0_18 = arith.constant 0 : index
    %c0_19 = arith.constant 0 : index
    %c10 = arith.constant 10 : index
    %c0_20 = arith.constant 0 : index
    %14 = vector.load %arg2[%c0_18, %c0_19, %c10, %c0_20] : memref<1x1x40x128xbf16, #tpu.memory_space<vmem>>, vector<1x1x16x128xbf16>
    %15 = vector.shape_cast %14 : vector<1x1x16x128xbf16> to vector<16x128xbf16>
    %16 = tpu.concatenate %11, %13, %15 in 1 : vector<16x128xbf16>, vector<16x128xbf16>, vector<16x128xbf16> -> vector<16x384xbf16>
    %c1_21 = arith.constant 1 : index
    %c0_22 = arith.constant 0 : index
    %c0_23 = arith.constant 0 : index
    %17 = vector.load %arg3[%c1_21, %c0_22, %c0_23] : memref<3x384x128xbf16, #tpu.memory_space<vmem>>, vector<1x384x128xbf16>
    %18 = vector.shape_cast %17 : vector<1x384x128xbf16> to vector<384x128xbf16>
    %cst_24 = arith.constant dense<0.000000e+00> : vector<16x128xf32>
    %19 = tpu.matmul %16, %18, %cst_24 {dimension_numbers = #tpu.dot_dimension_numbers<[1], [0], [0], [1], [0, 0, 1, 1], [], []>} : vector<16x384xbf16>, vector<384x128xbf16>, vector<16x128xf32> -> vector<16x128xf32>
    %20 = arith.addf %9, %19 : vector<16x128xf32>
    %c0_25 = arith.constant 0 : index
    %c0_26 = arith.constant 0 : index
    %c16 = arith.constant 16 : index
    %c0_27 = arith.constant 0 : index
    %21 = vector.load %arg2[%c0_25, %c0_26, %c16, %c0_27] : memref<1x1x40x128xbf16, #tpu.memory_space<vmem>>, vector<1x1x16x128xbf16>
    %22 = vector.shape_cast %21 : vector<1x1x16x128xbf16> to vector<16x128xbf16>
    %c0_28 = arith.constant 0 : index
    %c0_29 = arith.constant 0 : index
    %c17 = arith.constant 17 : index
    %c0_30 = arith.constant 0 : index
    %23 = vector.load %arg2[%c0_28, %c0_29, %c17, %c0_30] : memref<1x1x40x128xbf16, #tpu.memory_space<vmem>>, vector<1x1x16x128xbf16>
    %24 = vector.shape_cast %23 : vector<1x1x16x128xbf16> to vector<16x128xbf16>
    %c0_31 = arith.constant 0 : index
    %c0_32 = arith.constant 0 : index
    %c18 = arith.constant 18 : index
    %c0_33 = arith.constant 0 : index
    %25 = vector.load %arg2[%c0_31, %c0_32, %c18, %c0_33] : memref<1x1x40x128xbf16, #tpu.memory_space<vmem>>, vector<1x1x16x128xbf16>
    %26 = vector.shape_cast %25 : vector<1x1x16x128xbf16> to vector<16x128xbf16>
    %27 = tpu.concatenate %22, %24, %26 in 1 : vector<16x128xbf16>, vector<16x128xbf16>, vector<16x128xbf16> -> vector<16x384xbf16>
    %c2_34 = arith.constant 2 : index
    %c0_35 = arith.constant 0 : index
    %c0_36 = arith.constant 0 : index
    %28 = vector.load %arg3[%c2_34, %c0_35, %c0_36] : memref<3x384x128xbf16, #tpu.memory_space<vmem>>, vector<1x384x128xbf16>
    %29 = vector.shape_cast %28 : vector<1x384x128xbf16> to vector<384x128xbf16>
    %cst_37 = arith.constant dense<0.000000e+00> : vector<16x128xf32>
    %30 = tpu.matmul %27, %29, %cst_37 {dimension_numbers = #tpu.dot_dimension_numbers<[1], [0], [0], [1], [0, 0, 1, 1], [], []>} : vector<16x384xbf16>, vector<384x128xbf16>, vector<16x128xf32> -> vector<16x128xf32>
    %31 = arith.addf %20, %30 : vector<16x128xf32>
    %c0_38 = arith.constant 0 : index
    %c0_39 = arith.constant 0 : index
    %32 = vector.load %arg4[%c0_38, %c0_39] : memref<1x128xf32, #tpu.memory_space<vmem>>, vector<1x128xf32>
    %33 = vector.broadcast %32 : vector<1x128xf32> to vector<16x128xf32>
    %34 = arith.addf %31, %33 : vector<16x128xf32>
    %c0_40 = arith.constant 0 : index
    %c0_41 = arith.constant 0 : index
    %c0_42 = arith.constant 0 : index
    %c0_43 = arith.constant 0 : index
    %35 = vector.load %arg5[%c0_40, %c0_41, %c0_42, %c0_43] : memref<1x1x16x128xf32, #tpu.memory_space<vmem>>, vector<1x1x16x128xf32>
    %36 = vector.shape_cast %35 : vector<1x1x16x128xf32> to vector<16x128xf32>
    %37 = vector.shape_cast %34 : vector<16x128xf32> to vector<1x1x16x128xf32>
    tpu.vector_store %arg5[%c0_40, %c0_41, %c0_42, %c0_43], %37 {strides = array<i32>} : memref<1x1x16x128xf32, #tpu.memory_space<vmem>>, vector<1x1x16x128xf32>,
    return
  }
  func.func @transform_0(%arg0: i32, %arg1: i32) -> (i32, i32, i32, i32) {
    %c0_i32 = arith.constant 0 : i32
    %c0_i32_0 = arith.constant 0 : i32
    %c0_i32_1 = arith.constant 0 : i32
    return %arg0, %arg1, %c0_i32, %c0_i32_0 : i32, i32, i32, i32
  }
  func.func @transform_1(%arg0: i32, %arg1: i32) -> (i32, i32, i32) {
    %c0_i32 = arith.constant 0 : i32
    %c0_i32_0 = arith.constant 0 : i32
    %c0_i32_1 = arith.constant 0 : i32
    %c0_i32_2 = arith.constant 0 : i32
    return %c0_i32, %c0_i32_0, %c0_i32_1 : i32, i32, i32
  }
  func.func @transform_2(%arg0: i32, %arg1: i32) -> (i32, i32) {
    %c0_i32 = arith.constant 0 : i32
    %c0_i32_0 = arith.constant 0 : i32
    %c0_i32_1 = arith.constant 0 : i32
    return %c0_i32, %c0_i32_0 : i32, i32
  }
  func.func @transform_3(%arg0: i32, %arg1: i32) -> (i32, i32, i32, i32) {
    %c0_i32 = arith.constant 0 : i32
    %c0_i32_0 = arith.constant 0 : i32
    %c0_i32_1 = arith.constant 0 : i32
    return %arg0, %arg1, %c0_i32, %c0_i32_0 : i32, i32, i32, i32
  }
}

module attributes {stable_mosaic.version = 11 : i64} {
  func.func @_conv3x3_kernel(%arg0: i32, %arg1: i32, %arg2: memref<1x1x112x128xbf16, #tpu.memory_space<vmem>>, %arg3: memref<3x384x128xbf16, #tpu.memory_space<vmem>>, %arg4: memref<1x128xf32, #tpu.memory_space<vmem>>, %arg5: memref<1x1x64x128xf32, #tpu.memory_space<vmem>>) attributes {dimension_semantics = [#tpu.dimension_semantics<parallel>, #tpu.dimension_semantics<parallel>], iteration_bounds = array<i64: 2, 2>, scalar_prefetch = 0 : i64, scratch_operands = 0 : i64, tpu.core_type = #tpu.core_type<tc>, window_params = [{transform_indices = @transform_0, window_bounds = array<i64: 1, 1, 112, 128>}, {pipeline_mode = #tpu.pipeline_mode<synchronous>, transform_indices = @transform_1, window_bounds = array<i64: 3, 384, 128>}, {pipeline_mode = #tpu.pipeline_mode<synchronous>, transform_indices = @transform_2, window_bounds = array<i64: 1, 128>}, {transform_indices = @transform_3, window_bounds = array<i64: 1, 1, 64, 128>}]} {
    %c0 = arith.constant 0 : index
    %c0_0 = arith.constant 0 : index
    %c0_1 = arith.constant 0 : index
    %c0_2 = arith.constant 0 : index
    %0 = vector.load %arg2[%c0, %c0_0, %c0_1, %c0_2] : memref<1x1x112x128xbf16, #tpu.memory_space<vmem>>, vector<1x1x64x128xbf16>
    %1 = vector.shape_cast %0 : vector<1x1x64x128xbf16> to vector<64x128xbf16>
    %c0_3 = arith.constant 0 : index
    %c0_4 = arith.constant 0 : index
    %c1 = arith.constant 1 : index
    %c0_5 = arith.constant 0 : index
    %2 = vector.load %arg2[%c0_3, %c0_4, %c1, %c0_5] : memref<1x1x112x128xbf16, #tpu.memory_space<vmem>>, vector<1x1x64x128xbf16>
    %3 = vector.shape_cast %2 : vector<1x1x64x128xbf16> to vector<64x128xbf16>
    %c0_6 = arith.constant 0 : index
    %c0_7 = arith.constant 0 : index
    %c2 = arith.constant 2 : index
    %c0_8 = arith.constant 0 : index
    %4 = vector.load %arg2[%c0_6, %c0_7, %c2, %c0_8] : memref<1x1x112x128xbf16, #tpu.memory_space<vmem>>, vector<1x1x64x128xbf16>
    %5 = vector.shape_cast %4 : vector<1x1x64x128xbf16> to vector<64x128xbf16>
    %6 = tpu.concatenate %1, %3, %5 in 1 : vector<64x128xbf16>, vector<64x128xbf16>, vector<64x128xbf16> -> vector<64x384xbf16>
    %c0_9 = arith.constant 0 : index
    %c0_10 = arith.constant 0 : index
    %c0_11 = arith.constant 0 : index
    %7 = vector.load %arg3[%c0_9, %c0_10, %c0_11] : memref<3x384x128xbf16, #tpu.memory_space<vmem>>, vector<1x384x128xbf16>
    %8 = vector.shape_cast %7 : vector<1x384x128xbf16> to vector<384x128xbf16>
    %cst = arith.constant dense<0.000000e+00> : vector<64x128xf32>
    %9 = tpu.matmul %6, %8, %cst {dimension_numbers = #tpu.dot_dimension_numbers<[1], [0], [0], [1], [0, 0, 1, 1], [], []>} : vector<64x384xbf16>, vector<384x128xbf16>, vector<64x128xf32> -> vector<64x128xf32>
    %c0_12 = arith.constant 0 : index
    %c0_13 = arith.constant 0 : index
    %c16 = arith.constant 16 : index
    %c0_14 = arith.constant 0 : index
    %10 = vector.load %arg2[%c0_12, %c0_13, %c16, %c0_14] : memref<1x1x112x128xbf16, #tpu.memory_space<vmem>>, vector<1x1x64x128xbf16>
    %11 = vector.shape_cast %10 : vector<1x1x64x128xbf16> to vector<64x128xbf16>
    %c0_15 = arith.constant 0 : index
    %c0_16 = arith.constant 0 : index
    %c17 = arith.constant 17 : index
    %c0_17 = arith.constant 0 : index
    %12 = vector.load %arg2[%c0_15, %c0_16, %c17, %c0_17] : memref<1x1x112x128xbf16, #tpu.memory_space<vmem>>, vector<1x1x64x128xbf16>
    %13 = vector.shape_cast %12 : vector<1x1x64x128xbf16> to vector<64x128xbf16>
    %c0_18 = arith.constant 0 : index
    %c0_19 = arith.constant 0 : index
    %c18 = arith.constant 18 : index
    %c0_20 = arith.constant 0 : index
    %14 = vector.load %arg2[%c0_18, %c0_19, %c18, %c0_20] : memref<1x1x112x128xbf16, #tpu.memory_space<vmem>>, vector<1x1x64x128xbf16>
    %15 = vector.shape_cast %14 : vector<1x1x64x128xbf16> to vector<64x128xbf16>
    %16 = tpu.concatenate %11, %13, %15 in 1 : vector<64x128xbf16>, vector<64x128xbf16>, vector<64x128xbf16> -> vector<64x384xbf16>
    %c1_21 = arith.constant 1 : index
    %c0_22 = arith.constant 0 : index
    %c0_23 = arith.constant 0 : index
    %17 = vector.load %arg3[%c1_21, %c0_22, %c0_23] : memref<3x384x128xbf16, #tpu.memory_space<vmem>>, vector<1x384x128xbf16>
    %18 = vector.shape_cast %17 : vector<1x384x128xbf16> to vector<384x128xbf16>
    %cst_24 = arith.constant dense<0.000000e+00> : vector<64x128xf32>
    %19 = tpu.matmul %16, %18, %cst_24 {dimension_numbers = #tpu.dot_dimension_numbers<[1], [0], [0], [1], [0, 0, 1, 1], [], []>} : vector<64x384xbf16>, vector<384x128xbf16>, vector<64x128xf32> -> vector<64x128xf32>
    %20 = arith.addf %9, %19 : vector<64x128xf32>
    %c0_25 = arith.constant 0 : index
    %c0_26 = arith.constant 0 : index
    %c32 = arith.constant 32 : index
    %c0_27 = arith.constant 0 : index
    %21 = vector.load %arg2[%c0_25, %c0_26, %c32, %c0_27] : memref<1x1x112x128xbf16, #tpu.memory_space<vmem>>, vector<1x1x64x128xbf16>
    %22 = vector.shape_cast %21 : vector<1x1x64x128xbf16> to vector<64x128xbf16>
    %c0_28 = arith.constant 0 : index
    %c0_29 = arith.constant 0 : index
    %c33 = arith.constant 33 : index
    %c0_30 = arith.constant 0 : index
    %23 = vector.load %arg2[%c0_28, %c0_29, %c33, %c0_30] : memref<1x1x112x128xbf16, #tpu.memory_space<vmem>>, vector<1x1x64x128xbf16>
    %24 = vector.shape_cast %23 : vector<1x1x64x128xbf16> to vector<64x128xbf16>
    %c0_31 = arith.constant 0 : index
    %c0_32 = arith.constant 0 : index
    %c34 = arith.constant 34 : index
    %c0_33 = arith.constant 0 : index
    %25 = vector.load %arg2[%c0_31, %c0_32, %c34, %c0_33] : memref<1x1x112x128xbf16, #tpu.memory_space<vmem>>, vector<1x1x64x128xbf16>
    %26 = vector.shape_cast %25 : vector<1x1x64x128xbf16> to vector<64x128xbf16>
    %27 = tpu.concatenate %22, %24, %26 in 1 : vector<64x128xbf16>, vector<64x128xbf16>, vector<64x128xbf16> -> vector<64x384xbf16>
    %c2_34 = arith.constant 2 : index
    %c0_35 = arith.constant 0 : index
    %c0_36 = arith.constant 0 : index
    %28 = vector.load %arg3[%c2_34, %c0_35, %c0_36] : memref<3x384x128xbf16, #tpu.memory_space<vmem>>, vector<1x384x128xbf16>
    %29 = vector.shape_cast %28 : vector<1x384x128xbf16> to vector<384x128xbf16>
    %cst_37 = arith.constant dense<0.000000e+00> : vector<64x128xf32>
    %30 = tpu.matmul %27, %29, %cst_37 {dimension_numbers = #tpu.dot_dimension_numbers<[1], [0], [0], [1], [0, 0, 1, 1], [], []>} : vector<64x384xbf16>, vector<384x128xbf16>, vector<64x128xf32> -> vector<64x128xf32>
    %31 = arith.addf %20, %30 : vector<64x128xf32>
    %c0_38 = arith.constant 0 : index
    %c0_39 = arith.constant 0 : index
    %32 = vector.load %arg4[%c0_38, %c0_39] : memref<1x128xf32, #tpu.memory_space<vmem>>, vector<1x128xf32>
    %33 = vector.broadcast %32 : vector<1x128xf32> to vector<64x128xf32>
    %34 = arith.addf %31, %33 : vector<64x128xf32>
    %c0_40 = arith.constant 0 : index
    %c0_41 = arith.constant 0 : index
    %c0_42 = arith.constant 0 : index
    %c0_43 = arith.constant 0 : index
    %35 = vector.load %arg5[%c0_40, %c0_41, %c0_42, %c0_43] : memref<1x1x64x128xf32, #tpu.memory_space<vmem>>, vector<1x1x64x128xf32>
    %36 = vector.shape_cast %35 : vector<1x1x64x128xf32> to vector<64x128xf32>
    %37 = vector.shape_cast %34 : vector<64x128xf32> to vector<1x1x64x128xf32>
    tpu.vector_store %arg5[%c0_40, %c0_41, %c0_42, %c0_43], %37 {strides = array<i32>} : memref<1x1x64x128xf32, #tpu.memory_space<vmem>>, vector<1x1x64x128xf32>,
    return
  }
  func.func @transform_0(%arg0: i32, %arg1: i32) -> (i32, i32, i32, i32) {
    %c0_i32 = arith.constant 0 : i32
    %c0_i32_0 = arith.constant 0 : i32
    %c0_i32_1 = arith.constant 0 : i32
    return %arg0, %arg1, %c0_i32, %c0_i32_0 : i32, i32, i32, i32
  }
  func.func @transform_1(%arg0: i32, %arg1: i32) -> (i32, i32, i32) {
    %c0_i32 = arith.constant 0 : i32
    %c0_i32_0 = arith.constant 0 : i32
    %c0_i32_1 = arith.constant 0 : i32
    %c0_i32_2 = arith.constant 0 : i32
    return %c0_i32, %c0_i32_0, %c0_i32_1 : i32, i32, i32
  }
  func.func @transform_2(%arg0: i32, %arg1: i32) -> (i32, i32) {
    %c0_i32 = arith.constant 0 : i32
    %c0_i32_0 = arith.constant 0 : i32
    %c0_i32_1 = arith.constant 0 : i32
    return %c0_i32, %c0_i32_0 : i32, i32
  }
  func.func @transform_3(%arg0: i32, %arg1: i32) -> (i32, i32, i32, i32) {
    %c0_i32 = arith.constant 0 : i32
    %c0_i32_0 = arith.constant 0 : i32
    %c0_i32_1 = arith.constant 0 : i32
    return %arg0, %arg1, %c0_i32, %c0_i32_0 : i32, i32, i32, i32
  }
}

module attributes {stable_mosaic.version = 11 : i64} {
  func.func @_mm_bias_add_kernel(%arg0: i32, %arg1: memref<256x128xbf16, #tpu.memory_space<vmem>>, %arg2: memref<128x128xbf16, #tpu.memory_space<vmem>>, %arg3: memref<1x128xf32, #tpu.memory_space<vmem>>, %arg4: memref<256x128xbf16, #tpu.memory_space<vmem>>, %arg5: memref<256x128xbf16, #tpu.memory_space<vmem>>) attributes {dimension_semantics = [#tpu.dimension_semantics<parallel>], iteration_bounds = array<i64: 2>, scalar_prefetch = 0 : i64, scratch_operands = 0 : i64, tpu.core_type = #tpu.core_type<tc>, window_params = [{transform_indices = @transform_0, window_bounds = array<i64: 256, 128>}, {pipeline_mode = #tpu.pipeline_mode<synchronous>, transform_indices = @transform_1, window_bounds = array<i64: 128, 128>}, {pipeline_mode = #tpu.pipeline_mode<synchronous>, transform_indices = @transform_2, window_bounds = array<i64: 1, 128>}, {transform_indices = @transform_3, window_bounds = array<i64: 256, 128>}, {transform_indices = @transform_4, window_bounds = array<i64: 256, 128>}]} {
    %c0 = arith.constant 0 : index
    %c0_0 = arith.constant 0 : index
    %0 = vector.load %arg1[%c0, %c0_0] : memref<256x128xbf16, #tpu.memory_space<vmem>>, vector<256x128xbf16>
    %c0_1 = arith.constant 0 : index
    %c0_2 = arith.constant 0 : index
    %1 = vector.load %arg2[%c0_1, %c0_2] : memref<128x128xbf16, #tpu.memory_space<vmem>>, vector<128x128xbf16>
    %cst = arith.constant dense<0.000000e+00> : vector<256x128xf32>
    %2 = tpu.matmul %0, %1, %cst {dimension_numbers = #tpu.dot_dimension_numbers<[1], [0], [0], [1], [0, 0, 1, 1], [], []>} : vector<256x128xbf16>, vector<128x128xbf16>, vector<256x128xf32> -> vector<256x128xf32>
    %c0_3 = arith.constant 0 : index
    %c0_4 = arith.constant 0 : index
    %3 = vector.load %arg3[%c0_3, %c0_4] : memref<1x128xf32, #tpu.memory_space<vmem>>, vector<1x128xf32>
    %4 = vector.broadcast %3 : vector<1x128xf32> to vector<256x128xf32>
    %5 = arith.addf %2, %4 : vector<256x128xf32>
    %c0_5 = arith.constant 0 : index
    %c0_6 = arith.constant 0 : index
    %6 = vector.load %arg4[%c0_5, %c0_6] : memref<256x128xbf16, #tpu.memory_space<vmem>>, vector<256x128xbf16>
    %7 = arith.extf %6 : vector<256x128xbf16> to vector<256x128xf32>
    %8 = arith.addf %5, %7 : vector<256x128xf32>
    %9 = arith.truncf %8 : vector<256x128xf32> to vector<256x128xbf16>
    %c0_7 = arith.constant 0 : index
    %c0_8 = arith.constant 0 : index
    %10 = vector.load %arg5[%c0_7, %c0_8] : memref<256x128xbf16, #tpu.memory_space<vmem>>, vector<256x128xbf16>
    tpu.vector_store %arg5[%c0_7, %c0_8], %9 {strides = array<i32>} : memref<256x128xbf16, #tpu.memory_space<vmem>>, vector<256x128xbf16>,
    return
  }
  func.func @transform_0(%arg0: i32) -> (i32, i32) {
    %c0_i32 = arith.constant 0 : i32
    %c0_i32_0 = arith.constant 0 : i32
    return %arg0, %c0_i32 : i32, i32
  }
  func.func @transform_1(%arg0: i32) -> (i32, i32) {
    %c0_i32 = arith.constant 0 : i32
    %c0_i32_0 = arith.constant 0 : i32
    %c0_i32_1 = arith.constant 0 : i32
    return %c0_i32, %c0_i32_0 : i32, i32
  }
  func.func @transform_2(%arg0: i32) -> (i32, i32) {
    %c0_i32 = arith.constant 0 : i32
    %c0_i32_0 = arith.constant 0 : i32
    %c0_i32_1 = arith.constant 0 : i32
    return %c0_i32, %c0_i32_0 : i32, i32
  }
  func.func @transform_3(%arg0: i32) -> (i32, i32) {
    %c0_i32 = arith.constant 0 : i32
    %c0_i32_0 = arith.constant 0 : i32
    return %arg0, %c0_i32 : i32, i32
  }
  func.func @transform_4(%arg0: i32) -> (i32, i32) {
    %c0_i32 = arith.constant 0 : i32
    %c0_i32_0 = arith.constant 0 : i32
    return %arg0, %c0_i32 : i32, i32
  }
}

module attributes {stable_mosaic.version = 11 : i64} {
  func.func @_conv3x3_kernel(%arg0: i32, %arg1: i32, %arg2: memref<1x1x264x128xbf16, #tpu.memory_space<vmem>>, %arg3: memref<3x384x128xbf16, #tpu.memory_space<vmem>>, %arg4: memref<1x128xf32, #tpu.memory_space<vmem>>, %arg5: memref<1x1x192x128xf32, #tpu.memory_space<vmem>>) attributes {dimension_semantics = [#tpu.dimension_semantics<parallel>, #tpu.dimension_semantics<parallel>], iteration_bounds = array<i64: 2, 2>, scalar_prefetch = 0 : i64, scratch_operands = 0 : i64, tpu.core_type = #tpu.core_type<tc>, window_params = [{transform_indices = @transform_0, window_bounds = array<i64: 1, 1, 264, 128>}, {pipeline_mode = #tpu.pipeline_mode<synchronous>, transform_indices = @transform_1, window_bounds = array<i64: 3, 384, 128>}, {pipeline_mode = #tpu.pipeline_mode<synchronous>, transform_indices = @transform_2, window_bounds = array<i64: 1, 128>}, {transform_indices = @transform_3, window_bounds = array<i64: 1, 1, 192, 128>}]} {
    %c0 = arith.constant 0 : index
    %c0_0 = arith.constant 0 : index
    %c0_1 = arith.constant 0 : index
    %c0_2 = arith.constant 0 : index
    %0 = vector.load %arg2[%c0, %c0_0, %c0_1, %c0_2] : memref<1x1x264x128xbf16, #tpu.memory_space<vmem>>, vector<1x1x192x128xbf16>
    %1 = vector.shape_cast %0 : vector<1x1x192x128xbf16> to vector<192x128xbf16>
    %c0_3 = arith.constant 0 : index
    %c0_4 = arith.constant 0 : index
    %c1 = arith.constant 1 : index
    %c0_5 = arith.constant 0 : index
    %2 = vector.load %arg2[%c0_3, %c0_4, %c1, %c0_5] : memref<1x1x264x128xbf16, #tpu.memory_space<vmem>>, vector<1x1x192x128xbf16>
    %3 = vector.shape_cast %2 : vector<1x1x192x128xbf16> to vector<192x128xbf16>
    %c0_6 = arith.constant 0 : index
    %c0_7 = arith.constant 0 : index
    %c2 = arith.constant 2 : index
    %c0_8 = arith.constant 0 : index
    %4 = vector.load %arg2[%c0_6, %c0_7, %c2, %c0_8] : memref<1x1x264x128xbf16, #tpu.memory_space<vmem>>, vector<1x1x192x128xbf16>
    %5 = vector.shape_cast %4 : vector<1x1x192x128xbf16> to vector<192x128xbf16>
    %6 = tpu.concatenate %1, %3, %5 in 1 : vector<192x128xbf16>, vector<192x128xbf16>, vector<192x128xbf16> -> vector<192x384xbf16>
    %c0_9 = arith.constant 0 : index
    %c0_10 = arith.constant 0 : index
    %c0_11 = arith.constant 0 : index
    %7 = vector.load %arg3[%c0_9, %c0_10, %c0_11] : memref<3x384x128xbf16, #tpu.memory_space<vmem>>, vector<1x384x128xbf16>
    %8 = vector.shape_cast %7 : vector<1x384x128xbf16> to vector<384x128xbf16>
    %cst = arith.constant dense<0.000000e+00> : vector<192x128xf32>
    %9 = tpu.matmul %6, %8, %cst {dimension_numbers = #tpu.dot_dimension_numbers<[1], [0], [0], [1], [0, 0, 1, 1], [], []>} : vector<192x384xbf16>, vector<384x128xbf16>, vector<192x128xf32> -> vector<192x128xf32>
    %c0_12 = arith.constant 0 : index
    %c0_13 = arith.constant 0 : index
    %c24 = arith.constant 24 : index
    %c0_14 = arith.constant 0 : index
    %10 = vector.load %arg2[%c0_12, %c0_13, %c24, %c0_14] : memref<1x1x264x128xbf16, #tpu.memory_space<vmem>>, vector<1x1x192x128xbf16>
    %11 = vector.shape_cast %10 : vector<1x1x192x128xbf16> to vector<192x128xbf16>
    %c0_15 = arith.constant 0 : index
    %c0_16 = arith.constant 0 : index
    %c25 = arith.constant 25 : index
    %c0_17 = arith.constant 0 : index
    %12 = vector.load %arg2[%c0_15, %c0_16, %c25, %c0_17] : memref<1x1x264x128xbf16, #tpu.memory_space<vmem>>, vector<1x1x192x128xbf16>
    %13 = vector.shape_cast %12 : vector<1x1x192x128xbf16> to vector<192x128xbf16>
    %c0_18 = arith.constant 0 : index
    %c0_19 = arith.constant 0 : index
    %c26 = arith.constant 26 : index
    %c0_20 = arith.constant 0 : index
    %14 = vector.load %arg2[%c0_18, %c0_19, %c26, %c0_20] : memref<1x1x264x128xbf16, #tpu.memory_space<vmem>>, vector<1x1x192x128xbf16>
    %15 = vector.shape_cast %14 : vector<1x1x192x128xbf16> to vector<192x128xbf16>
    %16 = tpu.concatenate %11, %13, %15 in 1 : vector<192x128xbf16>, vector<192x128xbf16>, vector<192x128xbf16> -> vector<192x384xbf16>
    %c1_21 = arith.constant 1 : index
    %c0_22 = arith.constant 0 : index
    %c0_23 = arith.constant 0 : index
    %17 = vector.load %arg3[%c1_21, %c0_22, %c0_23] : memref<3x384x128xbf16, #tpu.memory_space<vmem>>, vector<1x384x128xbf16>
    %18 = vector.shape_cast %17 : vector<1x384x128xbf16> to vector<384x128xbf16>
    %cst_24 = arith.constant dense<0.000000e+00> : vector<192x128xf32>
    %19 = tpu.matmul %16, %18, %cst_24 {dimension_numbers = #tpu.dot_dimension_numbers<[1], [0], [0], [1], [0, 0, 1, 1], [], []>} : vector<192x384xbf16>, vector<384x128xbf16>, vector<192x128xf32> -> vector<192x128xf32>
    %20 = arith.addf %9, %19 : vector<192x128xf32>
    %c0_25 = arith.constant 0 : index
    %c0_26 = arith.constant 0 : index
    %c48 = arith.constant 48 : index
    %c0_27 = arith.constant 0 : index
    %21 = vector.load %arg2[%c0_25, %c0_26, %c48, %c0_27] : memref<1x1x264x128xbf16, #tpu.memory_space<vmem>>, vector<1x1x192x128xbf16>
    %22 = vector.shape_cast %21 : vector<1x1x192x128xbf16> to vector<192x128xbf16>
    %c0_28 = arith.constant 0 : index
    %c0_29 = arith.constant 0 : index
    %c49 = arith.constant 49 : index
    %c0_30 = arith.constant 0 : index
    %23 = vector.load %arg2[%c0_28, %c0_29, %c49, %c0_30] : memref<1x1x264x128xbf16, #tpu.memory_space<vmem>>, vector<1x1x192x128xbf16>
    %24 = vector.shape_cast %23 : vector<1x1x192x128xbf16> to vector<192x128xbf16>
    %c0_31 = arith.constant 0 : index
    %c0_32 = arith.constant 0 : index
    %c50 = arith.constant 50 : index
    %c0_33 = arith.constant 0 : index
    %25 = vector.load %arg2[%c0_31, %c0_32, %c50, %c0_33] : memref<1x1x264x128xbf16, #tpu.memory_space<vmem>>, vector<1x1x192x128xbf16>
    %26 = vector.shape_cast %25 : vector<1x1x192x128xbf16> to vector<192x128xbf16>
    %27 = tpu.concatenate %22, %24, %26 in 1 : vector<192x128xbf16>, vector<192x128xbf16>, vector<192x128xbf16> -> vector<192x384xbf16>
    %c2_34 = arith.constant 2 : index
    %c0_35 = arith.constant 0 : index
    %c0_36 = arith.constant 0 : index
    %28 = vector.load %arg3[%c2_34, %c0_35, %c0_36] : memref<3x384x128xbf16, #tpu.memory_space<vmem>>, vector<1x384x128xbf16>
    %29 = vector.shape_cast %28 : vector<1x384x128xbf16> to vector<384x128xbf16>
    %cst_37 = arith.constant dense<0.000000e+00> : vector<192x128xf32>
    %30 = tpu.matmul %27, %29, %cst_37 {dimension_numbers = #tpu.dot_dimension_numbers<[1], [0], [0], [1], [0, 0, 1, 1], [], []>} : vector<192x384xbf16>, vector<384x128xbf16>, vector<192x128xf32> -> vector<192x128xf32>
    %31 = arith.addf %20, %30 : vector<192x128xf32>
    %c0_38 = arith.constant 0 : index
    %c0_39 = arith.constant 0 : index
    %32 = vector.load %arg4[%c0_38, %c0_39] : memref<1x128xf32, #tpu.memory_space<vmem>>, vector<1x128xf32>
    %33 = vector.broadcast %32 : vector<1x128xf32> to vector<192x128xf32>
    %34 = arith.addf %31, %33 : vector<192x128xf32>
    %c0_40 = arith.constant 0 : index
    %c0_41 = arith.constant 0 : index
    %c0_42 = arith.constant 0 : index
    %c0_43 = arith.constant 0 : index
    %35 = vector.load %arg5[%c0_40, %c0_41, %c0_42, %c0_43] : memref<1x1x192x128xf32, #tpu.memory_space<vmem>>, vector<1x1x192x128xf32>
    %36 = vector.shape_cast %35 : vector<1x1x192x128xf32> to vector<192x128xf32>
    %37 = vector.shape_cast %34 : vector<192x128xf32> to vector<1x1x192x128xf32>
    tpu.vector_store %arg5[%c0_40, %c0_41, %c0_42, %c0_43], %37 {strides = array<i32>} : memref<1x1x192x128xf32, #tpu.memory_space<vmem>>, vector<1x1x192x128xf32>,
    return
  }
  func.func @transform_0(%arg0: i32, %arg1: i32) -> (i32, i32, i32, i32) {
    %c0_i32 = arith.constant 0 : i32
    %c0_i32_0 = arith.constant 0 : i32
    %c0_i32_1 = arith.constant 0 : i32
    return %arg0, %arg1, %c0_i32, %c0_i32_0 : i32, i32, i32, i32
  }
  func.func @transform_1(%arg0: i32, %arg1: i32) -> (i32, i32, i32) {
    %c0_i32 = arith.constant 0 : i32
    %c0_i32_0 = arith.constant 0 : i32
    %c0_i32_1 = arith.constant 0 : i32
    %c0_i32_2 = arith.constant 0 : i32
    return %c0_i32, %c0_i32_0, %c0_i32_1 : i32, i32, i32
  }
  func.func @transform_2(%arg0: i32, %arg1: i32) -> (i32, i32) {
    %c0_i32 = arith.constant 0 : i32
    %c0_i32_0 = arith.constant 0 : i32
    %c0_i32_1 = arith.constant 0 : i32
    return %c0_i32, %c0_i32_0 : i32, i32
  }
  func.func @transform_3(%arg0: i32, %arg1: i32) -> (i32, i32, i32, i32) {
    %c0_i32 = arith.constant 0 : i32
    %c0_i32_0 = arith.constant 0 : i32
    %c0_i32_1 = arith.constant 0 : i32
    return %arg0, %arg1, %c0_i32, %c0_i32_0 : i32, i32, i32, i32
  }
}

</mosaic_0001>

<bundles_post_ra>
// kernel: backbone_with_fpn_forward.12
= control target key start
LH: loop header
LB: loop body
LE: loop exit
PB: predicated region body
PF: predicated region fallthrough
CT: control target
= control target key end

     0   :  { %s1068_s12 = smov 0   ;;  %s1190_s0 = inlined_call_operand.vmem [shape: bf16[512,48], index: 0, kind: input, shape index: {}]   ;;  %s1191_s1 = inlined_call_operand.vmem [shape: bf16[48,128], index: 1, kind: input, shape index: {}]   ;;  %s1192_s2 = inlined_call_operand.vmem [shape: f32[1,128], index: 2, kind: input, shape index: {}]   ;;  %s1193_s3 = inlined_call_operand.vmem [shape: bf16[512,128], index: 3, kind: output, shape index: {}]  }
   0x1 LB: > { %s744_s13 = sadd.s32 4294967295, %s1046_s12   ;;  %p748_p0 = scmp.ge.s32.totalorder %s1046_s12, 1  ;;  %s1046_s12 = sphi %s1068_s12, %s13_s12  }
   0x2   : > { %p138_p1 = scmp.lt.s32.totalorder %s1046_s12, 3 }
   0x4   : > { %p139_p2 = pnand %p748_p0, %p138_p1 }
   0x5   : > { %v1021_v0 = vld [vmem:[%s1191_s1] sm:$0xff] (!%p139_p2)   ;;  %s749_s16 = sshll.u32 (!%p139_p2), %s744_s13, 5  ;;  %v1022_v1 = vld [vmem:[%s1191_s1 + $0x8] sm:$0xff] (!%p139_p2)   ;;  %v1023_v2 = vld [vmem:[%s1191_s1 + $0x10] sm:$0xff] (!%p139_p2)   ;;  %vm318_vm0 = vcmask (!%p139_p2), 392192  }
   0x6   : > { %142 = sbr.rel (%p139_p2) target bundleno = 263 (0x107), region = 32  ;;  %p163_p3 = scmp.lt.s32.totalorder (!%p139_p2), %s749_s16, 63  ;;  %969 = vmatprep.subr.bf16.mxu0 (!%p139_p2), %v1021_v0  ;;  %1007 = vmatprep.subr.bf16.mxu1 (!%p139_p2), %v1021_v0  ;;  %v1130_v20 = vld [vmem:[%s1192_s2] ss:$0 sm:$0xff] (!%p139_p2) }
   0x7   : > { %970 = vmatpush3.bf16.msra.mxu0 (!%p139_p2), %v1021_v0  ;;  %1010 = vmatpush3.bf16.msra.mxu1 (!%p139_p2), %v1021_v0 }
   0x8   : > { %971 = vmatprep.subr.bf16.mxu0 (!%p139_p2), %v1022_v1  ;;  %1008 = vmatprep.subr.bf16.mxu1 (!%p139_p2), %v1022_v1 }
   0xb   : > { %972 = vmatpush3.bf16.msra.mxu0 (!%p139_p2), %v1022_v1  ;;  %1011 = vmatpush3.bf16.msra.mxu1 (!%p139_p2), %v1022_v1 }
   0xc   : > { %973 = vmatprep.subr.bf16.mxu0 (!%p139_p2), %v1023_v2  ;;  %1009 = vmatprep.subr.bf16.mxu1 (!%p139_p2), %v1023_v2 }
   0xd   : > { %s1195_s16 = smov (!%p163_p3, %s749_s16), 63 }
   0xe   : > { %s750_s21 = sshll.u32 %s1195_s16, 2 }
   0xf   : > { %s1093_s24 = scalar_lea.vmem %s1190_s0, %s750_s21  ;;  %974 = vmatpush3.bf16.msra.mxu0 %v1023_v2  ;;  %1012 = vmatpush3.bf16.msra.mxu1 %v1023_v2  ;;  %s1143_s29 = scalar_lea.vmem %s1193_s3, %s750_s21 }
  0x10   : > { %v1024_v3 = vld [vmem:[%s1093_s24] sm:$0xff]   ;;  %v1026_v5 = vld [vmem:[%s1093_s24 + $0x8] sm:$0xff]   ;;  %v1028_v7 = vld [vmem:[%s1093_s24 + $0x10] sm:$0xff]  }
  0x11   : > { %v1025_v4 = vld [vmem:[%s1093_s24 + $0x40] sm:$0xff]   ;;  %975 = vmatprep.mubr.msk.bf16.mxu0 %vm318_vm0, %v1024_v3  ;;  %v1027_v6 = vld [vmem:[%s1093_s24 + $0x48] sm:$0xff]   ;;  %v1029_v8 = vld [vmem:[%s1093_s24 + $0x50] sm:$0xff]  }
  0x12   : > { %991 = vmatprep.mubr.msk.bf16.mxu1 %vm318_vm0, %v1025_v4  ;;  %976 = vmatmul.mubr.msk.bf16.vlgmr.msra.gmra.mrb[0].mxu0 %vm318_vm0, %v1026_v5  ;;  %v1030_v9 = vld [vmem:[%s1093_s24 + $0x18] sm:$0xff]   ;;  %v1032_v11 = vld [vmem:[%s1093_s24 + $0x20] sm:$0xff]   ;;  %v1034_v13 = vld [vmem:[%s1093_s24 + $0x28] sm:$0xff]  }
  0x13   : > { %992 = vmatmul.mubr.msk.bf16.vlgmr.msra.gmra.mrb[0].mxu1 %vm318_vm0, %v1027_v6  ;;  %979 = vmatprep.mubr.msk.bf16.mxu0 %vm318_vm0, %v1028_v7  ;;  %v1031_v10 = vld [vmem:[%s1093_s24 + $0x58] sm:$0xff]   ;;  %v1033_v12 = vld [vmem:[%s1093_s24 + $0x60] sm:$0xff]   ;;  %v1035_v14 = vld [vmem:[%s1093_s24 + $0x68] sm:$0xff]  }
  0x14   : > { %995 = vmatprep.mubr.msk.bf16.mxu1 %vm318_vm0, %v1029_v8  ;;  %v1036_v15 = vld [vmem:[%s1093_s24 + $0x30] sm:$0xff]   ;;  %v1038_v17 = vld [vmem:[%s1093_s24 + $0x38] sm:$0xff]  }
  0x15   : > { %v1037_v16 = vld [vmem:[%s1093_s24 + $0x70] sm:$0xff]   ;;  %v1039_v18 = vld [vmem:[%s1093_s24 + $0x78] sm:$0xff]  }
  0x1a   : > { %980 = vmatmul.mubr.msk.bf16.gmra.mrb[4].mxu0 %vm318_vm0, %v1030_v9 }
  0x1b   : > { %996 = vmatmul.mubr.msk.bf16.gmra.mrb[4].mxu1 %vm318_vm0, %v1031_v10  ;;  %983 = vmatprep.mubr.msk.bf16.mxu0 %vm318_vm0, %v1032_v11 }
  0x1c   : > { %999 = vmatprep.mubr.msk.bf16.mxu1 %vm318_vm0, %v1033_v12 }
  0x22   : > { %984 = vmatmul.mubr.msk.bf16.gmra.mrb[8].mxu0 %vm318_vm0, %v1034_v13 }
  0x23   : > { %1000 = vmatmul.mubr.msk.bf16.gmra.mrb[8].mxu1 %vm318_vm0, %v1035_v14  ;;  %987 = vmatprep.mubr.msk.bf16.mxu0 %vm318_vm0, %v1036_v15 }
  0x24   : > { %1003 = vmatprep.mubr.msk.bf16.mxu1 %vm318_vm0, %v1037_v16 }
  0x2a   : > { %988 = vmatmul.mubr.msk.bf16.gmra.mrb[12].mxu0 %vm318_vm0, %v1038_v17 }
  0x2b   : > { %1004 = vmatmul.mubr.msk.bf16.gmra.mrb[12].mxu1 %vm318_vm0, %v1039_v18 }
  0xe5   : > { %v977_v19 = vpop.f32.mrb[0].mxu0 }
  0xe6   : > { %v993_v21 = vpop.f32.mrb[0].mxu1  ;;  %v401_v22 = vpop.f32.mrb[1].mxu0  ;;  %v410_v26 = vadd.f32 %v977_v19, %v1130_v20 }
  0xe7   : > { %v465_v23 = vpop.f32.mrb[1].mxu1  ;;  %v978_v24 = vpop.f32.mrb[2].mxu0  ;;  %v474_v27 = vadd.f32 %v993_v21, %v1130_v20  ;;  %v402_v32 = vadd.f32 %v1130_v20, %v401_v22 }
  0xe8   : > { %v994_v25 = vpop.f32.mrb[2].mxu1  ;;  %v413_v28 = vadd.f32 %v978_v24, %v1130_v20  ;;  %v404_v30 = vpop.f32.mrb[3].mxu0  ;;  %v466_v33 = vadd.f32 %v1130_v20, %v465_v23 }
  0xe9   : > { %v477_v29 = vadd.f32 %v994_v25, %v1130_v20  ;;  %v468_v31 = vpop.f32.mrb[3].mxu1  ;;  %v405_v34 = vadd.f32 %v1130_v20, %v404_v30 }
  0xea   : > { %v469_v35 = vadd.f32 %v1130_v20, %v468_v31  ;;  %v863_v36 = vpack.c.bf16 %v413_v28, %v410_v26 }
  0xeb   : > { %v903_v37 = vpack.c.bf16 %v477_v29, %v474_v27  ;;  %v858_v38 = vpack.c.bf16 %v405_v34, %v402_v32 }
  0xec   : > { %v898_v39 = vpack.c.bf16 %v469_v35, %v466_v33  ;;  %935 = vst [vmem:[%s1143_s29 + $0x8] sm:$0xff] %v863_v36  }
  0xed   : > { %943 = vst [vmem:[%s1143_s29 + $0x48] sm:$0xff] %v903_v37   ;;  %859 = vst [vmem:[%s1143_s29] sm:$0xff] %v858_v38   ;;  %v981_v40 = vpop.f32.mrb[4].mxu0 }
  0xee   : > { %942 = vst [vmem:[%s1143_s29 + $0x40] sm:$0xff] %v898_v39   ;;  %v997_v41 = vpop.f32.mrb[4].mxu1  ;;  %v417_v42 = vpop.f32.mrb[5].mxu0  ;;  %v426_v46 = vadd.f32 %v981_v40, %v1130_v20 }
  0xef   : > { %v481_v43 = vpop.f32.mrb[5].mxu1  ;;  %v982_v44 = vpop.f32.mrb[6].mxu0  ;;  %v490_v47 = vadd.f32 %v997_v41, %v1130_v20  ;;  %v418_v52 = vadd.f32 %v1130_v20, %v417_v42 }
  0xf0   : > { %v998_v45 = vpop.f32.mrb[6].mxu1  ;;  %v429_v48 = vadd.f32 %v982_v44, %v1130_v20  ;;  %v420_v50 = vpop.f32.mrb[7].mxu0  ;;  %v482_v53 = vadd.f32 %v1130_v20, %v481_v43 }
  0xf1   : > { %v493_v49 = vadd.f32 %v998_v45, %v1130_v20  ;;  %v484_v51 = vpop.f32.mrb[7].mxu1  ;;  %v421_v54 = vadd.f32 %v1130_v20, %v420_v50 }
  0xf2   : > { %v485_v55 = vadd.f32 %v1130_v20, %v484_v51  ;;  %v873_v56 = vpack.c.bf16 %v429_v48, %v426_v46 }
  0xf3   : > { %v913_v57 = vpack.c.bf16 %v493_v49, %v490_v47  ;;  %v868_v58 = vpack.c.bf16 %v421_v54, %v418_v52 }
  0xf4   : > { %v908_v59 = vpack.c.bf16 %v485_v55, %v482_v53  ;;  %937 = vst [vmem:[%s1143_s29 + $0x18] sm:$0xff] %v873_v56  }
  0xf5   : > { %945 = vst [vmem:[%s1143_s29 + $0x58] sm:$0xff] %v913_v57   ;;  %936 = vst [vmem:[%s1143_s29 + $0x10] sm:$0xff] %v868_v58   ;;  %v985_v60 = vpop.f32.mrb[8].mxu0 }
  0xf6   : > { %944 = vst [vmem:[%s1143_s29 + $0x50] sm:$0xff] %v908_v59   ;;  %v1001_v61 = vpop.f32.mrb[8].mxu1  ;;  %v433_v62 = vpop.f32.mrb[9].mxu0  ;;  %v442_v2 = vadd.f32 %v985_v60, %v1130_v20 }
  0xf7   : > { %v497_v63 = vpop.f32.mrb[9].mxu1  ;;  %v986_v0 = vpop.f32.mrb[10].mxu0  ;;  %v506_v3 = vadd.f32 %v1001_v61, %v1130_v20  ;;  %v434_v8 = vadd.f32 %v1130_v20, %v433_v62 }
  0xf8   : > { %v1002_v1 = vpop.f32.mrb[10].mxu1  ;;  %v445_v4 = vadd.f32 %v986_v0, %v1130_v20  ;;  %v436_v6 = vpop.f32.mrb[11].mxu0  ;;  %v498_v9 = vadd.f32 %v1130_v20, %v497_v63 }
  0xf9   : > { %v509_v5 = vadd.f32 %v1002_v1, %v1130_v20  ;;  %v500_v7 = vpop.f32.mrb[11].mxu1  ;;  %v437_v10 = vadd.f32 %v1130_v20, %v436_v6 }
  0xfa   : > { %v501_v11 = vadd.f32 %v1130_v20, %v500_v7  ;;  %v883_v12 = vpack.c.bf16 %v445_v4, %v442_v2 }
  0xfb   : > { %v923_v13 = vpack.c.bf16 %v509_v5, %v506_v3  ;;  %v878_v14 = vpack.c.bf16 %v437_v10, %v434_v8 }
  0xfc   : > { %v918_v15 = vpack.c.bf16 %v501_v11, %v498_v9  ;;  %939 = vst [vmem:[%s1143_s29 + $0x28] sm:$0xff] %v883_v12  }
  0xfd   : > { %947 = vst [vmem:[%s1143_s29 + $0x68] sm:$0xff] %v923_v13   ;;  %938 = vst [vmem:[%s1143_s29 + $0x20] sm:$0xff] %v878_v14   ;;  %v989_v16 = vpop.f32.mrb[12].mxu0 }
  0xfe   : > { %946 = vst [vmem:[%s1143_s29 + $0x60] sm:$0xff] %v918_v15   ;;  %v1005_v17 = vpop.f32.mrb[12].mxu1  ;;  %v449_v18 = vpop.f32.mrb[13].mxu0  ;;  %v458_v23 = vadd.f32 %v989_v16, %v1130_v20 }
  0xff   : > { %v513_v19 = vpop.f32.mrb[13].mxu1  ;;  %v990_v21 = vpop.f32.mrb[14].mxu0  ;;  %v522_v24 = vadd.f32 %v1005_v17, %v1130_v20  ;;  %v450_v29 = vadd.f32 %v1130_v20, %v449_v18 }
 0x100   : > { %v1006_v22 = vpop.f32.mrb[14].mxu1  ;;  %v461_v25 = vadd.f32 %v990_v21, %v1130_v20  ;;  %v452_v27 = vpop.f32.mrb[15].mxu0  ;;  %v514_v30 = vadd.f32 %v1130_v20, %v513_v19 }
 0x101   : > { %v525_v26 = vadd.f32 %v1006_v22, %v1130_v20  ;;  %v516_v28 = vpop.f32.mrb[15].mxu1  ;;  %v453_v31 = vadd.f32 %v1130_v20, %v452_v27 }
 0x102   : > { %v517_v32 = vadd.f32 %v1130_v20, %v516_v28  ;;  %v893_v33 = vpack.c.bf16 %v461_v25, %v458_v23 }
 0x103   : > { %v933_v34 = vpack.c.bf16 %v525_v26, %v522_v24  ;;  %v888_v35 = vpack.c.bf16 %v453_v31, %v450_v29 }
 0x104   : > { %v928_v36 = vpack.c.bf16 %v517_v32, %v514_v30  ;;  %941 = vst [vmem:[%s1143_s29 + $0x38] sm:$0xff] %v893_v33  }
 0x105   : > { %949 = vst [vmem:[%s1143_s29 + $0x78] sm:$0xff] %v933_v34   ;;  %940 = vst [vmem:[%s1143_s29 + $0x30] sm:$0xff] %v888_v35  }
 0x106   : > { %948 = vst [vmem:[%s1143_s29 + $0x70] sm:$0xff] %v928_v36  }
 0x107 PF: > { %s13_s12 = sadd.s32 1, %s1046_s12  }
 0x108   : > { %p10_p4 = scmp.ge.s32.totalorder %s13_s12, 4  }
 0x10a   :  { %12 = sbr.rel (!%p10_p4) target bundleno = 1 (0x1), region = 62 }

// kernel: backbone_with_fpn_forward.13
= control target key start
LH: loop header
LB: loop body
LE: loop exit
PB: predicated region body
PF: predicated region fallthrough
CT: control target
= control target key end

     0   :  { %s1675_s1 = inlined_call_operand.vmem [shape: bf16[512,256], index: 1, kind: input, shape index: {}]   ;;  %s1676_s0 = inlined_call_operand.vmem [shape: bf16[128,512], index: 0, kind: input, shape index: {}]   ;;  %s1677_s2 = inlined_call_operand.vmem [shape: f32[1,256], index: 2, kind: input, shape index: {}]   ;;  %s1678_s3 = inlined_call_operand.vmem [shape: bf16[128,256], index: 3, kind: output, shape index: {}]  }
   0x1   :  { %v1136_v0 = vld [vmem:[%s1675_s1 + $0x4] ss:$8 sps:$4 sm:$0xff]   ;;  %v1140_v2 = vld [vmem:[%s1675_s1] ss:$8 sps:$4 sm:$0xff]   ;;  %v1142_v4 = vld [vmem:[%s1675_s1 + $0x14] ss:$8 sps:$4 sm:$0xff]  }
   0x2   :  { %v1138_v1 = vld [vmem:[%s1675_s1 + $0x104] ss:$8 sps:$4 sm:$0xff]   ;;  %602 = vmatprep.subr.bf16.mxu1 %v1136_v0  ;;  %v1141_v3 = vld [vmem:[%s1675_s1 + $0x100] ss:$8 sps:$4 sm:$0xff]   ;;  %v1144_v5 = vld [vmem:[%s1675_s1 + $0x114] ss:$8 sps:$4 sm:$0xff]  }
   0x3   :  { %715 = vmatprep.subr.bf16.mxu0 %v1138_v1  ;;  %603 = vmatpush1.bf16.msra.mxu1 %v1140_v2  ;;  %v1146_v6 = vld [vmem:[%s1675_s1 + $0x10] ss:$8 sps:$4 sm:$0xff]   ;;  %v1148_v8 = vld [vmem:[%s1675_s1 + $0x24] ss:$8 sps:$4 sm:$0xff]   ;;  %v1152_v10 = vld [vmem:[%s1675_s1 + $0x20] ss:$8 sps:$4 sm:$0xff]  }
   0x4   :  { %716 = vmatpush1.bf16.msra.mxu0 %v1141_v3  ;;  %604 = vmatprep.subr.bf16.mxu1 %v1142_v4  ;;  %v1147_v7 = vld [vmem:[%s1675_s1 + $0x110] ss:$8 sps:$4 sm:$0xff]   ;;  %v1150_v9 = vld [vmem:[%s1675_s1 + $0x124] ss:$8 sps:$4 sm:$0xff]   ;;  %v1153_v11 = vld [vmem:[%s1675_s1 + $0x120] ss:$8 sps:$4 sm:$0xff]  }
   0x5   :  { %717 = vmatprep.subr.bf16.mxu0 %v1144_v5  ;;  %v1154_v12 = vld [vmem:[%s1675_s1 + $0x34] ss:$8 sps:$4 sm:$0xff]   ;;  %v1158_v14 = vld [vmem:[%s1675_s1 + $0x30] ss:$8 sps:$4 sm:$0xff]   ;;  %v1160_v16 = vld [vmem:[%s1675_s1 + $0x44] ss:$8 sps:$4 sm:$0xff]  }
   0x6   :  { %v1156_v13 = vld [vmem:[%s1675_s1 + $0x134] ss:$8 sps:$4 sm:$0xff]   ;;  %v1159_v15 = vld [vmem:[%s1675_s1 + $0x130] ss:$8 sps:$4 sm:$0xff]   ;;  %v1162_v17 = vld [vmem:[%s1675_s1 + $0x144] ss:$8 sps:$4 sm:$0xff]  }
   0x7   :  { %605 = vmatpush1.bf16.msra.mxu1 %v1146_v6  ;;  %v1164_v18 = vld [vmem:[%s1675_s1 + $0x40] ss:$8 sps:$4 sm:$0xff]   ;;  %v1166_v20 = vld [vmem:[%s1675_s1 + $0x54] ss:$8 sps:$4 sm:$0xff]   ;;  %v1170_v22 = vld [vmem:[%s1675_s1 + $0x50] ss:$8 sps:$4 sm:$0xff]  }
   0x8   :  { %718 = vmatpush1.bf16.msra.mxu0 %v1147_v7  ;;  %606 = vmatprep.subr.bf16.mxu1 %v1148_v8  ;;  %v1165_v19 = vld [vmem:[%s1675_s1 + $0x140] ss:$8 sps:$4 sm:$0xff]   ;;  %v1168_v21 = vld [vmem:[%s1675_s1 + $0x154] ss:$8 sps:$4 sm:$0xff]   ;;  %v1171_v23 = vld [vmem:[%s1675_s1 + $0x150] ss:$8 sps:$4 sm:$0xff]  }
   0x9   :  { %719 = vmatprep.subr.bf16.mxu0 %v1150_v9  ;;  %v1172_v24 = vld [vmem:[%s1675_s1 + $0x64] ss:$8 sps:$4 sm:$0xff]   ;;  %v1176_v26 = vld [vmem:[%s1675_s1 + $0x60] ss:$8 sps:$4 sm:$0xff]   ;;  %v1178_v28 = vld [vmem:[%s1675_s1 + $0x74] ss:$8 sps:$4 sm:$0xff]  }
   0xa   :  { %v1174_v25 = vld [vmem:[%s1675_s1 + $0x164] ss:$8 sps:$4 sm:$0xff]   ;;  %v1177_v27 = vld [vmem:[%s1675_s1 + $0x160] ss:$8 sps:$4 sm:$0xff]   ;;  %v1180_v29 = vld [vmem:[%s1675_s1 + $0x174] ss:$8 sps:$4 sm:$0xff]  }
   0xb   :  { %607 = vmatpush1.bf16.msra.mxu1 %v1152_v10  ;;  %v1182_v30 = vld [vmem:[%s1675_s1 + $0x70] ss:$8 sps:$4 sm:$0xff]   ;;  %v1184_v32 = vld [vmem:[%s1675_s1 + $0x84] ss:$8 sps:$4 sm:$0xff]   ;;  %v1188_v34 = vld [vmem:[%s1675_s1 + $0x80] ss:$8 sps:$4 sm:$0xff]  }
   0xc   :  { %720 = vmatpush1.bf16.msra.mxu0 %v1153_v11  ;;  %608 = vmatprep.subr.bf16.mxu1 %v1154_v12  ;;  %v1183_v31 = vld [vmem:[%s1675_s1 + $0x170] ss:$8 sps:$4 sm:$0xff]   ;;  %v1186_v33 = vld [vmem:[%s1675_s1 + $0x184] ss:$8 sps:$4 sm:$0xff]   ;;  %v1189_v35 = vld [vmem:[%s1675_s1 + $0x180] ss:$8 sps:$4 sm:$0xff]  }
   0xd   :  { %721 = vmatprep.subr.bf16.mxu0 %v1156_v13  ;;  %v1190_v36 = vld [vmem:[%s1675_s1 + $0x94] ss:$8 sps:$4 sm:$0xff]   ;;  %v1194_v38 = vld [vmem:[%s1675_s1 + $0x90] ss:$8 sps:$4 sm:$0xff]   ;;  %v1196_v40 = vld [vmem:[%s1675_s1 + $0xa4] ss:$8 sps:$4 sm:$0xff]  }
   0xe   :  { %v1192_v37 = vld [vmem:[%s1675_s1 + $0x194] ss:$8 sps:$4 sm:$0xff]   ;;  %v1195_v39 = vld [vmem:[%s1675_s1 + $0x190] ss:$8 sps:$4 sm:$0xff]   ;;  %v1198_v41 = vld [vmem:[%s1675_s1 + $0x1a4] ss:$8 sps:$4 sm:$0xff]  }
   0xf   :  { %609 = vmatpush1.bf16.msra.mxu1 %v1158_v14  ;;  %v1200_v42 = vld [vmem:[%s1675_s1 + $0xa0] ss:$8 sps:$4 sm:$0xff]   ;;  %v1202_v44 = vld [vmem:[%s1675_s1 + $0xb4] ss:$8 sps:$4 sm:$0xff]   ;;  %v1206_v46 = vld [vmem:[%s1675_s1 + $0xb0] ss:$8 sps:$4 sm:$0xff]  }
  0x10   :  { %722 = vmatpush1.bf16.msra.mxu0 %v1159_v15  ;;  %610 = vmatprep.subr.bf16.mxu1 %v1160_v16  ;;  %v1201_v43 = vld [vmem:[%s1675_s1 + $0x1a0] ss:$8 sps:$4 sm:$0xff]   ;;  %v1204_v45 = vld [vmem:[%s1675_s1 + $0x1b4] ss:$8 sps:$4 sm:$0xff]   ;;  %v1207_v47 = vld [vmem:[%s1675_s1 + $0x1b0] ss:$8 sps:$4 sm:$0xff]  }
  0x11   :  { %723 = vmatprep.subr.bf16.mxu0 %v1162_v17  ;;  %v1208_v48 = vld [vmem:[%s1675_s1 + $0xc4] ss:$8 sps:$4 sm:$0xff]   ;;  %v1212_v52 = vld [vmem:[%s1675_s1 + $0xc0] ss:$8 sps:$4 sm:$0xff]   ;;  %v1214_v54 = vld [vmem:[%s1675_s1 + $0xd4] ss:$8 sps:$4 sm:$0xff]  }
  0x12   :  { %v1234_v49 = vld [vmem:[%s1676_s0 + $0x4] ss:$16 sps:$4 sm:$0xff]   ;;  %v1237_v51 = vld [vmem:[%s1676_s0 + $0xc] ss:$16 sps:$4 sm:$0xff]   ;;  %v1213_v53 = vld [vmem:[%s1675_s1 + $0x1c0] ss:$8 sps:$4 sm:$0xff]  }
  0x13   :  { %611 = vmatpush1.bf16.msra.mxu1 %v1164_v18  ;;  %v1210_v50 = vld [vmem:[%s1675_s1 + $0x1c4] ss:$8 sps:$4 sm:$0xff]   ;;  %634 = vmatprep.mubr.bf16.mxu1 %v1234_v49  ;;  %v1216_v55 = vld [vmem:[%s1675_s1 + $0x1d4] ss:$8 sps:$4 sm:$0xff]   ;;  %v1218_v56 = vld [vmem:[%s1675_s1 + $0xd0] ss:$8 sps:$4 sm:$0xff]  }
  0x14   :  { %724 = vmatpush1.bf16.msra.mxu0 %v1165_v19  ;;  %612 = vmatprep.subr.bf16.mxu1 %v1166_v20  ;;  %v1219_v57 = vld [vmem:[%s1675_s1 + $0x1d0] ss:$8 sps:$4 sm:$0xff]   ;;  %v1220_v58 = vld [vmem:[%s1675_s1 + $0xe4] ss:$8 sps:$4 sm:$0xff]   ;;  %v1224_v60 = vld [vmem:[%s1675_s1 + $0xe0] ss:$8 sps:$4 sm:$0xff]  }
  0x15   :  { %725 = vmatprep.subr.bf16.mxu0 %v1168_v21  ;;  %747 = vmatprep.mubr.bf16.mxu0 %v1237_v51  ;;  %v1222_v59 = vld [vmem:[%s1675_s1 + $0x1e4] ss:$8 sps:$4 sm:$0xff]   ;;  %v1225_v61 = vld [vmem:[%s1675_s1 + $0x1e0] ss:$8 sps:$4 sm:$0xff]   ;;  %v1226_v62 = vld [vmem:[%s1675_s1 + $0xf4] ss:$8 sps:$4 sm:$0xff]  }
  0x16   :  { %v1228_v63 = vld [vmem:[%s1675_s1 + $0x1f4] ss:$8 sps:$4 sm:$0xff]   ;;  %v1230_v0 = vld [vmem:[%s1675_s1 + $0xf0] ss:$8 sps:$4 sm:$0xff]  }
  0x17   :  { %613 = vmatpush1.bf16.msra.mxu1 %v1170_v22  ;;  %v1231_v1 = vld [vmem:[%s1675_s1 + $0x1f0] ss:$8 sps:$4 sm:$0xff]   ;;  %v1238_v4 = vld [vmem:[%s1676_s0 + $0x24] ss:$16 sps:$4 sm:$0xff]   ;;  %v1240_v5 = vld [vmem:[%s1676_s0 + $0x2c] ss:$16 sps:$4 sm:$0xff]  }
  0x18   :  { %726 = vmatpush1.bf16.msra.mxu0 %v1171_v23  ;;  %614 = vmatprep.subr.bf16.mxu1 %v1172_v24  ;;  %v1232_v2 = vld [vmem:[%s1676_s0] ss:$16 sps:$4 sm:$0xff]   ;;  %v1235_v3 = vld [vmem:[%s1676_s0 + $0x8] ss:$16 sps:$4 sm:$0xff]   ;;  %v1244_v8 = vld [vmem:[%s1676_s0 + $0x44] ss:$16 sps:$4 sm:$0xff]  }
  0x19   :  { %727 = vmatprep.subr.bf16.mxu0 %v1174_v25  ;;  %v1242_v6 = vld [vmem:[%s1676_s0 + $0x20] ss:$16 sps:$4 sm:$0xff]   ;;  %v1243_v7 = vld [vmem:[%s1676_s0 + $0x28] ss:$16 sps:$4 sm:$0xff]   ;;  %v1246_v9 = vld [vmem:[%s1676_s0 + $0x4c] ss:$16 sps:$4 sm:$0xff]  }
  0x1a   :  { %v1248_v10 = vld [vmem:[%s1676_s0 + $0x40] ss:$16 sps:$4 sm:$0xff]   ;;  %v1249_v11 = vld [vmem:[%s1676_s0 + $0x48] ss:$16 sps:$4 sm:$0xff]   ;;  %v1250_v12 = vld [vmem:[%s1676_s0 + $0x64] ss:$16 sps:$4 sm:$0xff]  }
  0x1b   :  { %615 = vmatpush1.bf16.msra.mxu1 %v1176_v26  ;;  %v1252_v13 = vld [vmem:[%s1676_s0 + $0x6c] ss:$16 sps:$4 sm:$0xff]   ;;  %v1254_v14 = vld [vmem:[%s1676_s0 + $0x60] ss:$16 sps:$4 sm:$0xff]   ;;  %v1255_v15 = vld [vmem:[%s1676_s0 + $0x68] ss:$16 sps:$4 sm:$0xff]  }
  0x1c   :  { %728 = vmatpush1.bf16.msra.mxu0 %v1177_v27  ;;  %616 = vmatprep.subr.bf16.mxu1 %v1178_v28  ;;  %v1256_v16 = vld [vmem:[%s1676_s0 + $0x84] ss:$16 sps:$4 sm:$0xff]   ;;  %v1258_v17 = vld [vmem:[%s1676_s0 + $0x8c] ss:$16 sps:$4 sm:$0xff]   ;;  %v1260_v18 = vld [vmem:[%s1676_s0 + $0x80] ss:$16 sps:$4 sm:$0xff]  }
  0x1d   :  { %729 = vmatprep.subr.bf16.mxu0 %v1180_v29  ;;  %v1261_v19 = vld [vmem:[%s1676_s0 + $0x88] ss:$16 sps:$4 sm:$0xff]   ;;  %v1262_v20 = vld [vmem:[%s1676_s0 + $0xa4] ss:$16 sps:$4 sm:$0xff]   ;;  %v1264_v21 = vld [vmem:[%s1676_s0 + $0xac] ss:$16 sps:$4 sm:$0xff]  }
  0x1e   :  { %v1266_v22 = vld [vmem:[%s1676_s0 + $0xa0] ss:$16 sps:$4 sm:$0xff]   ;;  %v1267_v23 = vld [vmem:[%s1676_s0 + $0xa8] ss:$16 sps:$4 sm:$0xff]   ;;  %v1268_v24 = vld [vmem:[%s1676_s0 + $0xc4] ss:$16 sps:$4 sm:$0xff]  }
  0x1f   :  { %617 = vmatpush1.bf16.msra.mxu1 %v1182_v30  ;;  %v1270_v25 = vld [vmem:[%s1676_s0 + $0xcc] ss:$16 sps:$4 sm:$0xff]   ;;  %v1272_v26 = vld [vmem:[%s1676_s0 + $0xc0] ss:$16 sps:$4 sm:$0xff]   ;;  %v1273_v27 = vld [vmem:[%s1676_s0 + $0xc8] ss:$16 sps:$4 sm:$0xff]  }
  0x20   :  { %730 = vmatpush1.bf16.msra.mxu0 %v1183_v31  ;;  %618 = vmatprep.subr.bf16.mxu1 %v1184_v32  ;;  %v1274_v28 = vld [vmem:[%s1676_s0 + $0xe4] ss:$16 sps:$4 sm:$0xff]   ;;  %v1276_v29 = vld [vmem:[%s1676_s0 + $0xec] ss:$16 sps:$4 sm:$0xff]   ;;  %v1278_v30 = vld [vmem:[%s1676_s0 + $0xe0] ss:$16 sps:$4 sm:$0xff]   ;;  %v112_v32 = vlaneseq }
  0x21   :  { %731 = vmatprep.subr.bf16.mxu0 %v1186_v33  ;;  %v1279_v31 = vld [vmem:[%s1676_s0 + $0xe8] ss:$16 sps:$4 sm:$0xff]  }
  0x22   :  { %v113_v33 = vshrl.u32 %v112_v32, 7 }
  0x23   :  { %619 = vmatpush1.bf16.msra.mxu1 %v1188_v34 }
  0x24   :  { %732 = vmatpush1.bf16.msra.mxu0 %v1189_v35  ;;  %620 = vmatprep.subr.bf16.mxu1 %v1190_v36  ;;  %v114_v34 = vsub.s32 0, %v113_v33  ;;  %v110_v35 = vld [vmem:[%s1677_s2] sm:$0x3]  ;;  %v118_v36 = vsub.s32 1, %v113_v33 }
  0x25   :  { %733 = vmatprep.subr.bf16.mxu0 %v1192_v37 }
  0x26   :  { %v1591_v37 = vrot.slane %v110_v35, %v114_v34 }
  0x27   :  { %621 = vmatpush1.bf16.msra.mxu1 %v1194_v38  ;;  %v1593_v38 = vrot.slane %v110_v35, %v118_v36 }
  0x28   :  { %734 = vmatpush1.bf16.msra.mxu0 %v1195_v39  ;;  %622 = vmatprep.subr.bf16.mxu1 %v1196_v40 }
  0x29   :  { %735 = vmatprep.subr.bf16.mxu0 %v1198_v41 }
  0x2b   :  { %623 = vmatpush1.bf16.msra.mxu1 %v1200_v42 }
  0x2c   :  { %736 = vmatpush1.bf16.msra.mxu0 %v1201_v43  ;;  %624 = vmatprep.subr.bf16.mxu1 %v1202_v44 }
  0x2d   :  { %737 = vmatprep.subr.bf16.mxu0 %v1204_v45 }
  0x2f   :  { %625 = vmatpush1.bf16.msra.mxu1 %v1206_v46 }
  0x30   :  { %738 = vmatpush1.bf16.msra.mxu0 %v1207_v47  ;;  %626 = vmatprep.subr.bf16.mxu1 %v1208_v48 }
  0x31   :  { %739 = vmatprep.subr.bf16.mxu0 %v1210_v50 }
  0x33   :  { %627 = vmatpush1.bf16.msra.mxu1 %v1212_v52 }
  0x34   :  { %740 = vmatpush1.bf16.msra.mxu0 %v1213_v53  ;;  %628 = vmatprep.subr.bf16.mxu1 %v1214_v54 }
  0x35   :  { %741 = vmatprep.subr.bf16.mxu0 %v1216_v55 }
  0x37   :  { %629 = vmatpush1.bf16.msra.mxu1 %v1218_v56 }
  0x38   :  { %742 = vmatpush1.bf16.msra.mxu0 %v1219_v57  ;;  %630 = vmatprep.subr.bf16.mxu1 %v1220_v58 }
  0x39   :  { %743 = vmatprep.subr.bf16.mxu0 %v1222_v59 }
  0x3b   :  { %631 = vmatpush1.bf16.msra.mxu1 %v1224_v60 }
  0x3c   :  { %744 = vmatpush1.bf16.msra.mxu0 %v1225_v61  ;;  %632 = vmatprep.subr.bf16.mxu1 %v1226_v62 }
  0x3d   :  { %745 = vmatprep.subr.bf16.mxu0 %v1228_v63 }
  0x3f   :  { %633 = vmatpush1.bf16.msra.mxu1 %v1230_v0 }
  0x40   :  { %746 = vmatpush1.bf16.msra.mxu0 %v1231_v1 }
  0x42   :  { %635 = vmatmul.mubr.bf16.vlgmr.msra.gmra.mrb[0].mxu1 %v1232_v2 }
  0x43   :  { %748 = vmatmul.mubr.bf16.vlgmr.msra.gmra.mrb[0].mxu0 %v1235_v3  ;;  %644 = vmatprep.mubr.bf16.mxu1 %v1238_v4 }
  0x44   :  { %757 = vmatprep.mubr.bf16.mxu0 %v1240_v5 }
  0x4a   :  { %645 = vmatmul.mubr.bf16.gmra.mrb[4].mxu1 %v1242_v6 }
  0x4b   :  { %758 = vmatmul.mubr.bf16.gmra.mrb[4].mxu0 %v1243_v7  ;;  %654 = vmatprep.mubr.bf16.mxu1 %v1244_v8 }
  0x4c   :  { %767 = vmatprep.mubr.bf16.mxu0 %v1246_v9 }
  0x52   :  { %655 = vmatmul.mubr.bf16.gmra.mrb[8].mxu1 %v1248_v10 }
  0x53   :  { %768 = vmatmul.mubr.bf16.gmra.mrb[8].mxu0 %v1249_v11  ;;  %664 = vmatprep.mubr.bf16.mxu1 %v1250_v12 }
  0x54   :  { %777 = vmatprep.mubr.bf16.mxu0 %v1252_v13 }
  0x5a   :  { %665 = vmatmul.mubr.bf16.gmra.mrb[12].mxu1 %v1254_v14 }
  0x5b   :  { %778 = vmatmul.mubr.bf16.gmra.mrb[12].mxu0 %v1255_v15  ;;  %674 = vmatprep.mubr.bf16.mxu1 %v1256_v16 }
  0x5c   :  { %787 = vmatprep.mubr.bf16.mxu0 %v1258_v17 }
  0x62   :  { %675 = vmatmul.mubr.bf16.gmra.mrb[16].mxu1 %v1260_v18 }
  0x63   :  { %788 = vmatmul.mubr.bf16.gmra.mrb[16].mxu0 %v1261_v19  ;;  %684 = vmatprep.mubr.bf16.mxu1 %v1262_v20 }
  0x64   :  { %797 = vmatprep.mubr.bf16.mxu0 %v1264_v21 }
  0x6a   :  { %685 = vmatmul.mubr.bf16.gmra.mrb[20].mxu1 %v1266_v22 }
  0x6b   :  { %798 = vmatmul.mubr.bf16.gmra.mrb[20].mxu0 %v1267_v23  ;;  %694 = vmatprep.mubr.bf16.mxu1 %v1268_v24 }
  0x6c   :  { %807 = vmatprep.mubr.bf16.mxu0 %v1270_v25 }
  0x72   :  { %695 = vmatmul.mubr.bf16.gmra.mrb[24].mxu1 %v1272_v26 }
  0x73   :  { %808 = vmatmul.mubr.bf16.gmra.mrb[24].mxu0 %v1273_v27  ;;  %704 = vmatprep.mubr.bf16.mxu1 %v1274_v28 }
  0x74   :  { %817 = vmatprep.mubr.bf16.mxu0 %v1276_v29 }
  0x7a   :  { %705 = vmatmul.mubr.bf16.gmra.mrb[28].mxu1 %v1278_v30 }
  0x7b   :  { %818 = vmatmul.mubr.bf16.gmra.mrb[28].mxu0 %v1279_v31 }
 0x115   :  { %v636_v39 = vpop.f32.mrb[0].mxu1 }
 0x116   :  { %v749_v40 = vpop.f32.mrb[0].mxu0  ;;  %v637_v41 = vadd.f32 %v636_v39, %v1591_v37  ;;  %v638_v42 = vpop.f32.mrb[1].mxu1 }
 0x117   :  { %v751_v43 = vpop.f32.mrb[1].mxu0  ;;  %v639_v44 = vadd.f32 %v638_v42, %v1593_v38  ;;  %v640_v45 = vpop.f32.mrb[2].mxu1 }
 0x118   :  { %v753_v46 = vpop.f32.mrb[2].mxu0  ;;  %v750_v47 = vadd.f32 %v749_v40, %v637_v41  ;;  %v641_v48 = vadd.f32 %v640_v45, %v1591_v37  ;;  %v642_v49 = vpop.f32.mrb[3].mxu1 }
 0x119   :  { %v755_v50 = vpop.f32.mrb[3].mxu0  ;;  %v752_v51 = vadd.f32 %v751_v43, %v639_v44  ;;  %v643_v52 = vadd.f32 %v642_v49, %v1593_v38 }
 0x11a   :  { %v754_v53 = vadd.f32 %v753_v46, %v641_v48 }
 0x11b   :  { %v1056_v54 = vpack.c.bf16 %v752_v51, %v750_v47  ;;  %v756_v55 = vadd.f32 %v755_v50, %v643_v52 }
 0x11d   :  { %924 = vst [vmem:[%s1678_s3] sm:$0xff] %v1056_v54  ;;  %v1057_v56 = vpack.c.bf16 %v756_v55, %v754_v53  ;;  %v646_v57 = vpop.f32.mrb[4].mxu1 }
 0x11e   :  { %v759_v58 = vpop.f32.mrb[4].mxu0  ;;  %v647_v59 = vadd.f32 %v646_v57, %v1591_v37  ;;  %v648_v60 = vpop.f32.mrb[5].mxu1 }
 0x11f   :  { %v761_v61 = vpop.f32.mrb[5].mxu0  ;;  %925 = vst [vmem:[%s1678_s3 + $0x8] sm:$0xff] %v1057_v56  ;;  %v649_v62 = vadd.f32 %v648_v60, %v1593_v38  ;;  %v650_v63 = vpop.f32.mrb[6].mxu1 }
 0x120   :  { %v763_v0 = vpop.f32.mrb[6].mxu0  ;;  %v760_v1 = vadd.f32 %v759_v58, %v647_v59  ;;  %v651_v2 = vadd.f32 %v650_v63, %v1591_v37  ;;  %v652_v3 = vpop.f32.mrb[7].mxu1 }
 0x121   :  { %v765_v4 = vpop.f32.mrb[7].mxu0  ;;  %v762_v5 = vadd.f32 %v761_v61, %v649_v62  ;;  %v653_v6 = vadd.f32 %v652_v3, %v1593_v38 }
 0x122   :  { %v764_v7 = vadd.f32 %v763_v0, %v651_v2 }
 0x123   :  { %v1058_v8 = vpack.c.bf16 %v762_v5, %v760_v1  ;;  %v766_v9 = vadd.f32 %v765_v4, %v653_v6 }
 0x125   :  { %926 = vst [vmem:[%s1678_s3 + $0x10] sm:$0xff] %v1058_v8  ;;  %v1059_v10 = vpack.c.bf16 %v766_v9, %v764_v7  ;;  %v656_v11 = vpop.f32.mrb[8].mxu1 }
 0x126   :  { %v769_v12 = vpop.f32.mrb[8].mxu0  ;;  %v657_v13 = vadd.f32 %v656_v11, %v1591_v37  ;;  %v658_v14 = vpop.f32.mrb[9].mxu1 }
 0x127   :  { %v771_v15 = vpop.f32.mrb[9].mxu0  ;;  %927 = vst [vmem:[%s1678_s3 + $0x18] sm:$0xff] %v1059_v10  ;;  %v659_v16 = vadd.f32 %v658_v14, %v1593_v38  ;;  %v660_v17 = vpop.f32.mrb[10].mxu1 }
 0x128   :  { %v773_v18 = vpop.f32.mrb[10].mxu0  ;;  %v770_v19 = vadd.f32 %v769_v12, %v657_v13  ;;  %v661_v20 = vadd.f32 %v660_v17, %v1591_v37  ;;  %v662_v21 = vpop.f32.mrb[11].mxu1 }
 0x129   :  { %v775_v22 = vpop.f32.mrb[11].mxu0  ;;  %v772_v23 = vadd.f32 %v771_v15, %v659_v16  ;;  %v663_v24 = vadd.f32 %v662_v21, %v1593_v38 }
 0x12a   :  { %v774_v25 = vadd.f32 %v773_v18, %v661_v20 }
 0x12b   :  { %v1060_v26 = vpack.c.bf16 %v772_v23, %v770_v19  ;;  %v776_v27 = vadd.f32 %v775_v22, %v663_v24 }
 0x12d   :  { %928 = vst [vmem:[%s1678_s3 + $0x20] sm:$0xff] %v1060_v26  ;;  %v1061_v28 = vpack.c.bf16 %v776_v27, %v774_v25  ;;  %v666_v29 = vpop.f32.mrb[12].mxu1 }
 0x12e   :  { %v779_v30 = vpop.f32.mrb[12].mxu0  ;;  %v667_v31 = vadd.f32 %v666_v29, %v1591_v37  ;;  %v668_v32 = vpop.f32.mrb[13].mxu1 }
 0x12f   :  { %v781_v33 = vpop.f32.mrb[13].mxu0  ;;  %929 = vst [vmem:[%s1678_s3 + $0x28] sm:$0xff] %v1061_v28  ;;  %v669_v34 = vadd.f32 %v668_v32, %v1593_v38  ;;  %v670_v35 = vpop.f32.mrb[14].mxu1 }
 0x130   :  { %v783_v36 = vpop.f32.mrb[14].mxu0  ;;  %v780_v39 = vadd.f32 %v779_v30, %v667_v31  ;;  %v671_v40 = vadd.f32 %v670_v35, %v1591_v37  ;;  %v672_v41 = vpop.f32.mrb[15].mxu1 }
 0x131   :  { %v785_v42 = vpop.f32.mrb[15].mxu0  ;;  %v782_v43 = vadd.f32 %v781_v33, %v669_v34  ;;  %v673_v44 = vadd.f32 %v672_v41, %v1593_v38 }
 0x132   :  { %v784_v45 = vadd.f32 %v783_v36, %v671_v40 }
 0x133   :  { %v1062_v46 = vpack.c.bf16 %v782_v43, %v780_v39  ;;  %v786_v47 = vadd.f32 %v785_v42, %v673_v44 }
 0x135   :  { %930 = vst [vmem:[%s1678_s3 + $0x30] sm:$0xff] %v1062_v46  ;;  %v1063_v48 = vpack.c.bf16 %v786_v47, %v784_v45  ;;  %v676_v49 = vpop.f32.mrb[16].mxu1 }
 0x136   :  { %v789_v50 = vpop.f32.mrb[16].mxu0  ;;  %v677_v51 = vadd.f32 %v676_v49, %v1591_v37  ;;  %v678_v52 = vpop.f32.mrb[17].mxu1 }
 0x137   :  { %v791_v53 = vpop.f32.mrb[17].mxu0  ;;  %931 = vst [vmem:[%s1678_s3 + $0x38] sm:$0xff] %v1063_v48  ;;  %v679_v54 = vadd.f32 %v678_v52, %v1593_v38  ;;  %v680_v55 = vpop.f32.mrb[18].mxu1 }
 0x138   :  { %v793_v56 = vpop.f32.mrb[18].mxu0  ;;  %v790_v57 = vadd.f32 %v789_v50, %v677_v51  ;;  %v681_v58 = vadd.f32 %v680_v55, %v1591_v37  ;;  %v682_v59 = vpop.f32.mrb[19].mxu1 }
 0x139   :  { %v795_v60 = vpop.f32.mrb[19].mxu0  ;;  %v792_v61 = vadd.f32 %v791_v53, %v679_v54  ;;  %v683_v62 = vadd.f32 %v682_v59, %v1593_v38 }
 0x13a   :  { %v794_v63 = vadd.f32 %v793_v56, %v681_v58 }
 0x13b   :  { %v1064_v0 = vpack.c.bf16 %v792_v61, %v790_v57  ;;  %v796_v1 = vadd.f32 %v795_v60, %v683_v62 }
 0x13d   :  { %932 = vst [vmem:[%s1678_s3 + $0x40] sm:$0xff] %v1064_v0  ;;  %v1065_v2 = vpack.c.bf16 %v796_v1, %v794_v63  ;;  %v686_v3 = vpop.f32.mrb[20].mxu1 }
 0x13e   :  { %v799_v4 = vpop.f32.mrb[20].mxu0  ;;  %v687_v5 = vadd.f32 %v686_v3, %v1591_v37  ;;  %v688_v6 = vpop.f32.mrb[21].mxu1 }
 0x13f   :  { %v801_v7 = vpop.f32.mrb[21].mxu0  ;;  %933 = vst [vmem:[%s1678_s3 + $0x48] sm:$0xff] %v1065_v2  ;;  %v689_v8 = vadd.f32 %v688_v6, %v1593_v38  ;;  %v690_v9 = vpop.f32.mrb[22].mxu1 }
 0x140   :  { %v803_v10 = vpop.f32.mrb[22].mxu0  ;;  %v800_v11 = vadd.f32 %v799_v4, %v687_v5  ;;  %v691_v12 = vadd.f32 %v690_v9, %v1591_v37  ;;  %v692_v13 = vpop.f32.mrb[23].mxu1 }
 0x141   :  { %v805_v14 = vpop.f32.mrb[23].mxu0  ;;  %v802_v15 = vadd.f32 %v801_v7, %v689_v8  ;;  %v693_v16 = vadd.f32 %v692_v13, %v1593_v38 }
 0x142   :  { %v804_v17 = vadd.f32 %v803_v10, %v691_v12 }
 0x143   :  { %v1066_v18 = vpack.c.bf16 %v802_v15, %v800_v11  ;;  %v806_v19 = vadd.f32 %v805_v14, %v693_v16 }
 0x145   :  { %934 = vst [vmem:[%s1678_s3 + $0x50] sm:$0xff] %v1066_v18  ;;  %v1067_v20 = vpack.c.bf16 %v806_v19, %v804_v17  ;;  %v696_v21 = vpop.f32.mrb[24].mxu1 }
 0x146   :  { %v809_v22 = vpop.f32.mrb[24].mxu0  ;;  %v697_v23 = vadd.f32 %v696_v21, %v1591_v37  ;;  %v698_v24 = vpop.f32.mrb[25].mxu1 }
 0x147   :  { %v811_v25 = vpop.f32.mrb[25].mxu0  ;;  %935 = vst [vmem:[%s1678_s3 + $0x58] sm:$0xff] %v1067_v20  ;;  %v699_v26 = vadd.f32 %v698_v24, %v1593_v38  ;;  %v700_v27 = vpop.f32.mrb[26].mxu1 }
 0x148   :  { %v813_v28 = vpop.f32.mrb[26].mxu0  ;;  %v810_v29 = vadd.f32 %v809_v22, %v697_v23  ;;  %v701_v30 = vadd.f32 %v700_v27, %v1591_v37  ;;  %v702_v31 = vpop.f32.mrb[27].mxu1 }
 0x149   :  { %v815_v32 = vpop.f32.mrb[27].mxu0  ;;  %v812_v33 = vadd.f32 %v811_v25, %v699_v26  ;;  %v703_v34 = vadd.f32 %v702_v31, %v1593_v38 }
 0x14a   :  { %v814_v35 = vadd.f32 %v813_v28, %v701_v30 }
 0x14b   :  { %v1068_v36 = vpack.c.bf16 %v812_v33, %v810_v29  ;;  %v816_v39 = vadd.f32 %v815_v32, %v703_v34 }
 0x14d   :  { %936 = vst [vmem:[%s1678_s3 + $0x60] sm:$0xff] %v1068_v36  ;;  %v1069_v40 = vpack.c.bf16 %v816_v39, %v814_v35  ;;  %v706_v41 = vpop.f32.mrb[28].mxu1 }
 0x14e   :  { %v819_v42 = vpop.f32.mrb[28].mxu0  ;;  %v707_v43 = vadd.f32 %v706_v41, %v1591_v37  ;;  %v708_v44 = vpop.f32.mrb[29].mxu1 }
 0x14f   :  { %v821_v45 = vpop.f32.mrb[29].mxu0  ;;  %937 = vst [vmem:[%s1678_s3 + $0x68] sm:$0xff] %v1069_v40  ;;  %v709_v46 = vadd.f32 %v708_v44, %v1593_v38  ;;  %v710_v47 = vpop.f32.mrb[30].mxu1 }
 0x150   :  { %v823_v48 = vpop.f32.mrb[30].mxu0  ;;  %v820_v49 = vadd.f32 %v819_v42, %v707_v43  ;;  %v711_v50 = vadd.f32 %v710_v47, %v1591_v37  ;;  %v712_v51 = vpop.f32.mrb[31].mxu1 }
 0x151   :  { %v825_v52 = vpop.f32.mrb[31].mxu0  ;;  %v822_v53 = vadd.f32 %v821_v45, %v709_v46  ;;  %v713_v54 = vadd.f32 %v712_v51, %v1593_v38 }
 0x152   :  { %v824_v55 = vadd.f32 %v823_v48, %v711_v50 }
 0x153   :  { %v1070_v56 = vpack.c.bf16 %v822_v53, %v820_v49  ;;  %v826_v57 = vadd.f32 %v825_v52, %v713_v54 }
 0x155   :  { %938 = vst [vmem:[%s1678_s3 + $0x70] sm:$0xff] %v1070_v56  ;;  %v1071_v58 = vpack.c.bf16 %v826_v57, %v824_v55 }
 0x157   :  { %939 = vst [vmem:[%s1678_s3 + $0x78] sm:$0xff] %v1071_v58 }

// kernel: backbone_with_fpn_forward.16
= control target key start
LH: loop header
LB: loop body
LE: loop exit
PB: predicated region body
PF: predicated region fallthrough
CT: control target
= control target key end

     0   :  { %s625_s1 = inlined_call_operand.vmem [shape: bf16[512,128], index: 1, kind: input, shape index: {}]   ;;  %s626_s0 = inlined_call_operand.vmem [shape: bf16[8,512], index: 0, kind: input, shape index: {}]   ;;  %s627_s2 = inlined_call_operand.vmem [shape: f32[1,128], index: 2, kind: input, shape index: {}]   ;;  %s628_s3 = inlined_call_operand.vmem [shape: bf16[8,128], index: 3, kind: output, shape index: {}]  }
   0x1   :  { %v461_v0 = vld [vmem:[%s625_s1 + $0x40] sm:$0xff]   ;;  %v465_v4 = vld [vmem:[%s625_s1 + $0x48] sm:$0xff]   ;;  %v469_v8 = vld [vmem:[%s625_s1 + $0x50] sm:$0xff]  }
   0x2   :  { %v462_v1 = vld [vmem:[%s625_s1 + $0xc0] sm:$0xff]   ;;  %417 = vmatprep.subr.bf16.mxu0 %v461_v0  ;;  %v466_v5 = vld [vmem:[%s625_s1 + $0xc8] sm:$0xff]   ;;  %v470_v9 = vld [vmem:[%s625_s1 + $0xd0] sm:$0xff]  }
   0x3   :  { %v463_v2 = vld [vmem:[%s625_s1] sm:$0xff]   ;;  %439 = vmatprep.subr.bf16.mxu1 %v462_v1  ;;  %v467_v6 = vld [vmem:[%s625_s1 + $0x8] sm:$0xff]   ;;  %v471_v10 = vld [vmem:[%s625_s1 + $0x10] sm:$0xff]  }
   0x4   :  { %v464_v3 = vld [vmem:[%s625_s1 + $0x80] sm:$0xff]   ;;  %418 = vmatpush3.bf16.msra.mxu0 %v463_v2  ;;  %v468_v7 = vld [vmem:[%s625_s1 + $0x88] sm:$0xff]   ;;  %v472_v11 = vld [vmem:[%s625_s1 + $0x90] sm:$0xff]  }
   0x5   :  { %440 = vmatpush3.bf16.msra.mxu1 %v464_v3  ;;  %419 = vmatprep.subr.bf16.mxu0 %v465_v4  ;;  %v473_v12 = vld [vmem:[%s625_s1 + $0x58] sm:$0xff]   ;;  %v477_v16 = vld [vmem:[%s625_s1 + $0x60] sm:$0xff]   ;;  %v481_v20 = vld [vmem:[%s625_s1 + $0x68] sm:$0xff]  }
   0x6   :  { %441 = vmatprep.subr.bf16.mxu1 %v466_v5  ;;  %v474_v13 = vld [vmem:[%s625_s1 + $0xd8] sm:$0xff]   ;;  %v478_v17 = vld [vmem:[%s625_s1 + $0xe0] sm:$0xff]   ;;  %v482_v21 = vld [vmem:[%s625_s1 + $0xe8] sm:$0xff]  }
   0x7   :  { %v475_v14 = vld [vmem:[%s625_s1 + $0x18] sm:$0xff]   ;;  %v479_v18 = vld [vmem:[%s625_s1 + $0x20] sm:$0xff]   ;;  %v483_v22 = vld [vmem:[%s625_s1 + $0x28] sm:$0xff]  }
   0x8   :  { %420 = vmatpush3.bf16.msra.mxu0 %v467_v6  ;;  %v476_v15 = vld [vmem:[%s625_s1 + $0x98] sm:$0xff]   ;;  %v480_v19 = vld [vmem:[%s625_s1 + $0xa0] sm:$0xff]   ;;  %v484_v23 = vld [vmem:[%s625_s1 + $0xa8] sm:$0xff]  }
   0x9   :  { %442 = vmatpush3.bf16.msra.mxu1 %v468_v7  ;;  %421 = vmatprep.subr.bf16.mxu0 %v469_v8  ;;  %v485_v24 = vld [vmem:[%s625_s1 + $0x70] sm:$0xff]   ;;  %v489_v28 = vld [vmem:[%s625_s1 + $0x78] sm:$0xff]   ;;  %v15_v32 = vld [vmem:[%s626_s0] sm:$0xff] }
   0xa   :  { %443 = vmatprep.subr.bf16.mxu1 %v470_v9  ;;  %v486_v25 = vld [vmem:[%s625_s1 + $0xf0] sm:$0xff]   ;;  %v490_v29 = vld [vmem:[%s625_s1 + $0xf8] sm:$0xff]   ;;  %v16_v33 = vld [vmem:[%s626_s0 + $0x8] sm:$0xff]  ;;  %v381_v34 = vcombine.low %v15_v32, %v15_v32  ;;  %v382_v35 = vcombine.high %v15_v32, %v15_v32 }
   0xb   :  { %v487_v26 = vld [vmem:[%s625_s1 + $0x30] sm:$0xff]   ;;  %v491_v30 = vld [vmem:[%s625_s1 + $0x38] sm:$0xff]   ;;  %v383_v36 = vcombine.low %v16_v33, %v16_v33  ;;  %v384_v37 = vcombine.high %v16_v33, %v16_v33  ;;  %v380_v40 = vld [vmem:[%s627_s2] ss:$0 sm:$0xff] }
   0xc   :  { %422 = vmatpush3.bf16.msra.mxu0 %v471_v10  ;;  %v488_v27 = vld [vmem:[%s625_s1 + $0xb0] sm:$0xff]   ;;  %v492_v31 = vld [vmem:[%s625_s1 + $0xb8] sm:$0xff]   ;;  %326 = vmatprep.mubr.bf16.mxu0 %v382_v35 }
   0xd   :  { %444 = vmatpush3.bf16.msra.mxu1 %v472_v11  ;;  %423 = vmatprep.subr.bf16.mxu0 %v473_v12 }
   0xe   :  { %445 = vmatprep.subr.bf16.mxu1 %v474_v13  ;;  %366 = vmatprep.mubr.bf16.mxu1 %v384_v37 }
  0x10   :  { %424 = vmatpush3.bf16.msra.mxu0 %v475_v14 }
  0x11   :  { %446 = vmatpush3.bf16.msra.mxu1 %v476_v15  ;;  %425 = vmatprep.subr.bf16.mxu0 %v477_v16 }
  0x12   :  { %447 = vmatprep.subr.bf16.mxu1 %v478_v17 }
  0x14   :  { %426 = vmatpush3.bf16.msra.mxu0 %v479_v18 }
  0x15   :  { %448 = vmatpush3.bf16.msra.mxu1 %v480_v19  ;;  %427 = vmatprep.subr.bf16.mxu0 %v481_v20 }
  0x16   :  { %449 = vmatprep.subr.bf16.mxu1 %v482_v21 }
  0x18   :  { %428 = vmatpush3.bf16.msra.mxu0 %v483_v22 }
  0x19   :  { %450 = vmatpush3.bf16.msra.mxu1 %v484_v23  ;;  %429 = vmatprep.subr.bf16.mxu0 %v485_v24 }
  0x1a   :  { %451 = vmatprep.subr.bf16.mxu1 %v486_v25 }
  0x1c   :  { %430 = vmatpush3.bf16.msra.mxu0 %v487_v26 }
  0x1d   :  { %452 = vmatpush3.bf16.msra.mxu1 %v488_v27  ;;  %431 = vmatprep.subr.bf16.mxu0 %v489_v28 }
  0x1e   :  { %453 = vmatprep.subr.bf16.mxu1 %v490_v29 }
  0x20   :  { %432 = vmatpush3.bf16.msra.mxu0 %v491_v30 }
  0x21   :  { %454 = vmatpush3.bf16.msra.mxu1 %v492_v31 }
  0x23   :  { %327 = vmatmul.mubr.bf16.vlgmr.msra.gmra.mrb[0].mxu0 %v381_v34 }
  0x24   :  { %367 = vmatmul.mubr.bf16.vlgmr.msra.gmra.mrb[0].mxu1 %v383_v36 }
  0xf6   :  { %v433_v38 = vpop.f32.mrb[0].mxu0 }
  0xf7   :  { %v455_v39 = vpop.f32.mrb[0].mxu1  ;;  %v434_v41 = vpop.f32.mrb[1].mxu0 }
  0xf8   :  { %v456_v42 = vpop.f32.mrb[1].mxu1  ;;  %v435_v43 = vadd.f32 %v434_v41, %v433_v38  ;;  %v436_v45 = vpop.f32.mrb[2].mxu0 }
  0xf9   :  { %v457_v44 = vadd.f32 %v456_v42, %v455_v39  ;;  %v458_v46 = vpop.f32.mrb[2].mxu1  ;;  %v437_v47 = vpop.f32.mrb[3].mxu0 }
  0xfa   :  { %v459_v48 = vpop.f32.mrb[3].mxu1  ;;  %v329_v49 = vadd.f32 %v435_v43, %v380_v40 }
  0xfc   :  { %v369_v50 = vadd.f32 %v457_v44, %v329_v49 }
  0xfe   :  { %v374_v51 = vpack.c.bf16 %v369_v50, %v369_v50 }
 0x100   :  { %375 = vst [vmem:[%s628_s3] sm:$0xf] %v374_v51 }

// kernel: backbone_with_fpn_forward.14
= control target key start
LH: loop header
LB: loop body
LE: loop exit
PB: predicated region body
PF: predicated region fallthrough
CT: control target
= control target key end

     0   :  { %s3775_s1 = inlined_call_operand.vmem [shape: bf16[1024,512], index: 1, kind: input, shape index: {}]   ;;  %s3776_s0 = inlined_call_operand.vmem [shape: bf16[32,1024], index: 0, kind: input, shape index: {}]   ;;  %s3777_s2 = inlined_call_operand.vmem [shape: f32[1,512], index: 2, kind: input, shape index: {}]   ;;  %s3778_s3 = inlined_call_operand.vmem [shape: bf16[32,512], index: 3, kind: output, shape index: {}]  }
   0x1   :  { %v2504_v0 = vld [vmem:[%s3775_s1 + $0x4] ss:$16 sps:$4 sm:$0xff]   ;;  %v2506_v1 = vld [vmem:[%s3775_s1 + $0xc] ss:$16 sps:$4 sm:$0xff]   ;;  %v2508_v2 = vld [vmem:[%s3775_s1] ss:$16 sps:$4 sm:$0xff]  }
   0x2   :  { %1668 = vmatprep.subr.bf16.mxu0 %v2504_v0  ;;  %v2509_v3 = vld [vmem:[%s3775_s1 + $0x8] ss:$16 sps:$4 sm:$0xff]   ;;  %1880 = vmatprep.subr.bf16.mxu1 %v2506_v1  ;;  %v2510_v4 = vld [vmem:[%s3775_s1 + $0x24] ss:$16 sps:$4 sm:$0xff]   ;;  %v2512_v5 = vld [vmem:[%s3775_s1 + $0x2c] ss:$16 sps:$4 sm:$0xff]  }
   0x3   :  { %1669 = vmatpush1.bf16.msra.mxu0 %v2508_v2  ;;  %1881 = vmatpush1.bf16.msra.mxu1 %v2509_v3  ;;  %v2514_v6 = vld [vmem:[%s3775_s1 + $0x20] ss:$16 sps:$4 sm:$0xff]   ;;  %v2515_v7 = vld [vmem:[%s3775_s1 + $0x28] ss:$16 sps:$4 sm:$0xff]   ;;  %v2516_v8 = vld [vmem:[%s3775_s1 + $0x44] ss:$16 sps:$4 sm:$0xff]  }
   0x4   :  { %1670 = vmatprep.subr.bf16.mxu0 %v2510_v4  ;;  %1882 = vmatprep.subr.bf16.mxu1 %v2512_v5  ;;  %v2518_v9 = vld [vmem:[%s3775_s1 + $0x4c] ss:$16 sps:$4 sm:$0xff]   ;;  %v2520_v10 = vld [vmem:[%s3775_s1 + $0x40] ss:$16 sps:$4 sm:$0xff]   ;;  %v2521_v11 = vld [vmem:[%s3775_s1 + $0x48] ss:$16 sps:$4 sm:$0xff]  }
   0x5   :  { %v2522_v12 = vld [vmem:[%s3775_s1 + $0x64] ss:$16 sps:$4 sm:$0xff]   ;;  %v2524_v13 = vld [vmem:[%s3775_s1 + $0x6c] ss:$16 sps:$4 sm:$0xff]   ;;  %v2526_v14 = vld [vmem:[%s3775_s1 + $0x60] ss:$16 sps:$4 sm:$0xff]  }
   0x6   :  { %v2527_v15 = vld [vmem:[%s3775_s1 + $0x68] ss:$16 sps:$4 sm:$0xff]   ;;  %v2528_v16 = vld [vmem:[%s3775_s1 + $0x84] ss:$16 sps:$4 sm:$0xff]   ;;  %v2530_v17 = vld [vmem:[%s3775_s1 + $0x8c] ss:$16 sps:$4 sm:$0xff]  }
   0x7   :  { %1671 = vmatpush1.bf16.msra.mxu0 %v2514_v6  ;;  %1883 = vmatpush1.bf16.msra.mxu1 %v2515_v7  ;;  %v2532_v18 = vld [vmem:[%s3775_s1 + $0x80] ss:$16 sps:$4 sm:$0xff]   ;;  %v2533_v19 = vld [vmem:[%s3775_s1 + $0x88] ss:$16 sps:$4 sm:$0xff]   ;;  %v2534_v20 = vld [vmem:[%s3775_s1 + $0xa4] ss:$16 sps:$4 sm:$0xff]  }
   0x8   :  { %1672 = vmatprep.subr.bf16.mxu0 %v2516_v8  ;;  %1884 = vmatprep.subr.bf16.mxu1 %v2518_v9  ;;  %v2536_v21 = vld [vmem:[%s3775_s1 + $0xac] ss:$16 sps:$4 sm:$0xff]   ;;  %v2538_v22 = vld [vmem:[%s3775_s1 + $0xa0] ss:$16 sps:$4 sm:$0xff]   ;;  %v2539_v23 = vld [vmem:[%s3775_s1 + $0xa8] ss:$16 sps:$4 sm:$0xff]  }
   0x9   :  { %v2540_v24 = vld [vmem:[%s3775_s1 + $0xc4] ss:$16 sps:$4 sm:$0xff]   ;;  %v2542_v25 = vld [vmem:[%s3775_s1 + $0xcc] ss:$16 sps:$4 sm:$0xff]   ;;  %v2544_v26 = vld [vmem:[%s3775_s1 + $0xc0] ss:$16 sps:$4 sm:$0xff]  }
   0xa   :  { %v2545_v27 = vld [vmem:[%s3775_s1 + $0xc8] ss:$16 sps:$4 sm:$0xff]   ;;  %v2546_v28 = vld [vmem:[%s3775_s1 + $0xe4] ss:$16 sps:$4 sm:$0xff]   ;;  %v2548_v29 = vld [vmem:[%s3775_s1 + $0xec] ss:$16 sps:$4 sm:$0xff]  }
   0xb   :  { %1673 = vmatpush1.bf16.msra.mxu0 %v2520_v10  ;;  %1885 = vmatpush1.bf16.msra.mxu1 %v2521_v11  ;;  %v2550_v30 = vld [vmem:[%s3775_s1 + $0xe0] ss:$16 sps:$4 sm:$0xff]   ;;  %v2551_v31 = vld [vmem:[%s3775_s1 + $0xe8] ss:$16 sps:$4 sm:$0xff]   ;;  %v2552_v32 = vld [vmem:[%s3775_s1 + $0x104] ss:$16 sps:$4 sm:$0xff]  }
   0xc   :  { %1674 = vmatprep.subr.bf16.mxu0 %v2522_v12  ;;  %1886 = vmatprep.subr.bf16.mxu1 %v2524_v13  ;;  %v2554_v33 = vld [vmem:[%s3775_s1 + $0x10c] ss:$16 sps:$4 sm:$0xff]   ;;  %v2556_v34 = vld [vmem:[%s3775_s1 + $0x100] ss:$16 sps:$4 sm:$0xff]   ;;  %v2557_v35 = vld [vmem:[%s3775_s1 + $0x108] ss:$16 sps:$4 sm:$0xff]  }
   0xd   :  { %v2558_v36 = vld [vmem:[%s3775_s1 + $0x124] ss:$16 sps:$4 sm:$0xff]   ;;  %v2560_v37 = vld [vmem:[%s3775_s1 + $0x12c] ss:$16 sps:$4 sm:$0xff]   ;;  %v2562_v38 = vld [vmem:[%s3775_s1 + $0x120] ss:$16 sps:$4 sm:$0xff]  }
   0xe   :  { %v2563_v39 = vld [vmem:[%s3775_s1 + $0x128] ss:$16 sps:$4 sm:$0xff]   ;;  %v2564_v40 = vld [vmem:[%s3775_s1 + $0x144] ss:$16 sps:$4 sm:$0xff]   ;;  %v2566_v41 = vld [vmem:[%s3775_s1 + $0x14c] ss:$16 sps:$4 sm:$0xff]  }
   0xf   :  { %1675 = vmatpush1.bf16.msra.mxu0 %v2526_v14  ;;  %1887 = vmatpush1.bf16.msra.mxu1 %v2527_v15  ;;  %v2568_v42 = vld [vmem:[%s3775_s1 + $0x140] ss:$16 sps:$4 sm:$0xff]   ;;  %v2569_v43 = vld [vmem:[%s3775_s1 + $0x148] ss:$16 sps:$4 sm:$0xff]   ;;  %v2570_v44 = vld [vmem:[%s3775_s1 + $0x164] ss:$16 sps:$4 sm:$0xff]  }
  0x10   :  { %1676 = vmatprep.subr.bf16.mxu0 %v2528_v16  ;;  %1888 = vmatprep.subr.bf16.mxu1 %v2530_v17  ;;  %v2572_v45 = vld [vmem:[%s3775_s1 + $0x16c] ss:$16 sps:$4 sm:$0xff]   ;;  %v14_v46 = vld [vmem:[%s3776_s0] sm:$0xff]  ;;  %v2575_v49 = vld [vmem:[%s3775_s1 + $0x168] ss:$16 sps:$4 sm:$0xff]  }
  0x11   :  { %v18_v47 = vld [vmem:[%s3776_s0 + $0x20] sm:$0xff]  ;;  %v2578_v52 = vld [vmem:[%s3775_s1 + $0x18c] ss:$16 sps:$4 sm:$0xff]   ;;  %v2581_v54 = vld [vmem:[%s3775_s1 + $0x188] ss:$16 sps:$4 sm:$0xff]  }
  0x12   :  { %v2574_v48 = vld [vmem:[%s3775_s1 + $0x160] ss:$16 sps:$4 sm:$0xff]   ;;  %v2153_v50 = vcombine.high %v14_v46, %v18_v47  ;;  %v2576_v51 = vld [vmem:[%s3775_s1 + $0x184] ss:$16 sps:$4 sm:$0xff]   ;;  %v2584_v56 = vld [vmem:[%s3775_s1 + $0x1ac] ss:$16 sps:$4 sm:$0xff]   ;;  %v2152_v5 = vcombine.low %v14_v46, %v18_v47 }
  0x13   :  { %1677 = vmatpush1.bf16.msra.mxu0 %v2532_v18  ;;  %1889 = vmatpush1.bf16.msra.mxu1 %v2533_v19  ;;  %v2580_v53 = vld [vmem:[%s3775_s1 + $0x180] ss:$16 sps:$4 sm:$0xff]   ;;  %v2582_v55 = vld [vmem:[%s3775_s1 + $0x1a4] ss:$16 sps:$4 sm:$0xff]   ;;  %v2587_v58 = vld [vmem:[%s3775_s1 + $0x1a8] ss:$16 sps:$4 sm:$0xff]  }
  0x14   :  { %1678 = vmatprep.subr.bf16.mxu0 %v2534_v20  ;;  %1890 = vmatprep.subr.bf16.mxu1 %v2536_v21  ;;  %v2586_v57 = vld [vmem:[%s3775_s1 + $0x1a0] ss:$16 sps:$4 sm:$0xff]   ;;  %v2588_v59 = vld [vmem:[%s3775_s1 + $0x1c4] ss:$16 sps:$4 sm:$0xff]   ;;  %v2590_v60 = vld [vmem:[%s3775_s1 + $0x1cc] ss:$16 sps:$4 sm:$0xff]  }
  0x15   :  { %1700 = vmatprep.mubr.bf16.mxu0 %v2153_v50  ;;  %1912 = vmatprep.mubr.bf16.mxu1 %v2153_v50  ;;  %v2592_v61 = vld [vmem:[%s3775_s1 + $0x1c0] ss:$16 sps:$4 sm:$0xff]   ;;  %v2593_v62 = vld [vmem:[%s3775_s1 + $0x1c8] ss:$16 sps:$4 sm:$0xff]   ;;  %v2594_v63 = vld [vmem:[%s3775_s1 + $0x1e4] ss:$16 sps:$4 sm:$0xff]  }
  0x16   :  { %v2596_v0 = vld [vmem:[%s3775_s1 + $0x1ec] ss:$16 sps:$4 sm:$0xff]   ;;  %v2598_v1 = vld [vmem:[%s3775_s1 + $0x1e0] ss:$16 sps:$4 sm:$0xff]   ;;  %v2599_v2 = vld [vmem:[%s3775_s1 + $0x1e8] ss:$16 sps:$4 sm:$0xff]  }
  0x17   :  { %1679 = vmatpush1.bf16.msra.mxu0 %v2538_v22  ;;  %1891 = vmatpush1.bf16.msra.mxu1 %v2539_v23  ;;  %v2602_v3 = vld [vmem:[%s3775_s1 + $0x204] ss:$16 sps:$4 sm:$0xff]   ;;  %v2605_v4 = vld [vmem:[%s3775_s1 + $0x20c] ss:$16 sps:$4 sm:$0xff]   ;;  %v2600_v6 = vld [vmem:[%s3775_s1 + $0x200] ss:$16 sps:$4 sm:$0xff]  }
  0x18   :  { %1680 = vmatprep.subr.bf16.mxu0 %v2540_v24  ;;  %1892 = vmatprep.subr.bf16.mxu1 %v2542_v25  ;;  %v2603_v7 = vld [vmem:[%s3775_s1 + $0x208] ss:$16 sps:$4 sm:$0xff]   ;;  %v2608_v8 = vld [vmem:[%s3775_s1 + $0x224] ss:$16 sps:$4 sm:$0xff]   ;;  %v2611_v9 = vld [vmem:[%s3775_s1 + $0x22c] ss:$16 sps:$4 sm:$0xff]  }
  0x19   :  { %v2606_v10 = vld [vmem:[%s3775_s1 + $0x220] ss:$16 sps:$4 sm:$0xff]   ;;  %v2609_v11 = vld [vmem:[%s3775_s1 + $0x228] ss:$16 sps:$4 sm:$0xff]   ;;  %v2614_v12 = vld [vmem:[%s3775_s1 + $0x244] ss:$16 sps:$4 sm:$0xff]  }
  0x1a   :  { %v2617_v13 = vld [vmem:[%s3775_s1 + $0x24c] ss:$16 sps:$4 sm:$0xff]   ;;  %v2612_v14 = vld [vmem:[%s3775_s1 + $0x240] ss:$16 sps:$4 sm:$0xff]   ;;  %v2615_v15 = vld [vmem:[%s3775_s1 + $0x248] ss:$16 sps:$4 sm:$0xff]  }
  0x1b   :  { %1681 = vmatpush1.bf16.msra.mxu0 %v2544_v26  ;;  %1893 = vmatpush1.bf16.msra.mxu1 %v2545_v27  ;;  %v2620_v16 = vld [vmem:[%s3775_s1 + $0x264] ss:$16 sps:$4 sm:$0xff]   ;;  %v2623_v17 = vld [vmem:[%s3775_s1 + $0x26c] ss:$16 sps:$4 sm:$0xff]   ;;  %v2618_v18 = vld [vmem:[%s3775_s1 + $0x260] ss:$16 sps:$4 sm:$0xff]  }
  0x1c   :  { %1682 = vmatprep.subr.bf16.mxu0 %v2546_v28  ;;  %1894 = vmatprep.subr.bf16.mxu1 %v2548_v29  ;;  %v2621_v19 = vld [vmem:[%s3775_s1 + $0x268] ss:$16 sps:$4 sm:$0xff]   ;;  %v2626_v20 = vld [vmem:[%s3775_s1 + $0x284] ss:$16 sps:$4 sm:$0xff]   ;;  %v2629_v21 = vld [vmem:[%s3775_s1 + $0x28c] ss:$16 sps:$4 sm:$0xff]  }
  0x1d   :  { %v2624_v22 = vld [vmem:[%s3775_s1 + $0x280] ss:$16 sps:$4 sm:$0xff]   ;;  %v2627_v23 = vld [vmem:[%s3775_s1 + $0x288] ss:$16 sps:$4 sm:$0xff]   ;;  %v2632_v24 = vld [vmem:[%s3775_s1 + $0x2a4] ss:$16 sps:$4 sm:$0xff]  }
  0x1e   :  { %v2635_v25 = vld [vmem:[%s3775_s1 + $0x2ac] ss:$16 sps:$4 sm:$0xff]   ;;  %v22_v26 = vld [vmem:[%s3776_s0 + $0x40] sm:$0xff]  ;;  %v2651_v46 = vld [vmem:[%s3775_s1 + $0x308] ss:$16 sps:$4 sm:$0xff]  }
  0x1f   :  { %1683 = vmatpush1.bf16.msra.mxu0 %v2550_v30  ;;  %1895 = vmatpush1.bf16.msra.mxu1 %v2551_v31  ;;  %v26_v27 = vld [vmem:[%s3776_s0 + $0x60] sm:$0xff]  ;;  %v2633_v30 = vld [vmem:[%s3775_s1 + $0x2a8] ss:$16 sps:$4 sm:$0xff]  }
  0x20   :  { %1684 = vmatprep.subr.bf16.mxu0 %v2552_v32  ;;  %1896 = vmatprep.subr.bf16.mxu1 %v2554_v33  ;;  %v2161_v28 = vcombine.high %v22_v26, %v26_v27  ;;  %v2630_v29 = vld [vmem:[%s3775_s1 + $0x2a0] ss:$16 sps:$4 sm:$0xff]   ;;  %v2160_v31 = vcombine.low %v22_v26, %v26_v27  ;;  %v2638_v32 = vld [vmem:[%s3775_s1 + $0x2c4] ss:$16 sps:$4 sm:$0xff]   ;;  %v2641_v33 = vld [vmem:[%s3775_s1 + $0x2cc] ss:$16 sps:$4 sm:$0xff]  }
  0x21   :  { %v2656_v47 = vld [vmem:[%s3775_s1 + $0x324] ss:$16 sps:$4 sm:$0xff]   ;;  %v2657_v50 = vld [vmem:[%s3775_s1 + $0x328] ss:$16 sps:$4 sm:$0xff]  }
  0x22   :  { %v3362_v27 = vld [vmem:[%s3776_s0 + $0x30] sm:$0xff] }
  0x23   :  { %1685 = vmatpush1.bf16.msra.mxu0 %v2556_v34  ;;  %1897 = vmatpush1.bf16.msra.mxu1 %v2557_v35  ;;  %v3193_v34 = vld [vmem:[%s3776_s0 + $0x8] sm:$0xff] }
  0x24   :  { %1686 = vmatprep.subr.bf16.mxu0 %v2558_v36  ;;  %1898 = vmatprep.subr.bf16.mxu1 %v2560_v37  ;;  %v3198_v35 = vld [vmem:[%s3776_s0 + $0x28] sm:$0xff]  ;;  %v2636_v36 = vld [vmem:[%s3775_s1 + $0x2c0] ss:$16 sps:$4 sm:$0xff]  }
  0x25   :  { %v2639_v37 = vld [vmem:[%s3775_s1 + $0x2c8] ss:$16 sps:$4 sm:$0xff]  }
  0x27   :  { %1687 = vmatpush1.bf16.msra.mxu0 %v2562_v38  ;;  %1899 = vmatpush1.bf16.msra.mxu1 %v2563_v39  ;;  %v2155_v38 = vcombine.high %v3193_v34, %v3198_v35  ;;  %v2644_v39 = vld [vmem:[%s3775_s1 + $0x2e4] ss:$16 sps:$4 sm:$0xff]  }
  0x28   :  { %1688 = vmatprep.subr.bf16.mxu0 %v2564_v40  ;;  %1900 = vmatprep.subr.bf16.mxu1 %v2566_v41  ;;  %v2647_v40 = vld [vmem:[%s3775_s1 + $0x2ec] ss:$16 sps:$4 sm:$0xff]   ;;  %v2642_v41 = vld [vmem:[%s3775_s1 + $0x2e0] ss:$16 sps:$4 sm:$0xff]  }
  0x2b   :  { %1689 = vmatpush1.bf16.msra.mxu0 %v2568_v42  ;;  %1901 = vmatpush1.bf16.msra.mxu1 %v2569_v43  ;;  %v2645_v42 = vld [vmem:[%s3775_s1 + $0x2e8] ss:$16 sps:$4 sm:$0xff]   ;;  %v2650_v43 = vld [vmem:[%s3775_s1 + $0x304] ss:$16 sps:$4 sm:$0xff]  }
  0x2c   :  { %1690 = vmatprep.subr.bf16.mxu0 %v2570_v44  ;;  %1902 = vmatprep.subr.bf16.mxu1 %v2572_v45  ;;  %v2653_v44 = vld [vmem:[%s3775_s1 + $0x30c] ss:$16 sps:$4 sm:$0xff]   ;;  %v2648_v45 = vld [vmem:[%s3775_s1 + $0x300] ss:$16 sps:$4 sm:$0xff]  }
  0x2f   :  { %1691 = vmatpush1.bf16.msra.mxu0 %v2574_v48  ;;  %1903 = vmatpush1.bf16.msra.mxu1 %v2575_v49  ;;  %v2659_v48 = vld [vmem:[%s3775_s1 + $0x32c] ss:$16 sps:$4 sm:$0xff]   ;;  %v2654_v49 = vld [vmem:[%s3775_s1 + $0x320] ss:$16 sps:$4 sm:$0xff]  }
  0x30   :  { %1692 = vmatprep.subr.bf16.mxu0 %v2576_v51  ;;  %1904 = vmatprep.subr.bf16.mxu1 %v2578_v52  ;;  %v2662_v51 = vld [vmem:[%s3775_s1 + $0x344] ss:$16 sps:$4 sm:$0xff]   ;;  %v2665_v52 = vld [vmem:[%s3775_s1 + $0x34c] ss:$16 sps:$4 sm:$0xff]  }
  0x33   :  { %1693 = vmatpush1.bf16.msra.mxu0 %v2580_v53  ;;  %1905 = vmatpush1.bf16.msra.mxu1 %v2581_v54  ;;  %v2660_v53 = vld [vmem:[%s3775_s1 + $0x340] ss:$16 sps:$4 sm:$0xff]   ;;  %v2663_v54 = vld [vmem:[%s3775_s1 + $0x348] ss:$16 sps:$4 sm:$0xff]  }
  0x34   :  { %1694 = vmatprep.subr.bf16.mxu0 %v2582_v55  ;;  %1906 = vmatprep.subr.bf16.mxu1 %v2584_v56  ;;  %v2668_v55 = vld [vmem:[%s3775_s1 + $0x364] ss:$16 sps:$4 sm:$0xff]   ;;  %v2671_v56 = vld [vmem:[%s3775_s1 + $0x36c] ss:$16 sps:$4 sm:$0xff]  }
  0x37   :  { %1695 = vmatpush1.bf16.msra.mxu0 %v2586_v57  ;;  %1907 = vmatpush1.bf16.msra.mxu1 %v2587_v58  ;;  %v2666_v57 = vld [vmem:[%s3775_s1 + $0x360] ss:$16 sps:$4 sm:$0xff]   ;;  %v2669_v58 = vld [vmem:[%s3775_s1 + $0x368] ss:$16 sps:$4 sm:$0xff]  }
  0x38   :  { %1696 = vmatprep.subr.bf16.mxu0 %v2588_v59  ;;  %1908 = vmatprep.subr.bf16.mxu1 %v2590_v60  ;;  %v2674_v59 = vld [vmem:[%s3775_s1 + $0x384] ss:$16 sps:$4 sm:$0xff]   ;;  %v2677_v60 = vld [vmem:[%s3775_s1 + $0x38c] ss:$16 sps:$4 sm:$0xff]  }
  0x3b   :  { %1697 = vmatpush1.bf16.msra.mxu0 %v2592_v61  ;;  %1909 = vmatpush1.bf16.msra.mxu1 %v2593_v62  ;;  %v2672_v61 = vld [vmem:[%s3775_s1 + $0x380] ss:$16 sps:$4 sm:$0xff]   ;;  %v2675_v62 = vld [vmem:[%s3775_s1 + $0x388] ss:$16 sps:$4 sm:$0xff]  }
  0x3c   :  { %1698 = vmatprep.subr.bf16.mxu0 %v2594_v63  ;;  %1910 = vmatprep.subr.bf16.mxu1 %v2596_v0  ;;  %v2680_v63 = vld [vmem:[%s3775_s1 + $0x3a4] ss:$16 sps:$4 sm:$0xff]   ;;  %v2683_v0 = vld [vmem:[%s3775_s1 + $0x3ac] ss:$16 sps:$4 sm:$0xff]  }
  0x3f   :  { %1699 = vmatpush1.bf16.msra.mxu0 %v2598_v1  ;;  %1911 = vmatpush1.bf16.msra.mxu1 %v2599_v2  ;;  %v2678_v1 = vld [vmem:[%s3775_s1 + $0x3a0] ss:$16 sps:$4 sm:$0xff]   ;;  %v2681_v2 = vld [vmem:[%s3775_s1 + $0x3a8] ss:$16 sps:$4 sm:$0xff]  }
  0x40   :  { %1721 = vmatprep.subr.bf16.mxu0 %v2602_v3  ;;  %1933 = vmatprep.subr.bf16.mxu1 %v2605_v4  ;;  %v2686_v3 = vld [vmem:[%s3775_s1 + $0x3c4] ss:$16 sps:$4 sm:$0xff]   ;;  %v2689_v4 = vld [vmem:[%s3775_s1 + $0x3cc] ss:$16 sps:$4 sm:$0xff]  }
  0x42   :  { %1701 = vmatmul.mubr.bf16.vlgmr.msra.gmra.mrb[0].mxu0 %v2152_v5  ;;  %1913 = vmatmul.mubr.bf16.vlgmr.msra.gmra.mrb[0].mxu1 %v2152_v5  ;;  %v2684_v5 = vld [vmem:[%s3775_s1 + $0x3c0] ss:$16 sps:$4 sm:$0xff]  }
  0x43   :  { %1722 = vmatpush1.bf16.msra.mxu0 %v2600_v6  ;;  %1934 = vmatpush1.bf16.msra.mxu1 %v2603_v7  ;;  %v2687_v6 = vld [vmem:[%s3775_s1 + $0x3c8] ss:$16 sps:$4 sm:$0xff]   ;;  %v2692_v7 = vld [vmem:[%s3775_s1 + $0x3e4] ss:$16 sps:$4 sm:$0xff]  }
  0x44   :  { %1723 = vmatprep.subr.bf16.mxu0 %v2608_v8  ;;  %1935 = vmatprep.subr.bf16.mxu1 %v2611_v9  ;;  %v2695_v8 = vld [vmem:[%s3775_s1 + $0x3ec] ss:$16 sps:$4 sm:$0xff]   ;;  %v2690_v9 = vld [vmem:[%s3775_s1 + $0x3e0] ss:$16 sps:$4 sm:$0xff]  }
  0x45   :  { %1710 = vmatprep.mubr.bf16.mxu0 %v2161_v28  ;;  %1922 = vmatprep.mubr.bf16.mxu1 %v2161_v28  ;;  %v2708_v28 = vld [vmem:[%s3775_s1 + $0x440] ss:$16 sps:$4 sm:$0xff]  }
  0x47   :  { %1724 = vmatpush1.bf16.msra.mxu0 %v2606_v10  ;;  %1936 = vmatpush1.bf16.msra.mxu1 %v2609_v11  ;;  %v2693_v10 = vld [vmem:[%s3775_s1 + $0x3e8] ss:$16 sps:$4 sm:$0xff]   ;;  %v2698_v11 = vld [vmem:[%s3775_s1 + $0x404] ss:$16 sps:$4 sm:$0xff]  }
  0x48   :  { %1725 = vmatprep.subr.bf16.mxu0 %v2614_v12  ;;  %1937 = vmatprep.subr.bf16.mxu1 %v2617_v13  ;;  %v2701_v12 = vld [vmem:[%s3775_s1 + $0x40c] ss:$16 sps:$4 sm:$0xff]   ;;  %v2696_v13 = vld [vmem:[%s3775_s1 + $0x400] ss:$16 sps:$4 sm:$0xff]  }
  0x4a   :  { %1711 = vmatmul.mubr.bf16.gmra.mrb[4].mxu0 %v2160_v31  ;;  %1923 = vmatmul.mubr.bf16.gmra.mrb[4].mxu1 %v2160_v31  ;;  %v2719_v31 = vld [vmem:[%s3775_s1 + $0x46c] ss:$16 sps:$4 sm:$0xff]  }
  0x4b   :  { %1726 = vmatpush1.bf16.msra.mxu0 %v2612_v14  ;;  %1938 = vmatpush1.bf16.msra.mxu1 %v2615_v15  ;;  %v2699_v14 = vld [vmem:[%s3775_s1 + $0x408] ss:$16 sps:$4 sm:$0xff]   ;;  %v2154_v15 = vcombine.low %v3193_v34, %v3198_v35  ;;  %v2722_v35 = vld [vmem:[%s3775_s1 + $0x484] ss:$16 sps:$4 sm:$0xff]  }
  0x4c   :  { %1727 = vmatprep.subr.bf16.mxu0 %v2620_v16  ;;  %1939 = vmatprep.subr.bf16.mxu1 %v2623_v17  ;;  %v23_v16 = vld [vmem:[%s3776_s0 + $0x48] sm:$0xff] }
  0x4d   :  { %1753 = vmatprep.mubr.bf16.mxu0 %v2155_v38  ;;  %1965 = vmatprep.mubr.bf16.mxu1 %v2155_v38  ;;  %v27_v17 = vld [vmem:[%s3776_s0 + $0x68] sm:$0xff] }
  0x4e   :  { %v2162_v26 = vcombine.low %v23_v16, %v27_v17  ;;  %v2717_v34 = vld [vmem:[%s3775_s1 + $0x468] ss:$16 sps:$4 sm:$0xff]  }
  0x4f   :  { %1728 = vmatpush1.bf16.msra.mxu0 %v2618_v18  ;;  %1940 = vmatpush1.bf16.msra.mxu1 %v2621_v19  ;;  %v2704_v18 = vld [vmem:[%s3775_s1 + $0x424] ss:$16 sps:$4 sm:$0xff]   ;;  %v2707_v19 = vld [vmem:[%s3775_s1 + $0x42c] ss:$16 sps:$4 sm:$0xff]   ;;  %v2723_v38 = vld [vmem:[%s3775_s1 + $0x488] ss:$16 sps:$4 sm:$0xff]  }
  0x50   :  { %1729 = vmatprep.subr.bf16.mxu0 %v2626_v20  ;;  %1941 = vmatprep.subr.bf16.mxu1 %v2629_v21  ;;  %v2163_v20 = vcombine.high %v23_v16, %v27_v17  ;;  %v2702_v21 = vld [vmem:[%s3775_s1 + $0x420] ss:$16 sps:$4 sm:$0xff]   ;;  %v2791_v16 = vld [vmem:[%s3775_s1 + $0x5ec] ss:$16 sps:$4 sm:$0xff]  }
  0x51   :  { %v2786_v17 = vld [vmem:[%s3775_s1 + $0x5e0] ss:$16 sps:$4 sm:$0xff]  }
  0x53   :  { %1730 = vmatpush1.bf16.msra.mxu0 %v2624_v22  ;;  %1942 = vmatpush1.bf16.msra.mxu1 %v2627_v23  ;;  %v2705_v22 = vld [vmem:[%s3775_s1 + $0x428] ss:$16 sps:$4 sm:$0xff]   ;;  %v2710_v23 = vld [vmem:[%s3775_s1 + $0x444] ss:$16 sps:$4 sm:$0xff]  }
  0x54   :  { %1731 = vmatprep.subr.bf16.mxu0 %v2632_v24  ;;  %1943 = vmatprep.subr.bf16.mxu1 %v2635_v25  ;;  %v2713_v24 = vld [vmem:[%s3775_s1 + $0x44c] ss:$16 sps:$4 sm:$0xff]   ;;  %v3357_v25 = vld [vmem:[%s3776_s0 + $0x10] sm:$0xff] }
  0x57   :  { %1732 = vmatpush1.bf16.msra.mxu0 %v2630_v29  ;;  %1944 = vmatpush1.bf16.msra.mxu1 %v2633_v30  ;;  %v2711_v29 = vld [vmem:[%s3775_s1 + $0x448] ss:$16 sps:$4 sm:$0xff]   ;;  %v2716_v30 = vld [vmem:[%s3775_s1 + $0x464] ss:$16 sps:$4 sm:$0xff]  }
  0x58   :  { %1733 = vmatprep.subr.bf16.mxu0 %v2638_v32  ;;  %1945 = vmatprep.subr.bf16.mxu1 %v2641_v33  ;;  %v2157_v32 = vcombine.high %v3357_v25, %v3362_v27  ;;  %v2714_v33 = vld [vmem:[%s3775_s1 + $0x460] ss:$16 sps:$4 sm:$0xff]  }
  0x5b   :  { %1734 = vmatpush1.bf16.msra.mxu0 %v2636_v36  ;;  %1946 = vmatpush1.bf16.msra.mxu1 %v2639_v37  ;;  %v2725_v36 = vld [vmem:[%s3775_s1 + $0x48c] ss:$16 sps:$4 sm:$0xff]   ;;  %v2720_v37 = vld [vmem:[%s3775_s1 + $0x480] ss:$16 sps:$4 sm:$0xff]  }
  0x5c   :  { %1735 = vmatprep.subr.bf16.mxu0 %v2644_v39  ;;  %1947 = vmatprep.subr.bf16.mxu1 %v2647_v40  ;;  %v2728_v39 = vld [vmem:[%s3775_s1 + $0x4a4] ss:$16 sps:$4 sm:$0xff]   ;;  %v2731_v40 = vld [vmem:[%s3775_s1 + $0x4ac] ss:$16 sps:$4 sm:$0xff]  }
  0x5f   :  { %1736 = vmatpush1.bf16.msra.mxu0 %v2642_v41  ;;  %1948 = vmatpush1.bf16.msra.mxu1 %v2645_v42  ;;  %v2726_v41 = vld [vmem:[%s3775_s1 + $0x4a0] ss:$16 sps:$4 sm:$0xff]   ;;  %v2729_v42 = vld [vmem:[%s3775_s1 + $0x4a8] ss:$16 sps:$4 sm:$0xff]  }
  0x60   :  { %1737 = vmatprep.subr.bf16.mxu0 %v2650_v43  ;;  %1949 = vmatprep.subr.bf16.mxu1 %v2653_v44  ;;  %v2734_v43 = vld [vmem:[%s3775_s1 + $0x4c4] ss:$16 sps:$4 sm:$0xff]   ;;  %v2737_v44 = vld [vmem:[%s3775_s1 + $0x4cc] ss:$16 sps:$4 sm:$0xff]  }
  0x63   :  { %1738 = vmatpush1.bf16.msra.mxu0 %v2648_v45  ;;  %1950 = vmatpush1.bf16.msra.mxu1 %v2651_v46  ;;  %v2732_v45 = vld [vmem:[%s3775_s1 + $0x4c0] ss:$16 sps:$4 sm:$0xff]   ;;  %v2735_v46 = vld [vmem:[%s3775_s1 + $0x4c8] ss:$16 sps:$4 sm:$0xff]  }
  0x64   :  { %1739 = vmatprep.subr.bf16.mxu0 %v2656_v47  ;;  %1951 = vmatprep.subr.bf16.mxu1 %v2659_v48  ;;  %v2740_v47 = vld [vmem:[%s3775_s1 + $0x4e4] ss:$16 sps:$4 sm:$0xff]   ;;  %v2743_v48 = vld [vmem:[%s3775_s1 + $0x4ec] ss:$16 sps:$4 sm:$0xff]  }
  0x67   :  { %1740 = vmatpush1.bf16.msra.mxu0 %v2654_v49  ;;  %1952 = vmatpush1.bf16.msra.mxu1 %v2657_v50  ;;  %v2738_v49 = vld [vmem:[%s3775_s1 + $0x4e0] ss:$16 sps:$4 sm:$0xff]   ;;  %v2741_v50 = vld [vmem:[%s3775_s1 + $0x4e8] ss:$16 sps:$4 sm:$0xff]  }
  0x68   :  { %1741 = vmatprep.subr.bf16.mxu0 %v2662_v51  ;;  %1953 = vmatprep.subr.bf16.mxu1 %v2665_v52  ;;  %v2746_v51 = vld [vmem:[%s3775_s1 + $0x504] ss:$16 sps:$4 sm:$0xff]   ;;  %v2749_v52 = vld [vmem:[%s3775_s1 + $0x50c] ss:$16 sps:$4 sm:$0xff]  }
  0x6b   :  { %1742 = vmatpush1.bf16.msra.mxu0 %v2660_v53  ;;  %1954 = vmatpush1.bf16.msra.mxu1 %v2663_v54  ;;  %v2744_v53 = vld [vmem:[%s3775_s1 + $0x500] ss:$16 sps:$4 sm:$0xff]   ;;  %v2747_v54 = vld [vmem:[%s3775_s1 + $0x508] ss:$16 sps:$4 sm:$0xff]  }
  0x6c   :  { %1743 = vmatprep.subr.bf16.mxu0 %v2668_v55  ;;  %1955 = vmatprep.subr.bf16.mxu1 %v2671_v56  ;;  %v2752_v55 = vld [vmem:[%s3775_s1 + $0x524] ss:$16 sps:$4 sm:$0xff]   ;;  %v2755_v56 = vld [vmem:[%s3775_s1 + $0x52c] ss:$16 sps:$4 sm:$0xff]  }
  0x6f   :  { %1744 = vmatpush1.bf16.msra.mxu0 %v2666_v57  ;;  %1956 = vmatpush1.bf16.msra.mxu1 %v2669_v58  ;;  %v2750_v57 = vld [vmem:[%s3775_s1 + $0x520] ss:$16 sps:$4 sm:$0xff]   ;;  %v2753_v58 = vld [vmem:[%s3775_s1 + $0x528] ss:$16 sps:$4 sm:$0xff]  }
  0x70   :  { %1745 = vmatprep.subr.bf16.mxu0 %v2674_v59  ;;  %1957 = vmatprep.subr.bf16.mxu1 %v2677_v60  ;;  %v2758_v59 = vld [vmem:[%s3775_s1 + $0x544] ss:$16 sps:$4 sm:$0xff]   ;;  %v2761_v60 = vld [vmem:[%s3775_s1 + $0x54c] ss:$16 sps:$4 sm:$0xff]  }
  0x73   :  { %1746 = vmatpush1.bf16.msra.mxu0 %v2672_v61  ;;  %1958 = vmatpush1.bf16.msra.mxu1 %v2675_v62  ;;  %v2756_v61 = vld [vmem:[%s3775_s1 + $0x540] ss:$16 sps:$4 sm:$0xff]   ;;  %v2759_v62 = vld [vmem:[%s3775_s1 + $0x548] ss:$16 sps:$4 sm:$0xff]  }
  0x74   :  { %1747 = vmatprep.subr.bf16.mxu0 %v2680_v63  ;;  %1959 = vmatprep.subr.bf16.mxu1 %v2683_v0  ;;  %v2764_v63 = vld [vmem:[%s3775_s1 + $0x564] ss:$16 sps:$4 sm:$0xff]   ;;  %v2767_v0 = vld [vmem:[%s3775_s1 + $0x56c] ss:$16 sps:$4 sm:$0xff]  }
  0x77   :  { %1748 = vmatpush1.bf16.msra.mxu0 %v2678_v1  ;;  %1960 = vmatpush1.bf16.msra.mxu1 %v2681_v2  ;;  %v2762_v1 = vld [vmem:[%s3775_s1 + $0x560] ss:$16 sps:$4 sm:$0xff]   ;;  %v2765_v2 = vld [vmem:[%s3775_s1 + $0x568] ss:$16 sps:$4 sm:$0xff]  }
  0x78   :  { %1749 = vmatprep.subr.bf16.mxu0 %v2686_v3  ;;  %1961 = vmatprep.subr.bf16.mxu1 %v2689_v4  ;;  %v2770_v3 = vld [vmem:[%s3775_s1 + $0x584] ss:$16 sps:$4 sm:$0xff]   ;;  %v2773_v4 = vld [vmem:[%s3775_s1 + $0x58c] ss:$16 sps:$4 sm:$0xff]  }
  0x7b   :  { %1750 = vmatpush1.bf16.msra.mxu0 %v2684_v5  ;;  %1962 = vmatpush1.bf16.msra.mxu1 %v2687_v6  ;;  %v2768_v5 = vld [vmem:[%s3775_s1 + $0x580] ss:$16 sps:$4 sm:$0xff]   ;;  %v2771_v6 = vld [vmem:[%s3775_s1 + $0x588] ss:$16 sps:$4 sm:$0xff]  }
  0x7c   :  { %1751 = vmatprep.subr.bf16.mxu0 %v2692_v7  ;;  %1963 = vmatprep.subr.bf16.mxu1 %v2695_v8  ;;  %v2776_v7 = vld [vmem:[%s3775_s1 + $0x5a4] ss:$16 sps:$4 sm:$0xff]   ;;  %v2779_v8 = vld [vmem:[%s3775_s1 + $0x5ac] ss:$16 sps:$4 sm:$0xff]  }
  0x7f   :  { %1752 = vmatpush1.bf16.msra.mxu0 %v2690_v9  ;;  %1964 = vmatpush1.bf16.msra.mxu1 %v2693_v10  ;;  %v2774_v9 = vld [vmem:[%s3775_s1 + $0x5a0] ss:$16 sps:$4 sm:$0xff]   ;;  %v2777_v10 = vld [vmem:[%s3775_s1 + $0x5a8] ss:$16 sps:$4 sm:$0xff]  }
  0x80   :  { %1774 = vmatprep.subr.bf16.mxu0 %v2698_v11  ;;  %1986 = vmatprep.subr.bf16.mxu1 %v2701_v12  ;;  %v2782_v11 = vld [vmem:[%s3775_s1 + $0x5c4] ss:$16 sps:$4 sm:$0xff]   ;;  %v2785_v12 = vld [vmem:[%s3775_s1 + $0x5cc] ss:$16 sps:$4 sm:$0xff]  }
  0x82   :  { %1754 = vmatmul.mubr.bf16.vlgmr.msra.gmra.mrb[0].mxu0 %v2154_v15  ;;  %1966 = vmatmul.mubr.bf16.vlgmr.msra.gmra.mrb[0].mxu1 %v2154_v15  ;;  %v2788_v15 = vld [vmem:[%s3775_s1 + $0x5e4] ss:$16 sps:$4 sm:$0xff]  }
  0x83   :  { %1775 = vmatpush1.bf16.msra.mxu0 %v2696_v13  ;;  %1987 = vmatpush1.bf16.msra.mxu1 %v2699_v14  ;;  %v2780_v13 = vld [vmem:[%s3775_s1 + $0x5c0] ss:$16 sps:$4 sm:$0xff]   ;;  %v2783_v14 = vld [vmem:[%s3775_s1 + $0x5c8] ss:$16 sps:$4 sm:$0xff]  }
  0x84   :  { %1776 = vmatprep.subr.bf16.mxu0 %v2704_v18  ;;  %1988 = vmatprep.subr.bf16.mxu1 %v2707_v19  ;;  %v2789_v18 = vld [vmem:[%s3775_s1 + $0x5e8] ss:$16 sps:$4 sm:$0xff]   ;;  %v2794_v19 = vld [vmem:[%s3775_s1 + $0x604] ss:$16 sps:$4 sm:$0xff]  }
  0x85   :  { %1763 = vmatprep.mubr.bf16.mxu0 %v2163_v20  ;;  %1975 = vmatprep.mubr.bf16.mxu1 %v2163_v20  ;;  %v2797_v20 = vld [vmem:[%s3775_s1 + $0x60c] ss:$16 sps:$4 sm:$0xff]  }
  0x87   :  { %1777 = vmatpush1.bf16.msra.mxu0 %v2702_v21  ;;  %1989 = vmatpush1.bf16.msra.mxu1 %v2705_v22  ;;  %v2156_v21 = vcombine.low %v3357_v25, %v3362_v27  ;;  %v24_v22 = vld [vmem:[%s3776_s0 + $0x50] sm:$0xff]  ;;  %v2803_v27 = vld [vmem:[%s3775_s1 + $0x62c] ss:$16 sps:$4 sm:$0xff]  }
  0x88   :  { %1778 = vmatprep.subr.bf16.mxu0 %v2710_v23  ;;  %1990 = vmatprep.subr.bf16.mxu1 %v2713_v24  ;;  %v28_v23 = vld [vmem:[%s3776_s0 + $0x70] sm:$0xff] }
  0x89   :  { %v2792_v24 = vld [vmem:[%s3775_s1 + $0x600] ss:$16 sps:$4 sm:$0xff]   ;;  %v2800_v25 = vld [vmem:[%s3775_s1 + $0x624] ss:$16 sps:$4 sm:$0xff]  }
  0x8a   :  { %1764 = vmatmul.mubr.bf16.gmra.mrb[4].mxu0 %v2162_v26  ;;  %1976 = vmatmul.mubr.bf16.gmra.mrb[4].mxu1 %v2162_v26  ;;  %v2795_v26 = vld [vmem:[%s3775_s1 + $0x608] ss:$16 sps:$4 sm:$0xff]  }
  0x8b   :  { %1779 = vmatpush1.bf16.msra.mxu0 %v2708_v28  ;;  %1991 = vmatpush1.bf16.msra.mxu1 %v2711_v29  ;;  %v2165_v28 = vcombine.high %v24_v22, %v28_v23  ;;  %v2798_v29 = vld [vmem:[%s3775_s1 + $0x620] ss:$16 sps:$4 sm:$0xff]  }
  0x8c   :  { %1780 = vmatprep.subr.bf16.mxu0 %v2716_v30  ;;  %1992 = vmatprep.subr.bf16.mxu1 %v2719_v31  ;;  %v2801_v30 = vld [vmem:[%s3775_s1 + $0x628] ss:$16 sps:$4 sm:$0xff]   ;;  %v2806_v31 = vld [vmem:[%s3775_s1 + $0x644] ss:$16 sps:$4 sm:$0xff]  }
  0x8d   :  { %1806 = vmatprep.mubr.bf16.mxu0 %v2157_v32  ;;  %2018 = vmatprep.mubr.bf16.mxu1 %v2157_v32  ;;  %v2809_v32 = vld [vmem:[%s3775_s1 + $0x64c] ss:$16 sps:$4 sm:$0xff]  }
  0x8f   :  { %1781 = vmatpush1.bf16.msra.mxu0 %v2714_v33  ;;  %1993 = vmatpush1.bf16.msra.mxu1 %v2717_v34  ;;  %v2164_v33 = vcombine.low %v24_v22, %v28_v23  ;;  %v3569_v34 = vld [vmem:[%s3776_s0 + $0x18] sm:$0xff]  ;;  %v2884_v23 = vld [vmem:[%s3775_s1 + $0x7e4] ss:$16 sps:$4 sm:$0xff]  }
  0x90   :  { %1782 = vmatprep.subr.bf16.mxu0 %v2722_v35  ;;  %1994 = vmatprep.subr.bf16.mxu1 %v2725_v36  ;;  %v3574_v35 = vld [vmem:[%s3776_s0 + $0x38] sm:$0xff]  ;;  %v2804_v36 = vld [vmem:[%s3775_s1 + $0x640] ss:$16 sps:$4 sm:$0xff]  }
  0x91   :  { %v2879_v22 = vld [vmem:[%s3775_s1 + $0x7c8] ss:$16 sps:$4 sm:$0xff]  }
  0x93   :  { %1783 = vmatpush1.bf16.msra.mxu0 %v2720_v37  ;;  %1995 = vmatpush1.bf16.msra.mxu1 %v2723_v38  ;;  %v2807_v37 = vld [vmem:[%s3775_s1 + $0x648] ss:$16 sps:$4 sm:$0xff]   ;;  %v2812_v38 = vld [vmem:[%s3775_s1 + $0x664] ss:$16 sps:$4 sm:$0xff]  }
  0x94   :  { %1784 = vmatprep.subr.bf16.mxu0 %v2728_v39  ;;  %1996 = vmatprep.subr.bf16.mxu1 %v2731_v40  ;;  %v2815_v39 = vld [vmem:[%s3775_s1 + $0x66c] ss:$16 sps:$4 sm:$0xff]   ;;  %v2159_v40 = vcombine.high %v3569_v34, %v3574_v35 }
  0x97   :  { %1785 = vmatpush1.bf16.msra.mxu0 %v2726_v41  ;;  %1997 = vmatpush1.bf16.msra.mxu1 %v2729_v42  ;;  %v2810_v41 = vld [vmem:[%s3775_s1 + $0x660] ss:$16 sps:$4 sm:$0xff]   ;;  %v2813_v42 = vld [vmem:[%s3775_s1 + $0x668] ss:$16 sps:$4 sm:$0xff]  }
  0x98   :  { %1786 = vmatprep.subr.bf16.mxu0 %v2734_v43  ;;  %1998 = vmatprep.subr.bf16.mxu1 %v2737_v44  ;;  %v2818_v43 = vld [vmem:[%s3775_s1 + $0x684] ss:$16 sps:$4 sm:$0xff]   ;;  %v2821_v44 = vld [vmem:[%s3775_s1 + $0x68c] ss:$16 sps:$4 sm:$0xff]  }
  0x9b   :  { %1787 = vmatpush1.bf16.msra.mxu0 %v2732_v45  ;;  %1999 = vmatpush1.bf16.msra.mxu1 %v2735_v46  ;;  %v2816_v45 = vld [vmem:[%s3775_s1 + $0x680] ss:$16 sps:$4 sm:$0xff]   ;;  %v2819_v46 = vld [vmem:[%s3775_s1 + $0x688] ss:$16 sps:$4 sm:$0xff]  }
  0x9c   :  { %1788 = vmatprep.subr.bf16.mxu0 %v2740_v47  ;;  %2000 = vmatprep.subr.bf16.mxu1 %v2743_v48  ;;  %v2824_v47 = vld [vmem:[%s3775_s1 + $0x6a4] ss:$16 sps:$4 sm:$0xff]   ;;  %v2827_v48 = vld [vmem:[%s3775_s1 + $0x6ac] ss:$16 sps:$4 sm:$0xff]  }
  0x9f   :  { %1789 = vmatpush1.bf16.msra.mxu0 %v2738_v49  ;;  %2001 = vmatpush1.bf16.msra.mxu1 %v2741_v50  ;;  %v2822_v49 = vld [vmem:[%s3775_s1 + $0x6a0] ss:$16 sps:$4 sm:$0xff]   ;;  %v2825_v50 = vld [vmem:[%s3775_s1 + $0x6a8] ss:$16 sps:$4 sm:$0xff]  }
  0xa0   :  { %1790 = vmatprep.subr.bf16.mxu0 %v2746_v51  ;;  %2002 = vmatprep.subr.bf16.mxu1 %v2749_v52  ;;  %v2830_v51 = vld [vmem:[%s3775_s1 + $0x6c4] ss:$16 sps:$4 sm:$0xff]   ;;  %v2833_v52 = vld [vmem:[%s3775_s1 + $0x6cc] ss:$16 sps:$4 sm:$0xff]  }
  0xa3   :  { %1791 = vmatpush1.bf16.msra.mxu0 %v2744_v53  ;;  %2003 = vmatpush1.bf16.msra.mxu1 %v2747_v54  ;;  %v2828_v53 = vld [vmem:[%s3775_s1 + $0x6c0] ss:$16 sps:$4 sm:$0xff]   ;;  %v2831_v54 = vld [vmem:[%s3775_s1 + $0x6c8] ss:$16 sps:$4 sm:$0xff]  }
  0xa4   :  { %1792 = vmatprep.subr.bf16.mxu0 %v2752_v55  ;;  %2004 = vmatprep.subr.bf16.mxu1 %v2755_v56  ;;  %v2836_v55 = vld [vmem:[%s3775_s1 + $0x6e4] ss:$16 sps:$4 sm:$0xff]   ;;  %v2839_v56 = vld [vmem:[%s3775_s1 + $0x6ec] ss:$16 sps:$4 sm:$0xff]  }
  0xa7   :  { %1793 = vmatpush1.bf16.msra.mxu0 %v2750_v57  ;;  %2005 = vmatpush1.bf16.msra.mxu1 %v2753_v58  ;;  %v2834_v57 = vld [vmem:[%s3775_s1 + $0x6e0] ss:$16 sps:$4 sm:$0xff]   ;;  %v2837_v58 = vld [vmem:[%s3775_s1 + $0x6e8] ss:$16 sps:$4 sm:$0xff]  }
  0xa8   :  { %1794 = vmatprep.subr.bf16.mxu0 %v2758_v59  ;;  %2006 = vmatprep.subr.bf16.mxu1 %v2761_v60  ;;  %v2842_v59 = vld [vmem:[%s3775_s1 + $0x704] ss:$16 sps:$4 sm:$0xff]   ;;  %v2845_v60 = vld [vmem:[%s3775_s1 + $0x70c] ss:$16 sps:$4 sm:$0xff]  }
  0xab   :  { %1795 = vmatpush1.bf16.msra.mxu0 %v2756_v61  ;;  %2007 = vmatpush1.bf16.msra.mxu1 %v2759_v62  ;;  %v2840_v61 = vld [vmem:[%s3775_s1 + $0x700] ss:$16 sps:$4 sm:$0xff]   ;;  %v2843_v62 = vld [vmem:[%s3775_s1 + $0x708] ss:$16 sps:$4 sm:$0xff]  }
  0xac   :  { %1796 = vmatprep.subr.bf16.mxu0 %v2764_v63  ;;  %2008 = vmatprep.subr.bf16.mxu1 %v2767_v0  ;;  %v2848_v63 = vld [vmem:[%s3775_s1 + $0x724] ss:$16 sps:$4 sm:$0xff]   ;;  %v2851_v0 = vld [vmem:[%s3775_s1 + $0x72c] ss:$16 sps:$4 sm:$0xff]  }
  0xaf   :  { %1797 = vmatpush1.bf16.msra.mxu0 %v2762_v1  ;;  %2009 = vmatpush1.bf16.msra.mxu1 %v2765_v2  ;;  %v2846_v1 = vld [vmem:[%s3775_s1 + $0x720] ss:$16 sps:$4 sm:$0xff]   ;;  %v2849_v2 = vld [vmem:[%s3775_s1 + $0x728] ss:$16 sps:$4 sm:$0xff]  }
  0xb0   :  { %1798 = vmatprep.subr.bf16.mxu0 %v2770_v3  ;;  %2010 = vmatprep.subr.bf16.mxu1 %v2773_v4  ;;  %v2854_v3 = vld [vmem:[%s3775_s1 + $0x744] ss:$16 sps:$4 sm:$0xff]   ;;  %v2857_v4 = vld [vmem:[%s3775_s1 + $0x74c] ss:$16 sps:$4 sm:$0xff]  }
  0xb3   :  { %1799 = vmatpush1.bf16.msra.mxu0 %v2768_v5  ;;  %2011 = vmatpush1.bf16.msra.mxu1 %v2771_v6  ;;  %v2852_v5 = vld [vmem:[%s3775_s1 + $0x740] ss:$16 sps:$4 sm:$0xff]   ;;  %v2855_v6 = vld [vmem:[%s3775_s1 + $0x748] ss:$16 sps:$4 sm:$0xff]  }
  0xb4   :  { %1800 = vmatprep.subr.bf16.mxu0 %v2776_v7  ;;  %2012 = vmatprep.subr.bf16.mxu1 %v2779_v8  ;;  %v2860_v7 = vld [vmem:[%s3775_s1 + $0x764] ss:$16 sps:$4 sm:$0xff]   ;;  %v2863_v8 = vld [vmem:[%s3775_s1 + $0x76c] ss:$16 sps:$4 sm:$0xff]  }
  0xb7   :  { %1801 = vmatpush1.bf16.msra.mxu0 %v2774_v9  ;;  %2013 = vmatpush1.bf16.msra.mxu1 %v2777_v10  ;;  %v2858_v9 = vld [vmem:[%s3775_s1 + $0x760] ss:$16 sps:$4 sm:$0xff]   ;;  %v2861_v10 = vld [vmem:[%s3775_s1 + $0x768] ss:$16 sps:$4 sm:$0xff]  }
  0xb8   :  { %1802 = vmatprep.subr.bf16.mxu0 %v2782_v11  ;;  %2014 = vmatprep.subr.bf16.mxu1 %v2785_v12  ;;  %v2866_v11 = vld [vmem:[%s3775_s1 + $0x784] ss:$16 sps:$4 sm:$0xff]   ;;  %v2869_v12 = vld [vmem:[%s3775_s1 + $0x78c] ss:$16 sps:$4 sm:$0xff]  }
  0xbb   :  { %1803 = vmatpush1.bf16.msra.mxu0 %v2780_v13  ;;  %2015 = vmatpush1.bf16.msra.mxu1 %v2783_v14  ;;  %v2864_v13 = vld [vmem:[%s3775_s1 + $0x780] ss:$16 sps:$4 sm:$0xff]   ;;  %v2867_v14 = vld [vmem:[%s3775_s1 + $0x788] ss:$16 sps:$4 sm:$0xff]  }
  0xbc   :  { %1804 = vmatprep.subr.bf16.mxu0 %v2788_v15  ;;  %2016 = vmatprep.subr.bf16.mxu1 %v2791_v16  ;;  %v2872_v15 = vld [vmem:[%s3775_s1 + $0x7a4] ss:$16 sps:$4 sm:$0xff]   ;;  %v2875_v16 = vld [vmem:[%s3775_s1 + $0x7ac] ss:$16 sps:$4 sm:$0xff]  }
  0xbf   :  { %1805 = vmatpush1.bf16.msra.mxu0 %v2786_v17  ;;  %2017 = vmatpush1.bf16.msra.mxu1 %v2789_v18  ;;  %v2870_v17 = vld [vmem:[%s3775_s1 + $0x7a0] ss:$16 sps:$4 sm:$0xff]   ;;  %v2873_v18 = vld [vmem:[%s3775_s1 + $0x7a8] ss:$16 sps:$4 sm:$0xff]  }
  0xc0   :  { %1827 = vmatprep.subr.bf16.mxu0 %v2794_v19  ;;  %2039 = vmatprep.subr.bf16.mxu1 %v2797_v20  ;;  %v2878_v19 = vld [vmem:[%s3775_s1 + $0x7c4] ss:$16 sps:$4 sm:$0xff]   ;;  %v2881_v20 = vld [vmem:[%s3775_s1 + $0x7cc] ss:$16 sps:$4 sm:$0xff]  }
  0xc2   :  { %1807 = vmatmul.mubr.bf16.vlgmr.msra.gmra.mrb[0].mxu0 %v2156_v21  ;;  %2019 = vmatmul.mubr.bf16.vlgmr.msra.gmra.mrb[0].mxu1 %v2156_v21  ;;  %v2876_v21 = vld [vmem:[%s3775_s1 + $0x7c0] ss:$16 sps:$4 sm:$0xff]  }
  0xc3   :  { %1828 = vmatpush1.bf16.msra.mxu0 %v2792_v24  ;;  %2040 = vmatpush1.bf16.msra.mxu1 %v2795_v26  ;;  %v2887_v24 = vld [vmem:[%s3775_s1 + $0x7ec] ss:$16 sps:$4 sm:$0xff]   ;;  %v2882_v26 = vld [vmem:[%s3775_s1 + $0x7e0] ss:$16 sps:$4 sm:$0xff]  }
  0xc4   :  { %1829 = vmatprep.subr.bf16.mxu0 %v2800_v25  ;;  %2041 = vmatprep.subr.bf16.mxu1 %v2803_v27  ;;  %v2885_v25 = vld [vmem:[%s3775_s1 + $0x7e8] ss:$16 sps:$4 sm:$0xff]  }
  0xc5   :  { %1816 = vmatprep.mubr.bf16.mxu0 %v2165_v28  ;;  %2028 = vmatprep.mubr.bf16.mxu1 %v2165_v28  ;;  %v25_v27 = vld [vmem:[%s3776_s0 + $0x58] sm:$0xff] }
  0xc6   :  { %v29_v28 = vld [vmem:[%s3776_s0 + $0x78] sm:$0xff] }
  0xc7   :  { %1830 = vmatpush1.bf16.msra.mxu0 %v2798_v29  ;;  %2042 = vmatpush1.bf16.msra.mxu1 %v2801_v30  ;;  %v2158_v29 = vcombine.low %v3569_v34, %v3574_v35  ;;  %v2167_v30 = vcombine.high %v25_v27, %v29_v28 }
  0xc8   :  { %1831 = vmatprep.subr.bf16.mxu0 %v2806_v31  ;;  %2043 = vmatprep.subr.bf16.mxu1 %v2809_v32  ;;  %v2166_v31 = vcombine.low %v25_v27, %v29_v28  ;;  %v288_v32 = vlaneseq }
  0xca   :  { %1817 = vmatmul.mubr.bf16.gmra.mrb[4].mxu0 %v2164_v33  ;;  %2029 = vmatmul.mubr.bf16.gmra.mrb[4].mxu1 %v2164_v33  ;;  %v289_v33 = vshrl.u32 %v288_v32, 7 }
  0xcb   :  { %1832 = vmatpush1.bf16.msra.mxu0 %v2804_v36  ;;  %2044 = vmatpush1.bf16.msra.mxu1 %v2807_v37 }
  0xcc   :  { %1833 = vmatprep.subr.bf16.mxu0 %v2812_v38  ;;  %2045 = vmatprep.subr.bf16.mxu1 %v2815_v39  ;;  %v290_v36 = vsub.s32 0, %v289_v33  ;;  %v298_v37 = vsub.s32 2, %v289_v33  ;;  %v286_v38 = vld [vmem:[%s3777_s2] sm:$0xf]  ;;  %v294_v39 = vsub.s32 1, %v289_v33  ;;  %v302_v34 = vsub.s32 3, %v289_v33 }
  0xcd   :  { %1859 = vmatprep.mubr.bf16.mxu0 %v2159_v40  ;;  %2071 = vmatprep.mubr.bf16.mxu1 %v2159_v40 }
  0xce   :  { %v291_v35 = vrot.slane %v286_v38, %v290_v36  ;;  %v299_v40 = vrot.slane %v286_v38, %v298_v37 }
  0xcf   :  { %1834 = vmatpush1.bf16.msra.mxu0 %v2810_v41  ;;  %2046 = vmatpush1.bf16.msra.mxu1 %v2813_v42  ;;  %v295_v41 = vrot.slane %v286_v38, %v294_v39  ;;  %v303_v42 = vrot.slane %v286_v38, %v302_v34 }
  0xd0   :  { %1835 = vmatprep.subr.bf16.mxu0 %v2818_v43  ;;  %2047 = vmatprep.subr.bf16.mxu1 %v2821_v44 }
  0xd3   :  { %1836 = vmatpush1.bf16.msra.mxu0 %v2816_v45  ;;  %2048 = vmatpush1.bf16.msra.mxu1 %v2819_v46 }
  0xd4   :  { %1837 = vmatprep.subr.bf16.mxu0 %v2824_v47  ;;  %2049 = vmatprep.subr.bf16.mxu1 %v2827_v48 }
  0xd7   :  { %1838 = vmatpush1.bf16.msra.mxu0 %v2822_v49  ;;  %2050 = vmatpush1.bf16.msra.mxu1 %v2825_v50 }
  0xd8   :  { %1839 = vmatprep.subr.bf16.mxu0 %v2830_v51  ;;  %2051 = vmatprep.subr.bf16.mxu1 %v2833_v52 }
  0xdb   :  { %1840 = vmatpush1.bf16.msra.mxu0 %v2828_v53  ;;  %2052 = vmatpush1.bf16.msra.mxu1 %v2831_v54 }
  0xdc   :  { %1841 = vmatprep.subr.bf16.mxu0 %v2836_v55  ;;  %2053 = vmatprep.subr.bf16.mxu1 %v2839_v56 }
  0xdf   :  { %1842 = vmatpush1.bf16.msra.mxu0 %v2834_v57  ;;  %2054 = vmatpush1.bf16.msra.mxu1 %v2837_v58 }
  0xe0   :  { %1843 = vmatprep.subr.bf16.mxu0 %v2842_v59  ;;  %2055 = vmatprep.subr.bf16.mxu1 %v2845_v60 }
  0xe3   :  { %1844 = vmatpush1.bf16.msra.mxu0 %v2840_v61  ;;  %2056 = vmatpush1.bf16.msra.mxu1 %v2843_v62 }
  0xe4   :  { %1845 = vmatprep.subr.bf16.mxu0 %v2848_v63  ;;  %2057 = vmatprep.subr.bf16.mxu1 %v2851_v0 }
  0xe7   :  { %1846 = vmatpush1.bf16.msra.mxu0 %v2846_v1  ;;  %2058 = vmatpush1.bf16.msra.mxu1 %v2849_v2 }
  0xe8   :  { %1847 = vmatprep.subr.bf16.mxu0 %v2854_v3  ;;  %2059 = vmatprep.subr.bf16.mxu1 %v2857_v4 }
  0xeb   :  { %1848 = vmatpush1.bf16.msra.mxu0 %v2852_v5  ;;  %2060 = vmatpush1.bf16.msra.mxu1 %v2855_v6 }
  0xec   :  { %1849 = vmatprep.subr.bf16.mxu0 %v2860_v7  ;;  %2061 = vmatprep.subr.bf16.mxu1 %v2863_v8 }
  0xef   :  { %1850 = vmatpush1.bf16.msra.mxu0 %v2858_v9  ;;  %2062 = vmatpush1.bf16.msra.mxu1 %v2861_v10 }
  0xf0   :  { %1851 = vmatprep.subr.bf16.mxu0 %v2866_v11  ;;  %2063 = vmatprep.subr.bf16.mxu1 %v2869_v12 }
  0xf3   :  { %1852 = vmatpush1.bf16.msra.mxu0 %v2864_v13  ;;  %2064 = vmatpush1.bf16.msra.mxu1 %v2867_v14 }
  0xf4   :  { %1853 = vmatprep.subr.bf16.mxu0 %v2872_v15  ;;  %2065 = vmatprep.subr.bf16.mxu1 %v2875_v16 }
  0xf7   :  { %1854 = vmatpush1.bf16.msra.mxu0 %v2870_v17  ;;  %2066 = vmatpush1.bf16.msra.mxu1 %v2873_v18 }
  0xf8   :  { %1855 = vmatprep.subr.bf16.mxu0 %v2878_v19  ;;  %2067 = vmatprep.subr.bf16.mxu1 %v2881_v20 }
  0xfb   :  { %1856 = vmatpush1.bf16.msra.mxu0 %v2876_v21  ;;  %2068 = vmatpush1.bf16.msra.mxu1 %v2879_v22 }
  0xfc   :  { %1857 = vmatprep.subr.bf16.mxu0 %v2884_v23  ;;  %2069 = vmatprep.subr.bf16.mxu1 %v2887_v24 }
  0xff   :  { %1858 = vmatpush1.bf16.msra.mxu0 %v2882_v26  ;;  %2070 = vmatpush1.bf16.msra.mxu1 %v2885_v25 }
 0x102   :  { %1860 = vmatmul.mubr.bf16.vlgmr.msra.gmra.mrb[0].mxu0 %v2158_v29  ;;  %2072 = vmatmul.mubr.bf16.vlgmr.msra.gmra.mrb[0].mxu1 %v2158_v29 }
 0x103   :  { %1869 = vmatprep.mubr.bf16.mxu0 %v2167_v30  ;;  %2081 = vmatprep.mubr.bf16.mxu1 %v2167_v30 }
 0x10a   :  { %1870 = vmatmul.mubr.bf16.gmra.mrb[4].mxu0 %v2166_v31  ;;  %2082 = vmatmul.mubr.bf16.gmra.mrb[4].mxu1 %v2166_v31 }
 0x1d5   :  { %v1861_v43 = vpop.f32.mrb[0].mxu0  ;;  %v2073_v44 = vpop.f32.mrb[0].mxu1 }
 0x1d6   :  { %v2440_v45 = vadd.f32 %v1861_v43, %v291_v35  ;;  %v2448_v46 = vadd.f32 %v2073_v44, %v299_v40  ;;  %v1863_v47 = vpop.f32.mrb[1].mxu0  ;;  %v2075_v48 = vpop.f32.mrb[1].mxu1 }
 0x1d7   :  { %v2441_v49 = vadd.f32 %v1863_v47, %v295_v41  ;;  %v2449_v50 = vadd.f32 %v2075_v48, %v303_v42  ;;  %v1865_v51 = vpop.f32.mrb[2].mxu0  ;;  %v2077_v52 = vpop.f32.mrb[2].mxu1 }
 0x1d8   :  { %v2442_v53 = vadd.f32 %v1865_v51, %v291_v35  ;;  %v2450_v54 = vadd.f32 %v2077_v52, %v299_v40  ;;  %v1867_v55 = vpop.f32.mrb[3].mxu0  ;;  %v2079_v56 = vpop.f32.mrb[3].mxu1 }
 0x1d9   :  { %v2432_v57 = vpack.c.bf16 %v2441_v49, %v2440_v45  ;;  %v2433_v58 = vpack.c.bf16 %v2449_v50, %v2448_v46  ;;  %v2443_v59 = vadd.f32 %v1867_v55, %v295_v41  ;;  %v2451_v60 = vadd.f32 %v2079_v56, %v303_v42 }
 0x1db   :  { %2140 = vst [vmem:[%s3778_s3] sm:$0xff] %v2432_v57  ;;  %2141 = vst [vmem:[%s3778_s3 + $0x8] sm:$0xff] %v2433_v58  ;;  %v2434_v61 = vpack.c.bf16 %v2443_v59, %v2442_v53  ;;  %v2435_v62 = vpack.c.bf16 %v2451_v60, %v2450_v54 }
 0x1dd   :  { %2142 = vst [vmem:[%s3778_s3 + $0x10] sm:$0xff] %v2434_v61  ;;  %2143 = vst [vmem:[%s3778_s3 + $0x18] sm:$0xff] %v2435_v62  ;;  %v1871_v63 = vpop.f32.mrb[4].mxu0  ;;  %v2083_v0 = vpop.f32.mrb[4].mxu1 }
 0x1de   :  { %v2444_v1 = vadd.f32 %v1871_v63, %v291_v35  ;;  %v2452_v2 = vadd.f32 %v2083_v0, %v299_v40  ;;  %v1873_v3 = vpop.f32.mrb[5].mxu0  ;;  %v2085_v4 = vpop.f32.mrb[5].mxu1 }
 0x1df   :  { %v2445_v5 = vadd.f32 %v1873_v3, %v295_v41  ;;  %v2453_v6 = vadd.f32 %v2085_v4, %v303_v42  ;;  %v1875_v7 = vpop.f32.mrb[6].mxu0  ;;  %v2087_v8 = vpop.f32.mrb[6].mxu1 }
 0x1e0   :  { %v2446_v9 = vadd.f32 %v1875_v7, %v291_v35  ;;  %v2454_v10 = vadd.f32 %v2087_v8, %v299_v40  ;;  %v1877_v11 = vpop.f32.mrb[7].mxu0  ;;  %v2089_v12 = vpop.f32.mrb[7].mxu1 }
 0x1e1   :  { %v2436_v13 = vpack.c.bf16 %v2445_v5, %v2444_v1  ;;  %v2437_v14 = vpack.c.bf16 %v2453_v6, %v2452_v2  ;;  %v2447_v15 = vadd.f32 %v1877_v11, %v295_v41  ;;  %v2455_v16 = vadd.f32 %v2089_v12, %v303_v42 }
 0x1e3   :  { %2144 = vst [vmem:[%s3778_s3 + $0x20] sm:$0xff] %v2436_v13  ;;  %2145 = vst [vmem:[%s3778_s3 + $0x28] sm:$0xff] %v2437_v14  ;;  %v2438_v17 = vpack.c.bf16 %v2447_v15, %v2446_v9  ;;  %v2439_v18 = vpack.c.bf16 %v2455_v16, %v2454_v10 }
 0x1e5   :  { %2146 = vst [vmem:[%s3778_s3 + $0x30] sm:$0xff] %v2438_v17  ;;  %2147 = vst [vmem:[%s3778_s3 + $0x38] sm:$0xff] %v2439_v18 }

// kernel: backbone_with_fpn_forward.18
= control target key start
LH: loop header
LB: loop body
LE: loop exit
PB: predicated region body
PF: predicated region fallthrough
CT: control target
= control target key end

     0   :  { %s792_s1 = inlined_call_operand.vmem [shape: bf16[512,128], index: 1, kind: input, shape index: {}]   ;;  %s793_s0 = inlined_call_operand.vmem [shape: bf16[32,512], index: 0, kind: input, shape index: {}]   ;;  %s794_s2 = inlined_call_operand.vmem [shape: f32[1,128], index: 2, kind: input, shape index: {}]   ;;  %s795_s3 = inlined_call_operand.vmem [shape: bf16[32,128], index: 3, kind: input, shape index: {}]   ;;  %s796_s4 = inlined_call_operand.vmem [shape: bf16[32,128], index: 4, kind: output, shape index: {}]  }
   0x1   :  { %v588_v0 = vld [vmem:[%s792_s1 + $0x40] sm:$0xff]   ;;  %v592_v4 = vld [vmem:[%s792_s1 + $0x48] sm:$0xff]   ;;  %v596_v8 = vld [vmem:[%s792_s1 + $0x50] sm:$0xff]  }
   0x2   :  { %v589_v1 = vld [vmem:[%s792_s1 + $0xc0] sm:$0xff]   ;;  %532 = vmatprep.subr.bf16.mxu0 %v588_v0  ;;  %v593_v5 = vld [vmem:[%s792_s1 + $0xc8] sm:$0xff]   ;;  %v597_v9 = vld [vmem:[%s792_s1 + $0xd0] sm:$0xff]  }
   0x3   :  { %v590_v2 = vld [vmem:[%s792_s1] sm:$0xff]   ;;  %560 = vmatprep.subr.bf16.mxu1 %v589_v1  ;;  %v594_v6 = vld [vmem:[%s792_s1 + $0x8] sm:$0xff]   ;;  %v598_v10 = vld [vmem:[%s792_s1 + $0x10] sm:$0xff]  }
   0x4   :  { %v591_v3 = vld [vmem:[%s792_s1 + $0x80] sm:$0xff]   ;;  %533 = vmatpush3.bf16.msra.mxu0 %v590_v2  ;;  %v595_v7 = vld [vmem:[%s792_s1 + $0x88] sm:$0xff]   ;;  %v599_v11 = vld [vmem:[%s792_s1 + $0x90] sm:$0xff]  }
   0x5   :  { %561 = vmatpush3.bf16.msra.mxu1 %v591_v3  ;;  %534 = vmatprep.subr.bf16.mxu0 %v592_v4  ;;  %v600_v12 = vld [vmem:[%s792_s1 + $0x58] sm:$0xff]   ;;  %v604_v16 = vld [vmem:[%s792_s1 + $0x60] sm:$0xff]   ;;  %v608_v20 = vld [vmem:[%s792_s1 + $0x68] sm:$0xff]  }
   0x6   :  { %562 = vmatprep.subr.bf16.mxu1 %v593_v5  ;;  %v601_v13 = vld [vmem:[%s792_s1 + $0xd8] sm:$0xff]   ;;  %v605_v17 = vld [vmem:[%s792_s1 + $0xe0] sm:$0xff]   ;;  %v609_v21 = vld [vmem:[%s792_s1 + $0xe8] sm:$0xff]  }
   0x7   :  { %v602_v14 = vld [vmem:[%s792_s1 + $0x18] sm:$0xff]   ;;  %v606_v18 = vld [vmem:[%s792_s1 + $0x20] sm:$0xff]   ;;  %v610_v22 = vld [vmem:[%s792_s1 + $0x28] sm:$0xff]  }
   0x8   :  { %535 = vmatpush3.bf16.msra.mxu0 %v594_v6  ;;  %v603_v15 = vld [vmem:[%s792_s1 + $0x98] sm:$0xff]   ;;  %v607_v19 = vld [vmem:[%s792_s1 + $0xa0] sm:$0xff]   ;;  %v611_v23 = vld [vmem:[%s792_s1 + $0xa8] sm:$0xff]  }
   0x9   :  { %563 = vmatpush3.bf16.msra.mxu1 %v595_v7  ;;  %536 = vmatprep.subr.bf16.mxu0 %v596_v8  ;;  %v612_v24 = vld [vmem:[%s792_s1 + $0x70] sm:$0xff]   ;;  %v616_v28 = vld [vmem:[%s792_s1 + $0x78] sm:$0xff]   ;;  %v463_v42 = vld [vmem:[%s794_s2] ss:$0 sm:$0xff] }
   0xa   :  { %564 = vmatprep.subr.bf16.mxu1 %v597_v9  ;;  %v613_v25 = vld [vmem:[%s792_s1 + $0xf0] sm:$0xff]   ;;  %v617_v29 = vld [vmem:[%s792_s1 + $0xf8] sm:$0xff]   ;;  %v513_v48 = vld [vmem:[%s795_s3] sm:$0xff]  }
   0xb   :  { %v614_v26 = vld [vmem:[%s792_s1 + $0x30] sm:$0xff]   ;;  %v618_v30 = vld [vmem:[%s792_s1 + $0x38] sm:$0xff]   ;;  %v514_v56 = vunpack.c.l.bf16 %v513_v48  ;;  %v515_v58 = vunpack.c.h.bf16 %v513_v48  ;;  %v530_v5 = vld [vmem:[%s795_s3 + $0x8] sm:$0xff]  }
   0xc   :  { %537 = vmatpush3.bf16.msra.mxu0 %v598_v10  ;;  %v615_v27 = vld [vmem:[%s792_s1 + $0xb0] sm:$0xff]   ;;  %v619_v31 = vld [vmem:[%s792_s1 + $0xb8] sm:$0xff]  }
   0xd   :  { %565 = vmatpush3.bf16.msra.mxu1 %v599_v11  ;;  %538 = vmatprep.subr.bf16.mxu0 %v600_v12  ;;  %v620_v32 = vld [vmem:[%s793_s0] ss:$16 sps:$4 sm:$0xff]   ;;  %v622_v33 = vld [vmem:[%s793_s0 + $0x4] ss:$16 sps:$4 sm:$0xff]   ;;  %v623_v34 = vld [vmem:[%s793_s0 + $0x8] ss:$16 sps:$4 sm:$0xff]  }
   0xe   :  { %566 = vmatprep.subr.bf16.mxu1 %v601_v13  ;;  %v625_v35 = vld [vmem:[%s793_s0 + $0xc] ss:$16 sps:$4 sm:$0xff]   ;;  %361 = vmatprep.mubr.bf16.mxu0 %v622_v33  ;;  %v626_v36 = vld [vmem:[%s793_s0 + $0x24] ss:$16 sps:$4 sm:$0xff]   ;;  %v630_v38 = vld [vmem:[%s793_s0 + $0x20] ss:$16 sps:$4 sm:$0xff]  }
   0xf   :  { %410 = vmatprep.mubr.bf16.mxu1 %v625_v35  ;;  %v628_v37 = vld [vmem:[%s793_s0 + $0x2c] ss:$16 sps:$4 sm:$0xff]   ;;  %v631_v39 = vld [vmem:[%s793_s0 + $0x28] ss:$16 sps:$4 sm:$0xff]  }
  0x10   :  { %539 = vmatpush3.bf16.msra.mxu0 %v602_v14  ;;  %v518_v14 = vunpack.c.l.bf16 %v530_v5 }
  0x11   :  { %567 = vmatpush3.bf16.msra.mxu1 %v603_v15  ;;  %540 = vmatprep.subr.bf16.mxu0 %v604_v16  ;;  %v519_v16 = vunpack.c.h.bf16 %v530_v5 }
  0x12   :  { %568 = vmatprep.subr.bf16.mxu1 %v605_v17 }
  0x14   :  { %541 = vmatpush3.bf16.msra.mxu0 %v606_v18 }
  0x15   :  { %569 = vmatpush3.bf16.msra.mxu1 %v607_v19  ;;  %542 = vmatprep.subr.bf16.mxu0 %v608_v20 }
  0x16   :  { %570 = vmatprep.subr.bf16.mxu1 %v609_v21 }
  0x18   :  { %543 = vmatpush3.bf16.msra.mxu0 %v610_v22 }
  0x19   :  { %571 = vmatpush3.bf16.msra.mxu1 %v611_v23  ;;  %544 = vmatprep.subr.bf16.mxu0 %v612_v24 }
  0x1a   :  { %572 = vmatprep.subr.bf16.mxu1 %v613_v25 }
  0x1c   :  { %545 = vmatpush3.bf16.msra.mxu0 %v614_v26 }
  0x1d   :  { %573 = vmatpush3.bf16.msra.mxu1 %v615_v27  ;;  %546 = vmatprep.subr.bf16.mxu0 %v616_v28 }
  0x1e   :  { %574 = vmatprep.subr.bf16.mxu1 %v617_v29 }
  0x20   :  { %547 = vmatpush3.bf16.msra.mxu0 %v618_v30 }
  0x21   :  { %575 = vmatpush3.bf16.msra.mxu1 %v619_v31 }
  0x23   :  { %362 = vmatmul.mubr.bf16.vlgmr.msra.gmra.mrb[0].mxu0 %v620_v32 }
  0x24   :  { %411 = vmatmul.mubr.bf16.vlgmr.msra.gmra.mrb[0].mxu1 %v623_v34  ;;  %369 = vmatprep.mubr.bf16.mxu0 %v626_v36 }
  0x25   :  { %418 = vmatprep.mubr.bf16.mxu1 %v628_v37 }
  0x2b   :  { %370 = vmatmul.mubr.bf16.gmra.mrb[4].mxu0 %v630_v38 }
  0x2c   :  { %419 = vmatmul.mubr.bf16.gmra.mrb[4].mxu1 %v631_v39 }
  0xf6   :  { %v548_v40 = vpop.f32.mrb[0].mxu0 }
  0xf7   :  { %v576_v41 = vpop.f32.mrb[0].mxu1  ;;  %v549_v43 = vpop.f32.mrb[1].mxu0 }
  0xf8   :  { %v550_v44 = vadd.f32 %v549_v43, %v548_v40  ;;  %v577_v45 = vpop.f32.mrb[1].mxu1  ;;  %v551_v46 = vpop.f32.mrb[2].mxu0 }
  0xf9   :  { %v578_v47 = vadd.f32 %v577_v45, %v576_v41  ;;  %v579_v49 = vpop.f32.mrb[2].mxu1  ;;  %v552_v50 = vpop.f32.mrb[3].mxu0 }
  0xfa   :  { %v364_v51 = vadd.f32 %v550_v44, %v463_v42  ;;  %v553_v52 = vadd.f32 %v552_v50, %v551_v46  ;;  %v580_v53 = vpop.f32.mrb[3].mxu1 }
  0xfb   :  { %v581_v54 = vadd.f32 %v580_v53, %v579_v49 }
  0xfc   :  { %v413_v55 = vadd.f32 %v578_v47, %v364_v51  ;;  %v367_v57 = vadd.f32 %v553_v52, %v463_v42 }
  0xfe   :  { %v416_v59 = vadd.f32 %v581_v54, %v367_v57  ;;  %v554_v60 = vpop.f32.mrb[4].mxu0  ;;  %v435_v63 = vadd.f32 %v514_v56, %v413_v55 }
  0xff   :  { %v582_v61 = vpop.f32.mrb[4].mxu1  ;;  %v555_v62 = vpop.f32.mrb[5].mxu0 }
 0x100   :  { %v436_v0 = vadd.f32 %v515_v58, %v416_v59  ;;  %v556_v1 = vadd.f32 %v555_v62, %v554_v60  ;;  %v583_v2 = vpop.f32.mrb[5].mxu1  ;;  %v557_v3 = vpop.f32.mrb[6].mxu0 }
 0x101   :  { %v584_v4 = vadd.f32 %v583_v2, %v582_v61  ;;  %v585_v6 = vpop.f32.mrb[6].mxu1  ;;  %v558_v7 = vpop.f32.mrb[7].mxu0 }
 0x102   :  { %v523_v8 = vpack.c.bf16 %v436_v0, %v435_v63  ;;  %v372_v9 = vadd.f32 %v556_v1, %v463_v42  ;;  %v559_v10 = vadd.f32 %v558_v7, %v557_v3  ;;  %v586_v11 = vpop.f32.mrb[7].mxu1 }
 0x103   :  { %v587_v12 = vadd.f32 %v586_v11, %v585_v6 }
 0x104   :  { %524 = vst [vmem:[%s796_s4] sm:$0xff] %v523_v8   ;;  %v421_v13 = vadd.f32 %v584_v4, %v372_v9  ;;  %v375_v15 = vadd.f32 %v559_v10, %v463_v42 }
 0x106   :  { %v424_v17 = vadd.f32 %v587_v12, %v375_v15  ;;  %v437_v18 = vadd.f32 %v518_v14, %v421_v13 }
 0x108   :  { %v438_v19 = vadd.f32 %v519_v16, %v424_v17 }
 0x10a   :  { %v528_v20 = vpack.c.bf16 %v438_v19, %v437_v18 }
 0x10c   :  { %531 = vst [vmem:[%s796_s4 + $0x8] sm:$0xff] %v528_v20  }

// kernel: backbone_with_fpn_forward.17
= control target key start
LH: loop header
LB: loop body
LE: loop exit
PB: predicated region body
PF: predicated region fallthrough
CT: control target
= control target key end

     0   :  { %s1709_s12 = smov 0   ;;  %s1711_s13 = smov 0   ;;  %s2037_s0 = inlined_call_operand.vmem [shape: bf16[2,2,32,128], index: 0, kind: input, shape index: {}]   ;;  %s2038_s1 = inlined_call_operand.vmem [shape: bf16[3,384,128], index: 1, kind: input, shape index: {}]   ;;  %s2039_s2 = inlined_call_operand.vmem [shape: f32[1,128], index: 2, kind: input, shape index: {}]   ;;  %s2040_s3 = inlined_call_operand.vmem [shape: f32[2,2,8,128], index: 3, kind: output, shape index: {}]  }
   0x1   :  { %s1713_s14 = smov 0   ;;  %s1715_s15 = smov 0  }
   0x2   :  { %s1717_s16 = smov 0  }
   0x3 LB: > { %s22_s17 = sadd.s32 1, %s1677_s14  ;;  %s25_s18 = sadd.s32 1, %s1681_s15  ;;  %s1685_s16 = sphi %s1717_s16, %s13_s16   ;;  %s1681_s15 = sphi %s1715_s15, %s2044_s15   ;;  %s1677_s14 = sphi %s1713_s14, %s2043_s14   ;;  %s1673_s13 = sphi %s1711_s13, %s2042_s13   ;;  %s1669_s12 = sphi %s1709_s12, %s2041_s12  }
   0x4   : > { %p23_p0 = scmp.ge.s32.totalorder %s22_s17, 2  ;;  %p1191_p1 = scmp.ge.s32.totalorder %s1685_s16, 1 }
   0x5   : > { %p157_p2 = scmp.lt.s32.totalorder %s1685_s16, 5 }
   0x6   : > { %s2046_s17 = smov (%p23_p0, %s22_s17), 0  ;;  %s2048_s18 = smov (!%p23_p0, %s25_s18), %s1681_s15 }
   0x7   : > { %p158_p3 = pnand %p1191_p1, %p157_p2  ;;  %p27_p4 = scmp.ge.s32.totalorder %s2048_s18, 2 }
   0x8   : > { %v1569_v0 = vld [vmem:[%s2038_s1 + $0x100] sm:$0xff] (!%p158_p3)   ;;  %v1687_v1 = vmov (!%p158_p3), 0.0   ;;  %p188_p5 = scmp.lt.s32.totalorder (!%p158_p3), %s1673_s13, 1  ;;  %v1572_v4 = vld [vmem:[%s2038_s1 + $0x108] sm:$0xff] (!%p158_p3)   ;;  %p190_p6 = scmp.lt.s32.totalorder (!%p158_p3), %s1669_s12, 1  ;;  %v1575_v7 = vld [vmem:[%s2038_s1 + $0x110] sm:$0xff] (!%p158_p3)  }
   0x9   : > { %s2050_s18 = smov (%p27_p4, %s2048_s18), 0  ;;  %161 = sbr.rel (%p158_p3) target bundleno = 328 (0x148), region = 32 }
   0xa   : > { %1467 = vmatprep.subr.bf16.mxu1 (!%p158_p3), %v1687_v1  ;;  %v1570_v2 = vld [vmem:[%s2038_s1 + $0xc0] sm:$0xff] (!%p158_p3)   ;;  %1374 = vmatprep.subr.bf16.mxu0 (!%p158_p3), %v1569_v0  ;;  %v1573_v5 = vld [vmem:[%s2038_s1 + $0xc8] sm:$0xff] (!%p158_p3)   ;;  %v1576_v8 = vld [vmem:[%s2038_s1 + $0xd0] sm:$0xff] (!%p158_p3)   ;;  %vm1688_vm0 = vmmov (!%p158_p3), 0  }
   0xb   : > { %v1571_v3 = vld [vmem:[%s2038_s1 + $0x140] sm:$0xff] (!%p158_p3)   ;;  %1375 = vmatpush3.bf16.msra.mxu0 (!%p158_p3), %v1570_v2  ;;  %v1574_v6 = vld [vmem:[%s2038_s1 + $0x148] sm:$0xff] (!%p158_p3)   ;;  %v1577_v9 = vld [vmem:[%s2038_s1 + $0x150] sm:$0xff] (!%p158_p3)   ;;  %1483 = vmatprep.mubr.msk.bf16.mxu1 (!%p158_p3), %vm1688_vm0, %v1687_v1 }
   0xc   : > { %1468 = vmatpush3.bf16.msra.mxu1 (!%p158_p3), %v1571_v3  ;;  %1376 = vmatprep.subr.bf16.mxu0 (!%p158_p3), %v1572_v4  ;;  %v1578_v10 = vld [vmem:[%s2038_s1 + $0x118] sm:$0xff] (!%p158_p3)   ;;  %v1581_v13 = vld [vmem:[%s2038_s1 + $0x120] sm:$0xff] (!%p158_p3)   ;;  %v1584_v16 = vld [vmem:[%s2038_s1 + $0x128] sm:$0xff] (!%p158_p3)  }
   0xd   : > { %1469 = vmatprep.subr.bf16.mxu1 (!%p158_p3), %v1687_v1  ;;  %v1579_v11 = vld [vmem:[%s2038_s1 + $0xd8] sm:$0xff] (!%p158_p3)   ;;  %v1582_v14 = vld [vmem:[%s2038_s1 + $0xe0] sm:$0xff] (!%p158_p3)   ;;  %v1585_v17 = vld [vmem:[%s2038_s1 + $0xe8] sm:$0xff] (!%p158_p3)  }
   0xe   : > { %v1580_v12 = vld [vmem:[%s2038_s1 + $0x158] sm:$0xff] (!%p158_p3)   ;;  %v1583_v15 = vld [vmem:[%s2038_s1 + $0x160] sm:$0xff] (!%p158_p3)   ;;  %v1586_v18 = vld [vmem:[%s2038_s1 + $0x168] sm:$0xff] (!%p158_p3)  }
   0xf   : > { %1377 = vmatpush3.bf16.msra.mxu0 (!%p158_p3), %v1573_v5  ;;  %v1587_v19 = vld [vmem:[%s2038_s1 + $0x130] sm:$0xff] (!%p158_p3)   ;;  %v1590_v22 = vld [vmem:[%s2038_s1 + $0x138] sm:$0xff] (!%p158_p3)   ;;  %v1594_v32 = vld [vmem:[%s2038_s1 + $0x40] sm:$0xff] (!%p158_p3)  }
  0x10   : > { %s2052_s13 = smov (!%p188_p5, %s1673_s13), 1  ;;  %1470 = vmatpush3.bf16.msra.mxu1 %v1574_v6  ;;  %1378 = vmatprep.subr.bf16.mxu0 %v1575_v7  ;;  %s2054_s12 = smov (!%p190_p6, %s1669_s12), 1  ;;  %v1588_v20 = vld [vmem:[%s2038_s1 + $0xf0] sm:$0xff]   ;;  %v1591_v25 = vld [vmem:[%s2038_s1 + $0xf8] sm:$0xff]   ;;  %v1596_v34 = vld [vmem:[%s2038_s1] sm:$0xff]  }
  0x11   : > { %1471 = vmatprep.subr.bf16.mxu1 %v1687_v1  ;;  %s1193_s23 = sshll.u32 %s2052_s13, 3  ;;  %s1192_s26 = sshll.u32 %s2054_s12, 2  ;;  %v1589_v21 = vld [vmem:[%s2038_s1 + $0x170] sm:$0xff]   ;;  %v1592_v28 = vld [vmem:[%s2038_s1 + $0x178] sm:$0xff]   ;;  %v1597_v37 = vld [vmem:[%s2038_s1 + $0x80] sm:$0xff]  }
  0x12   : > { %s194_s4 = sadd.s32 %s1193_s23, %s1192_s26  ;;  %v1598_v38 = vld [vmem:[%s2038_s1 + $0x48] sm:$0xff]   ;;  %v1601_v41 = vld [vmem:[%s2038_s1 + $0x50] sm:$0xff]   ;;  %v1604_v44 = vld [vmem:[%s2038_s1 + $0x58] sm:$0xff]  }
  0x13   : > { %1379 = vmatpush3.bf16.msra.mxu0 %v1576_v8  ;;  %s1194_s9 = sshll.u32 %s194_s4, 2  ;;  %v1599_v39 = vld [vmem:[%s2038_s1 + $0x8] sm:$0xff]   ;;  %v1602_v42 = vld [vmem:[%s2038_s1 + $0x10] sm:$0xff]   ;;  %v1605_v45 = vld [vmem:[%s2038_s1 + $0x18] sm:$0xff]  }
  0x14   : > { %1472 = vmatpush3.bf16.msra.mxu1 %v1577_v9  ;;  %1380 = vmatprep.subr.bf16.mxu0 %v1578_v10  ;;  %s1824_s25 = scalar_lea.vmem %s2037_s0, %s1194_s9  ;;  %v1600_v40 = vld [vmem:[%s2038_s1 + $0x88] sm:$0xff]   ;;  %v1603_v43 = vld [vmem:[%s2038_s1 + $0x90] sm:$0xff]   ;;  %v1606_v46 = vld [vmem:[%s2038_s1 + $0x98] sm:$0xff]  }
  0x15   : > { %1473 = vmatprep.subr.bf16.mxu1 %v1687_v1  ;;  %v275_v23 = vld [vmem:[%s1824_s25 + $0x4] sm:$0xf]  ;;  %v276_v24 = vld [vmem:[%s1824_s25 + $0x8] sm:$0x1]  ;;  %v206_v51 = vld [vmem:[%s1824_s25] sm:$0xf] }
  0x16   : > { %v1199_v26 = vcombine.low %v275_v23, %v276_v24  ;;  %v277_v27 = vld [vmem:[%s1824_s25 + $0x4] sm:$0xe]  ;;  %v1610_v50 = vld [vmem:[%s2038_s1 + $0x68] sm:$0xff]   ;;  %v207_v52 = vld [vmem:[%s1824_s25 + $0x4] sm:$0x1] }
  0x17   : > { %1381 = vmatpush3.bf16.msra.mxu0 %v1579_v11  ;;  %v1200_v31 = vcombine.low %v277_v27, %v276_v24  ;;  %v1607_v47 = vld [vmem:[%s2038_s1 + $0x60] sm:$0xff]   ;;  %v1197_v53 = vcombine.low %v206_v51, %v207_v52  ;;  %v1611_v54 = vld [vmem:[%s2038_s1 + $0x28] sm:$0xff]   ;;  %v1613_v56 = vld [vmem:[%s2038_s1 + $0x70] sm:$0xff]  }
  0x18   : > { %1474 = vmatpush3.bf16.msra.mxu1 %v1580_v12  ;;  %1382 = vmatprep.subr.bf16.mxu0 %v1581_v13  ;;  %v284_v29 = vshrl.u32 %v1199_v26, 16  ;;  %v286_v30 = vshll.u32 %v1199_v26, 16  ;;  %v1608_v48 = vld [vmem:[%s2038_s1 + $0x20] sm:$0xff]   ;;  %v1612_v55 = vld [vmem:[%s2038_s1 + $0xa8] sm:$0xff]   ;;  %v1614_v59 = vld [vmem:[%s2038_s1 + $0x30] sm:$0xff]  }
  0x19   : > { %1475 = vmatprep.subr.bf16.mxu1 %v1687_v1  ;;  %v294_v36 = vrot.slane %v1200_v31, 1  ;;  %v1609_v49 = vld [vmem:[%s2038_s1 + $0xa0] sm:$0xff]   ;;  %v215_v57 = vshrl.u32 %v1197_v53, 16  ;;  %v217_v58 = vshll.u32 %v1197_v53, 16  ;;  %v1615_v60 = vld [vmem:[%s2038_s1 + $0xb0] sm:$0xff]   ;;  %v1616_v61 = vld [vmem:[%s2038_s1 + $0x78] sm:$0xff]  }
  0x1a   : > { %v288_v33 = vrot.slane %v286_v30, 1  ;;  %v208_v0 = vld [vmem:[%s1824_s25] sm:$0xe]  ;;  %v1617_v2 = vld [vmem:[%s2038_s1 + $0x38] sm:$0xff]   ;;  %v1624_v9 = vld [vmem:[%s2038_s1 + $0x1c8] sm:$0xff]  }
  0x1b   : > { %1383 = vmatpush3.bf16.msra.mxu0 %v1582_v14  ;;  %v219_v62 = vrot.slane %v217_v58, 1  ;;  %v1618_v3 = vld [vmem:[%s2038_s1 + $0xb8] sm:$0xff]   ;;  %v1198_v4 = vcombine.low %v208_v0, %v207_v52  ;;  %v1620_v5 = vld [vmem:[%s2038_s1 + $0x1c0] sm:$0xff]   ;;  %v1625_v10 = vld [vmem:[%s2038_s1 + $0x188] sm:$0xff]  }
  0x1c   : > { %1476 = vmatpush3.bf16.msra.mxu1 %v1583_v15  ;;  %1384 = vmatprep.subr.bf16.mxu0 %v1584_v16  ;;  %v289_v35 = vor.u32 %v288_v33, %v284_v29  ;;  %v1622_v6 = vld [vmem:[%s2038_s1 + $0x180] sm:$0xff]   ;;  %v1626_v11 = vld [vmem:[%s2038_s1 + $0x208] sm:$0xff]   ;;  %v1627_v12 = vld [vmem:[%s2038_s1 + $0x1d0] sm:$0xff]  }
  0x1d   : > { %1477 = vmatprep.subr.bf16.mxu1 %v1687_v1  ;;  %v220_v63 = vor.u32 %v219_v62, %v215_v57  ;;  %v225_v7 = vrot.slane %v1198_v4, 1  ;;  %v1623_v8 = vld [vmem:[%s2038_s1 + $0x200] sm:$0xff]   ;;  %v1628_v13 = vld [vmem:[%s2038_s1 + $0x190] sm:$0xff]   ;;  %v1630_v15 = vld [vmem:[%s2038_s1 + $0x1d8] sm:$0xff]  }
  0x1e   : > { %521 = vmatprep.mubr.bf16.mxu0 %v289_v35  ;;  %v1629_v14 = vld [vmem:[%s2038_s1 + $0x210] sm:$0xff]   ;;  %v794_v16 = vld [vmem:[%s1824_s25 + $0x8] sm:$0xf]  ;;  %v1634_v24 = vld [vmem:[%s2038_s1 + $0x1a0] sm:$0xff]  }
  0x1f   : > { %1385 = vmatpush3.bf16.msra.mxu0 %v1585_v17  ;;  %v795_v17 = vld [vmem:[%s1824_s25 + $0xc] sm:$0x1]  ;;  %v1635_v26 = vld [vmem:[%s2038_s1 + $0x220] sm:$0xff]   ;;  %v1639_v31 = vld [vmem:[%s2038_s1 + $0x1f0] sm:$0xff]  }
  0x20   : > { %1478 = vmatpush3.bf16.msra.mxu1 %v1586_v18  ;;  %1386 = vmatprep.subr.bf16.mxu0 %v1587_v19  ;;  %v1631_v18 = vld [vmem:[%s2038_s1 + $0x198] sm:$0xff]   ;;  %v1297_v19 = vcombine.low %v794_v16, %v795_v17  ;;  %v1636_v27 = vld [vmem:[%s2038_s1 + $0x1e8] sm:$0xff]   ;;  %v1641_v33 = vld [vmem:[%s2038_s1 + $0x230] sm:$0xff]  }
  0x21   : > { %1479 = vmatprep.subr.bf16.mxu1 %v1687_v1  ;;  %v1637_v29 = vld [vmem:[%s2038_s1 + $0x1a8] sm:$0xff]  }
  0x22   : > { %v1638_v30 = vld [vmem:[%s2038_s1 + $0x228] sm:$0xff]  }
  0x23   : > { %1387 = vmatpush3.bf16.msra.mxu0 %v1588_v20  ;;  %v1632_v20 = vld [vmem:[%s2038_s1 + $0x218] sm:$0xff]   ;;  %v796_v35 = vld [vmem:[%s1824_s25 + $0x8] sm:$0xe] }
  0x24   : > { %1480 = vmatpush3.bf16.msra.mxu1 %v1589_v21  ;;  %1388 = vmatprep.subr.bf16.mxu0 %v1590_v22  ;;  %v1633_v21 = vld [vmem:[%s2038_s1 + $0x1e0] sm:$0xff]   ;;  %v803_v22 = vshrl.u32 %v1297_v19, 16 }
  0x25   : > { %1481 = vmatprep.subr.bf16.mxu1 %v1687_v1 }
  0x27   : > { %1389 = vmatpush3.bf16.msra.mxu0 %v1591_v25 }
  0x28   : > { %1482 = vmatpush3.bf16.msra.mxu1 %v1592_v28  ;;  %1405 = vmatprep.subr.bf16.mxu0 %v1594_v32  ;;  %v1640_v32 = vld [vmem:[%s2038_s1 + $0x1b0] sm:$0xff]  }
  0x29   : > { %1487 = vmatprep.subr.bf16.mxu1 %v1687_v1 }
  0x2a   : > { %522 = vmatmul.mubr.bf16.vlgmr.msra.gmra.mrb[0].mxu0 %v275_v23  ;;  %v805_v23 = vshll.u32 %v1297_v19, 16 }
  0x2b   : > { %1484 = vmatmul.mubr.bf16.vlgmr.msra.gmra.mrb[0].mxu1 %v294_v36  ;;  %1406 = vmatpush3.bf16.msra.mxu0 %v1596_v34  ;;  %v1642_v34 = vld [vmem:[%s2038_s1 + $0x1f8] sm:$0xff]  }
  0x2c   : > { %1488 = vmatpush3.bf16.msra.mxu1 %v1597_v37  ;;  %1407 = vmatprep.subr.bf16.mxu0 %v1598_v38  ;;  %v807_v25 = vrot.slane %v805_v23, 1  ;;  %v1643_v36 = vld [vmem:[%s2038_s1 + $0x1b8] sm:$0xff]   ;;  %v1298_v37 = vcombine.low %v796_v35, %v795_v17 }
  0x2d   : > { %1489 = vmatprep.subr.bf16.mxu1 %v1687_v1  ;;  %1503 = vmatprep.mubr.msk.bf16.mxu1 %vm1688_vm0, %v1687_v1  ;;  %v1644_v38 = vld [vmem:[%s2038_s1 + $0x238] sm:$0xff]  }
  0x2e   : > { %745 = vmatprep.mubr.bf16.mxu0 %v220_v63  ;;  %v808_v28 = vor.u32 %v807_v25, %v803_v22 }
  0x2f   : > { %1408 = vmatpush3.bf16.msra.mxu0 %v1599_v39  ;;  %v793_v39 = vld [vmem:[%s1824_s25 + $0x8] sm:$0xf]  ;;  %s1195_s25 = sshll.u32 %s2052_s13, 1 }
  0x30   : > { %1490 = vmatpush3.bf16.msra.mxu1 %v1600_v40  ;;  %1409 = vmatprep.subr.bf16.mxu0 %v1601_v41  ;;  %v813_v40 = vrot.slane %v1298_v37, 1  ;;  %s202_s8 = sadd.s32 %s1195_s25, %s2054_s12 }
  0x31   : > { %1491 = vmatprep.subr.bf16.mxu1 %v1687_v1  ;;  %s1196_s9 = sshll.u32 %s202_s8, 3 }
  0x32   : > { %s204_s13 = scalar_lea.vmem %s2040_s3, %s1196_s9 }
  0x33   : > { %1410 = vmatpush3.bf16.msra.mxu0 %v1602_v42 }
  0x34   : > { %1492 = vmatpush3.bf16.msra.mxu1 %v1603_v43  ;;  %1411 = vmatprep.subr.bf16.mxu0 %v1604_v44 }
  0x35   : > { %1493 = vmatprep.subr.bf16.mxu1 %v1687_v1 }
  0x37   : > { %1412 = vmatpush3.bf16.msra.mxu0 %v1605_v45 }
  0x38   : > { %1494 = vmatpush3.bf16.msra.mxu1 %v1606_v46  ;;  %1413 = vmatprep.subr.bf16.mxu0 %v1607_v47 }
  0x39   : > { %1495 = vmatprep.subr.bf16.mxu1 %v1687_v1 }
  0x3b   : > { %1414 = vmatpush3.bf16.msra.mxu0 %v1608_v48 }
  0x3c   : > { %1496 = vmatpush3.bf16.msra.mxu1 %v1609_v49  ;;  %1415 = vmatprep.subr.bf16.mxu0 %v1610_v50 }
  0x3d   : > { %1497 = vmatprep.subr.bf16.mxu1 %v1687_v1 }
  0x3f   : > { %1416 = vmatpush3.bf16.msra.mxu0 %v1611_v54 }
  0x40   : > { %1498 = vmatpush3.bf16.msra.mxu1 %v1612_v55  ;;  %1417 = vmatprep.subr.bf16.mxu0 %v1613_v56 }
  0x41   : > { %1499 = vmatprep.subr.bf16.mxu1 %v1687_v1 }
  0x43   : > { %1418 = vmatpush3.bf16.msra.mxu0 %v1614_v59 }
  0x44   : > { %1500 = vmatpush3.bf16.msra.mxu1 %v1615_v60  ;;  %1419 = vmatprep.subr.bf16.mxu0 %v1616_v61 }
  0x45   : > { %1501 = vmatprep.subr.bf16.mxu1 %v1687_v1 }
  0x47   : > { %1420 = vmatpush3.bf16.msra.mxu0 %v1617_v2 }
  0x48   : > { %1502 = vmatpush3.bf16.msra.mxu1 %v1618_v3  ;;  %1436 = vmatprep.subr.bf16.mxu0 %v1620_v5 }
  0x49   : > { %1507 = vmatprep.subr.bf16.mxu1 %v1687_v1 }
  0x4a   : > { %746 = vmatmul.mubr.bf16.vlgmr.msra.gmra.mrb[4].mxu0 %v206_v51 }
  0x4b   : > { %1504 = vmatmul.mubr.bf16.vlgmr.msra.gmra.mrb[4].mxu1 %v225_v7  ;;  %1437 = vmatpush3.bf16.msra.mxu0 %v1622_v6 }
  0x4c   : > { %1508 = vmatpush3.bf16.msra.mxu1 %v1623_v8  ;;  %1438 = vmatprep.subr.bf16.mxu0 %v1624_v9  ;;  %v1371_v8 = vld [vmem:[%s2039_s2] ss:$0 sm:$0xff] }
  0x4d   : > { %1509 = vmatprep.subr.bf16.mxu1 %v1687_v1  ;;  %1523 = vmatprep.mubr.msk.bf16.mxu1 %vm1688_vm0, %v1687_v1 }
  0x4e   : > { %1040 = vmatprep.mubr.bf16.mxu0 %v808_v28 }
  0x4f   : > { %1439 = vmatpush3.bf16.msra.mxu0 %v1625_v10 }
  0x50   : > { %1510 = vmatpush3.bf16.msra.mxu1 %v1626_v11  ;;  %1440 = vmatprep.subr.bf16.mxu0 %v1627_v12 }
  0x51   : > { %1511 = vmatprep.subr.bf16.mxu1 %v1687_v1 }
  0x53   : > { %1441 = vmatpush3.bf16.msra.mxu0 %v1628_v13 }
  0x54   : > { %1512 = vmatpush3.bf16.msra.mxu1 %v1629_v14  ;;  %1442 = vmatprep.subr.bf16.mxu0 %v1630_v15 }
  0x55   : > { %1513 = vmatprep.subr.bf16.mxu1 %v1687_v1 }
  0x57   : > { %1443 = vmatpush3.bf16.msra.mxu0 %v1631_v18 }
  0x58   : > { %1514 = vmatpush3.bf16.msra.mxu1 %v1632_v20  ;;  %1444 = vmatprep.subr.bf16.mxu0 %v1633_v21 }
  0x59   : > { %1515 = vmatprep.subr.bf16.mxu1 %v1687_v1 }
  0x5b   : > { %1445 = vmatpush3.bf16.msra.mxu0 %v1634_v24 }
  0x5c   : > { %1516 = vmatpush3.bf16.msra.mxu1 %v1635_v26  ;;  %1446 = vmatprep.subr.bf16.mxu0 %v1636_v27 }
  0x5d   : > { %1517 = vmatprep.subr.bf16.mxu1 %v1687_v1 }
  0x5f   : > { %1447 = vmatpush3.bf16.msra.mxu0 %v1637_v29 }
  0x60   : > { %1518 = vmatpush3.bf16.msra.mxu1 %v1638_v30  ;;  %1448 = vmatprep.subr.bf16.mxu0 %v1639_v31 }
  0x61   : > { %1519 = vmatprep.subr.bf16.mxu1 %v1687_v1 }
  0x63   : > { %1449 = vmatpush3.bf16.msra.mxu0 %v1640_v32 }
  0x64   : > { %1520 = vmatpush3.bf16.msra.mxu1 %v1641_v33  ;;  %1450 = vmatprep.subr.bf16.mxu0 %v1642_v34 }
  0x65   : > { %1521 = vmatprep.subr.bf16.mxu1 %v1687_v1 }
  0x67   : > { %1451 = vmatpush3.bf16.msra.mxu0 %v1643_v36 }
  0x68   : > { %1522 = vmatpush3.bf16.msra.mxu1 %v1644_v38 }
  0x6a   : > { %1041 = vmatmul.mubr.bf16.vlgmr.msra.gmra.mrb[8].mxu0 %v793_v39 }
  0x6b   : > { %1524 = vmatmul.mubr.bf16.vlgmr.msra.gmra.mrb[8].mxu1 %v813_v40 }
  0xfd   : > { %v1390_v41 = vpop.f32.mrb[0].mxu0 }
  0xfe   : > { %v1391_v42 = vpop.f32.mrb[1].mxu0  ;;  %v563_v43 = vpop.f32.mrb[0].mxu1 }
  0xff   : > { %v1392_v44 = vadd.f32 %v1391_v42, %v1390_v41  ;;  %v1393_v45 = vpop.f32.mrb[2].mxu0  ;;  %v1485_v46 = vpop.f32.mrb[1].mxu1 }
 0x100   : > { %v1394_v47 = vpop.f32.mrb[3].mxu0  ;;  %v566_v48 = vpop.f32.mrb[2].mxu1 }
 0x101   : > { %v564_v49 = vadd.f32 %v1392_v44, %v563_v43  ;;  %v1486_v50 = vpop.f32.mrb[3].mxu1 }
 0x11d   : > { %v1421_v51 = vpop.f32.mrb[4].mxu0 }
 0x11e   : > { %v1422_v1 = vpop.f32.mrb[5].mxu0  ;;  %v787_v52 = vpop.f32.mrb[4].mxu1 }
 0x11f   : > { %v1423_v53 = vadd.f32 %v1422_v1, %v1421_v51  ;;  %v1424_v54 = vpop.f32.mrb[6].mxu0  ;;  %v1505_v55 = vpop.f32.mrb[5].mxu1 }
 0x120   : > { %v1425_v56 = vpop.f32.mrb[7].mxu0  ;;  %v790_v57 = vpop.f32.mrb[6].mxu1 }
 0x121   : > { %v748_v58 = vadd.f32 %v1423_v53, %v564_v49  ;;  %v1506_v59 = vpop.f32.mrb[7].mxu1 }
 0x123   : > { %v788_v60 = vadd.f32 %v787_v52, %v748_v58 }
 0x13d   : > { %v1452_v61 = vpop.f32.mrb[8].mxu0 }
 0x13e   : > { %v1082_v62 = vpop.f32.mrb[8].mxu1  ;;  %v1453_v63 = vpop.f32.mrb[9].mxu0 }
 0x13f   : > { %v1454_v0 = vadd.f32 %v1453_v63, %v1452_v61  ;;  %v1525_v2 = vpop.f32.mrb[9].mxu1  ;;  %v1455_v3 = vpop.f32.mrb[10].mxu0 }
 0x140   : > { %v1085_v4 = vpop.f32.mrb[10].mxu1  ;;  %v1456_v5 = vpop.f32.mrb[11].mxu0 }
 0x141   : > { %v1083_v6 = vadd.f32 %v1454_v0, %v1082_v62  ;;  %v1526_v7 = vpop.f32.mrb[11].mxu1 }
 0x143   : > { %v1088_v9 = vadd.f32 %v1083_v6, %v788_v60 }
 0x145   : > { %v1096_v10 = vadd.f32 %v1371_v8, %v1088_v9 }
 0x147   : > { %1097 = vst [vmem:[%s204_s13] sm:$0xff] %v1096_v10 }
 0x148 PF: > { %s13_s16 = sadd.s32 1, %s1685_s16   ;;  %s2041_s12 = smov %s1677_s14 }
 0x149   : > { %p10_p7 = scmp.ge.s32.totalorder %s13_s16, 6   ;;  %s2042_s13 = smov %s1681_s15 }
 0x14a   : > { %s2043_s14 = smov %s2046_s17  ;;  %s2044_s15 = smov %s2050_s18 }
 0x14b   :  { %12 = sbr.rel (!%p10_p7) target bundleno = 3 (0x3), region = 64 }

// kernel: backbone_with_fpn_forward.15
= control target key start
LH: loop header
LB: loop body
LE: loop exit
PB: predicated region body
PF: predicated region fallthrough
CT: control target
= control target key end

     0   :  { %s6857_s1 = inlined_call_operand.vmem [shape: bf16[2048,512], index: 1, kind: input, shape index: {}]   ;;  %s6858_s0 = inlined_call_operand.vmem [shape: bf16[8,2048], index: 0, kind: input, shape index: {}]   ;;  %s6859_s2 = inlined_call_operand.vmem [shape: f32[1,512], index: 2, kind: input, shape index: {}]   ;;  %s6860_s3 = inlined_call_operand.vmem [shape: bf16[8,512], index: 3, kind: output, shape index: {}]  }
   0x1   :  { %v4442_v0 = vld [vmem:[%s6857_s1 + $0x4] ss:$16 sps:$4 sm:$0xff]   ;;  %v4444_v1 = vld [vmem:[%s6857_s1 + $0xc] ss:$16 sps:$4 sm:$0xff]   ;;  %v4446_v2 = vld [vmem:[%s6857_s1] ss:$16 sps:$4 sm:$0xff]  }
   0x2   :  { %3172 = vmatprep.subr.bf16.mxu0 %v4442_v0  ;;  %v4447_v3 = vld [vmem:[%s6857_s1 + $0x8] ss:$16 sps:$4 sm:$0xff]   ;;  %3500 = vmatprep.subr.bf16.mxu1 %v4444_v1  ;;  %v4448_v4 = vld [vmem:[%s6857_s1 + $0x24] ss:$16 sps:$4 sm:$0xff]   ;;  %v4450_v5 = vld [vmem:[%s6857_s1 + $0x2c] ss:$16 sps:$4 sm:$0xff]  }
   0x3   :  { %3173 = vmatpush1.bf16.msra.mxu0 %v4446_v2  ;;  %3501 = vmatpush1.bf16.msra.mxu1 %v4447_v3  ;;  %v4452_v6 = vld [vmem:[%s6857_s1 + $0x20] ss:$16 sps:$4 sm:$0xff]   ;;  %v4453_v7 = vld [vmem:[%s6857_s1 + $0x28] ss:$16 sps:$4 sm:$0xff]   ;;  %v4454_v8 = vld [vmem:[%s6857_s1 + $0x44] ss:$16 sps:$4 sm:$0xff]  }
   0x4   :  { %3174 = vmatprep.subr.bf16.mxu0 %v4448_v4  ;;  %3502 = vmatprep.subr.bf16.mxu1 %v4450_v5  ;;  %v4456_v9 = vld [vmem:[%s6857_s1 + $0x4c] ss:$16 sps:$4 sm:$0xff]   ;;  %v4458_v10 = vld [vmem:[%s6857_s1 + $0x40] ss:$16 sps:$4 sm:$0xff]   ;;  %v4459_v11 = vld [vmem:[%s6857_s1 + $0x48] ss:$16 sps:$4 sm:$0xff]  }
   0x5   :  { %v4460_v12 = vld [vmem:[%s6857_s1 + $0x64] ss:$16 sps:$4 sm:$0xff]   ;;  %v4462_v13 = vld [vmem:[%s6857_s1 + $0x6c] ss:$16 sps:$4 sm:$0xff]   ;;  %v4464_v14 = vld [vmem:[%s6857_s1 + $0x60] ss:$16 sps:$4 sm:$0xff]  }
   0x6   :  { %v4465_v15 = vld [vmem:[%s6857_s1 + $0x68] ss:$16 sps:$4 sm:$0xff]   ;;  %v4466_v16 = vld [vmem:[%s6857_s1 + $0x84] ss:$16 sps:$4 sm:$0xff]   ;;  %v4468_v17 = vld [vmem:[%s6857_s1 + $0x8c] ss:$16 sps:$4 sm:$0xff]  }
   0x7   :  { %3175 = vmatpush1.bf16.msra.mxu0 %v4452_v6  ;;  %3503 = vmatpush1.bf16.msra.mxu1 %v4453_v7  ;;  %v4470_v18 = vld [vmem:[%s6857_s1 + $0x80] ss:$16 sps:$4 sm:$0xff]   ;;  %v4471_v19 = vld [vmem:[%s6857_s1 + $0x88] ss:$16 sps:$4 sm:$0xff]   ;;  %v4472_v20 = vld [vmem:[%s6857_s1 + $0xa4] ss:$16 sps:$4 sm:$0xff]  }
   0x8   :  { %3176 = vmatprep.subr.bf16.mxu0 %v4454_v8  ;;  %3504 = vmatprep.subr.bf16.mxu1 %v4456_v9  ;;  %v4474_v21 = vld [vmem:[%s6857_s1 + $0xac] ss:$16 sps:$4 sm:$0xff]   ;;  %v4476_v22 = vld [vmem:[%s6857_s1 + $0xa0] ss:$16 sps:$4 sm:$0xff]   ;;  %v4477_v23 = vld [vmem:[%s6857_s1 + $0xa8] ss:$16 sps:$4 sm:$0xff]  }
   0x9   :  { %v4478_v24 = vld [vmem:[%s6857_s1 + $0xc4] ss:$16 sps:$4 sm:$0xff]   ;;  %v4480_v25 = vld [vmem:[%s6857_s1 + $0xcc] ss:$16 sps:$4 sm:$0xff]   ;;  %v4482_v26 = vld [vmem:[%s6857_s1 + $0xc0] ss:$16 sps:$4 sm:$0xff]  }
   0xa   :  { %v4483_v27 = vld [vmem:[%s6857_s1 + $0xc8] ss:$16 sps:$4 sm:$0xff]   ;;  %v4484_v28 = vld [vmem:[%s6857_s1 + $0xe4] ss:$16 sps:$4 sm:$0xff]   ;;  %v4486_v29 = vld [vmem:[%s6857_s1 + $0xec] ss:$16 sps:$4 sm:$0xff]  }
   0xb   :  { %3177 = vmatpush1.bf16.msra.mxu0 %v4458_v10  ;;  %3505 = vmatpush1.bf16.msra.mxu1 %v4459_v11  ;;  %v4488_v30 = vld [vmem:[%s6857_s1 + $0xe0] ss:$16 sps:$4 sm:$0xff]   ;;  %v4489_v31 = vld [vmem:[%s6857_s1 + $0xe8] ss:$16 sps:$4 sm:$0xff]   ;;  %v4490_v32 = vld [vmem:[%s6857_s1 + $0x104] ss:$16 sps:$4 sm:$0xff]  }
   0xc   :  { %3178 = vmatprep.subr.bf16.mxu0 %v4460_v12  ;;  %3506 = vmatprep.subr.bf16.mxu1 %v4462_v13  ;;  %v4492_v33 = vld [vmem:[%s6857_s1 + $0x10c] ss:$16 sps:$4 sm:$0xff]   ;;  %v4494_v34 = vld [vmem:[%s6857_s1 + $0x100] ss:$16 sps:$4 sm:$0xff]   ;;  %v4495_v35 = vld [vmem:[%s6857_s1 + $0x108] ss:$16 sps:$4 sm:$0xff]  }
   0xd   :  { %v4496_v36 = vld [vmem:[%s6857_s1 + $0x124] ss:$16 sps:$4 sm:$0xff]   ;;  %v4498_v37 = vld [vmem:[%s6857_s1 + $0x12c] ss:$16 sps:$4 sm:$0xff]   ;;  %v4500_v38 = vld [vmem:[%s6857_s1 + $0x120] ss:$16 sps:$4 sm:$0xff]  }
   0xe   :  { %v4501_v39 = vld [vmem:[%s6857_s1 + $0x128] ss:$16 sps:$4 sm:$0xff]   ;;  %v4502_v40 = vld [vmem:[%s6857_s1 + $0x144] ss:$16 sps:$4 sm:$0xff]   ;;  %v4504_v41 = vld [vmem:[%s6857_s1 + $0x14c] ss:$16 sps:$4 sm:$0xff]  }
   0xf   :  { %3179 = vmatpush1.bf16.msra.mxu0 %v4464_v14  ;;  %3507 = vmatpush1.bf16.msra.mxu1 %v4465_v15  ;;  %v4506_v42 = vld [vmem:[%s6857_s1 + $0x140] ss:$16 sps:$4 sm:$0xff]   ;;  %v4507_v43 = vld [vmem:[%s6857_s1 + $0x148] ss:$16 sps:$4 sm:$0xff]   ;;  %v4508_v44 = vld [vmem:[%s6857_s1 + $0x164] ss:$16 sps:$4 sm:$0xff]  }
  0x10   :  { %3180 = vmatprep.subr.bf16.mxu0 %v4466_v16  ;;  %3508 = vmatprep.subr.bf16.mxu1 %v4468_v17  ;;  %v4510_v45 = vld [vmem:[%s6857_s1 + $0x16c] ss:$16 sps:$4 sm:$0xff]   ;;  %v14_v46 = vld [vmem:[%s6858_s0] sm:$0xff]  ;;  %v4513_v49 = vld [vmem:[%s6857_s1 + $0x168] ss:$16 sps:$4 sm:$0xff]  }
  0x11   :  { %v4512_v47 = vld [vmem:[%s6857_s1 + $0x160] ss:$16 sps:$4 sm:$0xff]   ;;  %v3851_v48 = vcombine.high %v14_v46, %v14_v46  ;;  %v4514_v50 = vld [vmem:[%s6857_s1 + $0x184] ss:$16 sps:$4 sm:$0xff]   ;;  %v4516_v51 = vld [vmem:[%s6857_s1 + $0x18c] ss:$16 sps:$4 sm:$0xff]   ;;  %v3850_v4 = vcombine.low %v14_v46, %v14_v46 }
  0x12   :  { %v4518_v52 = vld [vmem:[%s6857_s1 + $0x180] ss:$16 sps:$4 sm:$0xff]   ;;  %v4519_v53 = vld [vmem:[%s6857_s1 + $0x188] ss:$16 sps:$4 sm:$0xff]   ;;  %v4520_v54 = vld [vmem:[%s6857_s1 + $0x1a4] ss:$16 sps:$4 sm:$0xff]  }
  0x13   :  { %3181 = vmatpush1.bf16.msra.mxu0 %v4470_v18  ;;  %3509 = vmatpush1.bf16.msra.mxu1 %v4471_v19  ;;  %v4522_v55 = vld [vmem:[%s6857_s1 + $0x1ac] ss:$16 sps:$4 sm:$0xff]   ;;  %v4524_v56 = vld [vmem:[%s6857_s1 + $0x1a0] ss:$16 sps:$4 sm:$0xff]   ;;  %v4525_v57 = vld [vmem:[%s6857_s1 + $0x1a8] ss:$16 sps:$4 sm:$0xff]  }
  0x14   :  { %3182 = vmatprep.subr.bf16.mxu0 %v4472_v20  ;;  %3510 = vmatprep.subr.bf16.mxu1 %v4474_v21  ;;  %v4526_v58 = vld [vmem:[%s6857_s1 + $0x1c4] ss:$16 sps:$4 sm:$0xff]   ;;  %v4528_v59 = vld [vmem:[%s6857_s1 + $0x1cc] ss:$16 sps:$4 sm:$0xff]   ;;  %v4530_v60 = vld [vmem:[%s6857_s1 + $0x1c0] ss:$16 sps:$4 sm:$0xff]  }
  0x15   :  { %3204 = vmatprep.mubr.bf16.mxu0 %v3851_v48  ;;  %3532 = vmatprep.mubr.bf16.mxu1 %v3851_v48  ;;  %v4531_v61 = vld [vmem:[%s6857_s1 + $0x1c8] ss:$16 sps:$4 sm:$0xff]   ;;  %v4532_v62 = vld [vmem:[%s6857_s1 + $0x1e4] ss:$16 sps:$4 sm:$0xff]   ;;  %v4534_v63 = vld [vmem:[%s6857_s1 + $0x1ec] ss:$16 sps:$4 sm:$0xff]  }
  0x16   :  { %v4536_v0 = vld [vmem:[%s6857_s1 + $0x1e0] ss:$16 sps:$4 sm:$0xff]   ;;  %v4537_v1 = vld [vmem:[%s6857_s1 + $0x1e8] ss:$16 sps:$4 sm:$0xff]   ;;  %v4542_v2 = vld [vmem:[%s6857_s1 + $0x204] ss:$16 sps:$4 sm:$0xff]  }
  0x17   :  { %3183 = vmatpush1.bf16.msra.mxu0 %v4476_v22  ;;  %3511 = vmatpush1.bf16.msra.mxu1 %v4477_v23  ;;  %v4545_v3 = vld [vmem:[%s6857_s1 + $0x20c] ss:$16 sps:$4 sm:$0xff]   ;;  %v4540_v5 = vld [vmem:[%s6857_s1 + $0x200] ss:$16 sps:$4 sm:$0xff]   ;;  %v4543_v6 = vld [vmem:[%s6857_s1 + $0x208] ss:$16 sps:$4 sm:$0xff]  }
  0x18   :  { %3184 = vmatprep.subr.bf16.mxu0 %v4478_v24  ;;  %3512 = vmatprep.subr.bf16.mxu1 %v4480_v25  ;;  %v4548_v7 = vld [vmem:[%s6857_s1 + $0x224] ss:$16 sps:$4 sm:$0xff]   ;;  %v4551_v8 = vld [vmem:[%s6857_s1 + $0x22c] ss:$16 sps:$4 sm:$0xff]   ;;  %v4546_v9 = vld [vmem:[%s6857_s1 + $0x220] ss:$16 sps:$4 sm:$0xff]  }
  0x19   :  { %v4549_v10 = vld [vmem:[%s6857_s1 + $0x228] ss:$16 sps:$4 sm:$0xff]   ;;  %v4554_v11 = vld [vmem:[%s6857_s1 + $0x244] ss:$16 sps:$4 sm:$0xff]   ;;  %v4557_v12 = vld [vmem:[%s6857_s1 + $0x24c] ss:$16 sps:$4 sm:$0xff]  }
  0x1a   :  { %v4552_v13 = vld [vmem:[%s6857_s1 + $0x240] ss:$16 sps:$4 sm:$0xff]   ;;  %v4555_v14 = vld [vmem:[%s6857_s1 + $0x248] ss:$16 sps:$4 sm:$0xff]   ;;  %v4560_v15 = vld [vmem:[%s6857_s1 + $0x264] ss:$16 sps:$4 sm:$0xff]  }
  0x1b   :  { %3185 = vmatpush1.bf16.msra.mxu0 %v4482_v26  ;;  %3513 = vmatpush1.bf16.msra.mxu1 %v4483_v27  ;;  %v4563_v16 = vld [vmem:[%s6857_s1 + $0x26c] ss:$16 sps:$4 sm:$0xff]   ;;  %v4558_v17 = vld [vmem:[%s6857_s1 + $0x260] ss:$16 sps:$4 sm:$0xff]   ;;  %v4561_v18 = vld [vmem:[%s6857_s1 + $0x268] ss:$16 sps:$4 sm:$0xff]  }
  0x1c   :  { %3186 = vmatprep.subr.bf16.mxu0 %v4484_v28  ;;  %3514 = vmatprep.subr.bf16.mxu1 %v4486_v29  ;;  %v4566_v19 = vld [vmem:[%s6857_s1 + $0x284] ss:$16 sps:$4 sm:$0xff]   ;;  %v4569_v20 = vld [vmem:[%s6857_s1 + $0x28c] ss:$16 sps:$4 sm:$0xff]   ;;  %v4564_v21 = vld [vmem:[%s6857_s1 + $0x280] ss:$16 sps:$4 sm:$0xff]  }
  0x1d   :  { %v4567_v22 = vld [vmem:[%s6857_s1 + $0x288] ss:$16 sps:$4 sm:$0xff]   ;;  %v4572_v23 = vld [vmem:[%s6857_s1 + $0x2a4] ss:$16 sps:$4 sm:$0xff]   ;;  %v4575_v24 = vld [vmem:[%s6857_s1 + $0x2ac] ss:$16 sps:$4 sm:$0xff]  }
  0x1e   :  { %v4570_v25 = vld [vmem:[%s6857_s1 + $0x2a0] ss:$16 sps:$4 sm:$0xff]   ;;  %v4573_v26 = vld [vmem:[%s6857_s1 + $0x2a8] ss:$16 sps:$4 sm:$0xff]   ;;  %v4578_v27 = vld [vmem:[%s6857_s1 + $0x2c4] ss:$16 sps:$4 sm:$0xff]  }
  0x1f   :  { %3187 = vmatpush1.bf16.msra.mxu0 %v4488_v30  ;;  %3515 = vmatpush1.bf16.msra.mxu1 %v4489_v31  ;;  %v4581_v28 = vld [vmem:[%s6857_s1 + $0x2cc] ss:$16 sps:$4 sm:$0xff]   ;;  %v4576_v31 = vld [vmem:[%s6857_s1 + $0x2c0] ss:$16 sps:$4 sm:$0xff]   ;;  %v4603_v48 = vld [vmem:[%s6857_s1 + $0x348] ss:$16 sps:$4 sm:$0xff]  }
  0x20   :  { %3188 = vmatprep.subr.bf16.mxu0 %v4490_v32  ;;  %3516 = vmatprep.subr.bf16.mxu1 %v4492_v33  ;;  %v5522_v29 = vld [vmem:[%s6858_s0 + $0x8] sm:$0xff]  ;;  %v4584_v33 = vld [vmem:[%s6857_s1 + $0x2e4] ss:$16 sps:$4 sm:$0xff]  }
  0x21   :  { %v3853_v30 = vcombine.high %v5522_v29, %v5522_v29  ;;  %v4579_v32 = vld [vmem:[%s6857_s1 + $0x2c8] ss:$16 sps:$4 sm:$0xff]   ;;  %v4605_v46 = vld [vmem:[%s6857_s1 + $0x34c] ss:$16 sps:$4 sm:$0xff]  }
  0x23   :  { %3189 = vmatpush1.bf16.msra.mxu0 %v4494_v34  ;;  %3517 = vmatpush1.bf16.msra.mxu1 %v4495_v35  ;;  %v4587_v34 = vld [vmem:[%s6857_s1 + $0x2ec] ss:$16 sps:$4 sm:$0xff]   ;;  %v4582_v35 = vld [vmem:[%s6857_s1 + $0x2e0] ss:$16 sps:$4 sm:$0xff]  }
  0x24   :  { %3190 = vmatprep.subr.bf16.mxu0 %v4496_v36  ;;  %3518 = vmatprep.subr.bf16.mxu1 %v4498_v37  ;;  %v4585_v36 = vld [vmem:[%s6857_s1 + $0x2e8] ss:$16 sps:$4 sm:$0xff]   ;;  %v4590_v37 = vld [vmem:[%s6857_s1 + $0x304] ss:$16 sps:$4 sm:$0xff]  }
  0x27   :  { %3191 = vmatpush1.bf16.msra.mxu0 %v4500_v38  ;;  %3519 = vmatpush1.bf16.msra.mxu1 %v4501_v39  ;;  %v4593_v38 = vld [vmem:[%s6857_s1 + $0x30c] ss:$16 sps:$4 sm:$0xff]   ;;  %v4588_v39 = vld [vmem:[%s6857_s1 + $0x300] ss:$16 sps:$4 sm:$0xff]  }
  0x28   :  { %3192 = vmatprep.subr.bf16.mxu0 %v4502_v40  ;;  %3520 = vmatprep.subr.bf16.mxu1 %v4504_v41  ;;  %v4591_v40 = vld [vmem:[%s6857_s1 + $0x308] ss:$16 sps:$4 sm:$0xff]   ;;  %v4596_v41 = vld [vmem:[%s6857_s1 + $0x324] ss:$16 sps:$4 sm:$0xff]  }
  0x2b   :  { %3193 = vmatpush1.bf16.msra.mxu0 %v4506_v42  ;;  %3521 = vmatpush1.bf16.msra.mxu1 %v4507_v43  ;;  %v4599_v42 = vld [vmem:[%s6857_s1 + $0x32c] ss:$16 sps:$4 sm:$0xff]   ;;  %v4594_v43 = vld [vmem:[%s6857_s1 + $0x320] ss:$16 sps:$4 sm:$0xff]  }
  0x2c   :  { %3194 = vmatprep.subr.bf16.mxu0 %v4508_v44  ;;  %3522 = vmatprep.subr.bf16.mxu1 %v4510_v45  ;;  %v4597_v44 = vld [vmem:[%s6857_s1 + $0x328] ss:$16 sps:$4 sm:$0xff]   ;;  %v4602_v45 = vld [vmem:[%s6857_s1 + $0x344] ss:$16 sps:$4 sm:$0xff]  }
  0x2f   :  { %3195 = vmatpush1.bf16.msra.mxu0 %v4512_v47  ;;  %3523 = vmatpush1.bf16.msra.mxu1 %v4513_v49  ;;  %v4600_v47 = vld [vmem:[%s6857_s1 + $0x340] ss:$16 sps:$4 sm:$0xff]   ;;  %v4608_v49 = vld [vmem:[%s6857_s1 + $0x364] ss:$16 sps:$4 sm:$0xff]  }
  0x30   :  { %3196 = vmatprep.subr.bf16.mxu0 %v4514_v50  ;;  %3524 = vmatprep.subr.bf16.mxu1 %v4516_v51  ;;  %v4611_v50 = vld [vmem:[%s6857_s1 + $0x36c] ss:$16 sps:$4 sm:$0xff]   ;;  %v4606_v51 = vld [vmem:[%s6857_s1 + $0x360] ss:$16 sps:$4 sm:$0xff]  }
  0x33   :  { %3197 = vmatpush1.bf16.msra.mxu0 %v4518_v52  ;;  %3525 = vmatpush1.bf16.msra.mxu1 %v4519_v53  ;;  %v4609_v52 = vld [vmem:[%s6857_s1 + $0x368] ss:$16 sps:$4 sm:$0xff]   ;;  %v4614_v53 = vld [vmem:[%s6857_s1 + $0x384] ss:$16 sps:$4 sm:$0xff]  }
  0x34   :  { %3198 = vmatprep.subr.bf16.mxu0 %v4520_v54  ;;  %3526 = vmatprep.subr.bf16.mxu1 %v4522_v55  ;;  %v4617_v54 = vld [vmem:[%s6857_s1 + $0x38c] ss:$16 sps:$4 sm:$0xff]   ;;  %v4612_v55 = vld [vmem:[%s6857_s1 + $0x380] ss:$16 sps:$4 sm:$0xff]  }
  0x37   :  { %3199 = vmatpush1.bf16.msra.mxu0 %v4524_v56  ;;  %3527 = vmatpush1.bf16.msra.mxu1 %v4525_v57  ;;  %v4615_v56 = vld [vmem:[%s6857_s1 + $0x388] ss:$16 sps:$4 sm:$0xff]   ;;  %v4620_v57 = vld [vmem:[%s6857_s1 + $0x3a4] ss:$16 sps:$4 sm:$0xff]  }
  0x38   :  { %3200 = vmatprep.subr.bf16.mxu0 %v4526_v58  ;;  %3528 = vmatprep.subr.bf16.mxu1 %v4528_v59  ;;  %v4623_v58 = vld [vmem:[%s6857_s1 + $0x3ac] ss:$16 sps:$4 sm:$0xff]   ;;  %v4618_v59 = vld [vmem:[%s6857_s1 + $0x3a0] ss:$16 sps:$4 sm:$0xff]  }
  0x3b   :  { %3201 = vmatpush1.bf16.msra.mxu0 %v4530_v60  ;;  %3529 = vmatpush1.bf16.msra.mxu1 %v4531_v61  ;;  %v4621_v60 = vld [vmem:[%s6857_s1 + $0x3a8] ss:$16 sps:$4 sm:$0xff]   ;;  %v4626_v61 = vld [vmem:[%s6857_s1 + $0x3c4] ss:$16 sps:$4 sm:$0xff]  }
  0x3c   :  { %3202 = vmatprep.subr.bf16.mxu0 %v4532_v62  ;;  %3530 = vmatprep.subr.bf16.mxu1 %v4534_v63  ;;  %v4629_v62 = vld [vmem:[%s6857_s1 + $0x3cc] ss:$16 sps:$4 sm:$0xff]   ;;  %v4624_v63 = vld [vmem:[%s6857_s1 + $0x3c0] ss:$16 sps:$4 sm:$0xff]  }
  0x3f   :  { %3203 = vmatpush1.bf16.msra.mxu0 %v4536_v0  ;;  %3531 = vmatpush1.bf16.msra.mxu1 %v4537_v1  ;;  %v4627_v0 = vld [vmem:[%s6857_s1 + $0x3c8] ss:$16 sps:$4 sm:$0xff]   ;;  %v4632_v1 = vld [vmem:[%s6857_s1 + $0x3e4] ss:$16 sps:$4 sm:$0xff]  }
  0x40   :  { %3213 = vmatprep.subr.bf16.mxu0 %v4542_v2  ;;  %3541 = vmatprep.subr.bf16.mxu1 %v4545_v3  ;;  %v4635_v2 = vld [vmem:[%s6857_s1 + $0x3ec] ss:$16 sps:$4 sm:$0xff]   ;;  %v4630_v3 = vld [vmem:[%s6857_s1 + $0x3e0] ss:$16 sps:$4 sm:$0xff]  }
  0x42   :  { %3205 = vmatmul.mubr.bf16.vlgmr.msra.gmra.mrb[0].mxu0 %v3850_v4  ;;  %3533 = vmatmul.mubr.bf16.vlgmr.msra.gmra.mrb[0].mxu1 %v3850_v4  ;;  %v4633_v4 = vld [vmem:[%s6857_s1 + $0x3e8] ss:$16 sps:$4 sm:$0xff]  }
  0x43   :  { %3214 = vmatpush1.bf16.msra.mxu0 %v4540_v5  ;;  %3542 = vmatpush1.bf16.msra.mxu1 %v4543_v6  ;;  %v4640_v5 = vld [vmem:[%s6857_s1 + $0x404] ss:$16 sps:$4 sm:$0xff]   ;;  %v4643_v6 = vld [vmem:[%s6857_s1 + $0x40c] ss:$16 sps:$4 sm:$0xff]  }
  0x44   :  { %3215 = vmatprep.subr.bf16.mxu0 %v4548_v7  ;;  %3543 = vmatprep.subr.bf16.mxu1 %v4551_v8  ;;  %v3852_v7 = vcombine.low %v5522_v29, %v5522_v29  ;;  %v4638_v8 = vld [vmem:[%s6857_s1 + $0x400] ss:$16 sps:$4 sm:$0xff]   ;;  %v4673_v29 = vld [vmem:[%s6857_s1 + $0x4ac] ss:$16 sps:$4 sm:$0xff]  }
  0x45   :  { %3245 = vmatprep.mubr.bf16.mxu0 %v3853_v30  ;;  %3573 = vmatprep.mubr.bf16.mxu1 %v3853_v30  ;;  %v4668_v30 = vld [vmem:[%s6857_s1 + $0x4a0] ss:$16 sps:$4 sm:$0xff]  }
  0x47   :  { %3216 = vmatpush1.bf16.msra.mxu0 %v4546_v9  ;;  %3544 = vmatpush1.bf16.msra.mxu1 %v4549_v10  ;;  %v4641_v9 = vld [vmem:[%s6857_s1 + $0x408] ss:$16 sps:$4 sm:$0xff]   ;;  %v4646_v10 = vld [vmem:[%s6857_s1 + $0x424] ss:$16 sps:$4 sm:$0xff]  }
  0x48   :  { %3217 = vmatprep.subr.bf16.mxu0 %v4554_v11  ;;  %3545 = vmatprep.subr.bf16.mxu1 %v4557_v12  ;;  %v5660_v11 = vld [vmem:[%s6858_s0 + $0x10] sm:$0xff]  ;;  %v4649_v12 = vld [vmem:[%s6857_s1 + $0x42c] ss:$16 sps:$4 sm:$0xff]  }
  0x4b   :  { %3218 = vmatpush1.bf16.msra.mxu0 %v4552_v13  ;;  %3546 = vmatpush1.bf16.msra.mxu1 %v4555_v14  ;;  %v3855_v13 = vcombine.high %v5660_v11, %v5660_v11  ;;  %v4644_v14 = vld [vmem:[%s6857_s1 + $0x420] ss:$16 sps:$4 sm:$0xff]  }
  0x4c   :  { %3219 = vmatprep.subr.bf16.mxu0 %v4560_v15  ;;  %3547 = vmatprep.subr.bf16.mxu1 %v4563_v16  ;;  %v4647_v15 = vld [vmem:[%s6857_s1 + $0x428] ss:$16 sps:$4 sm:$0xff]   ;;  %v4652_v16 = vld [vmem:[%s6857_s1 + $0x444] ss:$16 sps:$4 sm:$0xff]  }
  0x4f   :  { %3220 = vmatpush1.bf16.msra.mxu0 %v4558_v17  ;;  %3548 = vmatpush1.bf16.msra.mxu1 %v4561_v18  ;;  %v4655_v17 = vld [vmem:[%s6857_s1 + $0x44c] ss:$16 sps:$4 sm:$0xff]   ;;  %v4650_v18 = vld [vmem:[%s6857_s1 + $0x440] ss:$16 sps:$4 sm:$0xff]  }
  0x50   :  { %3221 = vmatprep.subr.bf16.mxu0 %v4566_v19  ;;  %3549 = vmatprep.subr.bf16.mxu1 %v4569_v20  ;;  %v4653_v19 = vld [vmem:[%s6857_s1 + $0x448] ss:$16 sps:$4 sm:$0xff]   ;;  %v4658_v20 = vld [vmem:[%s6857_s1 + $0x464] ss:$16 sps:$4 sm:$0xff]  }
  0x53   :  { %3222 = vmatpush1.bf16.msra.mxu0 %v4564_v21  ;;  %3550 = vmatpush1.bf16.msra.mxu1 %v4567_v22  ;;  %v4661_v21 = vld [vmem:[%s6857_s1 + $0x46c] ss:$16 sps:$4 sm:$0xff]   ;;  %v4656_v22 = vld [vmem:[%s6857_s1 + $0x460] ss:$16 sps:$4 sm:$0xff]  }
  0x54   :  { %3223 = vmatprep.subr.bf16.mxu0 %v4572_v23  ;;  %3551 = vmatprep.subr.bf16.mxu1 %v4575_v24  ;;  %v4659_v23 = vld [vmem:[%s6857_s1 + $0x468] ss:$16 sps:$4 sm:$0xff]   ;;  %v4664_v24 = vld [vmem:[%s6857_s1 + $0x484] ss:$16 sps:$4 sm:$0xff]  }
  0x57   :  { %3224 = vmatpush1.bf16.msra.mxu0 %v4570_v25  ;;  %3552 = vmatpush1.bf16.msra.mxu1 %v4573_v26  ;;  %v4667_v25 = vld [vmem:[%s6857_s1 + $0x48c] ss:$16 sps:$4 sm:$0xff]   ;;  %v4662_v26 = vld [vmem:[%s6857_s1 + $0x480] ss:$16 sps:$4 sm:$0xff]  }
  0x58   :  { %3225 = vmatprep.subr.bf16.mxu0 %v4578_v27  ;;  %3553 = vmatprep.subr.bf16.mxu1 %v4581_v28  ;;  %v4665_v27 = vld [vmem:[%s6857_s1 + $0x488] ss:$16 sps:$4 sm:$0xff]   ;;  %v4670_v28 = vld [vmem:[%s6857_s1 + $0x4a4] ss:$16 sps:$4 sm:$0xff]  }
  0x5b   :  { %3226 = vmatpush1.bf16.msra.mxu0 %v4576_v31  ;;  %3554 = vmatpush1.bf16.msra.mxu1 %v4579_v32  ;;  %v4671_v31 = vld [vmem:[%s6857_s1 + $0x4a8] ss:$16 sps:$4 sm:$0xff]   ;;  %v4676_v32 = vld [vmem:[%s6857_s1 + $0x4c4] ss:$16 sps:$4 sm:$0xff]  }
  0x5c   :  { %3227 = vmatprep.subr.bf16.mxu0 %v4584_v33  ;;  %3555 = vmatprep.subr.bf16.mxu1 %v4587_v34  ;;  %v4679_v33 = vld [vmem:[%s6857_s1 + $0x4cc] ss:$16 sps:$4 sm:$0xff]   ;;  %v4674_v34 = vld [vmem:[%s6857_s1 + $0x4c0] ss:$16 sps:$4 sm:$0xff]  }
  0x5f   :  { %3228 = vmatpush1.bf16.msra.mxu0 %v4582_v35  ;;  %3556 = vmatpush1.bf16.msra.mxu1 %v4585_v36  ;;  %v4677_v35 = vld [vmem:[%s6857_s1 + $0x4c8] ss:$16 sps:$4 sm:$0xff]   ;;  %v4682_v36 = vld [vmem:[%s6857_s1 + $0x4e4] ss:$16 sps:$4 sm:$0xff]  }
  0x60   :  { %3229 = vmatprep.subr.bf16.mxu0 %v4590_v37  ;;  %3557 = vmatprep.subr.bf16.mxu1 %v4593_v38  ;;  %v4685_v37 = vld [vmem:[%s6857_s1 + $0x4ec] ss:$16 sps:$4 sm:$0xff]   ;;  %v4680_v38 = vld [vmem:[%s6857_s1 + $0x4e0] ss:$16 sps:$4 sm:$0xff]  }
  0x63   :  { %3230 = vmatpush1.bf16.msra.mxu0 %v4588_v39  ;;  %3558 = vmatpush1.bf16.msra.mxu1 %v4591_v40  ;;  %v4683_v39 = vld [vmem:[%s6857_s1 + $0x4e8] ss:$16 sps:$4 sm:$0xff]   ;;  %v4688_v40 = vld [vmem:[%s6857_s1 + $0x504] ss:$16 sps:$4 sm:$0xff]  }
  0x64   :  { %3231 = vmatprep.subr.bf16.mxu0 %v4596_v41  ;;  %3559 = vmatprep.subr.bf16.mxu1 %v4599_v42  ;;  %v4691_v41 = vld [vmem:[%s6857_s1 + $0x50c] ss:$16 sps:$4 sm:$0xff]   ;;  %v4686_v42 = vld [vmem:[%s6857_s1 + $0x500] ss:$16 sps:$4 sm:$0xff]  }
  0x67   :  { %3232 = vmatpush1.bf16.msra.mxu0 %v4594_v43  ;;  %3560 = vmatpush1.bf16.msra.mxu1 %v4597_v44  ;;  %v4689_v43 = vld [vmem:[%s6857_s1 + $0x508] ss:$16 sps:$4 sm:$0xff]   ;;  %v4694_v44 = vld [vmem:[%s6857_s1 + $0x524] ss:$16 sps:$4 sm:$0xff]  }
  0x68   :  { %3233 = vmatprep.subr.bf16.mxu0 %v4602_v45  ;;  %3561 = vmatprep.subr.bf16.mxu1 %v4605_v46  ;;  %v4697_v45 = vld [vmem:[%s6857_s1 + $0x52c] ss:$16 sps:$4 sm:$0xff]   ;;  %v4692_v46 = vld [vmem:[%s6857_s1 + $0x520] ss:$16 sps:$4 sm:$0xff]  }
  0x6b   :  { %3234 = vmatpush1.bf16.msra.mxu0 %v4600_v47  ;;  %3562 = vmatpush1.bf16.msra.mxu1 %v4603_v48  ;;  %v4695_v47 = vld [vmem:[%s6857_s1 + $0x528] ss:$16 sps:$4 sm:$0xff]   ;;  %v4700_v48 = vld [vmem:[%s6857_s1 + $0x544] ss:$16 sps:$4 sm:$0xff]  }
  0x6c   :  { %3235 = vmatprep.subr.bf16.mxu0 %v4608_v49  ;;  %3563 = vmatprep.subr.bf16.mxu1 %v4611_v50  ;;  %v4703_v49 = vld [vmem:[%s6857_s1 + $0x54c] ss:$16 sps:$4 sm:$0xff]   ;;  %v4698_v50 = vld [vmem:[%s6857_s1 + $0x540] ss:$16 sps:$4 sm:$0xff]  }
  0x6f   :  { %3236 = vmatpush1.bf16.msra.mxu0 %v4606_v51  ;;  %3564 = vmatpush1.bf16.msra.mxu1 %v4609_v52  ;;  %v4701_v51 = vld [vmem:[%s6857_s1 + $0x548] ss:$16 sps:$4 sm:$0xff]   ;;  %v4706_v52 = vld [vmem:[%s6857_s1 + $0x564] ss:$16 sps:$4 sm:$0xff]  }
  0x70   :  { %3237 = vmatprep.subr.bf16.mxu0 %v4614_v53  ;;  %3565 = vmatprep.subr.bf16.mxu1 %v4617_v54  ;;  %v4709_v53 = vld [vmem:[%s6857_s1 + $0x56c] ss:$16 sps:$4 sm:$0xff]   ;;  %v4704_v54 = vld [vmem:[%s6857_s1 + $0x560] ss:$16 sps:$4 sm:$0xff]  }
  0x73   :  { %3238 = vmatpush1.bf16.msra.mxu0 %v4612_v55  ;;  %3566 = vmatpush1.bf16.msra.mxu1 %v4615_v56  ;;  %v4707_v55 = vld [vmem:[%s6857_s1 + $0x568] ss:$16 sps:$4 sm:$0xff]   ;;  %v4712_v56 = vld [vmem:[%s6857_s1 + $0x584] ss:$16 sps:$4 sm:$0xff]  }
  0x74   :  { %3239 = vmatprep.subr.bf16.mxu0 %v4620_v57  ;;  %3567 = vmatprep.subr.bf16.mxu1 %v4623_v58  ;;  %v4715_v57 = vld [vmem:[%s6857_s1 + $0x58c] ss:$16 sps:$4 sm:$0xff]   ;;  %v4710_v58 = vld [vmem:[%s6857_s1 + $0x580] ss:$16 sps:$4 sm:$0xff]  }
  0x77   :  { %3240 = vmatpush1.bf16.msra.mxu0 %v4618_v59  ;;  %3568 = vmatpush1.bf16.msra.mxu1 %v4621_v60  ;;  %v4713_v59 = vld [vmem:[%s6857_s1 + $0x588] ss:$16 sps:$4 sm:$0xff]   ;;  %v4718_v60 = vld [vmem:[%s6857_s1 + $0x5a4] ss:$16 sps:$4 sm:$0xff]  }
  0x78   :  { %3241 = vmatprep.subr.bf16.mxu0 %v4626_v61  ;;  %3569 = vmatprep.subr.bf16.mxu1 %v4629_v62  ;;  %v4721_v61 = vld [vmem:[%s6857_s1 + $0x5ac] ss:$16 sps:$4 sm:$0xff]   ;;  %v4716_v62 = vld [vmem:[%s6857_s1 + $0x5a0] ss:$16 sps:$4 sm:$0xff]  }
  0x7b   :  { %3242 = vmatpush1.bf16.msra.mxu0 %v4624_v63  ;;  %3570 = vmatpush1.bf16.msra.mxu1 %v4627_v0  ;;  %v4719_v63 = vld [vmem:[%s6857_s1 + $0x5a8] ss:$16 sps:$4 sm:$0xff]   ;;  %v4724_v0 = vld [vmem:[%s6857_s1 + $0x5c4] ss:$16 sps:$4 sm:$0xff]  }
  0x7c   :  { %3243 = vmatprep.subr.bf16.mxu0 %v4632_v1  ;;  %3571 = vmatprep.subr.bf16.mxu1 %v4635_v2  ;;  %v4727_v1 = vld [vmem:[%s6857_s1 + $0x5cc] ss:$16 sps:$4 sm:$0xff]   ;;  %v4722_v2 = vld [vmem:[%s6857_s1 + $0x5c0] ss:$16 sps:$4 sm:$0xff]  }
  0x7f   :  { %3244 = vmatpush1.bf16.msra.mxu0 %v4630_v3  ;;  %3572 = vmatpush1.bf16.msra.mxu1 %v4633_v4  ;;  %v4725_v3 = vld [vmem:[%s6857_s1 + $0x5c8] ss:$16 sps:$4 sm:$0xff]   ;;  %v4730_v4 = vld [vmem:[%s6857_s1 + $0x5e4] ss:$16 sps:$4 sm:$0xff]  }
  0x80   :  { %3254 = vmatprep.subr.bf16.mxu0 %v4640_v5  ;;  %3582 = vmatprep.subr.bf16.mxu1 %v4643_v6  ;;  %v4733_v5 = vld [vmem:[%s6857_s1 + $0x5ec] ss:$16 sps:$4 sm:$0xff]   ;;  %v4728_v6 = vld [vmem:[%s6857_s1 + $0x5e0] ss:$16 sps:$4 sm:$0xff]  }
  0x82   :  { %3246 = vmatmul.mubr.bf16.vlgmr.msra.gmra.mrb[0].mxu0 %v3852_v7  ;;  %3574 = vmatmul.mubr.bf16.vlgmr.msra.gmra.mrb[0].mxu1 %v3852_v7  ;;  %v4731_v7 = vld [vmem:[%s6857_s1 + $0x5e8] ss:$16 sps:$4 sm:$0xff]  }
  0x83   :  { %3255 = vmatpush1.bf16.msra.mxu0 %v4638_v8  ;;  %3583 = vmatpush1.bf16.msra.mxu1 %v4641_v9  ;;  %v4738_v8 = vld [vmem:[%s6857_s1 + $0x604] ss:$16 sps:$4 sm:$0xff]   ;;  %v4741_v9 = vld [vmem:[%s6857_s1 + $0x60c] ss:$16 sps:$4 sm:$0xff]  }
  0x84   :  { %3256 = vmatprep.subr.bf16.mxu0 %v4646_v10  ;;  %3584 = vmatprep.subr.bf16.mxu1 %v4649_v12  ;;  %v4736_v10 = vld [vmem:[%s6857_s1 + $0x600] ss:$16 sps:$4 sm:$0xff]   ;;  %v3854_v12 = vcombine.low %v5660_v11, %v5660_v11  ;;  %v4747_v11 = vld [vmem:[%s6857_s1 + $0x62c] ss:$16 sps:$4 sm:$0xff]  }
  0x85   :  { %3286 = vmatprep.mubr.bf16.mxu0 %v3855_v13  ;;  %3614 = vmatprep.mubr.bf16.mxu1 %v3855_v13  ;;  %v4739_v13 = vld [vmem:[%s6857_s1 + $0x608] ss:$16 sps:$4 sm:$0xff]  }
  0x87   :  { %3257 = vmatpush1.bf16.msra.mxu0 %v4644_v14  ;;  %3585 = vmatpush1.bf16.msra.mxu1 %v4647_v15  ;;  %v5858_v14 = vld [vmem:[%s6858_s0 + $0x18] sm:$0xff]  ;;  %v4744_v15 = vld [vmem:[%s6857_s1 + $0x624] ss:$16 sps:$4 sm:$0xff]  }
  0x88   :  { %3258 = vmatprep.subr.bf16.mxu0 %v4652_v16  ;;  %3586 = vmatprep.subr.bf16.mxu1 %v4655_v17  ;;  %v3857_v16 = vcombine.high %v5858_v14, %v5858_v14  ;;  %v4742_v17 = vld [vmem:[%s6857_s1 + $0x620] ss:$16 sps:$4 sm:$0xff]  }
  0x8b   :  { %3259 = vmatpush1.bf16.msra.mxu0 %v4650_v18  ;;  %3587 = vmatpush1.bf16.msra.mxu1 %v4653_v19  ;;  %v4745_v18 = vld [vmem:[%s6857_s1 + $0x628] ss:$16 sps:$4 sm:$0xff]   ;;  %v4750_v19 = vld [vmem:[%s6857_s1 + $0x644] ss:$16 sps:$4 sm:$0xff]  }
  0x8c   :  { %3260 = vmatprep.subr.bf16.mxu0 %v4658_v20  ;;  %3588 = vmatprep.subr.bf16.mxu1 %v4661_v21  ;;  %v4753_v20 = vld [vmem:[%s6857_s1 + $0x64c] ss:$16 sps:$4 sm:$0xff]   ;;  %v4748_v21 = vld [vmem:[%s6857_s1 + $0x640] ss:$16 sps:$4 sm:$0xff]  }
  0x8f   :  { %3261 = vmatpush1.bf16.msra.mxu0 %v4656_v22  ;;  %3589 = vmatpush1.bf16.msra.mxu1 %v4659_v23  ;;  %v4751_v22 = vld [vmem:[%s6857_s1 + $0x648] ss:$16 sps:$4 sm:$0xff]   ;;  %v4756_v23 = vld [vmem:[%s6857_s1 + $0x664] ss:$16 sps:$4 sm:$0xff]  }
  0x90   :  { %3262 = vmatprep.subr.bf16.mxu0 %v4664_v24  ;;  %3590 = vmatprep.subr.bf16.mxu1 %v4667_v25  ;;  %v4759_v24 = vld [vmem:[%s6857_s1 + $0x66c] ss:$16 sps:$4 sm:$0xff]   ;;  %v4754_v25 = vld [vmem:[%s6857_s1 + $0x660] ss:$16 sps:$4 sm:$0xff]  }
  0x93   :  { %3263 = vmatpush1.bf16.msra.mxu0 %v4662_v26  ;;  %3591 = vmatpush1.bf16.msra.mxu1 %v4665_v27  ;;  %v4757_v26 = vld [vmem:[%s6857_s1 + $0x668] ss:$16 sps:$4 sm:$0xff]   ;;  %v4762_v27 = vld [vmem:[%s6857_s1 + $0x684] ss:$16 sps:$4 sm:$0xff]  }
  0x94   :  { %3264 = vmatprep.subr.bf16.mxu0 %v4670_v28  ;;  %3592 = vmatprep.subr.bf16.mxu1 %v4673_v29  ;;  %v4765_v28 = vld [vmem:[%s6857_s1 + $0x68c] ss:$16 sps:$4 sm:$0xff]   ;;  %v4760_v29 = vld [vmem:[%s6857_s1 + $0x680] ss:$16 sps:$4 sm:$0xff]  }
  0x97   :  { %3265 = vmatpush1.bf16.msra.mxu0 %v4668_v30  ;;  %3593 = vmatpush1.bf16.msra.mxu1 %v4671_v31  ;;  %v4763_v30 = vld [vmem:[%s6857_s1 + $0x688] ss:$16 sps:$4 sm:$0xff]   ;;  %v4768_v31 = vld [vmem:[%s6857_s1 + $0x6a4] ss:$16 sps:$4 sm:$0xff]  }
  0x98   :  { %3266 = vmatprep.subr.bf16.mxu0 %v4676_v32  ;;  %3594 = vmatprep.subr.bf16.mxu1 %v4679_v33  ;;  %v4771_v32 = vld [vmem:[%s6857_s1 + $0x6ac] ss:$16 sps:$4 sm:$0xff]   ;;  %v4766_v33 = vld [vmem:[%s6857_s1 + $0x6a0] ss:$16 sps:$4 sm:$0xff]  }
  0x9b   :  { %3267 = vmatpush1.bf16.msra.mxu0 %v4674_v34  ;;  %3595 = vmatpush1.bf16.msra.mxu1 %v4677_v35  ;;  %v4769_v34 = vld [vmem:[%s6857_s1 + $0x6a8] ss:$16 sps:$4 sm:$0xff]   ;;  %v4774_v35 = vld [vmem:[%s6857_s1 + $0x6c4] ss:$16 sps:$4 sm:$0xff]  }
  0x9c   :  { %3268 = vmatprep.subr.bf16.mxu0 %v4682_v36  ;;  %3596 = vmatprep.subr.bf16.mxu1 %v4685_v37  ;;  %v4777_v36 = vld [vmem:[%s6857_s1 + $0x6cc] ss:$16 sps:$4 sm:$0xff]   ;;  %v4772_v37 = vld [vmem:[%s6857_s1 + $0x6c0] ss:$16 sps:$4 sm:$0xff]  }
  0x9f   :  { %3269 = vmatpush1.bf16.msra.mxu0 %v4680_v38  ;;  %3597 = vmatpush1.bf16.msra.mxu1 %v4683_v39  ;;  %v4775_v38 = vld [vmem:[%s6857_s1 + $0x6c8] ss:$16 sps:$4 sm:$0xff]   ;;  %v4780_v39 = vld [vmem:[%s6857_s1 + $0x6e4] ss:$16 sps:$4 sm:$0xff]  }
  0xa0   :  { %3270 = vmatprep.subr.bf16.mxu0 %v4688_v40  ;;  %3598 = vmatprep.subr.bf16.mxu1 %v4691_v41  ;;  %v4783_v40 = vld [vmem:[%s6857_s1 + $0x6ec] ss:$16 sps:$4 sm:$0xff]   ;;  %v4778_v41 = vld [vmem:[%s6857_s1 + $0x6e0] ss:$16 sps:$4 sm:$0xff]  }
  0xa3   :  { %3271 = vmatpush1.bf16.msra.mxu0 %v4686_v42  ;;  %3599 = vmatpush1.bf16.msra.mxu1 %v4689_v43  ;;  %v4781_v42 = vld [vmem:[%s6857_s1 + $0x6e8] ss:$16 sps:$4 sm:$0xff]   ;;  %v4786_v43 = vld [vmem:[%s6857_s1 + $0x704] ss:$16 sps:$4 sm:$0xff]  }
  0xa4   :  { %3272 = vmatprep.subr.bf16.mxu0 %v4694_v44  ;;  %3600 = vmatprep.subr.bf16.mxu1 %v4697_v45  ;;  %v4789_v44 = vld [vmem:[%s6857_s1 + $0x70c] ss:$16 sps:$4 sm:$0xff]   ;;  %v4784_v45 = vld [vmem:[%s6857_s1 + $0x700] ss:$16 sps:$4 sm:$0xff]  }
  0xa7   :  { %3273 = vmatpush1.bf16.msra.mxu0 %v4692_v46  ;;  %3601 = vmatpush1.bf16.msra.mxu1 %v4695_v47  ;;  %v4787_v46 = vld [vmem:[%s6857_s1 + $0x708] ss:$16 sps:$4 sm:$0xff]   ;;  %v4792_v47 = vld [vmem:[%s6857_s1 + $0x724] ss:$16 sps:$4 sm:$0xff]  }
  0xa8   :  { %3274 = vmatprep.subr.bf16.mxu0 %v4700_v48  ;;  %3602 = vmatprep.subr.bf16.mxu1 %v4703_v49  ;;  %v4795_v48 = vld [vmem:[%s6857_s1 + $0x72c] ss:$16 sps:$4 sm:$0xff]   ;;  %v4790_v49 = vld [vmem:[%s6857_s1 + $0x720] ss:$16 sps:$4 sm:$0xff]  }
  0xab   :  { %3275 = vmatpush1.bf16.msra.mxu0 %v4698_v50  ;;  %3603 = vmatpush1.bf16.msra.mxu1 %v4701_v51  ;;  %v4793_v50 = vld [vmem:[%s6857_s1 + $0x728] ss:$16 sps:$4 sm:$0xff]   ;;  %v4798_v51 = vld [vmem:[%s6857_s1 + $0x744] ss:$16 sps:$4 sm:$0xff]  }
  0xac   :  { %3276 = vmatprep.subr.bf16.mxu0 %v4706_v52  ;;  %3604 = vmatprep.subr.bf16.mxu1 %v4709_v53  ;;  %v4801_v52 = vld [vmem:[%s6857_s1 + $0x74c] ss:$16 sps:$4 sm:$0xff]   ;;  %v4796_v53 = vld [vmem:[%s6857_s1 + $0x740] ss:$16 sps:$4 sm:$0xff]  }
  0xaf   :  { %3277 = vmatpush1.bf16.msra.mxu0 %v4704_v54  ;;  %3605 = vmatpush1.bf16.msra.mxu1 %v4707_v55  ;;  %v4799_v54 = vld [vmem:[%s6857_s1 + $0x748] ss:$16 sps:$4 sm:$0xff]   ;;  %v4804_v55 = vld [vmem:[%s6857_s1 + $0x764] ss:$16 sps:$4 sm:$0xff]  }
  0xb0   :  { %3278 = vmatprep.subr.bf16.mxu0 %v4712_v56  ;;  %3606 = vmatprep.subr.bf16.mxu1 %v4715_v57  ;;  %v4807_v56 = vld [vmem:[%s6857_s1 + $0x76c] ss:$16 sps:$4 sm:$0xff]   ;;  %v4802_v57 = vld [vmem:[%s6857_s1 + $0x760] ss:$16 sps:$4 sm:$0xff]  }
  0xb3   :  { %3279 = vmatpush1.bf16.msra.mxu0 %v4710_v58  ;;  %3607 = vmatpush1.bf16.msra.mxu1 %v4713_v59  ;;  %v4805_v58 = vld [vmem:[%s6857_s1 + $0x768] ss:$16 sps:$4 sm:$0xff]   ;;  %v4810_v59 = vld [vmem:[%s6857_s1 + $0x784] ss:$16 sps:$4 sm:$0xff]  }
  0xb4   :  { %3280 = vmatprep.subr.bf16.mxu0 %v4718_v60  ;;  %3608 = vmatprep.subr.bf16.mxu1 %v4721_v61  ;;  %v4813_v60 = vld [vmem:[%s6857_s1 + $0x78c] ss:$16 sps:$4 sm:$0xff]   ;;  %v4808_v61 = vld [vmem:[%s6857_s1 + $0x780] ss:$16 sps:$4 sm:$0xff]  }
  0xb7   :  { %3281 = vmatpush1.bf16.msra.mxu0 %v4716_v62  ;;  %3609 = vmatpush1.bf16.msra.mxu1 %v4719_v63  ;;  %v4811_v62 = vld [vmem:[%s6857_s1 + $0x788] ss:$16 sps:$4 sm:$0xff]   ;;  %v4816_v63 = vld [vmem:[%s6857_s1 + $0x7a4] ss:$16 sps:$4 sm:$0xff]  }
  0xb8   :  { %3282 = vmatprep.subr.bf16.mxu0 %v4724_v0  ;;  %3610 = vmatprep.subr.bf16.mxu1 %v4727_v1  ;;  %v4819_v0 = vld [vmem:[%s6857_s1 + $0x7ac] ss:$16 sps:$4 sm:$0xff]   ;;  %v4814_v1 = vld [vmem:[%s6857_s1 + $0x7a0] ss:$16 sps:$4 sm:$0xff]  }
  0xbb   :  { %3283 = vmatpush1.bf16.msra.mxu0 %v4722_v2  ;;  %3611 = vmatpush1.bf16.msra.mxu1 %v4725_v3  ;;  %v4817_v2 = vld [vmem:[%s6857_s1 + $0x7a8] ss:$16 sps:$4 sm:$0xff]   ;;  %v4822_v3 = vld [vmem:[%s6857_s1 + $0x7c4] ss:$16 sps:$4 sm:$0xff]  }
  0xbc   :  { %3284 = vmatprep.subr.bf16.mxu0 %v4730_v4  ;;  %3612 = vmatprep.subr.bf16.mxu1 %v4733_v5  ;;  %v4825_v4 = vld [vmem:[%s6857_s1 + $0x7cc] ss:$16 sps:$4 sm:$0xff]   ;;  %v4820_v5 = vld [vmem:[%s6857_s1 + $0x7c0] ss:$16 sps:$4 sm:$0xff]  }
  0xbf   :  { %3285 = vmatpush1.bf16.msra.mxu0 %v4728_v6  ;;  %3613 = vmatpush1.bf16.msra.mxu1 %v4731_v7  ;;  %v4823_v6 = vld [vmem:[%s6857_s1 + $0x7c8] ss:$16 sps:$4 sm:$0xff]   ;;  %v4828_v7 = vld [vmem:[%s6857_s1 + $0x7e4] ss:$16 sps:$4 sm:$0xff]  }
  0xc0   :  { %3295 = vmatprep.subr.bf16.mxu0 %v4738_v8  ;;  %3623 = vmatprep.subr.bf16.mxu1 %v4741_v9  ;;  %v4831_v8 = vld [vmem:[%s6857_s1 + $0x7ec] ss:$16 sps:$4 sm:$0xff]   ;;  %v4826_v9 = vld [vmem:[%s6857_s1 + $0x7e0] ss:$16 sps:$4 sm:$0xff]  }
  0xc2   :  { %3287 = vmatmul.mubr.bf16.vlgmr.msra.gmra.mrb[0].mxu0 %v3854_v12  ;;  %3615 = vmatmul.mubr.bf16.vlgmr.msra.gmra.mrb[0].mxu1 %v3854_v12  ;;  %v4836_v12 = vld [vmem:[%s6857_s1 + $0x804] ss:$16 sps:$4 sm:$0xff]  }
  0xc3   :  { %3296 = vmatpush1.bf16.msra.mxu0 %v4736_v10  ;;  %3624 = vmatpush1.bf16.msra.mxu1 %v4739_v13  ;;  %v4829_v10 = vld [vmem:[%s6857_s1 + $0x7e8] ss:$16 sps:$4 sm:$0xff]   ;;  %v4839_v13 = vld [vmem:[%s6857_s1 + $0x80c] ss:$16 sps:$4 sm:$0xff]  }
  0xc4   :  { %3297 = vmatprep.subr.bf16.mxu0 %v4744_v15  ;;  %3625 = vmatprep.subr.bf16.mxu1 %v4747_v11  ;;  %v4834_v15 = vld [vmem:[%s6857_s1 + $0x800] ss:$16 sps:$4 sm:$0xff]   ;;  %v3856_v11 = vcombine.low %v5858_v14, %v5858_v14  ;;  %v4845_v14 = vld [vmem:[%s6857_s1 + $0x82c] ss:$16 sps:$4 sm:$0xff]  }
  0xc5   :  { %3327 = vmatprep.mubr.bf16.mxu0 %v3857_v16  ;;  %3655 = vmatprep.mubr.bf16.mxu1 %v3857_v16  ;;  %v6056_v16 = vld [vmem:[%s6858_s0 + $0x20] sm:$0xff] }
  0xc7   :  { %3298 = vmatpush1.bf16.msra.mxu0 %v4742_v17  ;;  %3626 = vmatpush1.bf16.msra.mxu1 %v4745_v18  ;;  %v4837_v17 = vld [vmem:[%s6857_s1 + $0x808] ss:$16 sps:$4 sm:$0xff]   ;;  %v4842_v18 = vld [vmem:[%s6857_s1 + $0x824] ss:$16 sps:$4 sm:$0xff]  }
  0xc8   :  { %3299 = vmatprep.subr.bf16.mxu0 %v4750_v19  ;;  %3627 = vmatprep.subr.bf16.mxu1 %v4753_v20  ;;  %v3859_v19 = vcombine.high %v6056_v16, %v6056_v16  ;;  %v4840_v20 = vld [vmem:[%s6857_s1 + $0x820] ss:$16 sps:$4 sm:$0xff]  }
  0xcb   :  { %3300 = vmatpush1.bf16.msra.mxu0 %v4748_v21  ;;  %3628 = vmatpush1.bf16.msra.mxu1 %v4751_v22  ;;  %v4843_v21 = vld [vmem:[%s6857_s1 + $0x828] ss:$16 sps:$4 sm:$0xff]   ;;  %v4848_v22 = vld [vmem:[%s6857_s1 + $0x844] ss:$16 sps:$4 sm:$0xff]  }
  0xcc   :  { %3301 = vmatprep.subr.bf16.mxu0 %v4756_v23  ;;  %3629 = vmatprep.subr.bf16.mxu1 %v4759_v24  ;;  %v4851_v23 = vld [vmem:[%s6857_s1 + $0x84c] ss:$16 sps:$4 sm:$0xff]   ;;  %v4846_v24 = vld [vmem:[%s6857_s1 + $0x840] ss:$16 sps:$4 sm:$0xff]  }
  0xcf   :  { %3302 = vmatpush1.bf16.msra.mxu0 %v4754_v25  ;;  %3630 = vmatpush1.bf16.msra.mxu1 %v4757_v26  ;;  %v4849_v25 = vld [vmem:[%s6857_s1 + $0x848] ss:$16 sps:$4 sm:$0xff]   ;;  %v4854_v26 = vld [vmem:[%s6857_s1 + $0x864] ss:$16 sps:$4 sm:$0xff]  }
  0xd0   :  { %3303 = vmatprep.subr.bf16.mxu0 %v4762_v27  ;;  %3631 = vmatprep.subr.bf16.mxu1 %v4765_v28  ;;  %v4857_v27 = vld [vmem:[%s6857_s1 + $0x86c] ss:$16 sps:$4 sm:$0xff]   ;;  %v4852_v28 = vld [vmem:[%s6857_s1 + $0x860] ss:$16 sps:$4 sm:$0xff]  }
  0xd3   :  { %3304 = vmatpush1.bf16.msra.mxu0 %v4760_v29  ;;  %3632 = vmatpush1.bf16.msra.mxu1 %v4763_v30  ;;  %v4855_v29 = vld [vmem:[%s6857_s1 + $0x868] ss:$16 sps:$4 sm:$0xff]   ;;  %v4860_v30 = vld [vmem:[%s6857_s1 + $0x884] ss:$16 sps:$4 sm:$0xff]  }
  0xd4   :  { %3305 = vmatprep.subr.bf16.mxu0 %v4768_v31  ;;  %3633 = vmatprep.subr.bf16.mxu1 %v4771_v32  ;;  %v4863_v31 = vld [vmem:[%s6857_s1 + $0x88c] ss:$16 sps:$4 sm:$0xff]   ;;  %v4858_v32 = vld [vmem:[%s6857_s1 + $0x880] ss:$16 sps:$4 sm:$0xff]  }
  0xd7   :  { %3306 = vmatpush1.bf16.msra.mxu0 %v4766_v33  ;;  %3634 = vmatpush1.bf16.msra.mxu1 %v4769_v34  ;;  %v4861_v33 = vld [vmem:[%s6857_s1 + $0x888] ss:$16 sps:$4 sm:$0xff]   ;;  %v4866_v34 = vld [vmem:[%s6857_s1 + $0x8a4] ss:$16 sps:$4 sm:$0xff]  }
  0xd8   :  { %3307 = vmatprep.subr.bf16.mxu0 %v4774_v35  ;;  %3635 = vmatprep.subr.bf16.mxu1 %v4777_v36  ;;  %v4869_v35 = vld [vmem:[%s6857_s1 + $0x8ac] ss:$16 sps:$4 sm:$0xff]   ;;  %v4864_v36 = vld [vmem:[%s6857_s1 + $0x8a0] ss:$16 sps:$4 sm:$0xff]  }
  0xdb   :  { %3308 = vmatpush1.bf16.msra.mxu0 %v4772_v37  ;;  %3636 = vmatpush1.bf16.msra.mxu1 %v4775_v38  ;;  %v4867_v37 = vld [vmem:[%s6857_s1 + $0x8a8] ss:$16 sps:$4 sm:$0xff]   ;;  %v4872_v38 = vld [vmem:[%s6857_s1 + $0x8c4] ss:$16 sps:$4 sm:$0xff]  }
  0xdc   :  { %3309 = vmatprep.subr.bf16.mxu0 %v4780_v39  ;;  %3637 = vmatprep.subr.bf16.mxu1 %v4783_v40  ;;  %v4875_v39 = vld [vmem:[%s6857_s1 + $0x8cc] ss:$16 sps:$4 sm:$0xff]   ;;  %v4870_v40 = vld [vmem:[%s6857_s1 + $0x8c0] ss:$16 sps:$4 sm:$0xff]  }
  0xdf   :  { %3310 = vmatpush1.bf16.msra.mxu0 %v4778_v41  ;;  %3638 = vmatpush1.bf16.msra.mxu1 %v4781_v42  ;;  %v4873_v41 = vld [vmem:[%s6857_s1 + $0x8c8] ss:$16 sps:$4 sm:$0xff]   ;;  %v4878_v42 = vld [vmem:[%s6857_s1 + $0x8e4] ss:$16 sps:$4 sm:$0xff]  }
  0xe0   :  { %3311 = vmatprep.subr.bf16.mxu0 %v4786_v43  ;;  %3639 = vmatprep.subr.bf16.mxu1 %v4789_v44  ;;  %v4881_v43 = vld [vmem:[%s6857_s1 + $0x8ec] ss:$16 sps:$4 sm:$0xff]   ;;  %v4876_v44 = vld [vmem:[%s6857_s1 + $0x8e0] ss:$16 sps:$4 sm:$0xff]  }
  0xe3   :  { %3312 = vmatpush1.bf16.msra.mxu0 %v4784_v45  ;;  %3640 = vmatpush1.bf16.msra.mxu1 %v4787_v46  ;;  %v4879_v45 = vld [vmem:[%s6857_s1 + $0x8e8] ss:$16 sps:$4 sm:$0xff]   ;;  %v4884_v46 = vld [vmem:[%s6857_s1 + $0x904] ss:$16 sps:$4 sm:$0xff]  }
  0xe4   :  { %3313 = vmatprep.subr.bf16.mxu0 %v4792_v47  ;;  %3641 = vmatprep.subr.bf16.mxu1 %v4795_v48  ;;  %v4887_v47 = vld [vmem:[%s6857_s1 + $0x90c] ss:$16 sps:$4 sm:$0xff]   ;;  %v4882_v48 = vld [vmem:[%s6857_s1 + $0x900] ss:$16 sps:$4 sm:$0xff]  }
  0xe7   :  { %3314 = vmatpush1.bf16.msra.mxu0 %v4790_v49  ;;  %3642 = vmatpush1.bf16.msra.mxu1 %v4793_v50  ;;  %v4885_v49 = vld [vmem:[%s6857_s1 + $0x908] ss:$16 sps:$4 sm:$0xff]   ;;  %v4890_v50 = vld [vmem:[%s6857_s1 + $0x924] ss:$16 sps:$4 sm:$0xff]  }
  0xe8   :  { %3315 = vmatprep.subr.bf16.mxu0 %v4798_v51  ;;  %3643 = vmatprep.subr.bf16.mxu1 %v4801_v52  ;;  %v4893_v51 = vld [vmem:[%s6857_s1 + $0x92c] ss:$16 sps:$4 sm:$0xff]   ;;  %v4888_v52 = vld [vmem:[%s6857_s1 + $0x920] ss:$16 sps:$4 sm:$0xff]  }
  0xeb   :  { %3316 = vmatpush1.bf16.msra.mxu0 %v4796_v53  ;;  %3644 = vmatpush1.bf16.msra.mxu1 %v4799_v54  ;;  %v4891_v53 = vld [vmem:[%s6857_s1 + $0x928] ss:$16 sps:$4 sm:$0xff]   ;;  %v4896_v54 = vld [vmem:[%s6857_s1 + $0x944] ss:$16 sps:$4 sm:$0xff]  }
  0xec   :  { %3317 = vmatprep.subr.bf16.mxu0 %v4804_v55  ;;  %3645 = vmatprep.subr.bf16.mxu1 %v4807_v56  ;;  %v4899_v55 = vld [vmem:[%s6857_s1 + $0x94c] ss:$16 sps:$4 sm:$0xff]   ;;  %v4894_v56 = vld [vmem:[%s6857_s1 + $0x940] ss:$16 sps:$4 sm:$0xff]  }
  0xef   :  { %3318 = vmatpush1.bf16.msra.mxu0 %v4802_v57  ;;  %3646 = vmatpush1.bf16.msra.mxu1 %v4805_v58  ;;  %v4897_v57 = vld [vmem:[%s6857_s1 + $0x948] ss:$16 sps:$4 sm:$0xff]   ;;  %v4902_v58 = vld [vmem:[%s6857_s1 + $0x964] ss:$16 sps:$4 sm:$0xff]  }
  0xf0   :  { %3319 = vmatprep.subr.bf16.mxu0 %v4810_v59  ;;  %3647 = vmatprep.subr.bf16.mxu1 %v4813_v60  ;;  %v4905_v59 = vld [vmem:[%s6857_s1 + $0x96c] ss:$16 sps:$4 sm:$0xff]   ;;  %v4900_v60 = vld [vmem:[%s6857_s1 + $0x960] ss:$16 sps:$4 sm:$0xff]  }
  0xf3   :  { %3320 = vmatpush1.bf16.msra.mxu0 %v4808_v61  ;;  %3648 = vmatpush1.bf16.msra.mxu1 %v4811_v62  ;;  %v4903_v61 = vld [vmem:[%s6857_s1 + $0x968] ss:$16 sps:$4 sm:$0xff]   ;;  %v4908_v62 = vld [vmem:[%s6857_s1 + $0x984] ss:$16 sps:$4 sm:$0xff]  }
  0xf4   :  { %3321 = vmatprep.subr.bf16.mxu0 %v4816_v63  ;;  %3649 = vmatprep.subr.bf16.mxu1 %v4819_v0  ;;  %v4911_v63 = vld [vmem:[%s6857_s1 + $0x98c] ss:$16 sps:$4 sm:$0xff]   ;;  %v4906_v0 = vld [vmem:[%s6857_s1 + $0x980] ss:$16 sps:$4 sm:$0xff]  }
  0xf7   :  { %3322 = vmatpush1.bf16.msra.mxu0 %v4814_v1  ;;  %3650 = vmatpush1.bf16.msra.mxu1 %v4817_v2  ;;  %v4909_v1 = vld [vmem:[%s6857_s1 + $0x988] ss:$16 sps:$4 sm:$0xff]   ;;  %v4914_v2 = vld [vmem:[%s6857_s1 + $0x9a4] ss:$16 sps:$4 sm:$0xff]  }
  0xf8   :  { %3323 = vmatprep.subr.bf16.mxu0 %v4822_v3  ;;  %3651 = vmatprep.subr.bf16.mxu1 %v4825_v4  ;;  %v4917_v3 = vld [vmem:[%s6857_s1 + $0x9ac] ss:$16 sps:$4 sm:$0xff]   ;;  %v4912_v4 = vld [vmem:[%s6857_s1 + $0x9a0] ss:$16 sps:$4 sm:$0xff]  }
  0xfb   :  { %3324 = vmatpush1.bf16.msra.mxu0 %v4820_v5  ;;  %3652 = vmatpush1.bf16.msra.mxu1 %v4823_v6  ;;  %v4915_v5 = vld [vmem:[%s6857_s1 + $0x9a8] ss:$16 sps:$4 sm:$0xff]   ;;  %v4920_v6 = vld [vmem:[%s6857_s1 + $0x9c4] ss:$16 sps:$4 sm:$0xff]  }
  0xfc   :  { %3325 = vmatprep.subr.bf16.mxu0 %v4828_v7  ;;  %3653 = vmatprep.subr.bf16.mxu1 %v4831_v8  ;;  %v4923_v7 = vld [vmem:[%s6857_s1 + $0x9cc] ss:$16 sps:$4 sm:$0xff]   ;;  %v4918_v8 = vld [vmem:[%s6857_s1 + $0x9c0] ss:$16 sps:$4 sm:$0xff]  }
  0xff   :  { %3326 = vmatpush1.bf16.msra.mxu0 %v4826_v9  ;;  %3654 = vmatpush1.bf16.msra.mxu1 %v4829_v10  ;;  %v4921_v9 = vld [vmem:[%s6857_s1 + $0x9c8] ss:$16 sps:$4 sm:$0xff]   ;;  %v4926_v10 = vld [vmem:[%s6857_s1 + $0x9e4] ss:$16 sps:$4 sm:$0xff]  }
 0x100   :  { %3336 = vmatprep.subr.bf16.mxu0 %v4836_v12  ;;  %3664 = vmatprep.subr.bf16.mxu1 %v4839_v13  ;;  %v4929_v12 = vld [vmem:[%s6857_s1 + $0x9ec] ss:$16 sps:$4 sm:$0xff]   ;;  %v4924_v13 = vld [vmem:[%s6857_s1 + $0x9e0] ss:$16 sps:$4 sm:$0xff]  }
 0x102   :  { %3328 = vmatmul.mubr.bf16.vlgmr.msra.gmra.mrb[0].mxu0 %v3856_v11  ;;  %3656 = vmatmul.mubr.bf16.vlgmr.msra.gmra.mrb[0].mxu1 %v3856_v11  ;;  %v4934_v11 = vld [vmem:[%s6857_s1 + $0xa04] ss:$16 sps:$4 sm:$0xff]  }
 0x103   :  { %3337 = vmatpush1.bf16.msra.mxu0 %v4834_v15  ;;  %3665 = vmatpush1.bf16.msra.mxu1 %v4837_v17  ;;  %v4927_v15 = vld [vmem:[%s6857_s1 + $0x9e8] ss:$16 sps:$4 sm:$0xff]   ;;  %v4937_v17 = vld [vmem:[%s6857_s1 + $0xa0c] ss:$16 sps:$4 sm:$0xff]  }
 0x104   :  { %3338 = vmatprep.subr.bf16.mxu0 %v4842_v18  ;;  %3666 = vmatprep.subr.bf16.mxu1 %v4845_v14  ;;  %v6252_v18 = vld [vmem:[%s6858_s0 + $0x28] sm:$0xff]  ;;  %v3858_v14 = vcombine.low %v6056_v16, %v6056_v16 }
 0x105   :  { %3368 = vmatprep.mubr.bf16.mxu0 %v3859_v19  ;;  %3696 = vmatprep.mubr.bf16.mxu1 %v3859_v19  ;;  %v4932_v19 = vld [vmem:[%s6857_s1 + $0xa00] ss:$16 sps:$4 sm:$0xff]   ;;  %v4943_v16 = vld [vmem:[%s6857_s1 + $0xa2c] ss:$16 sps:$4 sm:$0xff]  }
 0x107   :  { %3339 = vmatpush1.bf16.msra.mxu0 %v4840_v20  ;;  %3667 = vmatpush1.bf16.msra.mxu1 %v4843_v21  ;;  %v4935_v20 = vld [vmem:[%s6857_s1 + $0xa08] ss:$16 sps:$4 sm:$0xff]   ;;  %v4940_v21 = vld [vmem:[%s6857_s1 + $0xa24] ss:$16 sps:$4 sm:$0xff]  }
 0x108   :  { %3340 = vmatprep.subr.bf16.mxu0 %v4848_v22  ;;  %3668 = vmatprep.subr.bf16.mxu1 %v4851_v23  ;;  %v3861_v22 = vcombine.high %v6252_v18, %v6252_v18  ;;  %v4938_v23 = vld [vmem:[%s6857_s1 + $0xa20] ss:$16 sps:$4 sm:$0xff]  }
 0x10b   :  { %3341 = vmatpush1.bf16.msra.mxu0 %v4846_v24  ;;  %3669 = vmatpush1.bf16.msra.mxu1 %v4849_v25  ;;  %v4941_v24 = vld [vmem:[%s6857_s1 + $0xa28] ss:$16 sps:$4 sm:$0xff]   ;;  %v4946_v25 = vld [vmem:[%s6857_s1 + $0xa44] ss:$16 sps:$4 sm:$0xff]  }
 0x10c   :  { %3342 = vmatprep.subr.bf16.mxu0 %v4854_v26  ;;  %3670 = vmatprep.subr.bf16.mxu1 %v4857_v27  ;;  %v4949_v26 = vld [vmem:[%s6857_s1 + $0xa4c] ss:$16 sps:$4 sm:$0xff]   ;;  %v4944_v27 = vld [vmem:[%s6857_s1 + $0xa40] ss:$16 sps:$4 sm:$0xff]  }
 0x10f   :  { %3343 = vmatpush1.bf16.msra.mxu0 %v4852_v28  ;;  %3671 = vmatpush1.bf16.msra.mxu1 %v4855_v29  ;;  %v4947_v28 = vld [vmem:[%s6857_s1 + $0xa48] ss:$16 sps:$4 sm:$0xff]   ;;  %v4952_v29 = vld [vmem:[%s6857_s1 + $0xa64] ss:$16 sps:$4 sm:$0xff]  }
 0x110   :  { %3344 = vmatprep.subr.bf16.mxu0 %v4860_v30  ;;  %3672 = vmatprep.subr.bf16.mxu1 %v4863_v31  ;;  %v4955_v30 = vld [vmem:[%s6857_s1 + $0xa6c] ss:$16 sps:$4 sm:$0xff]   ;;  %v4950_v31 = vld [vmem:[%s6857_s1 + $0xa60] ss:$16 sps:$4 sm:$0xff]  }
 0x113   :  { %3345 = vmatpush1.bf16.msra.mxu0 %v4858_v32  ;;  %3673 = vmatpush1.bf16.msra.mxu1 %v4861_v33  ;;  %v4953_v32 = vld [vmem:[%s6857_s1 + $0xa68] ss:$16 sps:$4 sm:$0xff]   ;;  %v4958_v33 = vld [vmem:[%s6857_s1 + $0xa84] ss:$16 sps:$4 sm:$0xff]  }
 0x114   :  { %3346 = vmatprep.subr.bf16.mxu0 %v4866_v34  ;;  %3674 = vmatprep.subr.bf16.mxu1 %v4869_v35  ;;  %v4961_v34 = vld [vmem:[%s6857_s1 + $0xa8c] ss:$16 sps:$4 sm:$0xff]   ;;  %v4956_v35 = vld [vmem:[%s6857_s1 + $0xa80] ss:$16 sps:$4 sm:$0xff]  }
 0x117   :  { %3347 = vmatpush1.bf16.msra.mxu0 %v4864_v36  ;;  %3675 = vmatpush1.bf16.msra.mxu1 %v4867_v37  ;;  %v4959_v36 = vld [vmem:[%s6857_s1 + $0xa88] ss:$16 sps:$4 sm:$0xff]   ;;  %v4964_v37 = vld [vmem:[%s6857_s1 + $0xaa4] ss:$16 sps:$4 sm:$0xff]  }
 0x118   :  { %3348 = vmatprep.subr.bf16.mxu0 %v4872_v38  ;;  %3676 = vmatprep.subr.bf16.mxu1 %v4875_v39  ;;  %v4967_v38 = vld [vmem:[%s6857_s1 + $0xaac] ss:$16 sps:$4 sm:$0xff]   ;;  %v4962_v39 = vld [vmem:[%s6857_s1 + $0xaa0] ss:$16 sps:$4 sm:$0xff]  }
 0x11b   :  { %3349 = vmatpush1.bf16.msra.mxu0 %v4870_v40  ;;  %3677 = vmatpush1.bf16.msra.mxu1 %v4873_v41  ;;  %v4965_v40 = vld [vmem:[%s6857_s1 + $0xaa8] ss:$16 sps:$4 sm:$0xff]   ;;  %v4970_v41 = vld [vmem:[%s6857_s1 + $0xac4] ss:$16 sps:$4 sm:$0xff]  }
 0x11c   :  { %3350 = vmatprep.subr.bf16.mxu0 %v4878_v42  ;;  %3678 = vmatprep.subr.bf16.mxu1 %v4881_v43  ;;  %v4973_v42 = vld [vmem:[%s6857_s1 + $0xacc] ss:$16 sps:$4 sm:$0xff]   ;;  %v4968_v43 = vld [vmem:[%s6857_s1 + $0xac0] ss:$16 sps:$4 sm:$0xff]  }
 0x11f   :  { %3351 = vmatpush1.bf16.msra.mxu0 %v4876_v44  ;;  %3679 = vmatpush1.bf16.msra.mxu1 %v4879_v45  ;;  %v4971_v44 = vld [vmem:[%s6857_s1 + $0xac8] ss:$16 sps:$4 sm:$0xff]   ;;  %v4976_v45 = vld [vmem:[%s6857_s1 + $0xae4] ss:$16 sps:$4 sm:$0xff]  }
 0x120   :  { %3352 = vmatprep.subr.bf16.mxu0 %v4884_v46  ;;  %3680 = vmatprep.subr.bf16.mxu1 %v4887_v47  ;;  %v4979_v46 = vld [vmem:[%s6857_s1 + $0xaec] ss:$16 sps:$4 sm:$0xff]   ;;  %v4974_v47 = vld [vmem:[%s6857_s1 + $0xae0] ss:$16 sps:$4 sm:$0xff]  }
 0x123   :  { %3353 = vmatpush1.bf16.msra.mxu0 %v4882_v48  ;;  %3681 = vmatpush1.bf16.msra.mxu1 %v4885_v49  ;;  %v4977_v48 = vld [vmem:[%s6857_s1 + $0xae8] ss:$16 sps:$4 sm:$0xff]   ;;  %v4982_v49 = vld [vmem:[%s6857_s1 + $0xb04] ss:$16 sps:$4 sm:$0xff]  }
 0x124   :  { %3354 = vmatprep.subr.bf16.mxu0 %v4890_v50  ;;  %3682 = vmatprep.subr.bf16.mxu1 %v4893_v51  ;;  %v4985_v50 = vld [vmem:[%s6857_s1 + $0xb0c] ss:$16 sps:$4 sm:$0xff]   ;;  %v4980_v51 = vld [vmem:[%s6857_s1 + $0xb00] ss:$16 sps:$4 sm:$0xff]  }
 0x127   :  { %3355 = vmatpush1.bf16.msra.mxu0 %v4888_v52  ;;  %3683 = vmatpush1.bf16.msra.mxu1 %v4891_v53  ;;  %v4983_v52 = vld [vmem:[%s6857_s1 + $0xb08] ss:$16 sps:$4 sm:$0xff]   ;;  %v4988_v53 = vld [vmem:[%s6857_s1 + $0xb24] ss:$16 sps:$4 sm:$0xff]  }
 0x128   :  { %3356 = vmatprep.subr.bf16.mxu0 %v4896_v54  ;;  %3684 = vmatprep.subr.bf16.mxu1 %v4899_v55  ;;  %v4991_v54 = vld [vmem:[%s6857_s1 + $0xb2c] ss:$16 sps:$4 sm:$0xff]   ;;  %v4986_v55 = vld [vmem:[%s6857_s1 + $0xb20] ss:$16 sps:$4 sm:$0xff]  }
 0x12b   :  { %3357 = vmatpush1.bf16.msra.mxu0 %v4894_v56  ;;  %3685 = vmatpush1.bf16.msra.mxu1 %v4897_v57  ;;  %v4989_v56 = vld [vmem:[%s6857_s1 + $0xb28] ss:$16 sps:$4 sm:$0xff]   ;;  %v4994_v57 = vld [vmem:[%s6857_s1 + $0xb44] ss:$16 sps:$4 sm:$0xff]  }
 0x12c   :  { %3358 = vmatprep.subr.bf16.mxu0 %v4902_v58  ;;  %3686 = vmatprep.subr.bf16.mxu1 %v4905_v59  ;;  %v4997_v58 = vld [vmem:[%s6857_s1 + $0xb4c] ss:$16 sps:$4 sm:$0xff]   ;;  %v4992_v59 = vld [vmem:[%s6857_s1 + $0xb40] ss:$16 sps:$4 sm:$0xff]  }
 0x12f   :  { %3359 = vmatpush1.bf16.msra.mxu0 %v4900_v60  ;;  %3687 = vmatpush1.bf16.msra.mxu1 %v4903_v61  ;;  %v4995_v60 = vld [vmem:[%s6857_s1 + $0xb48] ss:$16 sps:$4 sm:$0xff]   ;;  %v5000_v61 = vld [vmem:[%s6857_s1 + $0xb64] ss:$16 sps:$4 sm:$0xff]  }
 0x130   :  { %3360 = vmatprep.subr.bf16.mxu0 %v4908_v62  ;;  %3688 = vmatprep.subr.bf16.mxu1 %v4911_v63  ;;  %v5003_v62 = vld [vmem:[%s6857_s1 + $0xb6c] ss:$16 sps:$4 sm:$0xff]   ;;  %v4998_v63 = vld [vmem:[%s6857_s1 + $0xb60] ss:$16 sps:$4 sm:$0xff]  }
 0x133   :  { %3361 = vmatpush1.bf16.msra.mxu0 %v4906_v0  ;;  %3689 = vmatpush1.bf16.msra.mxu1 %v4909_v1  ;;  %v5001_v0 = vld [vmem:[%s6857_s1 + $0xb68] ss:$16 sps:$4 sm:$0xff]   ;;  %v5006_v1 = vld [vmem:[%s6857_s1 + $0xb84] ss:$16 sps:$4 sm:$0xff]  }
 0x134   :  { %3362 = vmatprep.subr.bf16.mxu0 %v4914_v2  ;;  %3690 = vmatprep.subr.bf16.mxu1 %v4917_v3  ;;  %v5009_v2 = vld [vmem:[%s6857_s1 + $0xb8c] ss:$16 sps:$4 sm:$0xff]   ;;  %v5004_v3 = vld [vmem:[%s6857_s1 + $0xb80] ss:$16 sps:$4 sm:$0xff]  }
 0x137   :  { %3363 = vmatpush1.bf16.msra.mxu0 %v4912_v4  ;;  %3691 = vmatpush1.bf16.msra.mxu1 %v4915_v5  ;;  %v5007_v4 = vld [vmem:[%s6857_s1 + $0xb88] ss:$16 sps:$4 sm:$0xff]   ;;  %v5012_v5 = vld [vmem:[%s6857_s1 + $0xba4] ss:$16 sps:$4 sm:$0xff]  }
 0x138   :  { %3364 = vmatprep.subr.bf16.mxu0 %v4920_v6  ;;  %3692 = vmatprep.subr.bf16.mxu1 %v4923_v7  ;;  %v5015_v6 = vld [vmem:[%s6857_s1 + $0xbac] ss:$16 sps:$4 sm:$0xff]   ;;  %v5010_v7 = vld [vmem:[%s6857_s1 + $0xba0] ss:$16 sps:$4 sm:$0xff]  }
 0x13b   :  { %3365 = vmatpush1.bf16.msra.mxu0 %v4918_v8  ;;  %3693 = vmatpush1.bf16.msra.mxu1 %v4921_v9  ;;  %v5013_v8 = vld [vmem:[%s6857_s1 + $0xba8] ss:$16 sps:$4 sm:$0xff]   ;;  %v5018_v9 = vld [vmem:[%s6857_s1 + $0xbc4] ss:$16 sps:$4 sm:$0xff]  }
 0x13c   :  { %3366 = vmatprep.subr.bf16.mxu0 %v4926_v10  ;;  %3694 = vmatprep.subr.bf16.mxu1 %v4929_v12  ;;  %v5021_v10 = vld [vmem:[%s6857_s1 + $0xbcc] ss:$16 sps:$4 sm:$0xff]   ;;  %v5016_v12 = vld [vmem:[%s6857_s1 + $0xbc0] ss:$16 sps:$4 sm:$0xff]  }
 0x13f   :  { %3367 = vmatpush1.bf16.msra.mxu0 %v4924_v13  ;;  %3695 = vmatpush1.bf16.msra.mxu1 %v4927_v15  ;;  %v5019_v13 = vld [vmem:[%s6857_s1 + $0xbc8] ss:$16 sps:$4 sm:$0xff]   ;;  %v5024_v15 = vld [vmem:[%s6857_s1 + $0xbe4] ss:$16 sps:$4 sm:$0xff]  }
 0x140   :  { %3377 = vmatprep.subr.bf16.mxu0 %v4934_v11  ;;  %3705 = vmatprep.subr.bf16.mxu1 %v4937_v17  ;;  %v5027_v11 = vld [vmem:[%s6857_s1 + $0xbec] ss:$16 sps:$4 sm:$0xff]   ;;  %v5022_v17 = vld [vmem:[%s6857_s1 + $0xbe0] ss:$16 sps:$4 sm:$0xff]  }
 0x142   :  { %3369 = vmatmul.mubr.bf16.vlgmr.msra.gmra.mrb[0].mxu0 %v3858_v14  ;;  %3697 = vmatmul.mubr.bf16.vlgmr.msra.gmra.mrb[0].mxu1 %v3858_v14  ;;  %v5025_v14 = vld [vmem:[%s6857_s1 + $0xbe8] ss:$16 sps:$4 sm:$0xff]  }
 0x143   :  { %3378 = vmatpush1.bf16.msra.mxu0 %v4932_v19  ;;  %3706 = vmatpush1.bf16.msra.mxu1 %v4935_v20  ;;  %v5032_v19 = vld [vmem:[%s6857_s1 + $0xc04] ss:$16 sps:$4 sm:$0xff]   ;;  %v5035_v20 = vld [vmem:[%s6857_s1 + $0xc0c] ss:$16 sps:$4 sm:$0xff]  }
 0x144   :  { %3379 = vmatprep.subr.bf16.mxu0 %v4940_v21  ;;  %3707 = vmatprep.subr.bf16.mxu1 %v4943_v16  ;;  %v3860_v21 = vcombine.low %v6252_v18, %v6252_v18  ;;  %v6455_v16 = vld [vmem:[%s6858_s0 + $0x30] sm:$0xff] }
 0x145   :  { %3409 = vmatprep.mubr.bf16.mxu0 %v3861_v22  ;;  %3737 = vmatprep.mubr.bf16.mxu1 %v3861_v22  ;;  %v5030_v22 = vld [vmem:[%s6857_s1 + $0xc00] ss:$16 sps:$4 sm:$0xff]   ;;  %v5038_v18 = vld [vmem:[%s6857_s1 + $0xc24] ss:$16 sps:$4 sm:$0xff]  }
 0x147   :  { %3380 = vmatpush1.bf16.msra.mxu0 %v4938_v23  ;;  %3708 = vmatpush1.bf16.msra.mxu1 %v4941_v24  ;;  %v5033_v23 = vld [vmem:[%s6857_s1 + $0xc08] ss:$16 sps:$4 sm:$0xff]   ;;  %v5041_v24 = vld [vmem:[%s6857_s1 + $0xc2c] ss:$16 sps:$4 sm:$0xff]  }
 0x148   :  { %3381 = vmatprep.subr.bf16.mxu0 %v4946_v25  ;;  %3709 = vmatprep.subr.bf16.mxu1 %v4949_v26  ;;  %v3863_v25 = vcombine.high %v6455_v16, %v6455_v16  ;;  %v5036_v26 = vld [vmem:[%s6857_s1 + $0xc20] ss:$16 sps:$4 sm:$0xff]  }
 0x14b   :  { %3382 = vmatpush1.bf16.msra.mxu0 %v4944_v27  ;;  %3710 = vmatpush1.bf16.msra.mxu1 %v4947_v28  ;;  %v5039_v27 = vld [vmem:[%s6857_s1 + $0xc28] ss:$16 sps:$4 sm:$0xff]   ;;  %v5044_v28 = vld [vmem:[%s6857_s1 + $0xc44] ss:$16 sps:$4 sm:$0xff]  }
 0x14c   :  { %3383 = vmatprep.subr.bf16.mxu0 %v4952_v29  ;;  %3711 = vmatprep.subr.bf16.mxu1 %v4955_v30  ;;  %v5047_v29 = vld [vmem:[%s6857_s1 + $0xc4c] ss:$16 sps:$4 sm:$0xff]   ;;  %v5042_v30 = vld [vmem:[%s6857_s1 + $0xc40] ss:$16 sps:$4 sm:$0xff]  }
 0x14f   :  { %3384 = vmatpush1.bf16.msra.mxu0 %v4950_v31  ;;  %3712 = vmatpush1.bf16.msra.mxu1 %v4953_v32  ;;  %v5045_v31 = vld [vmem:[%s6857_s1 + $0xc48] ss:$16 sps:$4 sm:$0xff]   ;;  %v5050_v32 = vld [vmem:[%s6857_s1 + $0xc64] ss:$16 sps:$4 sm:$0xff]  }
 0x150   :  { %3385 = vmatprep.subr.bf16.mxu0 %v4958_v33  ;;  %3713 = vmatprep.subr.bf16.mxu1 %v4961_v34  ;;  %v5053_v33 = vld [vmem:[%s6857_s1 + $0xc6c] ss:$16 sps:$4 sm:$0xff]   ;;  %v5048_v34 = vld [vmem:[%s6857_s1 + $0xc60] ss:$16 sps:$4 sm:$0xff]  }
 0x153   :  { %3386 = vmatpush1.bf16.msra.mxu0 %v4956_v35  ;;  %3714 = vmatpush1.bf16.msra.mxu1 %v4959_v36  ;;  %v5051_v35 = vld [vmem:[%s6857_s1 + $0xc68] ss:$16 sps:$4 sm:$0xff]   ;;  %v5056_v36 = vld [vmem:[%s6857_s1 + $0xc84] ss:$16 sps:$4 sm:$0xff]  }
 0x154   :  { %3387 = vmatprep.subr.bf16.mxu0 %v4964_v37  ;;  %3715 = vmatprep.subr.bf16.mxu1 %v4967_v38  ;;  %v5059_v37 = vld [vmem:[%s6857_s1 + $0xc8c] ss:$16 sps:$4 sm:$0xff]   ;;  %v5054_v38 = vld [vmem:[%s6857_s1 + $0xc80] ss:$16 sps:$4 sm:$0xff]  }
 0x157   :  { %3388 = vmatpush1.bf16.msra.mxu0 %v4962_v39  ;;  %3716 = vmatpush1.bf16.msra.mxu1 %v4965_v40  ;;  %v5057_v39 = vld [vmem:[%s6857_s1 + $0xc88] ss:$16 sps:$4 sm:$0xff]   ;;  %v5062_v40 = vld [vmem:[%s6857_s1 + $0xca4] ss:$16 sps:$4 sm:$0xff]  }
 0x158   :  { %3389 = vmatprep.subr.bf16.mxu0 %v4970_v41  ;;  %3717 = vmatprep.subr.bf16.mxu1 %v4973_v42  ;;  %v5065_v41 = vld [vmem:[%s6857_s1 + $0xcac] ss:$16 sps:$4 sm:$0xff]   ;;  %v5060_v42 = vld [vmem:[%s6857_s1 + $0xca0] ss:$16 sps:$4 sm:$0xff]  }
 0x15b   :  { %3390 = vmatpush1.bf16.msra.mxu0 %v4968_v43  ;;  %3718 = vmatpush1.bf16.msra.mxu1 %v4971_v44  ;;  %v5063_v43 = vld [vmem:[%s6857_s1 + $0xca8] ss:$16 sps:$4 sm:$0xff]   ;;  %v5068_v44 = vld [vmem:[%s6857_s1 + $0xcc4] ss:$16 sps:$4 sm:$0xff]  }
 0x15c   :  { %3391 = vmatprep.subr.bf16.mxu0 %v4976_v45  ;;  %3719 = vmatprep.subr.bf16.mxu1 %v4979_v46  ;;  %v5071_v45 = vld [vmem:[%s6857_s1 + $0xccc] ss:$16 sps:$4 sm:$0xff]   ;;  %v5066_v46 = vld [vmem:[%s6857_s1 + $0xcc0] ss:$16 sps:$4 sm:$0xff]  }
 0x15f   :  { %3392 = vmatpush1.bf16.msra.mxu0 %v4974_v47  ;;  %3720 = vmatpush1.bf16.msra.mxu1 %v4977_v48  ;;  %v5069_v47 = vld [vmem:[%s6857_s1 + $0xcc8] ss:$16 sps:$4 sm:$0xff]   ;;  %v5074_v48 = vld [vmem:[%s6857_s1 + $0xce4] ss:$16 sps:$4 sm:$0xff]  }
 0x160   :  { %3393 = vmatprep.subr.bf16.mxu0 %v4982_v49  ;;  %3721 = vmatprep.subr.bf16.mxu1 %v4985_v50  ;;  %v5077_v49 = vld [vmem:[%s6857_s1 + $0xcec] ss:$16 sps:$4 sm:$0xff]   ;;  %v5072_v50 = vld [vmem:[%s6857_s1 + $0xce0] ss:$16 sps:$4 sm:$0xff]  }
 0x163   :  { %3394 = vmatpush1.bf16.msra.mxu0 %v4980_v51  ;;  %3722 = vmatpush1.bf16.msra.mxu1 %v4983_v52  ;;  %v5075_v51 = vld [vmem:[%s6857_s1 + $0xce8] ss:$16 sps:$4 sm:$0xff]   ;;  %v5080_v52 = vld [vmem:[%s6857_s1 + $0xd04] ss:$16 sps:$4 sm:$0xff]  }
 0x164   :  { %3395 = vmatprep.subr.bf16.mxu0 %v4988_v53  ;;  %3723 = vmatprep.subr.bf16.mxu1 %v4991_v54  ;;  %v5083_v53 = vld [vmem:[%s6857_s1 + $0xd0c] ss:$16 sps:$4 sm:$0xff]   ;;  %v5078_v54 = vld [vmem:[%s6857_s1 + $0xd00] ss:$16 sps:$4 sm:$0xff]  }
 0x167   :  { %3396 = vmatpush1.bf16.msra.mxu0 %v4986_v55  ;;  %3724 = vmatpush1.bf16.msra.mxu1 %v4989_v56  ;;  %v5081_v55 = vld [vmem:[%s6857_s1 + $0xd08] ss:$16 sps:$4 sm:$0xff]   ;;  %v5086_v56 = vld [vmem:[%s6857_s1 + $0xd24] ss:$16 sps:$4 sm:$0xff]  }
 0x168   :  { %3397 = vmatprep.subr.bf16.mxu0 %v4994_v57  ;;  %3725 = vmatprep.subr.bf16.mxu1 %v4997_v58  ;;  %v5089_v57 = vld [vmem:[%s6857_s1 + $0xd2c] ss:$16 sps:$4 sm:$0xff]   ;;  %v5084_v58 = vld [vmem:[%s6857_s1 + $0xd20] ss:$16 sps:$4 sm:$0xff]  }
 0x16b   :  { %3398 = vmatpush1.bf16.msra.mxu0 %v4992_v59  ;;  %3726 = vmatpush1.bf16.msra.mxu1 %v4995_v60  ;;  %v5087_v59 = vld [vmem:[%s6857_s1 + $0xd28] ss:$16 sps:$4 sm:$0xff]   ;;  %v5092_v60 = vld [vmem:[%s6857_s1 + $0xd44] ss:$16 sps:$4 sm:$0xff]  }
 0x16c   :  { %3399 = vmatprep.subr.bf16.mxu0 %v5000_v61  ;;  %3727 = vmatprep.subr.bf16.mxu1 %v5003_v62  ;;  %v5095_v61 = vld [vmem:[%s6857_s1 + $0xd4c] ss:$16 sps:$4 sm:$0xff]   ;;  %v5090_v62 = vld [vmem:[%s6857_s1 + $0xd40] ss:$16 sps:$4 sm:$0xff]  }
 0x16f   :  { %3400 = vmatpush1.bf16.msra.mxu0 %v4998_v63  ;;  %3728 = vmatpush1.bf16.msra.mxu1 %v5001_v0  ;;  %v5093_v63 = vld [vmem:[%s6857_s1 + $0xd48] ss:$16 sps:$4 sm:$0xff]   ;;  %v5098_v0 = vld [vmem:[%s6857_s1 + $0xd64] ss:$16 sps:$4 sm:$0xff]  }
 0x170   :  { %3401 = vmatprep.subr.bf16.mxu0 %v5006_v1  ;;  %3729 = vmatprep.subr.bf16.mxu1 %v5009_v2  ;;  %v5101_v1 = vld [vmem:[%s6857_s1 + $0xd6c] ss:$16 sps:$4 sm:$0xff]   ;;  %v5096_v2 = vld [vmem:[%s6857_s1 + $0xd60] ss:$16 sps:$4 sm:$0xff]  }
 0x173   :  { %3402 = vmatpush1.bf16.msra.mxu0 %v5004_v3  ;;  %3730 = vmatpush1.bf16.msra.mxu1 %v5007_v4  ;;  %v5099_v3 = vld [vmem:[%s6857_s1 + $0xd68] ss:$16 sps:$4 sm:$0xff]   ;;  %v5104_v4 = vld [vmem:[%s6857_s1 + $0xd84] ss:$16 sps:$4 sm:$0xff]  }
 0x174   :  { %3403 = vmatprep.subr.bf16.mxu0 %v5012_v5  ;;  %3731 = vmatprep.subr.bf16.mxu1 %v5015_v6  ;;  %v5107_v5 = vld [vmem:[%s6857_s1 + $0xd8c] ss:$16 sps:$4 sm:$0xff]   ;;  %v5102_v6 = vld [vmem:[%s6857_s1 + $0xd80] ss:$16 sps:$4 sm:$0xff]  }
 0x177   :  { %3404 = vmatpush1.bf16.msra.mxu0 %v5010_v7  ;;  %3732 = vmatpush1.bf16.msra.mxu1 %v5013_v8  ;;  %v5105_v7 = vld [vmem:[%s6857_s1 + $0xd88] ss:$16 sps:$4 sm:$0xff]   ;;  %v5110_v8 = vld [vmem:[%s6857_s1 + $0xda4] ss:$16 sps:$4 sm:$0xff]  }
 0x178   :  { %3405 = vmatprep.subr.bf16.mxu0 %v5018_v9  ;;  %3733 = vmatprep.subr.bf16.mxu1 %v5021_v10  ;;  %v5113_v9 = vld [vmem:[%s6857_s1 + $0xdac] ss:$16 sps:$4 sm:$0xff]   ;;  %v5108_v10 = vld [vmem:[%s6857_s1 + $0xda0] ss:$16 sps:$4 sm:$0xff]  }
 0x17b   :  { %3406 = vmatpush1.bf16.msra.mxu0 %v5016_v12  ;;  %3734 = vmatpush1.bf16.msra.mxu1 %v5019_v13  ;;  %v5111_v12 = vld [vmem:[%s6857_s1 + $0xda8] ss:$16 sps:$4 sm:$0xff]   ;;  %v5116_v13 = vld [vmem:[%s6857_s1 + $0xdc4] ss:$16 sps:$4 sm:$0xff]  }
 0x17c   :  { %3407 = vmatprep.subr.bf16.mxu0 %v5024_v15  ;;  %3735 = vmatprep.subr.bf16.mxu1 %v5027_v11  ;;  %v5119_v15 = vld [vmem:[%s6857_s1 + $0xdcc] ss:$16 sps:$4 sm:$0xff]   ;;  %v5114_v11 = vld [vmem:[%s6857_s1 + $0xdc0] ss:$16 sps:$4 sm:$0xff]  }
 0x17f   :  { %3408 = vmatpush1.bf16.msra.mxu0 %v5022_v17  ;;  %3736 = vmatpush1.bf16.msra.mxu1 %v5025_v14  ;;  %v5117_v17 = vld [vmem:[%s6857_s1 + $0xdc8] ss:$16 sps:$4 sm:$0xff]   ;;  %v5122_v14 = vld [vmem:[%s6857_s1 + $0xde4] ss:$16 sps:$4 sm:$0xff]  }
 0x180   :  { %3418 = vmatprep.subr.bf16.mxu0 %v5032_v19  ;;  %3746 = vmatprep.subr.bf16.mxu1 %v5035_v20  ;;  %v5125_v19 = vld [vmem:[%s6857_s1 + $0xdec] ss:$16 sps:$4 sm:$0xff]   ;;  %v5120_v20 = vld [vmem:[%s6857_s1 + $0xde0] ss:$16 sps:$4 sm:$0xff]  }
 0x182   :  { %3410 = vmatmul.mubr.bf16.vlgmr.msra.gmra.mrb[0].mxu0 %v3860_v21  ;;  %3738 = vmatmul.mubr.bf16.vlgmr.msra.gmra.mrb[0].mxu1 %v3860_v21  ;;  %v5123_v21 = vld [vmem:[%s6857_s1 + $0xde8] ss:$16 sps:$4 sm:$0xff]  }
 0x183   :  { %3419 = vmatpush1.bf16.msra.mxu0 %v5030_v22  ;;  %3747 = vmatpush1.bf16.msra.mxu1 %v5033_v23  ;;  %v5130_v22 = vld [vmem:[%s6857_s1 + $0xe04] ss:$16 sps:$4 sm:$0xff]   ;;  %v5133_v23 = vld [vmem:[%s6857_s1 + $0xe0c] ss:$16 sps:$4 sm:$0xff]  }
 0x184   :  { %3420 = vmatprep.subr.bf16.mxu0 %v5038_v18  ;;  %3748 = vmatprep.subr.bf16.mxu1 %v5041_v24  ;;  %v3862_v18 = vcombine.low %v6455_v16, %v6455_v16  ;;  %v6656_v24 = vld [vmem:[%s6858_s0 + $0x38] sm:$0xff]  ;;  %v5136_v16 = vld [vmem:[%s6857_s1 + $0xe24] ss:$16 sps:$4 sm:$0xff]  }
 0x185   :  { %3450 = vmatprep.mubr.bf16.mxu0 %v3863_v25  ;;  %3778 = vmatprep.mubr.bf16.mxu1 %v3863_v25  ;;  %v5128_v25 = vld [vmem:[%s6857_s1 + $0xe00] ss:$16 sps:$4 sm:$0xff]  }
 0x187   :  { %3421 = vmatpush1.bf16.msra.mxu0 %v5036_v26  ;;  %3749 = vmatpush1.bf16.msra.mxu1 %v5039_v27  ;;  %v5131_v26 = vld [vmem:[%s6857_s1 + $0xe08] ss:$16 sps:$4 sm:$0xff]   ;;  %v5139_v27 = vld [vmem:[%s6857_s1 + $0xe2c] ss:$16 sps:$4 sm:$0xff]  }
 0x188   :  { %3422 = vmatprep.subr.bf16.mxu0 %v5044_v28  ;;  %3750 = vmatprep.subr.bf16.mxu1 %v5047_v29  ;;  %v3865_v28 = vcombine.high %v6656_v24, %v6656_v24  ;;  %v5134_v29 = vld [vmem:[%s6857_s1 + $0xe20] ss:$16 sps:$4 sm:$0xff]  }
 0x18b   :  { %3423 = vmatpush1.bf16.msra.mxu0 %v5042_v30  ;;  %3751 = vmatpush1.bf16.msra.mxu1 %v5045_v31  ;;  %v5137_v30 = vld [vmem:[%s6857_s1 + $0xe28] ss:$16 sps:$4 sm:$0xff]   ;;  %v5142_v31 = vld [vmem:[%s6857_s1 + $0xe44] ss:$16 sps:$4 sm:$0xff]  }
 0x18c   :  { %3424 = vmatprep.subr.bf16.mxu0 %v5050_v32  ;;  %3752 = vmatprep.subr.bf16.mxu1 %v5053_v33  ;;  %v5145_v32 = vld [vmem:[%s6857_s1 + $0xe4c] ss:$16 sps:$4 sm:$0xff]   ;;  %v5140_v33 = vld [vmem:[%s6857_s1 + $0xe40] ss:$16 sps:$4 sm:$0xff]  }
 0x18f   :  { %3425 = vmatpush1.bf16.msra.mxu0 %v5048_v34  ;;  %3753 = vmatpush1.bf16.msra.mxu1 %v5051_v35  ;;  %v5143_v34 = vld [vmem:[%s6857_s1 + $0xe48] ss:$16 sps:$4 sm:$0xff]   ;;  %v5148_v35 = vld [vmem:[%s6857_s1 + $0xe64] ss:$16 sps:$4 sm:$0xff]  }
 0x190   :  { %3426 = vmatprep.subr.bf16.mxu0 %v5056_v36  ;;  %3754 = vmatprep.subr.bf16.mxu1 %v5059_v37  ;;  %v5151_v36 = vld [vmem:[%s6857_s1 + $0xe6c] ss:$16 sps:$4 sm:$0xff]   ;;  %v5146_v37 = vld [vmem:[%s6857_s1 + $0xe60] ss:$16 sps:$4 sm:$0xff]  }
 0x193   :  { %3427 = vmatpush1.bf16.msra.mxu0 %v5054_v38  ;;  %3755 = vmatpush1.bf16.msra.mxu1 %v5057_v39  ;;  %v5149_v38 = vld [vmem:[%s6857_s1 + $0xe68] ss:$16 sps:$4 sm:$0xff]   ;;  %v5154_v39 = vld [vmem:[%s6857_s1 + $0xe84] ss:$16 sps:$4 sm:$0xff]  }
 0x194   :  { %3428 = vmatprep.subr.bf16.mxu0 %v5062_v40  ;;  %3756 = vmatprep.subr.bf16.mxu1 %v5065_v41  ;;  %v5157_v40 = vld [vmem:[%s6857_s1 + $0xe8c] ss:$16 sps:$4 sm:$0xff]   ;;  %v5152_v41 = vld [vmem:[%s6857_s1 + $0xe80] ss:$16 sps:$4 sm:$0xff]  }
 0x197   :  { %3429 = vmatpush1.bf16.msra.mxu0 %v5060_v42  ;;  %3757 = vmatpush1.bf16.msra.mxu1 %v5063_v43  ;;  %v5155_v42 = vld [vmem:[%s6857_s1 + $0xe88] ss:$16 sps:$4 sm:$0xff]   ;;  %v5160_v43 = vld [vmem:[%s6857_s1 + $0xea4] ss:$16 sps:$4 sm:$0xff]  }
 0x198   :  { %3430 = vmatprep.subr.bf16.mxu0 %v5068_v44  ;;  %3758 = vmatprep.subr.bf16.mxu1 %v5071_v45  ;;  %v5163_v44 = vld [vmem:[%s6857_s1 + $0xeac] ss:$16 sps:$4 sm:$0xff]   ;;  %v5158_v45 = vld [vmem:[%s6857_s1 + $0xea0] ss:$16 sps:$4 sm:$0xff]  }
 0x19b   :  { %3431 = vmatpush1.bf16.msra.mxu0 %v5066_v46  ;;  %3759 = vmatpush1.bf16.msra.mxu1 %v5069_v47  ;;  %v5161_v46 = vld [vmem:[%s6857_s1 + $0xea8] ss:$16 sps:$4 sm:$0xff]   ;;  %v5166_v47 = vld [vmem:[%s6857_s1 + $0xec4] ss:$16 sps:$4 sm:$0xff]  }
 0x19c   :  { %3432 = vmatprep.subr.bf16.mxu0 %v5074_v48  ;;  %3760 = vmatprep.subr.bf16.mxu1 %v5077_v49  ;;  %v5169_v48 = vld [vmem:[%s6857_s1 + $0xecc] ss:$16 sps:$4 sm:$0xff]   ;;  %v5164_v49 = vld [vmem:[%s6857_s1 + $0xec0] ss:$16 sps:$4 sm:$0xff]  }
 0x19f   :  { %3433 = vmatpush1.bf16.msra.mxu0 %v5072_v50  ;;  %3761 = vmatpush1.bf16.msra.mxu1 %v5075_v51  ;;  %v5167_v50 = vld [vmem:[%s6857_s1 + $0xec8] ss:$16 sps:$4 sm:$0xff]   ;;  %v5172_v51 = vld [vmem:[%s6857_s1 + $0xee4] ss:$16 sps:$4 sm:$0xff]  }
 0x1a0   :  { %3434 = vmatprep.subr.bf16.mxu0 %v5080_v52  ;;  %3762 = vmatprep.subr.bf16.mxu1 %v5083_v53  ;;  %v5175_v52 = vld [vmem:[%s6857_s1 + $0xeec] ss:$16 sps:$4 sm:$0xff]   ;;  %v5170_v53 = vld [vmem:[%s6857_s1 + $0xee0] ss:$16 sps:$4 sm:$0xff]  }
 0x1a3   :  { %3435 = vmatpush1.bf16.msra.mxu0 %v5078_v54  ;;  %3763 = vmatpush1.bf16.msra.mxu1 %v5081_v55  ;;  %v5173_v54 = vld [vmem:[%s6857_s1 + $0xee8] ss:$16 sps:$4 sm:$0xff]   ;;  %v5178_v55 = vld [vmem:[%s6857_s1 + $0xf04] ss:$16 sps:$4 sm:$0xff]  }
 0x1a4   :  { %3436 = vmatprep.subr.bf16.mxu0 %v5086_v56  ;;  %3764 = vmatprep.subr.bf16.mxu1 %v5089_v57  ;;  %v5181_v56 = vld [vmem:[%s6857_s1 + $0xf0c] ss:$16 sps:$4 sm:$0xff]   ;;  %v5176_v57 = vld [vmem:[%s6857_s1 + $0xf00] ss:$16 sps:$4 sm:$0xff]  }
 0x1a7   :  { %3437 = vmatpush1.bf16.msra.mxu0 %v5084_v58  ;;  %3765 = vmatpush1.bf16.msra.mxu1 %v5087_v59  ;;  %v5179_v58 = vld [vmem:[%s6857_s1 + $0xf08] ss:$16 sps:$4 sm:$0xff]   ;;  %v5184_v59 = vld [vmem:[%s6857_s1 + $0xf24] ss:$16 sps:$4 sm:$0xff]  }
 0x1a8   :  { %3438 = vmatprep.subr.bf16.mxu0 %v5092_v60  ;;  %3766 = vmatprep.subr.bf16.mxu1 %v5095_v61  ;;  %v5187_v60 = vld [vmem:[%s6857_s1 + $0xf2c] ss:$16 sps:$4 sm:$0xff]   ;;  %v5182_v61 = vld [vmem:[%s6857_s1 + $0xf20] ss:$16 sps:$4 sm:$0xff]  }
 0x1ab   :  { %3439 = vmatpush1.bf16.msra.mxu0 %v5090_v62  ;;  %3767 = vmatpush1.bf16.msra.mxu1 %v5093_v63  ;;  %v5185_v62 = vld [vmem:[%s6857_s1 + $0xf28] ss:$16 sps:$4 sm:$0xff]   ;;  %v5190_v63 = vld [vmem:[%s6857_s1 + $0xf44] ss:$16 sps:$4 sm:$0xff]  }
 0x1ac   :  { %3440 = vmatprep.subr.bf16.mxu0 %v5098_v0  ;;  %3768 = vmatprep.subr.bf16.mxu1 %v5101_v1  ;;  %v5193_v0 = vld [vmem:[%s6857_s1 + $0xf4c] ss:$16 sps:$4 sm:$0xff]   ;;  %v5188_v1 = vld [vmem:[%s6857_s1 + $0xf40] ss:$16 sps:$4 sm:$0xff]  }
 0x1af   :  { %3441 = vmatpush1.bf16.msra.mxu0 %v5096_v2  ;;  %3769 = vmatpush1.bf16.msra.mxu1 %v5099_v3  ;;  %v5191_v2 = vld [vmem:[%s6857_s1 + $0xf48] ss:$16 sps:$4 sm:$0xff]   ;;  %v5196_v3 = vld [vmem:[%s6857_s1 + $0xf64] ss:$16 sps:$4 sm:$0xff]  }
 0x1b0   :  { %3442 = vmatprep.subr.bf16.mxu0 %v5104_v4  ;;  %3770 = vmatprep.subr.bf16.mxu1 %v5107_v5  ;;  %v5199_v4 = vld [vmem:[%s6857_s1 + $0xf6c] ss:$16 sps:$4 sm:$0xff]   ;;  %v5194_v5 = vld [vmem:[%s6857_s1 + $0xf60] ss:$16 sps:$4 sm:$0xff]  }
 0x1b3   :  { %3443 = vmatpush1.bf16.msra.mxu0 %v5102_v6  ;;  %3771 = vmatpush1.bf16.msra.mxu1 %v5105_v7  ;;  %v5197_v6 = vld [vmem:[%s6857_s1 + $0xf68] ss:$16 sps:$4 sm:$0xff]   ;;  %v5202_v7 = vld [vmem:[%s6857_s1 + $0xf84] ss:$16 sps:$4 sm:$0xff]  }
 0x1b4   :  { %3444 = vmatprep.subr.bf16.mxu0 %v5110_v8  ;;  %3772 = vmatprep.subr.bf16.mxu1 %v5113_v9  ;;  %v5205_v8 = vld [vmem:[%s6857_s1 + $0xf8c] ss:$16 sps:$4 sm:$0xff]   ;;  %v5200_v9 = vld [vmem:[%s6857_s1 + $0xf80] ss:$16 sps:$4 sm:$0xff]  }
 0x1b7   :  { %3445 = vmatpush1.bf16.msra.mxu0 %v5108_v10  ;;  %3773 = vmatpush1.bf16.msra.mxu1 %v5111_v12  ;;  %v5203_v10 = vld [vmem:[%s6857_s1 + $0xf88] ss:$16 sps:$4 sm:$0xff]   ;;  %v5208_v12 = vld [vmem:[%s6857_s1 + $0xfa4] ss:$16 sps:$4 sm:$0xff]  }
 0x1b8   :  { %3446 = vmatprep.subr.bf16.mxu0 %v5116_v13  ;;  %3774 = vmatprep.subr.bf16.mxu1 %v5119_v15  ;;  %v5211_v13 = vld [vmem:[%s6857_s1 + $0xfac] ss:$16 sps:$4 sm:$0xff]   ;;  %v5206_v15 = vld [vmem:[%s6857_s1 + $0xfa0] ss:$16 sps:$4 sm:$0xff]  }
 0x1bb   :  { %3447 = vmatpush1.bf16.msra.mxu0 %v5114_v11  ;;  %3775 = vmatpush1.bf16.msra.mxu1 %v5117_v17  ;;  %v5209_v11 = vld [vmem:[%s6857_s1 + $0xfa8] ss:$16 sps:$4 sm:$0xff]   ;;  %v5214_v17 = vld [vmem:[%s6857_s1 + $0xfc4] ss:$16 sps:$4 sm:$0xff]  }
 0x1bc   :  { %3448 = vmatprep.subr.bf16.mxu0 %v5122_v14  ;;  %3776 = vmatprep.subr.bf16.mxu1 %v5125_v19  ;;  %v5217_v14 = vld [vmem:[%s6857_s1 + $0xfcc] ss:$16 sps:$4 sm:$0xff]   ;;  %v5212_v19 = vld [vmem:[%s6857_s1 + $0xfc0] ss:$16 sps:$4 sm:$0xff]  }
 0x1bf   :  { %3449 = vmatpush1.bf16.msra.mxu0 %v5120_v20  ;;  %3777 = vmatpush1.bf16.msra.mxu1 %v5123_v21  ;;  %v5215_v20 = vld [vmem:[%s6857_s1 + $0xfc8] ss:$16 sps:$4 sm:$0xff]   ;;  %v5220_v21 = vld [vmem:[%s6857_s1 + $0xfe4] ss:$16 sps:$4 sm:$0xff]  }
 0x1c0   :  { %3459 = vmatprep.subr.bf16.mxu0 %v5130_v22  ;;  %3787 = vmatprep.subr.bf16.mxu1 %v5133_v23  ;;  %v5223_v22 = vld [vmem:[%s6857_s1 + $0xfec] ss:$16 sps:$4 sm:$0xff]   ;;  %v5218_v23 = vld [vmem:[%s6857_s1 + $0xfe0] ss:$16 sps:$4 sm:$0xff]  }
 0x1c2   :  { %3451 = vmatmul.mubr.bf16.vlgmr.msra.gmra.mrb[0].mxu0 %v3862_v18  ;;  %3779 = vmatmul.mubr.bf16.vlgmr.msra.gmra.mrb[0].mxu1 %v3862_v18  ;;  %v5221_v18 = vld [vmem:[%s6857_s1 + $0xfe8] ss:$16 sps:$4 sm:$0xff]  }
 0x1c3   :  { %3460 = vmatpush1.bf16.msra.mxu0 %v5128_v25  ;;  %3788 = vmatpush1.bf16.msra.mxu1 %v5131_v26  ;;  %v3864_v25 = vcombine.low %v6656_v24, %v6656_v24  ;;  %v536_v26 = vlaneseq }
 0x1c4   :  { %3461 = vmatprep.subr.bf16.mxu0 %v5136_v16  ;;  %3789 = vmatprep.subr.bf16.mxu1 %v5139_v27 }
 0x1c5   :  { %3491 = vmatprep.mubr.bf16.mxu0 %v3865_v28  ;;  %3819 = vmatprep.mubr.bf16.mxu1 %v3865_v28  ;;  %v537_v16 = vshrl.u32 %v536_v26, 7 }
 0x1c7   :  { %3462 = vmatpush1.bf16.msra.mxu0 %v5134_v29  ;;  %3790 = vmatpush1.bf16.msra.mxu1 %v5137_v30  ;;  %v538_v27 = vsub.s32 0, %v537_v16  ;;  %v546_v28 = vsub.s32 2, %v537_v16  ;;  %v534_v29 = vld [vmem:[%s6859_s2] sm:$0xf]  ;;  %v542_v30 = vsub.s32 1, %v537_v16 }
 0x1c8   :  { %3463 = vmatprep.subr.bf16.mxu0 %v5142_v31  ;;  %3791 = vmatprep.subr.bf16.mxu1 %v5145_v32  ;;  %v550_v31 = vsub.s32 3, %v537_v16 }
 0x1c9   :  { %v539_v32 = vrot.slane %v534_v29, %v538_v27 }
 0x1cb   :  { %3464 = vmatpush1.bf16.msra.mxu0 %v5140_v33  ;;  %3792 = vmatpush1.bf16.msra.mxu1 %v5143_v34  ;;  %v547_v33 = vrot.slane %v534_v29, %v546_v28  ;;  %v543_v34 = vrot.slane %v534_v29, %v542_v30 }
 0x1cc   :  { %3465 = vmatprep.subr.bf16.mxu0 %v5148_v35  ;;  %3793 = vmatprep.subr.bf16.mxu1 %v5151_v36  ;;  %v551_v35 = vrot.slane %v534_v29, %v550_v31 }
 0x1cf   :  { %3466 = vmatpush1.bf16.msra.mxu0 %v5146_v37  ;;  %3794 = vmatpush1.bf16.msra.mxu1 %v5149_v38 }
 0x1d0   :  { %3467 = vmatprep.subr.bf16.mxu0 %v5154_v39  ;;  %3795 = vmatprep.subr.bf16.mxu1 %v5157_v40 }
 0x1d3   :  { %3468 = vmatpush1.bf16.msra.mxu0 %v5152_v41  ;;  %3796 = vmatpush1.bf16.msra.mxu1 %v5155_v42 }
 0x1d4   :  { %3469 = vmatprep.subr.bf16.mxu0 %v5160_v43  ;;  %3797 = vmatprep.subr.bf16.mxu1 %v5163_v44 }
 0x1d7   :  { %3470 = vmatpush1.bf16.msra.mxu0 %v5158_v45  ;;  %3798 = vmatpush1.bf16.msra.mxu1 %v5161_v46 }
 0x1d8   :  { %3471 = vmatprep.subr.bf16.mxu0 %v5166_v47  ;;  %3799 = vmatprep.subr.bf16.mxu1 %v5169_v48 }
 0x1db   :  { %3472 = vmatpush1.bf16.msra.mxu0 %v5164_v49  ;;  %3800 = vmatpush1.bf16.msra.mxu1 %v5167_v50 }
 0x1dc   :  { %3473 = vmatprep.subr.bf16.mxu0 %v5172_v51  ;;  %3801 = vmatprep.subr.bf16.mxu1 %v5175_v52 }
 0x1df   :  { %3474 = vmatpush1.bf16.msra.mxu0 %v5170_v53  ;;  %3802 = vmatpush1.bf16.msra.mxu1 %v5173_v54 }
 0x1e0   :  { %3475 = vmatprep.subr.bf16.mxu0 %v5178_v55  ;;  %3803 = vmatprep.subr.bf16.mxu1 %v5181_v56 }
 0x1e3   :  { %3476 = vmatpush1.bf16.msra.mxu0 %v5176_v57  ;;  %3804 = vmatpush1.bf16.msra.mxu1 %v5179_v58 }
 0x1e4   :  { %3477 = vmatprep.subr.bf16.mxu0 %v5184_v59  ;;  %3805 = vmatprep.subr.bf16.mxu1 %v5187_v60 }
 0x1e7   :  { %3478 = vmatpush1.bf16.msra.mxu0 %v5182_v61  ;;  %3806 = vmatpush1.bf16.msra.mxu1 %v5185_v62 }
 0x1e8   :  { %3479 = vmatprep.subr.bf16.mxu0 %v5190_v63  ;;  %3807 = vmatprep.subr.bf16.mxu1 %v5193_v0 }
 0x1eb   :  { %3480 = vmatpush1.bf16.msra.mxu0 %v5188_v1  ;;  %3808 = vmatpush1.bf16.msra.mxu1 %v5191_v2 }
 0x1ec   :  { %3481 = vmatprep.subr.bf16.mxu0 %v5196_v3  ;;  %3809 = vmatprep.subr.bf16.mxu1 %v5199_v4 }
 0x1ef   :  { %3482 = vmatpush1.bf16.msra.mxu0 %v5194_v5  ;;  %3810 = vmatpush1.bf16.msra.mxu1 %v5197_v6 }
 0x1f0   :  { %3483 = vmatprep.subr.bf16.mxu0 %v5202_v7  ;;  %3811 = vmatprep.subr.bf16.mxu1 %v5205_v8 }
 0x1f3   :  { %3484 = vmatpush1.bf16.msra.mxu0 %v5200_v9  ;;  %3812 = vmatpush1.bf16.msra.mxu1 %v5203_v10 }
 0x1f4   :  { %3485 = vmatprep.subr.bf16.mxu0 %v5208_v12  ;;  %3813 = vmatprep.subr.bf16.mxu1 %v5211_v13 }
 0x1f7   :  { %3486 = vmatpush1.bf16.msra.mxu0 %v5206_v15  ;;  %3814 = vmatpush1.bf16.msra.mxu1 %v5209_v11 }
 0x1f8   :  { %3487 = vmatprep.subr.bf16.mxu0 %v5214_v17  ;;  %3815 = vmatprep.subr.bf16.mxu1 %v5217_v14 }
 0x1fb   :  { %3488 = vmatpush1.bf16.msra.mxu0 %v5212_v19  ;;  %3816 = vmatpush1.bf16.msra.mxu1 %v5215_v20 }
 0x1fc   :  { %3489 = vmatprep.subr.bf16.mxu0 %v5220_v21  ;;  %3817 = vmatprep.subr.bf16.mxu1 %v5223_v22 }
 0x1ff   :  { %3490 = vmatpush1.bf16.msra.mxu0 %v5218_v23  ;;  %3818 = vmatpush1.bf16.msra.mxu1 %v5221_v18 }
 0x202   :  { %3492 = vmatmul.mubr.bf16.vlgmr.msra.gmra.mrb[0].mxu0 %v3864_v25  ;;  %3820 = vmatmul.mubr.bf16.vlgmr.msra.gmra.mrb[0].mxu1 %v3864_v25 }
 0x2d5   :  { %v3493_v36 = vpop.f32.mrb[0].mxu0  ;;  %v3821_v24 = vpop.f32.mrb[0].mxu1 }
 0x2d6   :  { %v4382_v37 = vadd.f32 %v3493_v36, %v539_v32  ;;  %v4384_v38 = vadd.f32 %v3821_v24, %v547_v33  ;;  %v3495_v39 = vpop.f32.mrb[1].mxu0  ;;  %v3823_v40 = vpop.f32.mrb[1].mxu1 }
 0x2d7   :  { %v4383_v41 = vadd.f32 %v3495_v39, %v543_v34  ;;  %v4385_v42 = vadd.f32 %v3823_v40, %v551_v35  ;;  %v3497_v43 = vpop.f32.mrb[2].mxu0  ;;  %v3825_v44 = vpop.f32.mrb[2].mxu1 }
 0x2d8   :  { %v3498_v45 = vpop.f32.mrb[3].mxu0  ;;  %v3826_v46 = vpop.f32.mrb[3].mxu1 }
 0x2d9   :  { %v4380_v47 = vpack.c.bf16 %v4383_v41, %v4382_v37  ;;  %v4381_v48 = vpack.c.bf16 %v4385_v42, %v4384_v38 }
 0x2db   :  { %3844 = vst [vmem:[%s6860_s3] sm:$0xff] %v4380_v47  ;;  %3845 = vst [vmem:[%s6860_s3 + $0x8] sm:$0xff] %v4381_v48 }

// kernel: backbone_with_fpn_forward.20
= control target key start
LH: loop header
LB: loop body
LE: loop exit
PB: predicated region body
PF: predicated region fallthrough
CT: control target
= control target key end

     0   :  { %s939_s1 = inlined_call_operand.vmem [shape: bf16[256,128], index: 1, kind: input, shape index: {}]   ;;  %s940_s0 = inlined_call_operand.vmem [shape: bf16[128,256], index: 0, kind: input, shape index: {}]   ;;  %s941_s3 = inlined_call_operand.vmem [shape: bf16[128,128], index: 3, kind: input, shape index: {}]   ;;  %s942_s2 = inlined_call_operand.vmem [shape: f32[1,128], index: 2, kind: input, shape index: {}]   ;;  %s943_s4 = inlined_call_operand.vmem [shape: bf16[128,128], index: 4, kind: output, shape index: {}]  }
   0x1   :  { %v709_v0 = vld [vmem:[%s939_s1 + $0x40] sm:$0xff]   ;;  %v711_v2 = vld [vmem:[%s939_s1 + $0x48] sm:$0xff]   ;;  %v713_v4 = vld [vmem:[%s939_s1 + $0x50] sm:$0xff]  }
   0x2   :  { %v710_v1 = vld [vmem:[%s939_s1] sm:$0xff]   ;;  %629 = vmatprep.subr.bf16.mxu0 %v709_v0  ;;  %693 = vmatprep.subr.bf16.mxu1 %v709_v0  ;;  %v712_v3 = vld [vmem:[%s939_s1 + $0x8] sm:$0xff]   ;;  %v714_v5 = vld [vmem:[%s939_s1 + $0x10] sm:$0xff]  }
   0x3   :  { %630 = vmatpush3.bf16.msra.mxu0 %v710_v1  ;;  %701 = vmatpush3.bf16.msra.mxu1 %v710_v1  ;;  %v715_v6 = vld [vmem:[%s939_s1 + $0x58] sm:$0xff]   ;;  %v717_v8 = vld [vmem:[%s939_s1 + $0x60] sm:$0xff]   ;;  %v719_v10 = vld [vmem:[%s939_s1 + $0x68] sm:$0xff]  }
   0x4   :  { %631 = vmatprep.subr.bf16.mxu0 %v711_v2  ;;  %694 = vmatprep.subr.bf16.mxu1 %v711_v2  ;;  %v716_v7 = vld [vmem:[%s939_s1 + $0x18] sm:$0xff]   ;;  %v718_v9 = vld [vmem:[%s939_s1 + $0x20] sm:$0xff]   ;;  %v720_v13 = vld [vmem:[%s939_s1 + $0x28] sm:$0xff]  }
   0x5   :  { %v727_v11 = vld [vmem:[%s940_s0 + $0x4] ss:$8 sps:$4 sm:$0xff]   ;;  %v721_v14 = vld [vmem:[%s939_s1 + $0x70] sm:$0xff]   ;;  %v723_v16 = vld [vmem:[%s939_s1 + $0x78] sm:$0xff]  }
   0x6   :  { %v730_v12 = vld [vmem:[%s940_s0 + $0x44] ss:$8 sps:$4 sm:$0xff]   ;;  %281 = vmatprep.mubr.bf16.mxu0 %v727_v11  ;;  %v722_v15 = vld [vmem:[%s939_s1 + $0x30] sm:$0xff]   ;;  %v724_v17 = vld [vmem:[%s939_s1 + $0x38] sm:$0xff]  }
   0x7   :  { %632 = vmatpush3.bf16.msra.mxu0 %v712_v3  ;;  %702 = vmatpush3.bf16.msra.mxu1 %v712_v3  ;;  %v725_v18 = vld [vmem:[%s940_s0] ss:$8 sps:$4 sm:$0xff]   ;;  %v731_v20 = vld [vmem:[%s940_s0 + $0x14] ss:$8 sps:$4 sm:$0xff]   ;;  %v735_v22 = vld [vmem:[%s940_s0 + $0x10] ss:$8 sps:$4 sm:$0xff]  }
   0x8   :  { %633 = vmatprep.subr.bf16.mxu0 %v713_v4  ;;  %695 = vmatprep.subr.bf16.mxu1 %v713_v4  ;;  %v728_v19 = vld [vmem:[%s940_s0 + $0x40] ss:$8 sps:$4 sm:$0xff]   ;;  %v733_v21 = vld [vmem:[%s940_s0 + $0x54] ss:$8 sps:$4 sm:$0xff]   ;;  %v736_v23 = vld [vmem:[%s940_s0 + $0x50] ss:$8 sps:$4 sm:$0xff]  }
   0x9   :  { %313 = vmatprep.mubr.bf16.mxu1 %v730_v12  ;;  %v737_v24 = vld [vmem:[%s940_s0 + $0x24] ss:$8 sps:$4 sm:$0xff]   ;;  %v741_v26 = vld [vmem:[%s940_s0 + $0x20] ss:$8 sps:$4 sm:$0xff]   ;;  %v743_v28 = vld [vmem:[%s940_s0 + $0x34] ss:$8 sps:$4 sm:$0xff]  }
   0xa   :  { %v739_v25 = vld [vmem:[%s940_s0 + $0x64] ss:$8 sps:$4 sm:$0xff]   ;;  %v742_v27 = vld [vmem:[%s940_s0 + $0x60] ss:$8 sps:$4 sm:$0xff]   ;;  %v745_v29 = vld [vmem:[%s940_s0 + $0x74] ss:$8 sps:$4 sm:$0xff]  }
   0xb   :  { %634 = vmatpush3.bf16.msra.mxu0 %v714_v5  ;;  %703 = vmatpush3.bf16.msra.mxu1 %v714_v5  ;;  %v747_v30 = vld [vmem:[%s940_s0 + $0x30] ss:$8 sps:$4 sm:$0xff]   ;;  %v544_v34 = vld [vmem:[%s941_s3] sm:$0xff]   ;;  %v615_v61 = vld [vmem:[%s941_s3 + $0x8] sm:$0xff]  }
   0xc   :  { %635 = vmatprep.subr.bf16.mxu0 %v715_v6  ;;  %696 = vmatprep.subr.bf16.mxu1 %v715_v6  ;;  %v748_v31 = vld [vmem:[%s940_s0 + $0x70] ss:$8 sps:$4 sm:$0xff]   ;;  %v618_v35 = vld [vmem:[%s941_s3 + $0x20] sm:$0xff]   ;;  %v545_v43 = vunpack.c.l.bf16 %v544_v34  ;;  %v546_v46 = vunpack.c.h.bf16 %v544_v34  ;;  %v619_v62 = vld [vmem:[%s941_s3 + $0x28] sm:$0xff]  }
   0xd   :  { %v879_v36 = vld [vmem:[%s942_s2] ss:$0 sm:$0xff]  ;;  %v561_v44 = vunpack.c.l.bf16 %v618_v35  ;;  %v562_v48 = vunpack.c.h.bf16 %v618_v35  ;;  %v566_v12 = vunpack.c.h.bf16 %v619_v62 }
   0xf   :  { %636 = vmatpush3.bf16.msra.mxu0 %v716_v7  ;;  %704 = vmatpush3.bf16.msra.mxu1 %v716_v7  ;;  %v549_v7 = vunpack.c.l.bf16 %v615_v61 }
  0x10   :  { %637 = vmatprep.subr.bf16.mxu0 %v717_v8  ;;  %697 = vmatprep.subr.bf16.mxu1 %v717_v8  ;;  %v565_v8 = vunpack.c.l.bf16 %v619_v62 }
  0x13   :  { %638 = vmatpush3.bf16.msra.mxu0 %v718_v9  ;;  %705 = vmatpush3.bf16.msra.mxu1 %v718_v9 }
  0x14   :  { %639 = vmatprep.subr.bf16.mxu0 %v719_v10  ;;  %698 = vmatprep.subr.bf16.mxu1 %v719_v10  ;;  %v550_v10 = vunpack.c.h.bf16 %v615_v61 }
  0x17   :  { %640 = vmatpush3.bf16.msra.mxu0 %v720_v13  ;;  %706 = vmatpush3.bf16.msra.mxu1 %v720_v13 }
  0x18   :  { %641 = vmatprep.subr.bf16.mxu0 %v721_v14  ;;  %699 = vmatprep.subr.bf16.mxu1 %v721_v14 }
  0x1b   :  { %642 = vmatpush3.bf16.msra.mxu0 %v722_v15  ;;  %707 = vmatpush3.bf16.msra.mxu1 %v722_v15 }
  0x1c   :  { %643 = vmatprep.subr.bf16.mxu0 %v723_v16  ;;  %700 = vmatprep.subr.bf16.mxu1 %v723_v16 }
  0x1f   :  { %644 = vmatpush3.bf16.msra.mxu0 %v724_v17  ;;  %708 = vmatpush3.bf16.msra.mxu1 %v724_v17 }
  0x22   :  { %282 = vmatmul.mubr.bf16.vlgmr.msra.gmra.mrb[0].mxu0 %v725_v18  ;;  %314 = vmatmul.mubr.bf16.vlgmr.msra.gmra.mrb[0].mxu1 %v728_v19 }
  0x23   :  { %289 = vmatprep.mubr.bf16.mxu0 %v731_v20  ;;  %321 = vmatprep.mubr.bf16.mxu1 %v733_v21 }
  0x2a   :  { %290 = vmatmul.mubr.bf16.gmra.mrb[4].mxu0 %v735_v22  ;;  %322 = vmatmul.mubr.bf16.gmra.mrb[4].mxu1 %v736_v23 }
  0x2b   :  { %297 = vmatprep.mubr.bf16.mxu0 %v737_v24  ;;  %329 = vmatprep.mubr.bf16.mxu1 %v739_v25  ;;  %v616_v25 = vld [vmem:[%s941_s3 + $0x10] sm:$0xff]  }
  0x2c   :  { %v553_v35 = vunpack.c.l.bf16 %v616_v25 }
  0x32   :  { %298 = vmatmul.mubr.bf16.gmra.mrb[8].mxu0 %v741_v26  ;;  %330 = vmatmul.mubr.bf16.gmra.mrb[8].mxu1 %v742_v27  ;;  %v620_v26 = vld [vmem:[%s941_s3 + $0x30] sm:$0xff]  }
  0x33   :  { %305 = vmatprep.mubr.bf16.mxu0 %v743_v28  ;;  %337 = vmatprep.mubr.bf16.mxu1 %v745_v29 }
  0x3a   :  { %306 = vmatmul.mubr.bf16.gmra.mrb[12].mxu0 %v747_v30  ;;  %338 = vmatmul.mubr.bf16.gmra.mrb[12].mxu1 %v748_v31 }
  0xf5   :  { %v645_v32 = vpop.f32.mrb[0].mxu0  ;;  %v669_v33 = vpop.f32.mrb[0].mxu1 }
  0xf6   :  { %v646_v37 = vpop.f32.mrb[1].mxu0  ;;  %v670_v38 = vpop.f32.mrb[1].mxu1 }
  0xf7   :  { %v647_v39 = vadd.f32 %v646_v37, %v645_v32  ;;  %v671_v40 = vadd.f32 %v670_v38, %v669_v33  ;;  %v648_v41 = vpop.f32.mrb[2].mxu0  ;;  %v672_v42 = vpop.f32.mrb[2].mxu1  ;;  %v569_v37 = vunpack.c.l.bf16 %v620_v26 }
  0xf8   :  { %v649_v45 = vpop.f32.mrb[3].mxu0  ;;  %v673_v47 = vpop.f32.mrb[3].mxu1 }
  0xf9   :  { %v284_v49 = vadd.f32 %v647_v39, %v879_v36  ;;  %v316_v50 = vadd.f32 %v671_v40, %v879_v36  ;;  %v650_v51 = vadd.f32 %v649_v45, %v648_v41  ;;  %v674_v52 = vadd.f32 %v673_v47, %v672_v42 }
  0xfa   :  { %v554_v39 = vunpack.c.h.bf16 %v616_v25  ;;  %v570_v41 = vunpack.c.h.bf16 %v620_v26 }
  0xfb   :  { %v287_v53 = vadd.f32 %v650_v51, %v879_v36  ;;  %v319_v54 = vadd.f32 %v674_v52, %v879_v36  ;;  %v378_v55 = vadd.f32 %v545_v43, %v284_v49  ;;  %v386_v56 = vadd.f32 %v561_v44, %v316_v50 }
  0xfd   :  { %v379_v57 = vadd.f32 %v546_v46, %v287_v53  ;;  %v387_v58 = vadd.f32 %v562_v48, %v319_v54  ;;  %v651_v59 = vpop.f32.mrb[4].mxu0  ;;  %v675_v60 = vpop.f32.mrb[4].mxu1  ;;  %v617_v54 = vld [vmem:[%s941_s3 + $0x18] sm:$0xff]  }
  0xfe   :  { %v652_v63 = vpop.f32.mrb[5].mxu0  ;;  %v676_v0 = vpop.f32.mrb[5].mxu1 }
  0xff   :  { %v578_v1 = vpack.c.bf16 %v379_v57, %v378_v55  ;;  %v598_v2 = vpack.c.bf16 %v387_v58, %v386_v56  ;;  %v653_v3 = vadd.f32 %v652_v63, %v651_v59  ;;  %v677_v4 = vadd.f32 %v676_v0, %v675_v60  ;;  %v654_v5 = vpop.f32.mrb[6].mxu0  ;;  %v678_v6 = vpop.f32.mrb[6].mxu1  ;;  %v621_v55 = vld [vmem:[%s941_s3 + $0x38] sm:$0xff]  }
 0x100   :  { %v655_v9 = vpop.f32.mrb[7].mxu0  ;;  %v679_v11 = vpop.f32.mrb[7].mxu1  ;;  %v557_v0 = vunpack.c.l.bf16 %v617_v54 }
 0x101   :  { %579 = vst [vmem:[%s943_s4] sm:$0xff] %v578_v1   ;;  %625 = vst [vmem:[%s943_s4 + $0x20] sm:$0xff] %v598_v2   ;;  %v292_v13 = vadd.f32 %v653_v3, %v879_v36  ;;  %v324_v14 = vadd.f32 %v677_v4, %v879_v36  ;;  %v656_v15 = vadd.f32 %v655_v9, %v654_v5  ;;  %v573_v1 = vunpack.c.l.bf16 %v621_v55 }
 0x102   :  { %v680_v16 = vadd.f32 %v679_v11, %v678_v6  ;;  %v558_v3 = vunpack.c.h.bf16 %v617_v54  ;;  %v574_v5 = vunpack.c.h.bf16 %v621_v55 }
 0x103   :  { %v295_v17 = vadd.f32 %v656_v15, %v879_v36  ;;  %v380_v19 = vadd.f32 %v549_v7, %v292_v13  ;;  %v388_v20 = vadd.f32 %v565_v8, %v324_v14 }
 0x104   :  { %v327_v18 = vadd.f32 %v680_v16, %v879_v36 }
 0x105   :  { %v381_v21 = vadd.f32 %v550_v10, %v295_v17  ;;  %v657_v23 = vpop.f32.mrb[8].mxu0  ;;  %v681_v24 = vpop.f32.mrb[8].mxu1 }
 0x106   :  { %v389_v22 = vadd.f32 %v566_v12, %v327_v18  ;;  %v658_v27 = vpop.f32.mrb[9].mxu0  ;;  %v682_v28 = vpop.f32.mrb[9].mxu1 }
 0x107   :  { %v583_v29 = vpack.c.bf16 %v381_v21, %v380_v19  ;;  %v659_v31 = vadd.f32 %v658_v27, %v657_v23  ;;  %v683_v32 = vadd.f32 %v682_v28, %v681_v24  ;;  %v660_v33 = vpop.f32.mrb[10].mxu0  ;;  %v684_v34 = vpop.f32.mrb[10].mxu1 }
 0x108   :  { %v603_v30 = vpack.c.bf16 %v389_v22, %v388_v20  ;;  %v661_v38 = vpop.f32.mrb[11].mxu0  ;;  %v685_v40 = vpop.f32.mrb[11].mxu1 }
 0x109   :  { %622 = vst [vmem:[%s943_s4 + $0x8] sm:$0xff] %v583_v29   ;;  %v300_v42 = vadd.f32 %v659_v31, %v879_v36  ;;  %v332_v43 = vadd.f32 %v683_v32, %v879_v36  ;;  %v662_v44 = vadd.f32 %v661_v38, %v660_v33  ;;  %v686_v45 = vadd.f32 %v685_v40, %v684_v34 }
 0x10a   :  { %626 = vst [vmem:[%s943_s4 + $0x28] sm:$0xff] %v603_v30  }
 0x10b   :  { %v303_v46 = vadd.f32 %v662_v44, %v879_v36  ;;  %v335_v47 = vadd.f32 %v686_v45, %v879_v36  ;;  %v382_v48 = vadd.f32 %v553_v35, %v300_v42  ;;  %v390_v49 = vadd.f32 %v569_v37, %v332_v43 }
 0x10d   :  { %v383_v50 = vadd.f32 %v554_v39, %v303_v46  ;;  %v391_v51 = vadd.f32 %v570_v41, %v335_v47  ;;  %v663_v52 = vpop.f32.mrb[12].mxu0  ;;  %v687_v53 = vpop.f32.mrb[12].mxu1 }
 0x10e   :  { %v664_v56 = vpop.f32.mrb[13].mxu0  ;;  %v688_v57 = vpop.f32.mrb[13].mxu1 }
 0x10f   :  { %v588_v58 = vpack.c.bf16 %v383_v50, %v382_v48  ;;  %v608_v59 = vpack.c.bf16 %v391_v51, %v390_v49  ;;  %v665_v60 = vadd.f32 %v664_v56, %v663_v52  ;;  %v689_v61 = vadd.f32 %v688_v57, %v687_v53  ;;  %v666_v62 = vpop.f32.mrb[14].mxu0  ;;  %v690_v63 = vpop.f32.mrb[14].mxu1 }
 0x110   :  { %v667_v2 = vpop.f32.mrb[15].mxu0  ;;  %v691_v4 = vpop.f32.mrb[15].mxu1 }
 0x111   :  { %623 = vst [vmem:[%s943_s4 + $0x10] sm:$0xff] %v588_v58   ;;  %627 = vst [vmem:[%s943_s4 + $0x30] sm:$0xff] %v608_v59   ;;  %v308_v6 = vadd.f32 %v665_v60, %v879_v36  ;;  %v340_v7 = vadd.f32 %v689_v61, %v879_v36  ;;  %v668_v8 = vadd.f32 %v667_v2, %v666_v62 }
 0x112   :  { %v692_v9 = vadd.f32 %v691_v4, %v690_v63 }
 0x113   :  { %v311_v10 = vadd.f32 %v668_v8, %v879_v36  ;;  %v384_v12 = vadd.f32 %v557_v0, %v308_v6  ;;  %v392_v13 = vadd.f32 %v573_v1, %v340_v7 }
 0x114   :  { %v343_v11 = vadd.f32 %v692_v9, %v879_v36 }
 0x115   :  { %v385_v14 = vadd.f32 %v558_v3, %v311_v10 }
 0x116   :  { %v393_v15 = vadd.f32 %v574_v5, %v343_v11 }
 0x117   :  { %v593_v16 = vpack.c.bf16 %v385_v14, %v384_v12 }
 0x118   :  { %v613_v17 = vpack.c.bf16 %v393_v15, %v392_v13 }
 0x119   :  { %624 = vst [vmem:[%s943_s4 + $0x18] sm:$0xff] %v593_v16  }
 0x11a   :  { %628 = vst [vmem:[%s943_s4 + $0x38] sm:$0xff] %v613_v17  }

// kernel: backbone_with_fpn_forward.19
= control target key start
LH: loop header
LB: loop body
LE: loop exit
PB: predicated region body
PF: predicated region fallthrough
CT: control target
= control target key end

     0   :  { %s1773_s12 = smov 0   ;;  %s1775_s13 = smov 0   ;;  %s2119_s0 = inlined_call_operand.vmem [shape: bf16[2,2,40,128], index: 0, kind: input, shape index: {}]   ;;  %s2120_s1 = inlined_call_operand.vmem [shape: bf16[3,384,128], index: 1, kind: input, shape index: {}]   ;;  %s2121_s2 = inlined_call_operand.vmem [shape: f32[1,128], index: 2, kind: input, shape index: {}]   ;;  %s2122_s3 = inlined_call_operand.vmem [shape: f32[2,2,16,128], index: 3, kind: output, shape index: {}]  }
   0x1   :  { %s1777_s14 = smov 0   ;;  %s1779_s15 = smov 0  }
   0x2   :  { %s1781_s16 = smov 0  }
   0x3 LB: > { %s22_s17 = sadd.s32 1, %s1741_s14  ;;  %s25_s18 = sadd.s32 1, %s1745_s15  ;;  %s1749_s16 = sphi %s1781_s16, %s13_s16   ;;  %s1745_s15 = sphi %s1779_s15, %s2126_s15   ;;  %s1741_s14 = sphi %s1777_s14, %s2125_s14   ;;  %s1737_s13 = sphi %s1775_s13, %s2124_s13   ;;  %s1733_s12 = sphi %s1773_s12, %s2123_s12  }
   0x4   : > { %p23_p0 = scmp.ge.s32.totalorder %s22_s17, 2  ;;  %p1246_p1 = scmp.ge.s32.totalorder %s1749_s16, 1 }
   0x5   : > { %p157_p2 = scmp.lt.s32.totalorder %s1749_s16, 5 }
   0x6   : > { %s2128_s17 = smov (%p23_p0, %s22_s17), 0  ;;  %s2130_s18 = smov (!%p23_p0, %s25_s18), %s1745_s15 }
   0x7   : > { %p158_p3 = pnand %p1246_p1, %p157_p2  ;;  %p27_p4 = scmp.ge.s32.totalorder %s2130_s18, 2 }
   0x8   : > { %v1629_v0 = vld [vmem:[%s2120_s1 + $0x100] sm:$0xff] (!%p158_p3)   ;;  %v1751_v1 = vmov (!%p158_p3), 0.0   ;;  %p189_p5 = scmp.lt.s32.totalorder (!%p158_p3), %s1737_s13, 1  ;;  %p191_p6 = scmp.lt.s32.totalorder (!%p158_p3), %s1733_s12, 1  ;;  %v1632_v4 = vld [vmem:[%s2120_s1 + $0x108] sm:$0xff] (!%p158_p3)   ;;  %v1635_v7 = vld [vmem:[%s2120_s1 + $0x110] sm:$0xff] (!%p158_p3)  }
   0x9   : > { %s2132_s18 = smov (%p27_p4, %s2130_s18), 0  ;;  %161 = sbr.rel (%p158_p3) target bundleno = 330 (0x14a), region = 32 }
   0xa   : > { %1525 = vmatprep.subr.bf16.mxu1 (!%p158_p3), %v1751_v1  ;;  %v1630_v2 = vld [vmem:[%s2120_s1 + $0xc0] sm:$0xff] (!%p158_p3)   ;;  %1432 = vmatprep.subr.bf16.mxu0 (!%p158_p3), %v1629_v0  ;;  %v1633_v5 = vld [vmem:[%s2120_s1 + $0xc8] sm:$0xff] (!%p158_p3)   ;;  %v1636_v8 = vld [vmem:[%s2120_s1 + $0xd0] sm:$0xff] (!%p158_p3)   ;;  %vm1752_vm0 = vmmov (!%p158_p3), 0   ;;  %vm221_vm1 = vsmask.f32 (!%p158_p3), 7424 }
   0xb   : > { %v1631_v3 = vld [vmem:[%s2120_s1 + $0x140] sm:$0xff] (!%p158_p3)   ;;  %1433 = vmatpush3.bf16.msra.mxu0 (!%p158_p3), %v1630_v2  ;;  %v1634_v6 = vld [vmem:[%s2120_s1 + $0x148] sm:$0xff] (!%p158_p3)   ;;  %v1637_v9 = vld [vmem:[%s2120_s1 + $0x150] sm:$0xff] (!%p158_p3)   ;;  %1541 = vmatprep.mubr.msk.bf16.mxu1 (!%p158_p3), %vm1752_vm0, %v1751_v1  ;;  %vm238_vm2 = vcmask (!%p158_p3), 1046528  }
   0xc   : > { %1526 = vmatpush3.bf16.msra.mxu1 (!%p158_p3), %v1631_v3  ;;  %1434 = vmatprep.subr.bf16.mxu0 (!%p158_p3), %v1632_v4  ;;  %v1638_v10 = vld [vmem:[%s2120_s1 + $0x118] sm:$0xff] (!%p158_p3)   ;;  %v1641_v13 = vld [vmem:[%s2120_s1 + $0x120] sm:$0xff] (!%p158_p3)   ;;  %v1644_v16 = vld [vmem:[%s2120_s1 + $0x128] sm:$0xff] (!%p158_p3)  }
   0xd   : > { %1527 = vmatprep.subr.bf16.mxu1 (!%p158_p3), %v1751_v1  ;;  %v1639_v11 = vld [vmem:[%s2120_s1 + $0xd8] sm:$0xff] (!%p158_p3)   ;;  %v1642_v14 = vld [vmem:[%s2120_s1 + $0xe0] sm:$0xff] (!%p158_p3)   ;;  %v1645_v17 = vld [vmem:[%s2120_s1 + $0xe8] sm:$0xff] (!%p158_p3)  }
   0xe   : > { %v1640_v12 = vld [vmem:[%s2120_s1 + $0x158] sm:$0xff] (!%p158_p3)   ;;  %v1643_v15 = vld [vmem:[%s2120_s1 + $0x160] sm:$0xff] (!%p158_p3)   ;;  %v1646_v18 = vld [vmem:[%s2120_s1 + $0x168] sm:$0xff] (!%p158_p3)  }
   0xf   : > { %1435 = vmatpush3.bf16.msra.mxu0 (!%p158_p3), %v1633_v5  ;;  %v1647_v19 = vld [vmem:[%s2120_s1 + $0x130] sm:$0xff] (!%p158_p3)   ;;  %v1650_v22 = vld [vmem:[%s2120_s1 + $0x138] sm:$0xff] (!%p158_p3)   ;;  %v1655_v34 = vld [vmem:[%s2120_s1 + $0x40] sm:$0xff] (!%p158_p3)  }
  0x10   : > { %s2134_s13 = smov (!%p189_p5, %s1737_s13), 1  ;;  %s2136_s12 = smov (!%p191_p6, %s1733_s12), 1  ;;  %1528 = vmatpush3.bf16.msra.mxu1 %v1634_v6  ;;  %1436 = vmatprep.subr.bf16.mxu0 %v1635_v7  ;;  %v1648_v20 = vld [vmem:[%s2120_s1 + $0xf0] sm:$0xff]   ;;  %v1651_v25 = vld [vmem:[%s2120_s1 + $0xf8] sm:$0xff]   ;;  %v1657_v40 = vld [vmem:[%s2120_s1] sm:$0xff]  }
  0x11   : > { %1529 = vmatprep.subr.bf16.mxu1 %v1751_v1  ;;  %s1586_s21 = smul.u32 10, %s2134_s13  ;;  %v1649_v21 = vld [vmem:[%s2120_s1 + $0x170] sm:$0xff]   ;;  %v1652_v29 = vld [vmem:[%s2120_s1 + $0x178] sm:$0xff]   ;;  %v1658_v42 = vld [vmem:[%s2120_s1 + $0x80] sm:$0xff]   ;;  %s1248_s7 = sshll.u32 %s2136_s12, 1 }
  0x12   : > { %s1585_s24 = smul.u32 5, %s2136_s12  ;;  %v1659_v44 = vld [vmem:[%s2120_s1 + $0x48] sm:$0xff]   ;;  %v1662_v47 = vld [vmem:[%s2120_s1 + $0x50] sm:$0xff]   ;;  %v1665_v50 = vld [vmem:[%s2120_s1 + $0x58] sm:$0xff]   ;;  %s1249_s8 = sshll.u32 %s2134_s13, 2 }
  0x13   : > { %1437 = vmatpush3.bf16.msra.mxu0 %v1636_v8  ;;  %v1660_v45 = vld [vmem:[%s2120_s1 + $0x8] sm:$0xff]   ;;  %v1663_v48 = vld [vmem:[%s2120_s1 + $0x10] sm:$0xff]   ;;  %v1666_v51 = vld [vmem:[%s2120_s1 + $0x18] sm:$0xff]  }
  0x14   : > { %1530 = vmatpush3.bf16.msra.mxu1 %v1637_v9  ;;  %1438 = vmatprep.subr.bf16.mxu0 %v1638_v10  ;;  %s195_s4 = sadd.s32 %s1586_s21, %s1585_s24  ;;  %v1661_v46 = vld [vmem:[%s2120_s1 + $0x88] sm:$0xff]   ;;  %v1664_v49 = vld [vmem:[%s2120_s1 + $0x90] sm:$0xff]   ;;  %v1667_v52 = vld [vmem:[%s2120_s1 + $0x98] sm:$0xff]  }
  0x15   : > { %1531 = vmatprep.subr.bf16.mxu1 %v1751_v1  ;;  %s1247_s9 = sshll.u32 %s195_s4, 2  ;;  %v1668_v53 = vld [vmem:[%s2120_s1 + $0x60] sm:$0xff]   ;;  %v1671_v56 = vld [vmem:[%s2120_s1 + $0x68] sm:$0xff]   ;;  %v1674_v63 = vld [vmem:[%s2120_s1 + $0x70] sm:$0xff]  }
  0x16   : > { %s1888_s25 = scalar_lea.vmem %s2119_s0, %s1247_s9  ;;  %v1669_v54 = vld [vmem:[%s2120_s1 + $0x20] sm:$0xff]   ;;  %v1672_v57 = vld [vmem:[%s2120_s1 + $0x28] sm:$0xff]   ;;  %v1675_v4 = vld [vmem:[%s2120_s1 + $0x30] sm:$0xff]   ;;  %s204_s9 = sadd.s32 %s1249_s8, %s1248_s7 }
  0x17   : > { %1439 = vmatpush3.bf16.msra.mxu0 %v1639_v11  ;;  %v1897_v23 = vld [vmem:[%s1888_s25 + $0x4] sm:$0xf]  ;;  %v1900_v24 = vld [vmem:[%s1888_s25 + $0x8] sm:$0xf]  ;;  %v208_v58 = vld [vmem:[%s1888_s25] sm:$0xf] }
  0x18   : > { %1532 = vmatpush3.bf16.msra.mxu1 %v1640_v12  ;;  %1440 = vmatprep.subr.bf16.mxu0 %v1641_v13  ;;  %v1254_v26 = vcombine.low %v1897_v23, %v1900_v24  ;;  %v1654_v27 = vld [vmem:[%s1888_s25 + $0xc] ss:$0 sps:$4 sm:$0x11]   ;;  %v293_v28 = vld [vmem:[%s1888_s25 + $0x4] sm:$0xe]  ;;  %v1251_v60 = vcombine.low %v208_v58, %v1897_v23  ;;  %v1676_v5 = vld [vmem:[%s2120_s1 + $0xb0] sm:$0xff]  }
  0x19   : > { %1533 = vmatprep.subr.bf16.mxu1 %v1751_v1  ;;  %v309_v32 = vshll.u32 %v1654_v27, 16  ;;  %v1256_v33 = vcombine.low %v293_v28, %v1900_v24  ;;  %v318_v35 = vrot.slane %v1654_v27, 1  ;;  %v1670_v55 = vld [vmem:[%s2120_s1 + $0xa0] sm:$0xff]   ;;  %v1673_v59 = vld [vmem:[%s2120_s1 + $0xa8] sm:$0xff]   ;;  %v1677_v9 = vld [vmem:[%s2120_s1 + $0x78] sm:$0xff]  }
  0x1a   : > { %v302_v30 = vshrl.u32 %v1254_v26, 16  ;;  %v304_v31 = vshll.u32 %v1254_v26, 16  ;;  %v1681_v61 = vld [vmem:[%s1888_s25 + $0x8] ss:$0 sps:$4 sm:$0x11]   ;;  %v223_v0 = vshrl.u32 %v1251_v60, 16 }
  0x1b   : > { %1441 = vmatpush3.bf16.msra.mxu0 %v1642_v14  ;;  %v311_v37 = vrot.slane %v309_v32, 1  ;;  %v317_v38 = vrot.slane %v1256_v33, 1  ;;  %v211_v62 = vld [vmem:[%s1888_s25] sm:$0xe]  ;;  %v225_v2 = vshll.u32 %v1251_v60, 16  ;;  %v230_v3 = vshll.u32 %v1681_v61, 16 }
  0x1c   : > { %1534 = vmatpush3.bf16.msra.mxu1 %v1643_v15  ;;  %1442 = vmatprep.subr.bf16.mxu0 %v1644_v16  ;;  %v306_v36 = vrot.slane %v304_v31, 1  ;;  %v1253_v8 = vcombine.low %v211_v62, %v1897_v23  ;;  %v1678_v11 = vld [vmem:[%s2120_s1 + $0x38] sm:$0xff]   ;;  %v240_v15 = vrot.slane %v1681_v61, 1  ;;  %v1682_v16 = vld [vmem:[%s2120_s1 + $0x1c0] sm:$0xff]   ;;  %v1689_v23 = vld [vmem:[%s2120_s1 + $0x1d0] sm:$0xff]  }
  0x1d   : > { %1535 = vmatprep.subr.bf16.mxu1 %v1751_v1  ;;  %v319_v41 = vsel %vm238_vm2, %v317_v38, %v318_v35  ;;  %v227_v6 = vrot.slane %v225_v2, 1  ;;  %v232_v7 = vrot.slane %v230_v3, 1  ;;  %v1679_v12 = vld [vmem:[%s2120_s1 + $0xb8] sm:$0xff]   ;;  %v823_v31 = vld [vmem:[%s1888_s25 + $0x8] sm:$0xf] }
  0x1e   : > { %v307_v39 = vor.u32 %v306_v36, %v302_v30  ;;  %v239_v14 = vrot.slane %v1253_v8, 1  ;;  %v1692_v27 = vld [vmem:[%s2120_s1 + $0x1d8] sm:$0xff]   ;;  %v1695_v30 = vld [vmem:[%s2120_s1 + $0x1e0] sm:$0xff]   ;;  %v824_v32 = vld [vmem:[%s1888_s25 + $0xc] sm:$0xf] }
  0x1f   : > { %1443 = vmatpush3.bf16.msra.mxu0 %v1645_v17  ;;  %v228_v10 = vor.u32 %v227_v6, %v223_v0  ;;  %v1684_v17 = vld [vmem:[%s2120_s1 + $0x180] sm:$0xff]   ;;  %v1693_v28 = vld [vmem:[%s2120_s1 + $0x198] sm:$0xff]   ;;  %v822_v33 = vld [vmem:[%s1888_s25 + $0xc] sm:$0xf] }
  0x20   : > { %1536 = vmatpush3.bf16.msra.mxu1 %v1646_v18  ;;  %1444 = vmatprep.subr.bf16.mxu0 %v1647_v19  ;;  %v312_v43 = vsel %vm221_vm1, %v307_v39, %v311_v37  ;;  %v241_v18 = vsel %vm238_vm2, %v239_v14, %v240_v15  ;;  %v1685_v19 = vld [vmem:[%s2120_s1 + $0x200] sm:$0xff]   ;;  %v1708_v35 = vld [vmem:[%s1888_s25 + $0x10] ss:$0 sps:$4 sm:$0x11]   ;;  %v1353_v36 = vcombine.low %v1900_v24, %v822_v33  ;;  %v826_v37 = vld [vmem:[%s1888_s25 + $0x8] sm:$0xe] }
  0x21   : > { %1537 = vmatprep.subr.bf16.mxu1 %v1751_v1  ;;  %546 = vmatprep.mubr.bf16.mxu0 %v312_v43  ;;  %v233_v13 = vsel %vm221_vm1, %v228_v10, %v232_v7  ;;  %v1356_v38 = vcombine.low %v826_v37, %v824_v32  ;;  %v1696_v39 = vld [vmem:[%s2120_s1 + $0x1a0] sm:$0xff]   ;;  %v847_v43 = vshll.u32 %v1708_v35, 16  ;;  %v1698_v24 = vld [vmem:[%s2120_s1 + $0x1e8] sm:$0xff]   ;;  %v1706_v58 = vld [vmem:[%s2120_s1 + $0x238] sm:$0xff]   ;;  %s1250_s25 = sshll.u32 %s204_s9, 3 }
  0x22   : > { %v1429_v33 = vld [vmem:[%s2121_s2] ss:$0 sm:$0xff]  ;;  %s206_s19 = scalar_lea.vmem %s2122_s3, %s1250_s25 }
  0x23   : > { %1445 = vmatpush3.bf16.msra.mxu0 %v1648_v20  ;;  %v1686_v20 = vld [vmem:[%s2120_s1 + $0x1c8] sm:$0xff]  }
  0x24   : > { %1538 = vmatpush3.bf16.msra.mxu1 %v1649_v21  ;;  %1446 = vmatprep.subr.bf16.mxu0 %v1650_v22  ;;  %v1687_v21 = vld [vmem:[%s2120_s1 + $0x188] sm:$0xff]  }
  0x25   : > { %1539 = vmatprep.subr.bf16.mxu1 %v1751_v1  ;;  %v1688_v22 = vld [vmem:[%s2120_s1 + $0x208] sm:$0xff]  }
  0x27   : > { %1447 = vmatpush3.bf16.msra.mxu0 %v1651_v25  ;;  %v1690_v25 = vld [vmem:[%s2120_s1 + $0x190] sm:$0xff]  }
  0x28   : > { %1540 = vmatpush3.bf16.msra.mxu1 %v1652_v29  ;;  %1463 = vmatprep.subr.bf16.mxu0 %v1655_v34  ;;  %v1694_v29 = vld [vmem:[%s2120_s1 + $0x218] sm:$0xff]   ;;  %v1354_v34 = vcombine.low %v823_v31, %v824_v32 }
  0x29   : > { %1545 = vmatprep.subr.bf16.mxu1 %v1751_v1 }
  0x2a   : > { %547 = vmatmul.mubr.bf16.vlgmr.msra.gmra.mrb[0].mxu0 %v1254_v26  ;;  %v1691_v26 = vld [vmem:[%s2120_s1 + $0x210] sm:$0xff]  }
  0x2b   : > { %1542 = vmatmul.mubr.bf16.vlgmr.msra.gmra.mrb[0].mxu1 %v319_v41  ;;  %1464 = vmatpush3.bf16.msra.mxu0 %v1657_v40  ;;  %v1697_v40 = vld [vmem:[%s2120_s1 + $0x220] sm:$0xff]   ;;  %v840_v41 = vshrl.u32 %v1354_v34, 16 }
  0x2c   : > { %1546 = vmatpush3.bf16.msra.mxu1 %v1658_v42  ;;  %1465 = vmatprep.subr.bf16.mxu0 %v1659_v44  ;;  %v842_v42 = vshll.u32 %v1354_v34, 16  ;;  %v856_v44 = vrot.slane %v1708_v35, 1 }
  0x2d   : > { %1547 = vmatprep.subr.bf16.mxu1 %v1751_v1  ;;  %1561 = vmatprep.mubr.msk.bf16.mxu1 %vm1752_vm0, %v1751_v1 }
  0x2e   : > { %772 = vmatprep.mubr.bf16.mxu0 %v233_v13 }
  0x2f   : > { %1466 = vmatpush3.bf16.msra.mxu0 %v1660_v45  ;;  %v855_v45 = vrot.slane %v1356_v38, 1 }
  0x30   : > { %1548 = vmatpush3.bf16.msra.mxu1 %v1661_v46  ;;  %1467 = vmatprep.subr.bf16.mxu0 %v1662_v47  ;;  %v844_v46 = vrot.slane %v842_v42, 1  ;;  %v849_v47 = vrot.slane %v847_v43, 1 }
  0x31   : > { %1549 = vmatprep.subr.bf16.mxu1 %v1751_v1 }
  0x33   : > { %1468 = vmatpush3.bf16.msra.mxu0 %v1663_v48  ;;  %v857_v48 = vsel %vm238_vm2, %v855_v45, %v856_v44 }
  0x34   : > { %1550 = vmatpush3.bf16.msra.mxu1 %v1664_v49  ;;  %1469 = vmatprep.subr.bf16.mxu0 %v1665_v50  ;;  %v1699_v49 = vld [vmem:[%s2120_s1 + $0x1a8] sm:$0xff]  }
  0x35   : > { %1551 = vmatprep.subr.bf16.mxu1 %v1751_v1  ;;  %v1700_v50 = vld [vmem:[%s2120_s1 + $0x228] sm:$0xff]  }
  0x37   : > { %1470 = vmatpush3.bf16.msra.mxu0 %v1666_v51  ;;  %v845_v51 = vor.u32 %v844_v46, %v840_v41 }
  0x38   : > { %1552 = vmatpush3.bf16.msra.mxu1 %v1667_v52  ;;  %1471 = vmatprep.subr.bf16.mxu0 %v1668_v53  ;;  %v1701_v52 = vld [vmem:[%s2120_s1 + $0x1f0] sm:$0xff]  }
  0x39   : > { %1553 = vmatprep.subr.bf16.mxu1 %v1751_v1  ;;  %v850_v53 = vsel %vm221_vm1, %v845_v51, %v849_v47 }
  0x3b   : > { %1472 = vmatpush3.bf16.msra.mxu0 %v1669_v54  ;;  %v1702_v54 = vld [vmem:[%s2120_s1 + $0x1b0] sm:$0xff]  }
  0x3c   : > { %1554 = vmatpush3.bf16.msra.mxu1 %v1670_v55  ;;  %1473 = vmatprep.subr.bf16.mxu0 %v1671_v56  ;;  %v1703_v55 = vld [vmem:[%s2120_s1 + $0x230] sm:$0xff]   ;;  %v1704_v56 = vld [vmem:[%s2120_s1 + $0x1f8] sm:$0xff]  }
  0x3d   : > { %1555 = vmatprep.subr.bf16.mxu1 %v1751_v1 }
  0x3f   : > { %1474 = vmatpush3.bf16.msra.mxu0 %v1672_v57  ;;  %v1705_v57 = vld [vmem:[%s2120_s1 + $0x1b8] sm:$0xff]  }
  0x40   : > { %1556 = vmatpush3.bf16.msra.mxu1 %v1673_v59  ;;  %1475 = vmatprep.subr.bf16.mxu0 %v1674_v63 }
  0x41   : > { %1557 = vmatprep.subr.bf16.mxu1 %v1751_v1 }
  0x43   : > { %1476 = vmatpush3.bf16.msra.mxu0 %v1675_v4 }
  0x44   : > { %1558 = vmatpush3.bf16.msra.mxu1 %v1676_v5  ;;  %1477 = vmatprep.subr.bf16.mxu0 %v1677_v9 }
  0x45   : > { %1559 = vmatprep.subr.bf16.mxu1 %v1751_v1 }
  0x47   : > { %1478 = vmatpush3.bf16.msra.mxu0 %v1678_v11 }
  0x48   : > { %1560 = vmatpush3.bf16.msra.mxu1 %v1679_v12  ;;  %1494 = vmatprep.subr.bf16.mxu0 %v1682_v16 }
  0x49   : > { %1565 = vmatprep.subr.bf16.mxu1 %v1751_v1 }
  0x4a   : > { %773 = vmatmul.mubr.bf16.vlgmr.msra.gmra.mrb[4].mxu0 %v1251_v60 }
  0x4b   : > { %1562 = vmatmul.mubr.bf16.vlgmr.msra.gmra.mrb[4].mxu1 %v241_v18  ;;  %1495 = vmatpush3.bf16.msra.mxu0 %v1684_v17 }
  0x4c   : > { %1566 = vmatpush3.bf16.msra.mxu1 %v1685_v19  ;;  %1496 = vmatprep.subr.bf16.mxu0 %v1686_v20 }
  0x4d   : > { %1567 = vmatprep.subr.bf16.mxu1 %v1751_v1  ;;  %1581 = vmatprep.mubr.msk.bf16.mxu1 %vm1752_vm0, %v1751_v1 }
  0x4e   : > { %1084 = vmatprep.mubr.bf16.mxu0 %v850_v53 }
  0x4f   : > { %1497 = vmatpush3.bf16.msra.mxu0 %v1687_v21 }
  0x50   : > { %1568 = vmatpush3.bf16.msra.mxu1 %v1688_v22  ;;  %1498 = vmatprep.subr.bf16.mxu0 %v1689_v23 }
  0x51   : > { %1569 = vmatprep.subr.bf16.mxu1 %v1751_v1 }
  0x53   : > { %1499 = vmatpush3.bf16.msra.mxu0 %v1690_v25 }
  0x54   : > { %1570 = vmatpush3.bf16.msra.mxu1 %v1691_v26  ;;  %1500 = vmatprep.subr.bf16.mxu0 %v1692_v27 }
  0x55   : > { %1571 = vmatprep.subr.bf16.mxu1 %v1751_v1 }
  0x57   : > { %1501 = vmatpush3.bf16.msra.mxu0 %v1693_v28 }
  0x58   : > { %1572 = vmatpush3.bf16.msra.mxu1 %v1694_v29  ;;  %1502 = vmatprep.subr.bf16.mxu0 %v1695_v30 }
  0x59   : > { %1573 = vmatprep.subr.bf16.mxu1 %v1751_v1 }
  0x5b   : > { %1503 = vmatpush3.bf16.msra.mxu0 %v1696_v39 }
  0x5c   : > { %1574 = vmatpush3.bf16.msra.mxu1 %v1697_v40  ;;  %1504 = vmatprep.subr.bf16.mxu0 %v1698_v24 }
  0x5d   : > { %1575 = vmatprep.subr.bf16.mxu1 %v1751_v1 }
  0x5f   : > { %1505 = vmatpush3.bf16.msra.mxu0 %v1699_v49 }
  0x60   : > { %1576 = vmatpush3.bf16.msra.mxu1 %v1700_v50  ;;  %1506 = vmatprep.subr.bf16.mxu0 %v1701_v52 }
  0x61   : > { %1577 = vmatprep.subr.bf16.mxu1 %v1751_v1 }
  0x63   : > { %1507 = vmatpush3.bf16.msra.mxu0 %v1702_v54 }
  0x64   : > { %1578 = vmatpush3.bf16.msra.mxu1 %v1703_v55  ;;  %1508 = vmatprep.subr.bf16.mxu0 %v1704_v56 }
  0x65   : > { %1579 = vmatprep.subr.bf16.mxu1 %v1751_v1 }
  0x67   : > { %1509 = vmatpush3.bf16.msra.mxu0 %v1705_v57 }
  0x68   : > { %1580 = vmatpush3.bf16.msra.mxu1 %v1706_v58 }
  0x6a   : > { %1085 = vmatmul.mubr.bf16.vlgmr.msra.gmra.mrb[8].mxu0 %v1353_v36 }
  0x6b   : > { %1582 = vmatmul.mubr.bf16.vlgmr.msra.gmra.mrb[8].mxu1 %v857_v48 }
  0xfd   : > { %v1448_v59 = vpop.f32.mrb[0].mxu0 }
  0xfe   : > { %v589_v60 = vpop.f32.mrb[0].mxu1  ;;  %v1449_v61 = vpop.f32.mrb[1].mxu0 }
  0xff   : > { %v1543_v62 = vpop.f32.mrb[1].mxu1  ;;  %v1450_v63 = vadd.f32 %v1449_v61, %v1448_v59  ;;  %v1451_v0 = vpop.f32.mrb[2].mxu0 }
 0x100   : > { %v592_v2 = vpop.f32.mrb[2].mxu1  ;;  %v1452_v3 = vpop.f32.mrb[3].mxu0 }
 0x101   : > { %v1544_v4 = vpop.f32.mrb[3].mxu1  ;;  %v590_v5 = vadd.f32 %v1450_v63, %v589_v60  ;;  %v1453_v6 = vadd.f32 %v1452_v3, %v1451_v0 }
 0x103   : > { %v593_v7 = vadd.f32 %v1453_v6, %v592_v2 }
 0x11d   : > { %v1479_v8 = vpop.f32.mrb[4].mxu0 }
 0x11e   : > { %v815_v1 = vpop.f32.mrb[4].mxu1  ;;  %v1480_v9 = vpop.f32.mrb[5].mxu0 }
 0x11f   : > { %v1563_v10 = vpop.f32.mrb[5].mxu1  ;;  %v1481_v11 = vadd.f32 %v1480_v9, %v1479_v8  ;;  %v1482_v12 = vpop.f32.mrb[6].mxu0 }
 0x120   : > { %v818_v13 = vpop.f32.mrb[6].mxu1  ;;  %v1483_v14 = vpop.f32.mrb[7].mxu0 }
 0x121   : > { %v1564_v15 = vpop.f32.mrb[7].mxu1  ;;  %v775_v16 = vadd.f32 %v1481_v11, %v590_v5  ;;  %v1484_v17 = vadd.f32 %v1483_v14, %v1482_v12 }
 0x123   : > { %v816_v18 = vadd.f32 %v815_v1, %v775_v16  ;;  %v778_v19 = vadd.f32 %v1484_v17, %v593_v7 }
 0x125   : > { %v819_v20 = vadd.f32 %v818_v13, %v778_v19 }
 0x13d   : > { %v1510_v21 = vpop.f32.mrb[8].mxu0 }
 0x13e   : > { %v1127_v22 = vpop.f32.mrb[8].mxu1  ;;  %v1511_v23 = vpop.f32.mrb[9].mxu0 }
 0x13f   : > { %v1583_v25 = vpop.f32.mrb[9].mxu1  ;;  %v1512_v26 = vadd.f32 %v1511_v23, %v1510_v21  ;;  %v1513_v27 = vpop.f32.mrb[10].mxu0 }
 0x140   : > { %v1130_v28 = vpop.f32.mrb[10].mxu1  ;;  %v1514_v29 = vpop.f32.mrb[11].mxu0 }
 0x141   : > { %v1584_v30 = vpop.f32.mrb[11].mxu1  ;;  %v1128_v31 = vadd.f32 %v1512_v26, %v1127_v22  ;;  %v1515_v32 = vadd.f32 %v1514_v29, %v1513_v27 }
 0x143   : > { %v1134_v34 = vadd.f32 %v1128_v31, %v816_v18  ;;  %v1131_v35 = vadd.f32 %v1515_v32, %v1130_v28 }
 0x145   : > { %v1143_v36 = vadd.f32 %v1429_v33, %v1134_v34  ;;  %v1135_v37 = vadd.f32 %v1131_v35, %v819_v20 }
 0x147   : > { %1145 = vst [vmem:[%s206_s19] sm:$0xff] %v1143_v36  ;;  %v1144_v38 = vadd.f32 %v1429_v33, %v1135_v37 }
 0x149   : > { %1146 = vst [vmem:[%s206_s19 + $0x8] sm:$0xff] %v1144_v38 }
 0x14a PF: > { %s13_s16 = sadd.s32 1, %s1749_s16   ;;  %s2123_s12 = smov %s1741_s14 }
 0x14b   : > { %p10_p7 = scmp.ge.s32.totalorder %s13_s16, 6   ;;  %s2124_s13 = smov %s1745_s15 }
 0x14c   : > { %s2125_s14 = smov %s2128_s17  ;;  %s2126_s15 = smov %s2132_s18 }
 0x14d   :  { %12 = sbr.rel (!%p10_p7) target bundleno = 3 (0x3), region = 64 }

// kernel: backbone_with_fpn_forward.21
= control target key start
LH: loop header
LB: loop body
LE: loop exit
PB: predicated region body
PF: predicated region fallthrough
CT: control target
= control target key end

     0   :  { %s2182_s12 = smov 0   ;;  %s2184_s13 = smov 0   ;;  %s2593_s0 = inlined_call_operand.vmem [shape: bf16[2,2,112,128], index: 0, kind: input, shape index: {}]   ;;  %s2594_s1 = inlined_call_operand.vmem [shape: bf16[3,384,128], index: 1, kind: input, shape index: {}]   ;;  %s2595_s2 = inlined_call_operand.vmem [shape: f32[1,128], index: 2, kind: input, shape index: {}]   ;;  %s2596_s3 = inlined_call_operand.vmem [shape: f32[2,2,64,128], index: 3, kind: output, shape index: {}]  }
   0x1   :  { %s2186_s14 = smov 0   ;;  %s2188_s15 = smov 0  }
   0x2   :  { %s2190_s16 = smov 0  }
   0x3 LB: > { %s22_s17 = sadd.s32 1, %s2152_s14  ;;  %s25_s18 = sadd.s32 1, %s2156_s15  ;;  %s2160_s16 = sphi %s2190_s16, %s13_s16   ;;  %s2156_s15 = sphi %s2188_s15, %s2600_s15   ;;  %s2152_s14 = sphi %s2186_s14, %s2599_s14   ;;  %s2148_s13 = sphi %s2184_s13, %s2598_s13   ;;  %s2144_s12 = sphi %s2182_s12, %s2597_s12  }
   0x4   : > { %p23_p0 = scmp.ge.s32.totalorder %s22_s17, 2  ;;  %p1534_p1 = scmp.ge.s32.totalorder %s2160_s16, 1 }
   0x5   : > { %p157_p2 = scmp.lt.s32.totalorder %s2160_s16, 5 }
   0x6   : > { %s2602_s17 = smov (%p23_p0, %s22_s17), 0  ;;  %s2604_s18 = smov (!%p23_p0, %s25_s18), %s2156_s15 }
   0x7   : > { %p158_p3 = pnand %p1534_p1, %p157_p2  ;;  %p27_p4 = scmp.ge.s32.totalorder %s2604_s18, 2 }
   0x8   : > { %v2035_v0 = vld [vmem:[%s2594_s1 + $0x100] sm:$0xff] (!%p158_p3)   ;;  %p189_p5 = scmp.lt.s32.totalorder (!%p158_p3), %s2148_s13, 1  ;;  %v2038_v3 = vld [vmem:[%s2594_s1 + $0x108] sm:$0xff] (!%p158_p3)   ;;  %p191_p6 = scmp.lt.s32.totalorder (!%p158_p3), %s2144_s12, 1  ;;  %v2041_v6 = vld [vmem:[%s2594_s1 + $0x110] sm:$0xff] (!%p158_p3)   ;;  %vm289_vm0 = vcmask (!%p158_p3), 1046528  }
   0x9   : > { %s2606_s18 = smov (%p27_p4, %s2604_s18), 0  ;;  %161 = sbr.rel (%p158_p3) target bundleno = 355 (0x163), region = 32 }
   0xa   : > { %v2036_v1 = vld [vmem:[%s2594_s1 + $0x140] sm:$0xff] (!%p158_p3)   ;;  %1725 = vmatprep.subr.bf16.mxu0 (!%p158_p3), %v2035_v0  ;;  %v2039_v4 = vld [vmem:[%s2594_s1 + $0x148] sm:$0xff] (!%p158_p3)   ;;  %v2042_v7 = vld [vmem:[%s2594_s1 + $0x150] sm:$0xff] (!%p158_p3)   ;;  %vm245_vm1 = vsmask.f32 (!%p158_p3), 7424 }
   0xb   : > { %v2037_v2 = vld [vmem:[%s2594_s1 + $0xc0] sm:$0xff] (!%p158_p3)   ;;  %1881 = vmatprep.subr.bf16.mxu1 (!%p158_p3), %v2036_v1  ;;  %v2040_v5 = vld [vmem:[%s2594_s1 + $0xc8] sm:$0xff] (!%p158_p3)   ;;  %v2043_v8 = vld [vmem:[%s2594_s1 + $0xd0] sm:$0xff] (!%p158_p3)  }
   0xc   : > { %1726 = vmatpush3.bf16.msra.mxu0 (!%p158_p3), %v2037_v2  ;;  %1882 = vmatpush3.bf16.msra.mxu1 (!%p158_p3), %v2036_v1  ;;  %v2044_v9 = vld [vmem:[%s2594_s1 + $0x118] sm:$0xff] (!%p158_p3)   ;;  %v2047_v12 = vld [vmem:[%s2594_s1 + $0x120] sm:$0xff] (!%p158_p3)   ;;  %v2050_v15 = vld [vmem:[%s2594_s1 + $0x128] sm:$0xff] (!%p158_p3)  }
   0xd   : > { %1727 = vmatprep.subr.bf16.mxu0 (!%p158_p3), %v2038_v3  ;;  %1883 = vmatprep.subr.bf16.mxu1 (!%p158_p3), %v2039_v4  ;;  %v2045_v10 = vld [vmem:[%s2594_s1 + $0x158] sm:$0xff] (!%p158_p3)   ;;  %v2048_v13 = vld [vmem:[%s2594_s1 + $0x160] sm:$0xff] (!%p158_p3)   ;;  %v2051_v16 = vld [vmem:[%s2594_s1 + $0x168] sm:$0xff] (!%p158_p3)  }
   0xe   : > { %v2046_v11 = vld [vmem:[%s2594_s1 + $0xd8] sm:$0xff] (!%p158_p3)   ;;  %v2049_v14 = vld [vmem:[%s2594_s1 + $0xe0] sm:$0xff] (!%p158_p3)   ;;  %v2052_v17 = vld [vmem:[%s2594_s1 + $0xe8] sm:$0xff] (!%p158_p3)  }
   0xf   : > { %v2053_v18 = vld [vmem:[%s2594_s1 + $0x130] sm:$0xff] (!%p158_p3)   ;;  %v2056_v21 = vld [vmem:[%s2594_s1 + $0x138] sm:$0xff] (!%p158_p3)   ;;  %v2062_v32 = vld [vmem:[%s2594_s1 + $0x40] sm:$0xff] (!%p158_p3)  }
  0x10   : > { %s2608_s13 = smov (!%p189_p5, %s2148_s13), 1  ;;  %s2610_s12 = smov (!%p191_p6, %s2144_s12), 1  ;;  %1728 = vmatpush3.bf16.msra.mxu0 %v2040_v5  ;;  %1884 = vmatpush3.bf16.msra.mxu1 %v2039_v4  ;;  %v2054_v19 = vld [vmem:[%s2594_s1 + $0x170] sm:$0xff]   ;;  %v2057_v24 = vld [vmem:[%s2594_s1 + $0x178] sm:$0xff]   ;;  %v2063_v35 = vld [vmem:[%s2594_s1 + $0x80] sm:$0xff]  }
  0x11   : > { %1729 = vmatprep.subr.bf16.mxu0 %v2041_v6  ;;  %1885 = vmatprep.subr.bf16.mxu1 %v2042_v7  ;;  %s1994_s21 = smul.u32 28, %s2608_s13  ;;  %v2055_v20 = vld [vmem:[%s2594_s1 + $0xf0] sm:$0xff]   ;;  %v2058_v27 = vld [vmem:[%s2594_s1 + $0xf8] sm:$0xff]   ;;  %v2065_v41 = vld [vmem:[%s2594_s1] sm:$0xff]   ;;  %s1536_s7 = sshll.u32 %s2610_s12, 3 }
  0x12   : > { %s1993_s24 = smul.u32 14, %s2610_s12  ;;  %v2066_v44 = vld [vmem:[%s2594_s1 + $0x48] sm:$0xff]   ;;  %v2069_v53 = vld [vmem:[%s2594_s1 + $0x50] sm:$0xff]   ;;  %v2072_v58 = vld [vmem:[%s2594_s1 + $0x58] sm:$0xff]   ;;  %s1537_s8 = sshll.u32 %s2608_s13, 4 }
  0x13   : > { %v2067_v48 = vld [vmem:[%s2594_s1 + $0x88] sm:$0xff]   ;;  %v2070_v55 = vld [vmem:[%s2594_s1 + $0x90] sm:$0xff]   ;;  %v2073_v60 = vld [vmem:[%s2594_s1 + $0x98] sm:$0xff]  }
  0x14   : > { %1730 = vmatpush3.bf16.msra.mxu0 %v2043_v8  ;;  %1886 = vmatpush3.bf16.msra.mxu1 %v2042_v7  ;;  %s195_s4 = sadd.s32 %s1994_s21, %s1993_s24  ;;  %v2068_v51 = vld [vmem:[%s2594_s1 + $0x8] sm:$0xff]   ;;  %v2071_v56 = vld [vmem:[%s2594_s1 + $0x10] sm:$0xff]   ;;  %v2074_v61 = vld [vmem:[%s2594_s1 + $0x18] sm:$0xff]  }
  0x15   : > { %1731 = vmatprep.subr.bf16.mxu0 %v2044_v9  ;;  %1887 = vmatprep.subr.bf16.mxu1 %v2045_v10  ;;  %s1535_s9 = sshll.u32 %s195_s4, 2  ;;  %v2076_v0 = vld [vmem:[%s2594_s1 + $0x60] sm:$0xff]   ;;  %v2079_v9 = vld [vmem:[%s2594_s1 + $0x68] sm:$0xff]  }
  0x16   : > { %s2289_s25 = scalar_lea.vmem %s2593_s0, %s1535_s9  ;;  %v2077_v2 = vld [vmem:[%s2594_s1 + $0xa0] sm:$0xff]   ;;  %s204_s9 = sadd.s32 %s1537_s8, %s1536_s7 }
  0x17   : > { %v210_v22 = vld [vmem:[%s2289_s25 + $0x8] sm:$0xf]  ;;  %v211_v23 = vld [vmem:[%s2289_s25 + $0xc] sm:$0xf]  ;;  %v2305_v26 = vld [vmem:[%s2289_s25 + $0x10] sm:$0xff]   ;;  %s1538_s10 = sshll.u32 %s204_s9, 3 }
  0x18   : > { %1732 = vmatpush3.bf16.msra.mxu0 %v2046_v11  ;;  %1888 = vmatpush3.bf16.msra.mxu1 %v2045_v10  ;;  %v2302_v25 = vcombine.low %v210_v22, %v211_v23  ;;  %v354_v28 = vld [vmem:[%s2289_s25 + $0x8] sm:$0xe]  ;;  %v262_v31 = vshll.u32 %v2305_v26, 16  ;;  %v2318_v33 = vrot.slane %v2305_v26, 1  ;;  %v2326_v38 = vld [vmem:[%s2289_s25 + $0x18] sm:$0xff]   ;;  %v266_v39 = vshrl.u32 %v2305_v26, 16  ;;  %s2566_s20 = scalar_lea.vmem %s2596_s3, %s1538_s10 }
  0x19   : > { %1733 = vmatprep.subr.bf16.mxu0 %v2047_v12  ;;  %1889 = vmatprep.subr.bf16.mxu1 %v2048_v13  ;;  %v1547_v34 = vcombine.low %v354_v28, %v211_v23  ;;  %v2334_v43 = vrot.slane %v2326_v38, 1  ;;  %v270_v50 = vshll.u32 %v2326_v38, 16  ;;  %v274_v57 = vshrl.u32 %v2326_v38, 16  ;;  %v2075_v59 = vld [vmem:[%s2289_s25 + $0x20] sm:$0xff]   ;;  %v2080_v10 = vld [vmem:[%s2594_s1 + $0xa8] sm:$0xff]   ;;  %v2085_v28 = vld [vmem:[%s2594_s1 + $0x30] sm:$0xff]  }
  0x1a   : > { %v254_v29 = vshll.u32 %v2302_v25, 16  ;;  %v258_v30 = vshrl.u32 %v2302_v25, 16  ;;  %v264_v37 = vrot.slane %v262_v31, 1  ;;  %v365_v63 = vshll.u32 %v2075_v59, 16  ;;  %v2078_v6 = vld [vmem:[%s2594_s1 + $0x20] sm:$0xff]  }
  0x1b   : > { %v382_v40 = vrot.slane %v1547_v34, 1  ;;  %v2347_v47 = vsel %vm289_vm0, %v2318_v33, %v2334_v43  ;;  %v272_v52 = vrot.slane %v270_v50, 1  ;;  %v369_v3 = vshrl.u32 %v2075_v59, 16  ;;  %v2082_v7 = vld [vmem:[%s2289_s25 + $0x28] ss:$0 sps:$4 sm:$0x11]  }
  0x1c   : > { %1734 = vmatpush3.bf16.msra.mxu0 %v2049_v14  ;;  %1890 = vmatpush3.bf16.msra.mxu1 %v2048_v13  ;;  %v2323_v36 = vrot.slane %v254_v29, 1  ;;  %v268_v49 = vor.u32 %v266_v39, %v264_v37  ;;  %v367_v1 = vrot.slane %v365_v63, 1  ;;  %v384_v4 = vrot.slane %v2075_v59, 1  ;;  %v2081_v14 = vld [vmem:[%s2594_s1 + $0x28] sm:$0xff]   ;;  %v217_v23 = vld [vmem:[%s2289_s25] sm:$0xe] }
  0x1d   : > { %1735 = vmatprep.subr.bf16.mxu0 %v2050_v15  ;;  %1891 = vmatprep.subr.bf16.mxu1 %v2051_v16  ;;  %v383_v45 = vsel %vm289_vm0, %v382_v40, %v2318_v33  ;;  %v2383_v62 = vor.u32 %v274_v57, %v272_v52  ;;  %v373_v12 = vshll.u32 %v2082_v7, 16  ;;  %v386_v13 = vrot.slane %v2082_v7, 1  ;;  %v2086_v29 = vld [vmem:[%s2594_s1 + $0x78] sm:$0xff]   ;;  %v2096_v50 = vld [vmem:[%s2594_s1 + $0x188] sm:$0xff]  }
  0x1e   : > { %v260_v42 = vor.u32 %v258_v30, %v2323_v36  ;;  %1897 = vmatprep.mubr.bf16.mxu1 %v383_v45  ;;  %v2363_v54 = vsel %vm245_vm1, %v268_v49, %v272_v52  ;;  %v385_v8 = vsel %vm289_vm0, %v2334_v43, %v384_v4  ;;  %v371_v11 = vor.u32 %v369_v3, %v367_v1  ;;  %v2093_v45 = vld [vmem:[%s2594_s1 + $0x180] sm:$0xff]   ;;  %v2094_v49 = vld [vmem:[%s2594_s1 + $0x1c8] sm:$0xff]   ;;  %v2099_v52 = vld [vmem:[%s2594_s1 + $0x190] sm:$0xff]  }
  0x1f   : > { %v368_v5 = vsel %vm245_vm1, %v2383_v62, %v367_v1  ;;  %v375_v15 = vrot.slane %v373_v12, 1  ;;  %v989_v1 = vld [vmem:[%s2289_s25 + $0x14] sm:$0xf]  ;;  %v997_v3 = vld [vmem:[%s2289_s25 + $0x10] sm:$0xe] }
  0x20   : > { %1736 = vmatpush3.bf16.msra.mxu0 %v2052_v17  ;;  %1892 = vmatpush3.bf16.msra.mxu1 %v2051_v16  ;;  %v2342_v46 = vsel %vm245_vm1, %v260_v42, %v264_v37  ;;  %v387_v16 = vsel %vm289_vm0, %v384_v4, %v386_v13  ;;  %v2083_v17 = vld [vmem:[%s2594_s1 + $0x70] sm:$0xff]   ;;  %v2092_v42 = vld [vmem:[%s2594_s1 + $0x200] sm:$0xff]   ;;  %v2108_v4 = vld [vmem:[%s2594_s1 + $0x1a8] sm:$0xff]  }
  0x21   : > { %1737 = vmatprep.subr.bf16.mxu0 %v2053_v18  ;;  %1893 = vmatprep.subr.bf16.mxu1 %v2054_v19  ;;  %v376_v18 = vsel %vm245_vm1, %v371_v11, %v375_v15  ;;  %v2110_v11 = vld [vmem:[%s2594_s1 + $0x1f0] sm:$0xff]   ;;  %v2120_v15 = vld [vmem:[%s2289_s25 + $0x28] sm:$0xff]  }
  0x22   : > { %616 = vmatprep.mubr.bf16.mxu0 %v2342_v46  ;;  %v2111_v12 = vld [vmem:[%s2594_s1 + $0x230] sm:$0xff]  }
  0x24   : > { %1738 = vmatpush3.bf16.msra.mxu0 %v2055_v20  ;;  %1894 = vmatpush3.bf16.msra.mxu1 %v2054_v19  ;;  %v2084_v19 = vld [vmem:[%s2594_s1 + $0xb0] sm:$0xff]   ;;  %v208_v20 = vld [vmem:[%s2289_s25] sm:$0xf] }
  0x25   : > { %1739 = vmatprep.subr.bf16.mxu0 %v2056_v21  ;;  %1895 = vmatprep.subr.bf16.mxu1 %v2057_v24  ;;  %v209_v21 = vld [vmem:[%s2289_s25 + $0x4] sm:$0xf] }
  0x26   : > { %v1539_v22 = vcombine.low %v208_v20, %v209_v21  ;;  %v2121_v20 = vld [vmem:[%s2289_s25 + $0x30] ss:$0 sps:$4 sm:$0x11]  }
  0x28   : > { %1740 = vmatpush3.bf16.msra.mxu0 %v2058_v27  ;;  %1896 = vmatpush3.bf16.msra.mxu1 %v2057_v24  ;;  %v1544_v24 = vcombine.low %v217_v23, %v209_v21  ;;  %v291_v27 = vrot.slane %v2302_v25, 1  ;;  %v247_v30 = vshrl.u32 %v1539_v22, 16  ;;  %v249_v31 = vshll.u32 %v1539_v22, 16 }
  0x29   : > { %1777 = vmatprep.subr.bf16.mxu0 %v2062_v32  ;;  %1905 = vmatprep.subr.bf16.mxu1 %v2063_v35  ;;  %v2087_v32 = vld [vmem:[%s2594_s1 + $0xb8] sm:$0xff]  }
  0x2a   : > { %v290_v34 = vrot.slane %v1544_v24, 1  ;;  %v251_v37 = vrot.slane %v249_v31, 1  ;;  %v1049_v31 = vshll.u32 %v2120_v15, 16 }
  0x2b   : > { %617 = vmatmul.mubr.bf16.vlgmr.msra.gmra.mrb[0].mxu0 %v2302_v25  ;;  %1898 = vmatmul.mubr.bf16.vlgmr.msra.gmra.mrb[0].mxu1 %v2347_v47 }
  0x2c   : > { %1778 = vmatpush3.bf16.msra.mxu0 %v2065_v41  ;;  %1906 = vmatpush3.bf16.msra.mxu1 %v2063_v35  ;;  %v2088_v35 = vld [vmem:[%s2594_s1 + $0x38] sm:$0xff]   ;;  %v292_v39 = vsel %vm289_vm0, %v290_v34, %v291_v27  ;;  %v252_v40 = vor.u32 %v251_v37, %v247_v30  ;;  %v2091_v41 = vld [vmem:[%s2594_s1 + $0x1c0] sm:$0xff]   ;;  %v1075_v30 = vrot.slane %v2121_v20, 1  ;;  %v1053_v34 = vshrl.u32 %v2120_v15, 16 }
  0x2d   : > { %1779 = vmatprep.subr.bf16.mxu0 %v2066_v44  ;;  %1907 = vmatprep.subr.bf16.mxu1 %v2067_v48  ;;  %v2113_v37 = vld [vmem:[%s2594_s1 + $0x1f8] sm:$0xff]  }
  0x2e   : > { %624 = vmatprep.mubr.bf16.mxu0 %v2363_v54  ;;  %1901 = vmatprep.mubr.bf16.mxu1 %v385_v8  ;;  %v257_v44 = vsel %vm245_vm1, %v252_v40, %v2323_v36  ;;  %v2095_v36 = vld [vmem:[%s2594_s1 + $0x208] sm:$0xff]   ;;  %v1649_v8 = vcombine.low %v997_v3, %v989_v1 }
  0x30   : > { %1780 = vmatpush3.bf16.msra.mxu0 %v2068_v51  ;;  %1908 = vmatpush3.bf16.msra.mxu1 %v2067_v48  ;;  %v294_v48 = vsel %vm289_vm0, %v291_v27, %v2318_v33  ;;  %v2097_v33 = vld [vmem:[%s2594_s1 + $0x1d0] sm:$0xff]  }
  0x31   : > { %1781 = vmatprep.subr.bf16.mxu0 %v2069_v53  ;;  %1909 = vmatprep.subr.bf16.mxu1 %v2070_v55  ;;  %v2098_v51 = vld [vmem:[%s2594_s1 + $0x210] sm:$0xff]   ;;  %v2100_v53 = vld [vmem:[%s2594_s1 + $0x1d8] sm:$0xff]  }
  0x33   : > { %625 = vmatmul.mubr.bf16.gmra.mrb[4].mxu0 %v2305_v26  ;;  %1902 = vmatmul.mubr.bf16.gmra.mrb[4].mxu1 %v387_v16 }
  0x34   : > { %1782 = vmatpush3.bf16.msra.mxu0 %v2071_v56  ;;  %1910 = vmatpush3.bf16.msra.mxu1 %v2070_v55  ;;  %v2109_v55 = vld [vmem:[%s2289_s25 + $0x20] ss:$0 sps:$4 sm:$0x11]   ;;  %v2101_v56 = vld [vmem:[%s2594_s1 + $0x218] sm:$0xff]  }
  0x35   : > { %1783 = vmatprep.subr.bf16.mxu0 %v2072_v58  ;;  %1911 = vmatprep.subr.bf16.mxu1 %v2073_v60  ;;  %v278_v57 = vshll.u32 %v2109_v55, 16  ;;  %v2103_v58 = vld [vmem:[%s2594_s1 + $0x1e0] sm:$0xff]  }
  0x36   : > { %632 = vmatprep.mubr.bf16.mxu0 %v368_v5  ;;  %1921 = vmatprep.mubr.bf16.mxu1 %v292_v39  ;;  %v2114_v39 = vld [vmem:[%s2594_s1 + $0x238] sm:$0xff]  }
  0x37   : > { %v280_v63 = vrot.slane %v278_v57, 1 }
  0x38   : > { %1784 = vmatpush3.bf16.msra.mxu0 %v2074_v61  ;;  %1912 = vmatpush3.bf16.msra.mxu1 %v2073_v60  ;;  %v2105_v60 = vld [vmem:[%s2594_s1 + $0x1a0] sm:$0xff]   ;;  %v2106_v61 = vld [vmem:[%s2594_s1 + $0x1e8] sm:$0xff]  }
  0x39   : > { %1785 = vmatprep.subr.bf16.mxu0 %v2076_v0  ;;  %1913 = vmatprep.subr.bf16.mxu1 %v2077_v2  ;;  %v988_v0 = vld [vmem:[%s2289_s25 + $0x10] sm:$0xf] }
  0x3b   : > { %633 = vmatmul.mubr.bf16.gmra.mrb[8].mxu0 %v2326_v38 }
  0x3c   : > { %1786 = vmatpush3.bf16.msra.mxu0 %v2078_v6  ;;  %1914 = vmatpush3.bf16.msra.mxu1 %v2077_v2  ;;  %v2502_v2 = vld [vmem:[%s2289_s25 + $0x18] sm:$0xff]  }
  0x3d   : > { %1787 = vmatprep.subr.bf16.mxu0 %v2079_v9  ;;  %1915 = vmatprep.subr.bf16.mxu1 %v2080_v10  ;;  %v1033_v7 = vshll.u32 %v2502_v2, 16  ;;  %v2512_v9 = vld [vmem:[%s2289_s25 + $0x20] sm:$0xff]   ;;  %v1069_v13 = vrot.slane %v2502_v2, 1 }
  0x3e   : > { %640 = vmatprep.mubr.bf16.mxu0 %v376_v18  ;;  %v1041_v18 = vshll.u32 %v2512_v9, 16  ;;  %v1045_v21 = vshrl.u32 %v2512_v9, 16 }
  0x3f   : > { %v1035_v16 = vrot.slane %v1033_v7, 1 }
  0x40   : > { %1788 = vmatpush3.bf16.msra.mxu0 %v2081_v14  ;;  %1916 = vmatpush3.bf16.msra.mxu1 %v2080_v10  ;;  %v281_v10 = vsel %vm245_vm1, %v2383_v62, %v280_v63  ;;  %v1037_v14 = vshrl.u32 %v2502_v2, 16  ;;  %v1071_v62 = vrot.slane %v2512_v9, 1 }
  0x41   : > { %1789 = vmatprep.subr.bf16.mxu0 %v2083_v17  ;;  %1917 = vmatprep.subr.bf16.mxu1 %v2084_v19  ;;  %v1068_v17 = vrot.slane %v1649_v8, 1 }
  0x42   : > { %v1072_v24 = vsel %vm289_vm0, %v1069_v13, %v1071_v62  ;;  %v1039_v27 = vor.u32 %v1037_v14, %v1035_v16 }
  0x43   : > { %641 = vmatmul.mubr.bf16.gmra.mrb[12].mxu0 %v2075_v59  ;;  %v1070_v23 = vsel %vm289_vm0, %v1068_v17, %v1069_v13 }
  0x44   : > { %1790 = vmatpush3.bf16.msra.mxu0 %v2085_v28  ;;  %1918 = vmatpush3.bf16.msra.mxu1 %v2084_v19  ;;  %v1073_v19 = vrot.slane %v2120_v15, 1  ;;  %v1043_v28 = vrot.slane %v1041_v18, 1 }
  0x45   : > { %1791 = vmatprep.subr.bf16.mxu0 %v2086_v29  ;;  %1919 = vmatprep.subr.bf16.mxu1 %v2087_v32 }
  0x46   : > { %890 = vmatprep.mubr.bf16.mxu0 %v257_v44  ;;  %v1074_v29 = vsel %vm289_vm0, %v1071_v62, %v1073_v19  ;;  %v1044_v40 = vsel %vm245_vm1, %v1039_v27, %v1043_v28  ;;  %v1051_v44 = vrot.slane %v1049_v31, 1 }
  0x48   : > { %1792 = vmatpush3.bf16.msra.mxu0 %v2088_v35  ;;  %1920 = vmatpush3.bf16.msra.mxu1 %v2087_v32  ;;  %v2112_v32 = vld [vmem:[%s2594_s1 + $0x1b0] sm:$0xff]   ;;  %v1057_v35 = vshll.u32 %v2121_v20, 16 }
  0x49   : > { %1829 = vmatprep.subr.bf16.mxu0 %v2091_v41  ;;  %1929 = vmatprep.subr.bf16.mxu1 %v2092_v42  ;;  %v1076_v41 = vsel %vm289_vm0, %v1073_v19, %v1075_v30 }
  0x4b   : > { %891 = vmatmul.mubr.bf16.vlgmr.msra.gmra.mrb[16].mxu0 %v1539_v22  ;;  %1922 = vmatmul.mubr.bf16.vlgmr.msra.gmra.mrb[0].mxu1 %v294_v48 }
  0x4c   : > { %1830 = vmatpush3.bf16.msra.mxu0 %v2093_v45  ;;  %1930 = vmatpush3.bf16.msra.mxu1 %v2092_v42  ;;  %v1047_v42 = vor.u32 %v1045_v21, %v1043_v28  ;;  %v1059_v45 = vrot.slane %v1057_v35, 1 }
  0x4d   : > { %1831 = vmatprep.subr.bf16.mxu0 %v2094_v49  ;;  %1931 = vmatprep.subr.bf16.mxu1 %v2095_v36 }
  0x4e   : > { %898 = vmatprep.mubr.bf16.mxu0 %v2342_v46  ;;  %1925 = vmatprep.mubr.bf16.mxu1 %v2347_v47  ;;  %v297_v46 = vrot.slane %v2109_v55, 1  ;;  %v2102_v47 = vld [vmem:[%s2594_s1 + $0x198] sm:$0xff]   ;;  %v1052_v49 = vsel %vm245_vm1, %v1047_v42, %v1051_v44 }
  0x50   : > { %1832 = vmatpush3.bf16.msra.mxu0 %v2096_v50  ;;  %1932 = vmatpush3.bf16.msra.mxu1 %v2095_v36  ;;  %v298_v59 = vsel %vm289_vm0, %v2334_v43, %v297_v46  ;;  %v2107_v43 = vld [vmem:[%s2594_s1 + $0x228] sm:$0xff]   ;;  %v1055_v36 = vor.u32 %v1053_v34, %v1051_v44  ;;  %v2115_v50 = vld [vmem:[%s2594_s1 + $0x1b8] sm:$0xff]  }
  0x51   : > { %1833 = vmatprep.subr.bf16.mxu0 %v2097_v33  ;;  %1933 = vmatprep.subr.bf16.mxu1 %v2098_v51 }
  0x52   : > { %v1060_v33 = vsel %vm245_vm1, %v1055_v36, %v1059_v45 }
  0x53   : > { %899 = vmatmul.mubr.bf16.gmra.mrb[20].mxu0 %v2302_v25  ;;  %v2104_v25 = vld [vmem:[%s2594_s1 + $0x220] sm:$0xff]   ;;  %1926 = vmatmul.mubr.bf16.gmra.mrb[4].mxu1 %v298_v59 }
  0x54   : > { %1834 = vmatpush3.bf16.msra.mxu0 %v2099_v52  ;;  %1934 = vmatpush3.bf16.msra.mxu1 %v2098_v51 }
  0x55   : > { %1835 = vmatprep.subr.bf16.mxu0 %v2100_v53  ;;  %1935 = vmatprep.subr.bf16.mxu1 %v2101_v56 }
  0x56   : > { %906 = vmatprep.mubr.bf16.mxu0 %v2363_v54  ;;  %v2499_v54 = vcombine.low %v988_v0, %v989_v1  ;;  %1945 = vmatprep.mubr.bf16.mxu1 %v1070_v23 }
  0x58   : > { %1836 = vmatpush3.bf16.msra.mxu0 %v2102_v47  ;;  %1936 = vmatpush3.bf16.msra.mxu1 %v2101_v56  ;;  %v1026_v5 = vshrl.u32 %v2499_v54, 16  ;;  %v1028_v6 = vshll.u32 %v2499_v54, 16 }
  0x59   : > { %1837 = vmatprep.subr.bf16.mxu0 %v2103_v58  ;;  %1937 = vmatprep.subr.bf16.mxu1 %v2104_v25 }
  0x5b   : > { %907 = vmatmul.mubr.bf16.gmra.mrb[24].mxu0 %v2305_v26  ;;  %v1030_v26 = vrot.slane %v1028_v6, 1 }
  0x5c   : > { %1838 = vmatpush3.bf16.msra.mxu0 %v2105_v60  ;;  %1938 = vmatpush3.bf16.msra.mxu1 %v2104_v25 }
  0x5d   : > { %1839 = vmatprep.subr.bf16.mxu0 %v2106_v61  ;;  %1939 = vmatprep.subr.bf16.mxu1 %v2107_v43  ;;  %v1031_v22 = vor.u32 %v1030_v26, %v1026_v5 }
  0x5e   : > { %914 = vmatprep.mubr.bf16.mxu0 %v281_v10 }
  0x5f   : > { %v1036_v48 = vsel %vm245_vm1, %v1031_v22, %v1035_v16 }
  0x60   : > { %1840 = vmatpush3.bf16.msra.mxu0 %v2108_v4  ;;  %1940 = vmatpush3.bf16.msra.mxu1 %v2107_v43 }
  0x61   : > { %1841 = vmatprep.subr.bf16.mxu0 %v2110_v11  ;;  %1941 = vmatprep.subr.bf16.mxu1 %v2111_v12 }
  0x63   : > { %915 = vmatmul.mubr.bf16.gmra.mrb[28].mxu0 %v2326_v38 }
  0x64   : > { %1842 = vmatpush3.bf16.msra.mxu0 %v2112_v32  ;;  %1942 = vmatpush3.bf16.msra.mxu1 %v2111_v12 }
  0x65   : > { %1843 = vmatprep.subr.bf16.mxu0 %v2113_v37  ;;  %1943 = vmatprep.subr.bf16.mxu1 %v2114_v39 }
  0x66   : > { %1306 = vmatprep.mubr.bf16.mxu0 %v1036_v48 }
  0x68   : > { %1844 = vmatpush3.bf16.msra.mxu0 %v2115_v50  ;;  %1944 = vmatpush3.bf16.msra.mxu1 %v2114_v39 }
  0x6b   : > { %1307 = vmatmul.mubr.bf16.vlgmr.msra.gmra.mrb[32].mxu0 %v2499_v54  ;;  %1946 = vmatmul.mubr.bf16.vlgmr.msra.gmra.mrb[0].mxu1 %v1072_v24 }
  0x6c   : > { %1314 = vmatprep.mubr.bf16.mxu0 %v1044_v40  ;;  %1949 = vmatprep.mubr.bf16.mxu1 %v1074_v29 }
  0x73   : > { %1315 = vmatmul.mubr.bf16.gmra.mrb[36].mxu0 %v2502_v2  ;;  %1950 = vmatmul.mubr.bf16.gmra.mrb[4].mxu1 %v1076_v41 }
  0x74   : > { %1322 = vmatprep.mubr.bf16.mxu0 %v1052_v49 }
  0x7b   : > { %1323 = vmatmul.mubr.bf16.gmra.mrb[40].mxu0 %v2512_v9 }
  0x7c   : > { %1330 = vmatprep.mubr.bf16.mxu0 %v1060_v33 }
  0x83   : > { %1331 = vmatmul.mubr.bf16.gmra.mrb[44].mxu0 %v2120_v15 }
  0xfe   : > { %v1741_v38 = vpop.f32.mrb[0].mxu0 }
  0xff   : > { %v1742_v51 = vpop.f32.mrb[1].mxu0 }
 0x100   : > { %v1743_v52 = vadd.f32 %v1742_v51, %v1741_v38  ;;  %v1744_v53 = vpop.f32.mrb[2].mxu0 }
 0x101   : > { %v1745_v55 = vpop.f32.mrb[3].mxu0 }
 0x102   : > { %v1746_v56 = vadd.f32 %v1745_v55, %v1744_v53  ;;  %v1722_v53 = vld [vmem:[%s2595_s2] ss:$0 sm:$0xff] }
 0x106   : > { %v1747_v46 = vpop.f32.mrb[4].mxu0 }
 0x107   : > { %v1748_v47 = vpop.f32.mrb[5].mxu0 }
 0x108   : > { %v1749_v57 = vadd.f32 %v1748_v47, %v1747_v46  ;;  %v1750_v58 = vpop.f32.mrb[6].mxu0 }
 0x109   : > { %v1751_v59 = vpop.f32.mrb[7].mxu0 }
 0x10a   : > { %v1752_v25 = vadd.f32 %v1751_v59, %v1750_v58 }
 0x10e   : > { %v1753_v60 = vpop.f32.mrb[8].mxu0 }
 0x10f   : > { %v1754_v61 = vpop.f32.mrb[9].mxu0 }
 0x110   : > { %v1755_v43 = vadd.f32 %v1754_v61, %v1753_v60  ;;  %v1756_v63 = vpop.f32.mrb[10].mxu0 }
 0x111   : > { %v1757_v0 = vpop.f32.mrb[11].mxu0 }
 0x112   : > { %v1758_v1 = vadd.f32 %v1757_v0, %v1756_v63 }
 0x116   : > { %v1759_v54 = vpop.f32.mrb[12].mxu0 }
 0x117   : > { %v1760_v2 = vpop.f32.mrb[13].mxu0 }
 0x118   : > { %v1761_v3 = vadd.f32 %v1760_v2, %v1759_v54  ;;  %v1762_v4 = vpop.f32.mrb[14].mxu0 }
 0x119   : > { %v1763_v5 = vpop.f32.mrb[15].mxu0 }
 0x11a   : > { %v1764_v6 = vadd.f32 %v1763_v5, %v1762_v4 }
 0x11e   : > { %v1793_v7 = vpop.f32.mrb[16].mxu0 }
 0x11f   : > { %v1794_v8 = vpop.f32.mrb[17].mxu0 }
 0x120   : > { %v1795_v9 = vadd.f32 %v1794_v8, %v1793_v7  ;;  %v1796_v10 = vpop.f32.mrb[18].mxu0 }
 0x121   : > { %v1797_v11 = vpop.f32.mrb[19].mxu0 }
 0x122   : > { %v1956_v12 = vadd.f32 %v1795_v9, %v1743_v52  ;;  %v1798_v13 = vadd.f32 %v1797_v11, %v1796_v10 }
 0x124   : > { %v1962_v14 = vadd.f32 %v1798_v13, %v1746_v56 }
 0x126   : > { %v1799_v15 = vpop.f32.mrb[20].mxu0 }
 0x127   : > { %v1800_v26 = vpop.f32.mrb[21].mxu0 }
 0x128   : > { %v1801_v16 = vadd.f32 %v1800_v26, %v1799_v15  ;;  %v1802_v17 = vpop.f32.mrb[22].mxu0 }
 0x129   : > { %v1803_v62 = vpop.f32.mrb[23].mxu0 }
 0x12a   : > { %v1953_v18 = vadd.f32 %v1801_v16, %v1749_v57  ;;  %v1804_v19 = vadd.f32 %v1803_v62, %v1802_v17 }
 0x12c   : > { %v1959_v20 = vadd.f32 %v1804_v19, %v1752_v25 }
 0x12e   : > { %v1805_v21 = vpop.f32.mrb[24].mxu0 }
 0x12f   : > { %v1806_v22 = vpop.f32.mrb[25].mxu0 }
 0x130   : > { %v1807_v23 = vadd.f32 %v1806_v22, %v1805_v21  ;;  %v1808_v24 = vpop.f32.mrb[26].mxu0 }
 0x131   : > { %v1809_v27 = vpop.f32.mrb[27].mxu0 }
 0x132   : > { %v1968_v28 = vadd.f32 %v1807_v23, %v1755_v43  ;;  %v1810_v29 = vadd.f32 %v1809_v27, %v1808_v24 }
 0x134   : > { %v1974_v30 = vadd.f32 %v1810_v29, %v1758_v1 }
 0x136   : > { %v1811_v31 = vpop.f32.mrb[28].mxu0 }
 0x137   : > { %v1812_v32 = vpop.f32.mrb[29].mxu0 }
 0x138   : > { %v1813_v34 = vadd.f32 %v1812_v32, %v1811_v31  ;;  %v1814_v35 = vpop.f32.mrb[30].mxu0 }
 0x139   : > { %v1815_v37 = vpop.f32.mrb[31].mxu0 }
 0x13a   : > { %v2554_v39 = vadd.f32 %v1813_v34, %v1761_v3  ;;  %v1816_v40 = vadd.f32 %v1815_v37, %v1814_v35 }
 0x13c   : > { %v2556_v41 = vadd.f32 %v1816_v40, %v1764_v6 }
 0x13e   : > { %v1845_v42 = vpop.f32.mrb[32].mxu0  ;;  %v1947_v44 = vpop.f32.mrb[0].mxu1 }
 0x13f   : > { %v1846_v45 = vpop.f32.mrb[33].mxu0  ;;  %v1373_v48 = vpop.f32.mrb[1].mxu1 }
 0x140   : > { %v1847_v49 = vadd.f32 %v1846_v45, %v1845_v42  ;;  %v1848_v36 = vpop.f32.mrb[34].mxu0  ;;  %v1948_v50 = vpop.f32.mrb[2].mxu1 }
 0x141   : > { %v1849_v33 = vpop.f32.mrb[35].mxu0  ;;  %v1376_v38 = vpop.f32.mrb[3].mxu1 }
 0x142   : > { %v1957_v51 = vadd.f32 %v1956_v12, %v1847_v49  ;;  %v1850_v52 = vadd.f32 %v1849_v33, %v1848_v36 }
 0x144   : > { %v1958_v55 = vadd.f32 %v1957_v51, %v1373_v48  ;;  %v1963_v56 = vadd.f32 %v1962_v14, %v1850_v52 }
 0x146   : > { %v1419_v46 = vadd.f32 %v1958_v55, %v1722_v53  ;;  %v1964_v47 = vadd.f32 %v1963_v56, %v1376_v38  ;;  %v1851_v57 = vpop.f32.mrb[36].mxu0  ;;  %v1951_v58 = vpop.f32.mrb[4].mxu1 }
 0x147   : > { %v1852_v59 = vpop.f32.mrb[37].mxu0  ;;  %v1389_v25 = vpop.f32.mrb[5].mxu1 }
 0x148   : > { %1427 = vst [vmem:[%s2566_s20] sm:$0xff] %v1419_v46  ;;  %v1420_v60 = vadd.f32 %v1964_v47, %v1722_v53  ;;  %v1853_v61 = vadd.f32 %v1852_v59, %v1851_v57  ;;  %v1854_v43 = vpop.f32.mrb[38].mxu0  ;;  %v1952_v63 = vpop.f32.mrb[6].mxu1 }
 0x149   : > { %v1855_v0 = vpop.f32.mrb[39].mxu0  ;;  %v1392_v1 = vpop.f32.mrb[7].mxu1 }
 0x14a   : > { %1428 = vst [vmem:[%s2566_s20 + $0x8] sm:$0xff] %v1420_v60  ;;  %v1954_v54 = vadd.f32 %v1953_v18, %v1853_v61  ;;  %v1856_v2 = vadd.f32 %v1855_v0, %v1854_v43 }
 0x14c   : > { %v1955_v3 = vadd.f32 %v1954_v54, %v1947_v44  ;;  %v1960_v4 = vadd.f32 %v1959_v20, %v1856_v2 }
 0x14e   : > { %v1421_v5 = vadd.f32 %v1955_v3, %v1722_v53  ;;  %v1961_v6 = vadd.f32 %v1960_v4, %v1948_v50  ;;  %v1857_v7 = vpop.f32.mrb[40].mxu0 }
 0x14f   : > { %v1858_v8 = vpop.f32.mrb[41].mxu0 }
 0x150   : > { %1429 = vst [vmem:[%s2566_s20 + $0x10] sm:$0xff] %v1421_v5  ;;  %v1422_v9 = vadd.f32 %v1961_v6, %v1722_v53  ;;  %v1859_v10 = vadd.f32 %v1858_v8, %v1857_v7  ;;  %v1860_v11 = vpop.f32.mrb[42].mxu0 }
 0x151   : > { %v1861_v12 = vpop.f32.mrb[43].mxu0 }
 0x152   : > { %1430 = vst [vmem:[%s2566_s20 + $0x18] sm:$0xff] %v1422_v9  ;;  %v1969_v13 = vadd.f32 %v1968_v28, %v1859_v10  ;;  %v1862_v14 = vadd.f32 %v1861_v12, %v1860_v11 }
 0x154   : > { %v1970_v15 = vadd.f32 %v1969_v13, %v1389_v25  ;;  %v1975_v26 = vadd.f32 %v1974_v30, %v1862_v14 }
 0x156   : > { %v1423_v16 = vadd.f32 %v1970_v15, %v1722_v53  ;;  %v1976_v17 = vadd.f32 %v1975_v26, %v1392_v1  ;;  %v1863_v62 = vpop.f32.mrb[44].mxu0 }
 0x157   : > { %v1864_v18 = vpop.f32.mrb[45].mxu0 }
 0x158   : > { %1431 = vst [vmem:[%s2566_s20 + $0x20] sm:$0xff] %v1423_v16  ;;  %v1424_v19 = vadd.f32 %v1976_v17, %v1722_v53  ;;  %v1865_v20 = vadd.f32 %v1864_v18, %v1863_v62  ;;  %v1866_v21 = vpop.f32.mrb[46].mxu0 }
 0x159   : > { %v1867_v22 = vpop.f32.mrb[47].mxu0 }
 0x15a   : > { %1432 = vst [vmem:[%s2566_s20 + $0x28] sm:$0xff] %v1424_v19  ;;  %v1966_v23 = vadd.f32 %v2554_v39, %v1865_v20  ;;  %v1868_v24 = vadd.f32 %v1867_v22, %v1866_v21 }
 0x15c   : > { %v1967_v27 = vadd.f32 %v1966_v23, %v1951_v58  ;;  %v1972_v28 = vadd.f32 %v2556_v41, %v1868_v24 }
 0x15e   : > { %v1425_v29 = vadd.f32 %v1967_v27, %v1722_v53  ;;  %v1973_v30 = vadd.f32 %v1972_v28, %v1952_v63 }
 0x160   : > { %1433 = vst [vmem:[%s2566_s20 + $0x30] sm:$0xff] %v1425_v29  ;;  %v1426_v31 = vadd.f32 %v1973_v30, %v1722_v53 }
 0x162   : > { %1434 = vst [vmem:[%s2566_s20 + $0x38] sm:$0xff] %v1426_v31 }
 0x163 PF: > { %s13_s16 = sadd.s32 1, %s2160_s16   ;;  %s2597_s12 = smov %s2152_s14 }
 0x164   : > { %p10_p7 = scmp.ge.s32.totalorder %s13_s16, 6   ;;  %s2598_s13 = smov %s2156_s15 }
 0x165   : > { %s2599_s14 = smov %s2602_s17  ;;  %s2600_s15 = smov %s2606_s18 }
 0x166   :  { %12 = sbr.rel (!%p10_p7) target bundleno = 3 (0x3), region = 64 }

// kernel: backbone_with_fpn_forward.22
= control target key start
LH: loop header
LB: loop body
LE: loop exit
PB: predicated region body
PF: predicated region fallthrough
CT: control target
= control target key end

     0   :  { %s1337_s15 = smov 0   ;;  %s1477_s0 = inlined_call_operand.vmem [shape: bf16[512,128], index: 0, kind: input, shape index: {}]   ;;  %s1478_s1 = inlined_call_operand.vmem [shape: bf16[128,128], index: 1, kind: input, shape index: {}]   ;;  %s1479_s2 = inlined_call_operand.vmem [shape: f32[1,128], index: 2, kind: input, shape index: {}]   ;;  %s1480_s3 = inlined_call_operand.vmem [shape: bf16[512,128], index: 3, kind: input, shape index: {}]   ;;  %s1481_s4 = inlined_call_operand.vmem [shape: bf16[512,128], index: 4, kind: output, shape index: {}]  }
   0x1 LB: > { %s908_s16 = sadd.s32 4294967295, %s1310_s15   ;;  %p912_p0 = scmp.ge.s32.totalorder %s1310_s15, 1  ;;  %s1310_s15 = sphi %s1337_s15, %s14_s15  }
   0x2   : > { %p174_p1 = scmp.lt.s32.totalorder %s1310_s15, 3 }
   0x4   : > { %p175_p2 = pnand %p912_p0, %p174_p1 }
   0x5   : > { %v1280_v0 = vld [vmem:[%s1478_s1] sm:$0xff] (!%p175_p2)   ;;  %s913_s19 = sshll.u32 (!%p175_p2), %s908_s16, 5  ;;  %v1281_v1 = vld [vmem:[%s1478_s1 + $0x8] sm:$0xff] (!%p175_p2)   ;;  %v1282_v2 = vld [vmem:[%s1478_s1 + $0x10] sm:$0xff] (!%p175_p2)  }
   0x6   : > { %178 = sbr.rel (%p175_p2) target bundleno = 284 (0x11c), region = 36  ;;  %p206_p3 = scmp.lt.s32.totalorder (!%p175_p2), %s913_s19, 63  ;;  %1208 = vmatprep.subr.bf16.mxu0 (!%p175_p2), %v1280_v0  ;;  %1256 = vmatprep.subr.bf16.mxu1 (!%p175_p2), %v1280_v0  ;;  %v1283_v3 = vld [vmem:[%s1478_s1 + $0x18] sm:$0xff] (!%p175_p2)   ;;  %v1284_v6 = vld [vmem:[%s1478_s1 + $0x20] sm:$0xff] (!%p175_p2)   ;;  %v1285_v7 = vld [vmem:[%s1478_s1 + $0x28] sm:$0xff] (!%p175_p2)  }
   0x7   : > { %1209 = vmatpush3.bf16.msra.mxu0 (!%p175_p2), %v1280_v0  ;;  %1264 = vmatpush3.bf16.msra.mxu1 (!%p175_p2), %v1280_v0  ;;  %v1286_v8 = vld [vmem:[%s1478_s1 + $0x30] sm:$0xff] (!%p175_p2)   ;;  %v1287_v9 = vld [vmem:[%s1478_s1 + $0x38] sm:$0xff] (!%p175_p2)   ;;  %v1406_v28 = vld [vmem:[%s1479_s2] ss:$0 sm:$0xff] (!%p175_p2) }
   0x8   : > { %1210 = vmatprep.subr.bf16.mxu0 (!%p175_p2), %v1281_v1  ;;  %1257 = vmatprep.subr.bf16.mxu1 (!%p175_p2), %v1281_v1 }
   0xb   : > { %1211 = vmatpush3.bf16.msra.mxu0 (!%p175_p2), %v1281_v1  ;;  %1265 = vmatpush3.bf16.msra.mxu1 (!%p175_p2), %v1281_v1 }
   0xc   : > { %1212 = vmatprep.subr.bf16.mxu0 (!%p175_p2), %v1282_v2  ;;  %1258 = vmatprep.subr.bf16.mxu1 (!%p175_p2), %v1282_v2 }
   0xd   : > { %s1483_s19 = smov (!%p206_p3, %s913_s19), 63 }
   0xe   : > { %s1354_s24 = sshll.u32 %s1483_s19, 2 }
   0xf   : > { %s1360_s27 = scalar_lea.vmem %s1477_s0, %s1354_s24  ;;  %1213 = vmatpush3.bf16.msra.mxu0 %v1282_v2  ;;  %1266 = vmatpush3.bf16.msra.mxu1 %v1282_v2  ;;  %s1397_s14 = scalar_lea.vmem %s1480_s3, %s1354_s24 }
  0x10   : > { %v1288_v4 = vld [vmem:[%s1360_s27] sm:$0xff]   ;;  %1214 = vmatprep.subr.bf16.mxu0 %v1283_v3  ;;  %1259 = vmatprep.subr.bf16.mxu1 %v1283_v3  ;;  %v1290_v10 = vld [vmem:[%s1360_s27 + $0x8] sm:$0xff]   ;;  %v1292_v12 = vld [vmem:[%s1360_s27 + $0x10] sm:$0xff]   ;;  %s1424_s20 = scalar_lea.vmem %s1481_s4, %s1354_s24 }
  0x11   : > { %v1289_v5 = vld [vmem:[%s1360_s27 + $0x40] sm:$0xff]   ;;  %1224 = vmatprep.mubr.bf16.mxu0 %v1288_v4  ;;  %v1291_v11 = vld [vmem:[%s1360_s27 + $0x48] sm:$0xff]   ;;  %v1293_v13 = vld [vmem:[%s1360_s27 + $0x50] sm:$0xff]  }
  0x12   : > { %1240 = vmatprep.mubr.bf16.mxu1 %v1289_v5  ;;  %v1294_v14 = vld [vmem:[%s1360_s27 + $0x18] sm:$0xff]   ;;  %v1296_v16 = vld [vmem:[%s1360_s27 + $0x20] sm:$0xff]   ;;  %v1298_v18 = vld [vmem:[%s1360_s27 + $0x28] sm:$0xff]  }
  0x13   : > { %1215 = vmatpush3.bf16.msra.mxu0 %v1283_v3  ;;  %1267 = vmatpush3.bf16.msra.mxu1 %v1283_v3  ;;  %v1295_v15 = vld [vmem:[%s1360_s27 + $0x58] sm:$0xff]   ;;  %v1297_v17 = vld [vmem:[%s1360_s27 + $0x60] sm:$0xff]   ;;  %v1299_v19 = vld [vmem:[%s1360_s27 + $0x68] sm:$0xff]  }
  0x14   : > { %1216 = vmatprep.subr.bf16.mxu0 %v1284_v6  ;;  %1260 = vmatprep.subr.bf16.mxu1 %v1284_v6  ;;  %v1300_v20 = vld [vmem:[%s1360_s27 + $0x30] sm:$0xff]   ;;  %v1302_v22 = vld [vmem:[%s1360_s27 + $0x38] sm:$0xff]   ;;  %v1154_v24 = vld [vmem:[%s1397_s14 + $0x8] sm:$0xff]  }
  0x15   : > { %v1301_v21 = vld [vmem:[%s1360_s27 + $0x70] sm:$0xff]   ;;  %v1303_v23 = vld [vmem:[%s1360_s27 + $0x78] sm:$0xff]   ;;  %v1162_v25 = vld [vmem:[%s1397_s14 + $0x48] sm:$0xff]   ;;  %v1016_v30 = vunpack.c.l.bf16 %v1154_v24  ;;  %v1017_v39 = vunpack.c.h.bf16 %v1154_v24 }
  0x16   : > { %v1011_v26 = vld [vmem:[%s1397_s14] sm:$0xff]   ;;  %v1048_v32 = vunpack.c.l.bf16 %v1162_v25  ;;  %v1049_v40 = vunpack.c.h.bf16 %v1162_v25  ;;  %v1156_v53 = vld [vmem:[%s1397_s14 + $0x18] sm:$0xff]   ;;  %v1155_v59 = vld [vmem:[%s1397_s14 + $0x10] sm:$0xff]  }
  0x17   : > { %1217 = vmatpush3.bf16.msra.mxu0 %v1284_v6  ;;  %1268 = vmatpush3.bf16.msra.mxu1 %v1284_v6  ;;  %v1161_v27 = vld [vmem:[%s1397_s14 + $0x40] sm:$0xff]   ;;  %v1012_v33 = vunpack.c.l.bf16 %v1011_v26  ;;  %v1013_v45 = vunpack.c.h.bf16 %v1011_v26  ;;  %v1164_v54 = vld [vmem:[%s1397_s14 + $0x58] sm:$0xff]   ;;  %v1163_v60 = vld [vmem:[%s1397_s14 + $0x50] sm:$0xff]   ;;  %v1024_v3 = vunpack.c.l.bf16 %v1156_v53 }
  0x18   : > { %1218 = vmatprep.subr.bf16.mxu0 %v1285_v7  ;;  %1261 = vmatprep.subr.bf16.mxu1 %v1285_v7  ;;  %v1044_v34 = vunpack.c.l.bf16 %v1161_v27  ;;  %v1045_v46 = vunpack.c.h.bf16 %v1161_v27  ;;  %v1056_v4 = vunpack.c.l.bf16 %v1164_v54 }
  0x1b   : > { %1219 = vmatpush3.bf16.msra.mxu0 %v1285_v7  ;;  %1269 = vmatpush3.bf16.msra.mxu1 %v1285_v7 }
  0x1c   : > { %1220 = vmatprep.subr.bf16.mxu0 %v1286_v8  ;;  %1262 = vmatprep.subr.bf16.mxu1 %v1286_v8 }
  0x1f   : > { %1221 = vmatpush3.bf16.msra.mxu0 %v1286_v8  ;;  %1270 = vmatpush3.bf16.msra.mxu1 %v1286_v8 }
  0x20   : > { %1222 = vmatprep.subr.bf16.mxu0 %v1287_v9  ;;  %1263 = vmatprep.subr.bf16.mxu1 %v1287_v9 }
  0x23   : > { %1223 = vmatpush3.bf16.msra.mxu0 %v1287_v9  ;;  %1271 = vmatpush3.bf16.msra.mxu1 %v1287_v9  ;;  %v1020_v9 = vunpack.c.l.bf16 %v1155_v59 }
  0x26   : > { %1225 = vmatmul.mubr.bf16.vlgmr.msra.gmra.mrb[0].mxu0 %v1290_v10  ;;  %1241 = vmatmul.mubr.bf16.vlgmr.msra.gmra.mrb[0].mxu1 %v1291_v11  ;;  %v1052_v10 = vunpack.c.l.bf16 %v1163_v60 }
  0x27   : > { %1228 = vmatprep.mubr.bf16.mxu0 %v1292_v12  ;;  %1244 = vmatprep.mubr.bf16.mxu1 %v1293_v13 }
  0x2e   : > { %1229 = vmatmul.mubr.bf16.gmra.mrb[4].mxu0 %v1294_v14  ;;  %1245 = vmatmul.mubr.bf16.gmra.mrb[4].mxu1 %v1295_v15  ;;  %v1025_v15 = vunpack.c.h.bf16 %v1156_v53 }
  0x2f   : > { %1232 = vmatprep.mubr.bf16.mxu0 %v1296_v16  ;;  %1248 = vmatprep.mubr.bf16.mxu1 %v1297_v17  ;;  %v1057_v16 = vunpack.c.h.bf16 %v1164_v54 }
  0x36   : > { %1233 = vmatmul.mubr.bf16.gmra.mrb[8].mxu0 %v1298_v18  ;;  %1249 = vmatmul.mubr.bf16.gmra.mrb[8].mxu1 %v1299_v19 }
  0x37   : > { %1236 = vmatprep.mubr.bf16.mxu0 %v1300_v20  ;;  %1252 = vmatprep.mubr.bf16.mxu1 %v1301_v21  ;;  %v1021_v21 = vunpack.c.h.bf16 %v1155_v59 }
  0x3e   : > { %1237 = vmatmul.mubr.bf16.gmra.mrb[12].mxu0 %v1302_v22  ;;  %1253 = vmatmul.mubr.bf16.gmra.mrb[12].mxu1 %v1303_v23  ;;  %v1053_v22 = vunpack.c.h.bf16 %v1163_v60 }
  0xf9   : > { %v1226_v29 = vpop.f32.mrb[0].mxu0  ;;  %v1242_v31 = vpop.f32.mrb[0].mxu1 }
  0xfa   : > { %v466_v35 = vadd.f32 %v1226_v29, %v1406_v28  ;;  %v530_v36 = vadd.f32 %v1242_v31, %v1406_v28  ;;  %v457_v37 = vpop.f32.mrb[1].mxu0  ;;  %v521_v38 = vpop.f32.mrb[1].mxu1  ;;  %v1166_v31 = vld [vmem:[%s1397_s14 + $0x68] sm:$0xff]  }
  0xfb   : > { %v458_v41 = vadd.f32 %v1406_v28, %v457_v37  ;;  %v522_v42 = vadd.f32 %v1406_v28, %v521_v38  ;;  %v1227_v43 = vpop.f32.mrb[2].mxu0  ;;  %v1243_v44 = vpop.f32.mrb[2].mxu1  ;;  %v1165_v37 = vld [vmem:[%s1397_s14 + $0x60] sm:$0xff]  }
  0xfc   : > { %v469_v47 = vadd.f32 %v1227_v43, %v1406_v28  ;;  %v533_v48 = vadd.f32 %v1243_v44, %v1406_v28  ;;  %v460_v49 = vpop.f32.mrb[3].mxu0  ;;  %v524_v50 = vpop.f32.mrb[3].mxu1  ;;  %v650_v55 = vadd.f32 %v1016_v30, %v466_v35  ;;  %v666_v56 = vadd.f32 %v1048_v32, %v530_v36  ;;  %v1158_v30 = vld [vmem:[%s1397_s14 + $0x28] sm:$0xff]   ;;  %v1157_v36 = vld [vmem:[%s1397_s14 + $0x20] sm:$0xff]  }
  0xfd   : > { %v461_v51 = vadd.f32 %v1406_v28, %v460_v49  ;;  %v525_v52 = vadd.f32 %v1406_v28, %v524_v50  ;;  %v648_v61 = vadd.f32 %v1012_v33, %v458_v41  ;;  %v664_v62 = vadd.f32 %v1044_v34, %v522_v42 }
  0xfe   : > { %v651_v57 = vadd.f32 %v1017_v39, %v469_v47  ;;  %v667_v58 = vadd.f32 %v1049_v40, %v533_v48  ;;  %v1032_v44 = vunpack.c.l.bf16 %v1158_v30  ;;  %v1028_v50 = vunpack.c.l.bf16 %v1157_v36 }
  0xff   : > { %v649_v63 = vadd.f32 %v1013_v45, %v461_v51  ;;  %v665_v0 = vadd.f32 %v1045_v46, %v525_v52  ;;  %v1064_v45 = vunpack.c.l.bf16 %v1166_v31  ;;  %v1060_v51 = vunpack.c.l.bf16 %v1165_v37 }
 0x100   : > { %v1082_v1 = vpack.c.bf16 %v651_v57, %v650_v55  ;;  %v1122_v2 = vpack.c.bf16 %v667_v58, %v666_v56  ;;  %v1033_v56 = vunpack.c.h.bf16 %v1158_v30  ;;  %v1065_v57 = vunpack.c.h.bf16 %v1166_v31 }
 0x101   : > { %v1077_v5 = vpack.c.bf16 %v649_v63, %v648_v61  ;;  %v1117_v6 = vpack.c.bf16 %v665_v0, %v664_v62  ;;  %v1230_v7 = vpop.f32.mrb[4].mxu0  ;;  %v1246_v8 = vpop.f32.mrb[4].mxu1  ;;  %v1029_v62 = vunpack.c.h.bf16 %v1157_v36  ;;  %v1061_v63 = vunpack.c.h.bf16 %v1165_v37 }
 0x102   : > { %1169 = vst [vmem:[%s1424_s20 + $0x8] sm:$0xff] %v1082_v1   ;;  %1177 = vst [vmem:[%s1424_s20 + $0x48] sm:$0xff] %v1122_v2   ;;  %v482_v11 = vadd.f32 %v1230_v7, %v1406_v28  ;;  %v546_v12 = vadd.f32 %v1246_v8, %v1406_v28  ;;  %v473_v13 = vpop.f32.mrb[5].mxu0  ;;  %v537_v14 = vpop.f32.mrb[5].mxu1  ;;  %v1168_v7 = vld [vmem:[%s1397_s14 + $0x78] sm:$0xff]  }
 0x103   : > { %1078 = vst [vmem:[%s1424_s20] sm:$0xff] %v1077_v5   ;;  %1176 = vst [vmem:[%s1424_s20 + $0x40] sm:$0xff] %v1117_v6   ;;  %v474_v17 = vadd.f32 %v1406_v28, %v473_v13  ;;  %v538_v18 = vadd.f32 %v1406_v28, %v537_v14  ;;  %v1231_v19 = vpop.f32.mrb[6].mxu0  ;;  %v1247_v20 = vpop.f32.mrb[6].mxu1  ;;  %v1160_v6 = vld [vmem:[%s1397_s14 + $0x38] sm:$0xff]   ;;  %v1167_v13 = vld [vmem:[%s1397_s14 + $0x70] sm:$0xff]  }
 0x104   : > { %v485_v23 = vadd.f32 %v1231_v19, %v1406_v28  ;;  %v549_v24 = vadd.f32 %v1247_v20, %v1406_v28  ;;  %v476_v25 = vpop.f32.mrb[7].mxu0  ;;  %v540_v26 = vpop.f32.mrb[7].mxu1  ;;  %v654_v32 = vadd.f32 %v1024_v3, %v482_v11  ;;  %v670_v33 = vadd.f32 %v1056_v4, %v546_v12  ;;  %v1159_v12 = vld [vmem:[%s1397_s14 + $0x30] sm:$0xff]  }
 0x105   : > { %v477_v27 = vadd.f32 %v1406_v28, %v476_v25  ;;  %v541_v29 = vadd.f32 %v1406_v28, %v540_v26  ;;  %v652_v38 = vadd.f32 %v1020_v9, %v474_v17  ;;  %v668_v39 = vadd.f32 %v1052_v10, %v538_v18 }
 0x106   : > { %v655_v34 = vadd.f32 %v1025_v15, %v485_v23  ;;  %v671_v35 = vadd.f32 %v1057_v16, %v549_v24  ;;  %v1040_v20 = vunpack.c.l.bf16 %v1160_v6  ;;  %v1036_v26 = vunpack.c.l.bf16 %v1159_v12 }
 0x107   : > { %v653_v40 = vadd.f32 %v1021_v21, %v477_v27  ;;  %v669_v41 = vadd.f32 %v1053_v22, %v541_v29  ;;  %v1072_v21 = vunpack.c.l.bf16 %v1168_v7  ;;  %v1068_v27 = vunpack.c.l.bf16 %v1167_v13 }
 0x108   : > { %v1092_v42 = vpack.c.bf16 %v655_v34, %v654_v32  ;;  %v1132_v43 = vpack.c.bf16 %v671_v35, %v670_v33  ;;  %v1041_v33 = vunpack.c.h.bf16 %v1160_v6  ;;  %v1073_v34 = vunpack.c.h.bf16 %v1168_v7 }
 0x109   : > { %v1087_v46 = vpack.c.bf16 %v653_v40, %v652_v38  ;;  %v1127_v47 = vpack.c.bf16 %v669_v41, %v668_v39  ;;  %v1234_v48 = vpop.f32.mrb[8].mxu0  ;;  %v1250_v49 = vpop.f32.mrb[8].mxu1  ;;  %v1037_v39 = vunpack.c.h.bf16 %v1159_v12  ;;  %v1069_v40 = vunpack.c.h.bf16 %v1167_v13 }
 0x10a   : > { %1171 = vst [vmem:[%s1424_s20 + $0x18] sm:$0xff] %v1092_v42   ;;  %1179 = vst [vmem:[%s1424_s20 + $0x58] sm:$0xff] %v1132_v43   ;;  %v498_v52 = vadd.f32 %v1234_v48, %v1406_v28  ;;  %v562_v53 = vadd.f32 %v1250_v49, %v1406_v28  ;;  %v489_v54 = vpop.f32.mrb[9].mxu0  ;;  %v553_v55 = vpop.f32.mrb[9].mxu1 }
 0x10b   : > { %1170 = vst [vmem:[%s1424_s20 + $0x10] sm:$0xff] %v1087_v46   ;;  %1178 = vst [vmem:[%s1424_s20 + $0x50] sm:$0xff] %v1127_v47   ;;  %v490_v58 = vadd.f32 %v1406_v28, %v489_v54  ;;  %v554_v59 = vadd.f32 %v1406_v28, %v553_v55  ;;  %v1235_v60 = vpop.f32.mrb[10].mxu0  ;;  %v1251_v61 = vpop.f32.mrb[10].mxu1 }
 0x10c   : > { %v501_v0 = vadd.f32 %v1235_v60, %v1406_v28  ;;  %v565_v1 = vadd.f32 %v1251_v61, %v1406_v28  ;;  %v492_v2 = vpop.f32.mrb[11].mxu0  ;;  %v556_v3 = vpop.f32.mrb[11].mxu1  ;;  %v658_v8 = vadd.f32 %v1032_v44, %v498_v52  ;;  %v674_v9 = vadd.f32 %v1064_v45, %v562_v53 }
 0x10d   : > { %v493_v4 = vadd.f32 %v1406_v28, %v492_v2  ;;  %v557_v5 = vadd.f32 %v1406_v28, %v556_v3  ;;  %v656_v14 = vadd.f32 %v1028_v50, %v490_v58  ;;  %v672_v15 = vadd.f32 %v1060_v51, %v554_v59 }
 0x10e   : > { %v659_v10 = vadd.f32 %v1033_v56, %v501_v0  ;;  %v675_v11 = vadd.f32 %v1065_v57, %v565_v1 }
 0x10f   : > { %v657_v16 = vadd.f32 %v1029_v62, %v493_v4  ;;  %v673_v17 = vadd.f32 %v1061_v63, %v557_v5 }
 0x110   : > { %v1102_v18 = vpack.c.bf16 %v659_v10, %v658_v8  ;;  %v1142_v19 = vpack.c.bf16 %v675_v11, %v674_v9 }
 0x111   : > { %v1097_v22 = vpack.c.bf16 %v657_v16, %v656_v14  ;;  %v1137_v23 = vpack.c.bf16 %v673_v17, %v672_v15  ;;  %v1238_v24 = vpop.f32.mrb[12].mxu0  ;;  %v1254_v25 = vpop.f32.mrb[12].mxu1 }
 0x112   : > { %1173 = vst [vmem:[%s1424_s20 + $0x28] sm:$0xff] %v1102_v18   ;;  %1181 = vst [vmem:[%s1424_s20 + $0x68] sm:$0xff] %v1142_v19   ;;  %v514_v29 = vadd.f32 %v1238_v24, %v1406_v28  ;;  %v578_v30 = vadd.f32 %v1254_v25, %v1406_v28  ;;  %v505_v31 = vpop.f32.mrb[13].mxu0  ;;  %v569_v32 = vpop.f32.mrb[13].mxu1 }
 0x113   : > { %1172 = vst [vmem:[%s1424_s20 + $0x20] sm:$0xff] %v1097_v22   ;;  %1180 = vst [vmem:[%s1424_s20 + $0x60] sm:$0xff] %v1137_v23   ;;  %v506_v35 = vadd.f32 %v1406_v28, %v505_v31  ;;  %v570_v36 = vadd.f32 %v1406_v28, %v569_v32  ;;  %v1239_v37 = vpop.f32.mrb[14].mxu0  ;;  %v1255_v38 = vpop.f32.mrb[14].mxu1 }
 0x114   : > { %v517_v41 = vadd.f32 %v1239_v37, %v1406_v28  ;;  %v581_v42 = vadd.f32 %v1255_v38, %v1406_v28  ;;  %v508_v43 = vpop.f32.mrb[15].mxu0  ;;  %v572_v44 = vpop.f32.mrb[15].mxu1  ;;  %v662_v47 = vadd.f32 %v1040_v20, %v514_v29  ;;  %v678_v48 = vadd.f32 %v1072_v21, %v578_v30 }
 0x115   : > { %v509_v45 = vadd.f32 %v1406_v28, %v508_v43  ;;  %v573_v46 = vadd.f32 %v1406_v28, %v572_v44  ;;  %v660_v51 = vadd.f32 %v1036_v26, %v506_v35  ;;  %v676_v52 = vadd.f32 %v1068_v27, %v570_v36 }
 0x116   : > { %v663_v49 = vadd.f32 %v1041_v33, %v517_v41  ;;  %v679_v50 = vadd.f32 %v1073_v34, %v581_v42 }
 0x117   : > { %v661_v53 = vadd.f32 %v1037_v39, %v509_v45  ;;  %v677_v54 = vadd.f32 %v1069_v40, %v573_v46 }
 0x118   : > { %v1112_v55 = vpack.c.bf16 %v663_v49, %v662_v47  ;;  %v1152_v56 = vpack.c.bf16 %v679_v50, %v678_v48 }
 0x119   : > { %v1107_v57 = vpack.c.bf16 %v661_v53, %v660_v51  ;;  %v1147_v58 = vpack.c.bf16 %v677_v54, %v676_v52 }
 0x11a   : > { %1175 = vst [vmem:[%s1424_s20 + $0x38] sm:$0xff] %v1112_v55   ;;  %1183 = vst [vmem:[%s1424_s20 + $0x78] sm:$0xff] %v1152_v56  }
 0x11b   : > { %1174 = vst [vmem:[%s1424_s20 + $0x30] sm:$0xff] %v1107_v57   ;;  %1182 = vst [vmem:[%s1424_s20 + $0x70] sm:$0xff] %v1147_v58  }
 0x11c PF: > { %s14_s15 = sadd.s32 1, %s1310_s15  }
 0x11d   : > { %p11_p4 = scmp.ge.s32.totalorder %s14_s15, 4  }
 0x11f   :  { %13 = sbr.rel (!%p11_p4) target bundleno = 1 (0x1), region = 69 }

// kernel: backbone_with_fpn_forward.23
= control target key start
LH: loop header
LB: loop body
LE: loop exit
PB: predicated region body
PF: predicated region fallthrough
CT: control target
= control target key end

     0   :  { %s3450_s12 = smov 0   ;;  %s3452_s13 = smov 0   ;;  %s4483_s0 = inlined_call_operand.vmem [shape: bf16[2,2,264,128], index: 0, kind: input, shape index: {}]   ;;  %s4484_s1 = inlined_call_operand.vmem [shape: bf16[3,384,128], index: 1, kind: input, shape index: {}]   ;;  %s4485_s2 = inlined_call_operand.vmem [shape: f32[1,128], index: 2, kind: input, shape index: {}]   ;;  %s4486_s3 = inlined_call_operand.vmem [shape: f32[2,2,192,128], index: 3, kind: output, shape index: {}]  }
   0x1   :  { %s3454_s14 = smov 0   ;;  %s3456_s15 = smov 0  }
   0x2   :  { %s3458_s16 = smov 0  }
   0x3 LB: > { %s22_s17 = sadd.s32 1, %s3420_s14  ;;  %s25_s18 = sadd.s32 1, %s3424_s15  ;;  %s3428_s16 = sphi %s3458_s16, %s13_s16   ;;  %s3424_s15 = sphi %s3456_s15, %s4490_s15   ;;  %s3420_s14 = sphi %s3454_s14, %s4489_s14   ;;  %s3416_s13 = sphi %s3452_s13, %s4488_s13   ;;  %s3412_s12 = sphi %s3450_s12, %s4487_s12  }
   0x4   : > { %p23_p0 = scmp.ge.s32.totalorder %s22_s17, 2  ;;  %p2436_p1 = scmp.ge.s32.totalorder %s3428_s16, 1 }
   0x5   : > { %p157_p2 = scmp.lt.s32.totalorder %s3428_s16, 5 }
   0x6   : > { %s4492_s17 = smov (%p23_p0, %s22_s17), 0  ;;  %s4494_s18 = smov (!%p23_p0, %s25_s18), %s3424_s15 }
   0x7   : > { %p158_p3 = pnand %p2436_p1, %p157_p2  ;;  %p27_p4 = scmp.ge.s32.totalorder %s4494_s18, 2 }
   0x8   : > { %v3276_v0 = vld [vmem:[%s4484_s1 + $0x100] sm:$0xff] (!%p158_p3)   ;;  %p189_p5 = scmp.lt.s32.totalorder (!%p158_p3), %s3416_s13, 1  ;;  %v3279_v3 = vld [vmem:[%s4484_s1 + $0x108] sm:$0xff] (!%p158_p3)   ;;  %p191_p6 = scmp.lt.s32.totalorder (!%p158_p3), %s3412_s12, 1  ;;  %v3282_v6 = vld [vmem:[%s4484_s1 + $0x110] sm:$0xff] (!%p158_p3)   ;;  %vm425_vm0 = vcmask (!%p158_p3), 1046528  }
   0x9   : > { %s4496_s18 = smov (%p27_p4, %s4494_s18), 0  ;;  %161 = sbr.rel (%p158_p3) target bundleno = 471 (0x1d7), region = 32 }
   0xa   : > { %v3277_v1 = vld [vmem:[%s4484_s1 + $0x140] sm:$0xff] (!%p158_p3)   ;;  %2652 = vmatprep.subr.bf16.mxu0 (!%p158_p3), %v3276_v0  ;;  %v3280_v4 = vld [vmem:[%s4484_s1 + $0x148] sm:$0xff] (!%p158_p3)   ;;  %v3283_v7 = vld [vmem:[%s4484_s1 + $0x150] sm:$0xff] (!%p158_p3)   ;;  %vm309_vm1 = vsmask.f32 (!%p158_p3), 7424 }
   0xb   : > { %v3278_v2 = vld [vmem:[%s4484_s1 + $0xc0] sm:$0xff] (!%p158_p3)   ;;  %2976 = vmatprep.subr.bf16.mxu1 (!%p158_p3), %v3277_v1  ;;  %v3281_v5 = vld [vmem:[%s4484_s1 + $0xc8] sm:$0xff] (!%p158_p3)   ;;  %v3284_v8 = vld [vmem:[%s4484_s1 + $0xd0] sm:$0xff] (!%p158_p3)  }
   0xc   : > { %2653 = vmatpush3.bf16.msra.mxu0 (!%p158_p3), %v3278_v2  ;;  %2977 = vmatpush3.bf16.msra.mxu1 (!%p158_p3), %v3277_v1  ;;  %v3285_v9 = vld [vmem:[%s4484_s1 + $0x118] sm:$0xff] (!%p158_p3)   ;;  %v3288_v12 = vld [vmem:[%s4484_s1 + $0x120] sm:$0xff] (!%p158_p3)   ;;  %v3291_v15 = vld [vmem:[%s4484_s1 + $0x128] sm:$0xff] (!%p158_p3)  }
   0xd   : > { %2654 = vmatprep.subr.bf16.mxu0 (!%p158_p3), %v3279_v3  ;;  %2978 = vmatprep.subr.bf16.mxu1 (!%p158_p3), %v3280_v4  ;;  %v3286_v10 = vld [vmem:[%s4484_s1 + $0x158] sm:$0xff] (!%p158_p3)   ;;  %v3289_v13 = vld [vmem:[%s4484_s1 + $0x160] sm:$0xff] (!%p158_p3)   ;;  %v3292_v16 = vld [vmem:[%s4484_s1 + $0x168] sm:$0xff] (!%p158_p3)  }
   0xe   : > { %v3287_v11 = vld [vmem:[%s4484_s1 + $0xd8] sm:$0xff] (!%p158_p3)   ;;  %v3290_v14 = vld [vmem:[%s4484_s1 + $0xe0] sm:$0xff] (!%p158_p3)   ;;  %v3293_v17 = vld [vmem:[%s4484_s1 + $0xe8] sm:$0xff] (!%p158_p3)  }
   0xf   : > { %v3294_v18 = vld [vmem:[%s4484_s1 + $0x130] sm:$0xff] (!%p158_p3)   ;;  %v3297_v21 = vld [vmem:[%s4484_s1 + $0x138] sm:$0xff] (!%p158_p3)   ;;  %v3305_v39 = vld [vmem:[%s4484_s1 + $0x40] sm:$0xff] (!%p158_p3)  }
  0x10   : > { %s4498_s13 = smov (!%p189_p5, %s3416_s13), 1  ;;  %s4500_s12 = smov (!%p191_p6, %s3412_s12), 1  ;;  %2655 = vmatpush3.bf16.msra.mxu0 %v3281_v5  ;;  %2979 = vmatpush3.bf16.msra.mxu1 %v3280_v4  ;;  %v3295_v19 = vld [vmem:[%s4484_s1 + $0x170] sm:$0xff]   ;;  %v3298_v22 = vld [vmem:[%s4484_s1 + $0x178] sm:$0xff]   ;;  %v3306_v43 = vld [vmem:[%s4484_s1 + $0x1c0] sm:$0xff]  }
  0x11   : > { %2656 = vmatprep.subr.bf16.mxu0 %v3282_v6  ;;  %2980 = vmatprep.subr.bf16.mxu1 %v3283_v7  ;;  %s3233_s21 = smul.u32 66, %s4498_s13  ;;  %v3296_v20 = vld [vmem:[%s4484_s1 + $0xf0] sm:$0xff]   ;;  %v3299_v36 = vld [vmem:[%s4484_s1 + $0xf8] sm:$0xff]   ;;  %v3307_v45 = vld [vmem:[%s4484_s1] sm:$0xff]  }
  0x12   : > { %s3232_s24 = smul.u32 33, %s4500_s12  ;;  %v3308_v49 = vld [vmem:[%s4484_s1 + $0x180] sm:$0xff]   ;;  %v3309_v50 = vld [vmem:[%s4484_s1 + $0x48] sm:$0xff]   ;;  %v3313_v2 = vld [vmem:[%s4484_s1 + $0x50] sm:$0xff]  }
  0x13   : > { %v3311_v59 = vld [vmem:[%s4484_s1 + $0x8] sm:$0xff]   ;;  %s3235_s8 = smul.u32 48, %s4498_s13 }
  0x14   : > { %2657 = vmatpush3.bf16.msra.mxu0 %v3284_v8  ;;  %2981 = vmatpush3.bf16.msra.mxu1 %v3283_v7  ;;  %s195_s4 = sadd.s32 %s3233_s21, %s3232_s24  ;;  %v3314_v1 = vld [vmem:[%s4484_s1 + $0x1c8] sm:$0xff]   ;;  %v3315_v7 = vld [vmem:[%s4484_s1 + $0x10] sm:$0xff]  }
  0x15   : > { %2658 = vmatprep.subr.bf16.mxu0 %v3285_v9  ;;  %2982 = vmatprep.subr.bf16.mxu1 %v3286_v10  ;;  %s2437_s9 = sshll.u32 %s195_s4, 2  ;;  %v3316_v6 = vld [vmem:[%s4484_s1 + $0x188] sm:$0xff]  }
  0x16   : > { %s3557_s25 = scalar_lea.vmem %s4483_s0, %s2437_s9 }
  0x17   : > { %v3569_v23 = vld [vmem:[%s3557_s25 + $0xc] sm:$0xf]  ;;  %v3572_v24 = vld [vmem:[%s3557_s25 + $0x10] sm:$0xf]  ;;  %v3575_v25 = vld [vmem:[%s3557_s25 + $0x14] sm:$0xf] }
  0x18   : > { %2659 = vmatpush3.bf16.msra.mxu0 %v3287_v11  ;;  %2983 = vmatpush3.bf16.msra.mxu1 %v3286_v10  ;;  %v3578_v26 = vld [vmem:[%s3557_s25 + $0x18] sm:$0xf]  ;;  %v2453_v27 = vcombine.low %v3569_v23, %v3572_v24  ;;  %v515_v29 = vld [vmem:[%s3557_s25 + $0xc] sm:$0xe]  ;;  %v3588_v30 = vld [vmem:[%s3557_s25 + $0x1c] sm:$0xf] }
  0x19   : > { %2660 = vmatprep.subr.bf16.mxu0 %v3288_v12  ;;  %2984 = vmatprep.subr.bf16.mxu1 %v3289_v13  ;;  %v3584_v28 = vcombine.low %v3575_v25, %v3578_v26  ;;  %v3591_v31 = vld [vmem:[%s3557_s25 + $0x20] sm:$0xf]  ;;  %v2466_v34 = vcombine.low %v515_v29, %v3572_v24  ;;  %v3625_v54 = vld [vmem:[%s3557_s25 + $0x24] sm:$0xf]  ;;  %v3628_v55 = vld [vmem:[%s3557_s25 + $0x28] sm:$0xf] }
  0x1a   : > { %v550_v32 = vshrl.u32 %v2453_v27, 16  ;;  %v552_v33 = vshll.u32 %v2453_v27, 16  ;;  %v3596_v35 = vcombine.low %v3588_v30, %v3591_v31  ;;  %v3632_v58 = vcombine.low %v3625_v54, %v3628_v55  ;;  %v3638_v60 = vld [vmem:[%s3557_s25 + $0x2c] sm:$0xf]  ;;  %v220_v61 = vld [vmem:[%s3557_s25 + $0x30] sm:$0xf] }
  0x1b   : > { %v557_v37 = vshll.u32 %v3584_v28, 16  ;;  %v665_v38 = vrot.slane %v3584_v28, 1  ;;  %v664_v41 = vrot.slane %v2466_v34, 1  ;;  %v561_v51 = vshrl.u32 %v3584_v28, 16  ;;  %v221_v10 = vld [vmem:[%s3557_s25 + $0x34] sm:$0xf] }
  0x1c   : > { %2661 = vmatpush3.bf16.msra.mxu0 %v3290_v14  ;;  %2985 = vmatpush3.bf16.msra.mxu1 %v3289_v13  ;;  %v554_v40 = vrot.slane %v552_v33, 1  ;;  %v667_v42 = vrot.slane %v3596_v35, 1  ;;  %v565_v52 = vshll.u32 %v3596_v35, 16  ;;  %v669_v63 = vrot.slane %v3632_v58, 1  ;;  %v222_v11 = vld [vmem:[%s3557_s25 + $0x38] sm:$0xf] }
  0x1d   : > { %2662 = vmatprep.subr.bf16.mxu0 %v3291_v15  ;;  %2986 = vmatprep.subr.bf16.mxu1 %v3292_v16  ;;  %v559_v44 = vrot.slane %v557_v37, 1  ;;  %v666_v47 = vsel %vm425_vm0, %v664_v41, %v665_v38  ;;  %v3644_v0 = vcombine.low %v3638_v60, %v220_v61  ;;  %v569_v3 = vshrl.u32 %v3596_v35, 16  ;;  %v223_v14 = vld [vmem:[%s3557_s25 + $0x3c] sm:$0xf]  ;;  %v224_v15 = vld [vmem:[%s3557_s25 + $0x40] sm:$0xf] }
  0x1e   : > { %v555_v46 = vor.u32 %v554_v40, %v550_v32  ;;  %v668_v48 = vsel %vm425_vm0, %v665_v38, %v667_v42  ;;  %2992 = vmatprep.mubr.bf16.mxu1 %v666_v47  ;;  %v567_v57 = vrot.slane %v565_v52, 1  ;;  %v670_v4 = vsel %vm425_vm0, %v667_v42, %v669_v63  ;;  %v225_v33 = vld [vmem:[%s3557_s25 + $0x44] sm:$0xf]  ;;  %v226_v34 = vld [vmem:[%s3557_s25 + $0x48] sm:$0xf]  ;;  %v3324_v37 = vld [vmem:[%s4484_s1 + $0x1d0] sm:$0xff]  }
  0x1f   : > { %v563_v56 = vor.u32 %v561_v51, %v559_v44  ;;  %v671_v5 = vrot.slane %v3644_v0, 1  ;;  %v573_v9 = vshll.u32 %v3632_v58, 16  ;;  %v3665_v13 = vcombine.low %v221_v10, %v222_v11  ;;  %v227_v41 = vld [vmem:[%s3557_s25 + $0x4c] sm:$0xf]  ;;  %v228_v42 = vld [vmem:[%s3557_s25 + $0x50] sm:$0xf] }
  0x20   : > { %2663 = vmatpush3.bf16.msra.mxu0 %v3293_v17  ;;  %2987 = vmatpush3.bf16.msra.mxu1 %v3292_v16  ;;  %v560_v53 = vsel %vm309_vm1, %v555_v46, %v559_v44  ;;  %v571_v8 = vor.u32 %v569_v3, %v567_v57  ;;  %v3669_v16 = vcombine.low %v220_v61, %v221_v10  ;;  %v581_v29 = vshll.u32 %v3644_v0, 16  ;;  %v3326_v47 = vld [vmem:[%s4484_s1 + $0x190] sm:$0xff]   ;;  %v3329_v3 = vld [vmem:[%s4484_s1 + $0x28] sm:$0xff]  }
  0x21   : > { %2664 = vmatprep.subr.bf16.mxu0 %v3294_v18  ;;  %2988 = vmatprep.subr.bf16.mxu1 %v3295_v19  ;;  %v568_v62 = vsel %vm309_vm1, %v563_v56, %v567_v57  ;;  %v672_v12 = vsel %vm425_vm0, %v669_v63, %v671_v5  ;;  %v575_v17 = vrot.slane %v573_v9, 1  ;;  %v3671_v18 = vcombine.low %v223_v14, %v224_v15  ;;  %v229_v57 = vld [vmem:[%s3557_s25 + $0x54] sm:$0xf]  ;;  %v210_v10 = vld [vmem:[%s3557_s25 + $0x8] sm:$0xf] }
  0x22   : > { %926 = vmatprep.mubr.bf16.mxu0 %v560_v53  ;;  %v3696_v40 = vcombine.low %v225_v33, %v226_v34  ;;  %v3700_v44 = vcombine.low %v224_v15, %v225_v33  ;;  %v3703_v46 = vcombine.low %v227_v41, %v228_v42  ;;  %v585_v53 = vshrl.u32 %v3644_v0, 16  ;;  %v3331_v9 = vld [vmem:[%s4484_s1 + $0x70] sm:$0xff]   ;;  %v3338_v33 = vld [vmem:[%s4484_s1 + $0x38] sm:$0xff]  }
  0x23   : > { %v576_v32 = vsel %vm309_vm1, %v571_v8, %v575_v17  ;;  %v589_v56 = vshll.u32 %v3665_v13, 16  ;;  %v597_v15 = vshll.u32 %v3671_v18, 16 }
  0x24   : > { %2665 = vmatpush3.bf16.msra.mxu0 %v3296_v20  ;;  %2989 = vmatpush3.bf16.msra.mxu1 %v3295_v19  ;;  %v3319_v19 = vld [vmem:[%s4484_s1 + $0x58] sm:$0xff]   ;;  %v3676_v20 = vcombine.low %v222_v11, %v223_v14  ;;  %v679_v61 = vrot.slane %v3703_v46, 1 }
  0x25   : > { %2666 = vmatprep.subr.bf16.mxu0 %v3297_v21  ;;  %2990 = vmatprep.subr.bf16.mxu1 %v3298_v22  ;;  %v673_v21 = vrot.slane %v3665_v13, 1 }
  0x27   : > { %v674_v38 = vsel %vm425_vm0, %v671_v5, %v673_v21  ;;  %v511_v5 = vld [vmem:[%s3557_s25 + $0x60] sm:$0xf] }
  0x28   : > { %2667 = vmatpush3.bf16.msra.mxu0 %v3299_v36  ;;  %2991 = vmatpush3.bf16.msra.mxu1 %v3298_v22  ;;  %v3320_v22 = vld [vmem:[%s4484_s1 + $0x18] sm:$0xff]   ;;  %v3323_v36 = vld [vmem:[%s4484_s1 + $0x60] sm:$0xff]  }
  0x29   : > { %2760 = vmatprep.subr.bf16.mxu1 %v3305_v39  ;;  %2868 = vmatprep.subr.bf16.mxu0 %v3306_v43  ;;  %v675_v39 = vrot.slane %v3671_v18, 1 }
  0x2b   : > { %927 = vmatmul.mubr.bf16.vlgmr.msra.gmra.mrb[0].mxu0 %v2453_v27  ;;  %2993 = vmatmul.mubr.bf16.vlgmr.msra.gmra.mrb[0].mxu1 %v668_v48  ;;  %v577_v27 = vshrl.u32 %v3632_v58, 16  ;;  %v3708_v48 = vcombine.low %v226_v34, %v227_v41  ;;  %v3769_v34 = vcombine.low %v210_v10, %v3569_v23  ;;  %v3342_v23 = vld [vmem:[%s4484_s1 + $0x1a0] sm:$0xff]  }
  0x2c   : > { %2761 = vmatpush3.bf16.msra.mxu1 %v3307_v45  ;;  %2869 = vmatpush3.bf16.msra.mxu0 %v3308_v49  ;;  %v677_v45 = vrot.slane %v3696_v40, 1  ;;  %v3325_v49 = vld [vmem:[%s4484_s1 + $0x20] sm:$0xff]  }
  0x2d   : > { %2762 = vmatprep.subr.bf16.mxu1 %v3309_v50  ;;  %934 = vmatprep.mubr.bf16.mxu0 %v568_v62  ;;  %v579_v43 = vor.u32 %v577_v27, %v575_v17  ;;  %v676_v50 = vsel %vm425_vm0, %v673_v21, %v675_v39  ;;  %v3327_v62 = vld [vmem:[%s4484_s1 + $0x68] sm:$0xff]   ;;  %v3333_v21 = vld [vmem:[%s4484_s1 + $0x30] sm:$0xff]  }
  0x2e   : > { %2870 = vmatprep.subr.bf16.mxu0 %v3314_v1  ;;  %2996 = vmatprep.mubr.bf16.mxu1 %v670_v4  ;;  %v678_v52 = vsel %vm425_vm0, %v675_v39, %v677_v45  ;;  %v3726_v1 = vcombine.low %v228_v42, %v229_v57  ;;  %v231_v4 = vld [vmem:[%s3557_s25 + $0x5c] sm:$0xf]  ;;  %v680_v14 = vsel %vm425_vm0, %v677_v45, %v679_v61  ;;  %v3758_v27 = vld [vmem:[%s3557_s25 + $0x64] sm:$0xff]   ;;  %v3786_v42 = vld [vmem:[%s3557_s25 + $0x6c] ss:$0 sps:$4 sm:$0x11]  }
  0x2f   : > { %v3744_v11 = vcombine.low %v231_v4, %v511_v5 }
  0x30   : > { %2763 = vmatpush3.bf16.msra.mxu1 %v3311_v59  ;;  %2871 = vmatpush3.bf16.msra.mxu0 %v3316_v6  ;;  %v230_v59 = vld [vmem:[%s3557_s25 + $0x58] sm:$0xf] }
  0x31   : > { %2764 = vmatprep.subr.bf16.mxu1 %v3313_v2  ;;  %2872 = vmatprep.subr.bf16.mxu0 %v3324_v37  ;;  %v3724_v63 = vcombine.low %v229_v57, %v230_v59  ;;  %v591_v2 = vrot.slane %v589_v56, 1  ;;  %v3738_v8 = vcombine.low %v230_v59, %v231_v4  ;;  %v208_v37 = vld [vmem:[%s3557_s25] sm:$0xf]  ;;  %v3345_v59 = vld [vmem:[%s4484_s1 + $0x1e8] sm:$0xff]  }
  0x33   : > { %935 = vmatmul.mubr.bf16.gmra.mrb[4].mxu0 %v3584_v28  ;;  %2997 = vmatmul.mubr.bf16.gmra.mrb[4].mxu1 %v672_v12  ;;  %v583_v28 = vrot.slane %v581_v29, 1  ;;  %v681_v6 = vrot.slane %v3724_v63, 1  ;;  %v3334_v12 = vld [vmem:[%s4484_s1 + $0x198] sm:$0xff]  }
  0x34   : > { %2765 = vmatpush3.bf16.msra.mxu1 %v3315_v7  ;;  %942 = vmatprep.mubr.bf16.mxu0 %v576_v32  ;;  %v3332_v7 = vld [vmem:[%s4484_s1 + $0x1d8] sm:$0xff]   ;;  %v683_v32 = vrot.slane %v3744_v11, 1 }
  0x35   : > { %3000 = vmatprep.mubr.bf16.mxu1 %v674_v38  ;;  %2766 = vmatprep.subr.bf16.mxu1 %v3319_v19  ;;  %v584_v51 = vsel %vm309_vm1, %v579_v43, %v583_v28  ;;  %v682_v19 = vsel %vm425_vm0, %v679_v61, %v681_v6  ;;  %v3337_v29 = vld [vmem:[%s4484_s1 + $0x78] sm:$0xff]   ;;  %v3773_v38 = vld [vmem:[%s3557_s25 + $0x4] sm:$0xf]  ;;  %v3346_v61 = vld [vmem:[%s4484_s1 + $0x1a8] sm:$0xff]  }
  0x36   : > { %2873 = vmatpush3.bf16.msra.mxu0 %v3326_v47  ;;  %v3780_v41 = vcombine.low %v208_v37, %v3773_v38  ;;  %v3791_v43 = vld [vmem:[%s4484_s1 + $0x80] sm:$0xff]   ;;  %v684_v45 = vsel %vm425_vm0, %v681_v6, %v683_v32  ;;  %v3812_v6 = vcombine.low %v3628_v55, %v3638_v60  ;;  %v609_v55 = vshrl.u32 %v3696_v40, 16 }
  0x37   : > { %2874 = vmatprep.subr.bf16.mxu0 %v3332_v7  ;;  %v3350_v7 = vld [vmem:[%s4484_s1 + $0x1f0] sm:$0xff]   ;;  %v366_v37 = vshll.u32 %v3676_v20, 16 }
  0x38   : > { %2767 = vmatpush3.bf16.msra.mxu1 %v3320_v22  ;;  %v593_v22 = vshrl.u32 %v3665_v13, 16  ;;  %v313_v47 = vshll.u32 %v3780_v41, 16 }
  0x39   : > { %2768 = vmatprep.subr.bf16.mxu1 %v3323_v36  ;;  %v599_v36 = vrot.slane %v597_v15, 1  ;;  %v3354_v15 = vld [vmem:[%s4484_s1 + $0x1f8] sm:$0xff]  }
  0x3a   : > { %2875 = vmatpush3.bf16.msra.mxu0 %v3334_v12  ;;  %v595_v39 = vor.u32 %v593_v22, %v591_v2  ;;  %v315_v57 = vrot.slane %v313_v47, 1  ;;  %v350_v12 = vshll.u32 %v3812_v6, 16  ;;  %v3844_v22 = vcombine.low %v3578_v26, %v3588_v30  ;;  %v3859_v47 = vld [vmem:[%s4484_s1 + $0x200] sm:$0xff]  }
  0x3b   : > { %943 = vmatmul.mubr.bf16.gmra.mrb[8].mxu0 %v3596_v35  ;;  %3001 = vmatmul.mubr.bf16.gmra.mrb[8].mxu1 %v676_v50  ;;  %v587_v35 = vor.u32 %v585_v53, %v583_v28  ;;  %v685_v28 = vrot.slane %v3758_v27, 1  ;;  %v605_v50 = vshll.u32 %v3696_v40, 16  ;;  %v621_v26 = vshll.u32 %v3724_v63, 16 }
  0x3c   : > { %950 = vmatprep.mubr.bf16.mxu0 %v584_v51  ;;  %3004 = vmatprep.mubr.bf16.mxu1 %v678_v52  ;;  %v311_v51 = vshrl.u32 %v3780_v41, 16  ;;  %v318_v52 = vshll.u32 %v3769_v34, 16  ;;  %v600_v53 = vsel %vm309_vm1, %v595_v39, %v599_v36 }
  0x3d   : > { %2769 = vmatpush3.bf16.msra.mxu1 %v3325_v49  ;;  %v592_v17 = vsel %vm309_vm1, %v587_v35, %v591_v2  ;;  %v601_v49 = vshrl.u32 %v3671_v18, 16  ;;  %v686_v56 = vsel %vm425_vm0, %v683_v32, %v685_v28  ;;  %v3351_v35 = vld [vmem:[%s4484_s1 + $0x1b0] sm:$0xff]   ;;  %v362_v32 = vshrl.u32 %v3669_v16, 16 }
  0x3e   : > { %2770 = vmatprep.subr.bf16.mxu1 %v3327_v62  ;;  %v687_v62 = vrot.slane %v3786_v42, 1  ;;  %v316_v4 = vor.u32 %v315_v57, %v311_v51  ;;  %v320_v5 = vrot.slane %v318_v52, 1  ;;  %v617_v51 = vshrl.u32 %v3703_v46, 16 }
  0x3f   : > { %v603_v2 = vor.u32 %v601_v49, %v599_v36 }
  0x40   : > { %v321_v60 = vsel %vm309_vm1, %v316_v4, %v320_v5  ;;  %v3349_v4 = vld [vmem:[%s4484_s1 + $0x90] sm:$0xff]  }
  0x41   : > { %2771 = vmatpush3.bf16.msra.mxu1 %v3329_v3  ;;  %v607_v3 = vrot.slane %v605_v50, 1  ;;  %v3344_v50 = vld [vmem:[%s4484_s1 + $0x88] sm:$0xff]  }
  0x42   : > { %2772 = vmatprep.subr.bf16.mxu1 %v3331_v9  ;;  %v688_v9 = vsel %vm425_vm0, %v685_v28, %v687_v62 }
  0x43   : > { %951 = vmatmul.mubr.bf16.gmra.mrb[12].mxu0 %v3632_v58  ;;  %3005 = vmatmul.mubr.bf16.gmra.mrb[12].mxu1 %v680_v14  ;;  %v3341_v58 = vld [vmem:[%s4484_s1 + $0x1e0] sm:$0xff]   ;;  %v608_v10 = vsel %vm309_vm1, %v603_v2, %v607_v3 }
  0x44   : > { %958 = vmatprep.mubr.bf16.mxu0 %v592_v17  ;;  %3008 = vmatprep.mubr.bf16.mxu1 %v682_v19  ;;  %v3836_v17 = vrot.slane %v350_v12, 1  ;;  %v3355_v19 = vld [vmem:[%s4484_s1 + $0x1b8] sm:$0xff]   ;;  %v637_v12 = vshll.u32 %v3758_v27, 16 }
  0x45   : > { %2773 = vmatpush3.bf16.msra.mxu1 %v3333_v21  ;;  %2876 = vmatprep.subr.bf16.mxu0 %v3341_v58  ;;  %v354_v21 = vshrl.u32 %v3812_v6, 16 }
  0x46   : > { %2774 = vmatprep.subr.bf16.mxu1 %v3337_v29  ;;  %2877 = vmatpush3.bf16.msra.mxu0 %v3342_v23  ;;  %v358_v29 = vshll.u32 %v3669_v16, 16  ;;  %v3850_v23 = vrot.slane %v366_v37, 1 }
  0x47   : > { %2878 = vmatprep.subr.bf16.mxu0 %v3345_v59  ;;  %v356_v36 = vor.u32 %v354_v21, %v3836_v17  ;;  %v623_v59 = vrot.slane %v621_v26, 1  ;;  %v633_v21 = vshrl.u32 %v3744_v11, 16 }
  0x48   : > { %v360_v28 = vrot.slane %v358_v29, 1 }
  0x49   : > { %2775 = vmatpush3.bf16.msra.mxu1 %v3338_v33 }
  0x4a   : > { %3016 = vmatprep.subr.bf16.mxu1 %v3791_v43  ;;  %2879 = vmatpush3.bf16.msra.mxu0 %v3346_v61  ;;  %v3854_v30 = vsel %vm309_vm1, %v356_v36, %v360_v28 }
  0x4b   : > { %959 = vmatmul.mubr.bf16.gmra.mrb[16].mxu0 %v3644_v0  ;;  %3009 = vmatmul.mubr.bf16.gmra.mrb[16].mxu1 %v684_v45  ;;  %v3816_v0 = vcombine.low %v3572_v24, %v3575_v25  ;;  %v613_v24 = vshll.u32 %v3703_v46, 16  ;;  %v322_v25 = vshrl.u32 %v3769_v34, 16  ;;  %v364_v45 = vor.u32 %v362_v32, %v360_v28  ;;  %v1554_v28 = vld [vmem:[%s3557_s25 + $0x18] sm:$0xf] }
  0x4c   : > { %966 = vmatprep.mubr.bf16.mxu0 %v600_v53  ;;  %3012 = vmatprep.mubr.bf16.mxu1 %v686_v56  ;;  %v334_v53 = vshll.u32 %v3844_v22, 16 }
  0x4d   : > { %2880 = vmatprep.subr.bf16.mxu0 %v3350_v7  ;;  %v326_v14 = vshll.u32 %v3816_v0, 16  ;;  %v615_v33 = vrot.slane %v613_v24, 1  ;;  %v324_v58 = vor.u32 %v322_v25, %v320_v5  ;;  %v330_v52 = vshrl.u32 %v3816_v0, 16  ;;  %v233_v24 = vld [vmem:[%s3557_s25] sm:$0xe] }
  0x4e   : > { %2881 = vmatpush3.bf16.msra.mxu0 %v3351_v35  ;;  %v3871_v57 = vsel %vm309_vm1, %v364_v45, %v3850_v23  ;;  %v336_v2 = vrot.slane %v334_v53, 1  ;;  %v338_v7 = vshrl.u32 %v3844_v22, 16  ;;  %v427_v25 = vrot.slane %v3769_v34, 1 }
  0x4f   : > { %2882 = vmatprep.subr.bf16.mxu0 %v3354_v15  ;;  %v328_v39 = vrot.slane %v326_v14, 1  ;;  %v619_v61 = vor.u32 %v617_v51, %v615_v33  ;;  %v429_v14 = vrot.slane %v3816_v0, 1  ;;  %v435_v45 = vrot.slane %v3812_v6, 1 }
  0x51   : > { %v329_v56 = vsel %vm309_vm1, %v324_v58, %v328_v39  ;;  %v332_v62 = vor.u32 %v330_v52, %v328_v39  ;;  %v641_v52 = vshrl.u32 %v3758_v27, 16 }
  0x52   : > { %2883 = vmatpush3.bf16.msra.mxu0 %v3355_v19 }
  0x53   : > { %967 = vmatmul.mubr.bf16.gmra.mrb[20].mxu0 %v3665_v13  ;;  %3013 = vmatmul.mubr.bf16.gmra.mrb[20].mxu1 %v688_v9  ;;  %v611_v13 = vor.u32 %v609_v55, %v607_v3  ;;  %v3879_v3 = vcombine.low %v3591_v31, %v3625_v54  ;;  %v337_v5 = vsel %vm309_vm1, %v332_v62, %v336_v2  ;;  %v3353_v31 = vld [vmem:[%s4484_s1 + $0x98] sm:$0xff]   ;;  %v645_v62 = vshll.u32 %v3786_v42, 16 }
  0x54   : > { %974 = vmatprep.mubr.bf16.mxu0 %v608_v10  ;;  %1328 = vmatprep.mubr.bf16.mxu1 %v321_v60  ;;  %v340_v10 = vor.u32 %v338_v7, %v336_v2  ;;  %v3360_v60 = vld [vmem:[%s4484_s1 + $0xa0] sm:$0xff]  }
  0x55   : > { %v616_v49 = vsel %vm309_vm1, %v611_v13, %v615_v33  ;;  %3056 = vmatprep.subr.bf16.mxu0 %v3859_v47  ;;  %v342_v35 = vshll.u32 %v3879_v3, 16  ;;  %v346_v29 = vshrl.u32 %v3879_v3, 16  ;;  %v431_v13 = vrot.slane %v3844_v22, 1 }
  0x56   : > { %v639_v33 = vrot.slane %v637_v12, 1  ;;  %v433_v26 = vrot.slane %v3879_v3, 1  ;;  %v370_v12 = vshrl.u32 %v3676_v20, 16 }
  0x57   : > { %v344_v55 = vrot.slane %v342_v35, 1  ;;  %v3920_v37 = vsel %vm425_vm0, %v429_v14, %v431_v13 }
  0x58   : > { %v3934_v51 = vsel %vm425_vm0, %v433_v26, %v435_v45  ;;  %v643_v42 = vor.u32 %v641_v52, %v639_v33 }
  0x59   : > { %v345_v19 = vsel %vm309_vm1, %v340_v10, %v344_v55  ;;  %v348_v39 = vor.u32 %v346_v29, %v344_v55  ;;  %v378_v29 = vshrl.u32 %v3700_v44, 16 }
  0x5b   : > { %975 = vmatmul.mubr.bf16.gmra.mrb[24].mxu0 %v3671_v18  ;;  %1329 = vmatmul.mubr.bf16.vlgmr.msra.gmra.mrb[24].mxu1 %v3780_v41  ;;  %v625_v18 = vshrl.u32 %v3724_v63, 16  ;;  %v629_v41 = vshll.u32 %v3744_v11, 16 }
  0x5c   : > { %3017 = vmatpush3.bf16.msra.mxu1 %v3791_v43  ;;  %982 = vmatprep.mubr.bf16.mxu0 %v616_v49  ;;  %v624_v43 = vsel %vm309_vm1, %v619_v61, %v623_v59  ;;  %v437_v49 = vrot.slane %v3669_v16, 1  ;;  %v353_v61 = vsel %vm309_vm1, %v348_v39, %v3836_v17  ;;  %v647_v17 = vrot.slane %v645_v62, 1 }
  0x5d   : > { %1336 = vmatprep.mubr.bf16.mxu1 %v329_v56  ;;  %3018 = vmatprep.subr.bf16.mxu1 %v3344_v50  ;;  %v627_v54 = vor.u32 %v625_v18, %v623_v59  ;;  %v631_v9 = vrot.slane %v629_v41, 1  ;;  %v439_v56 = vrot.slane %v3676_v20, 1  ;;  %v3956_v41 = vld [vmem:[%s3557_s25 + $0x20] sm:$0xff]  }
  0x5e   : > { %v3938_v53 = vsel %vm425_vm0, %v435_v45, %v437_v49  ;;  %v1771_v35 = vrot.slane %v3956_v41, 1  ;;  %v390_v45 = vshll.u32 %v3726_v1, 16 }
  0x5f   : > { %v632_v15 = vsel %vm309_vm1, %v627_v54, %v631_v9  ;;  %v635_v58 = vor.u32 %v633_v21, %v631_v9  ;;  %v3951_v18 = vsel %vm425_vm0, %v437_v49, %v439_v56 }
  0x60   : > { %3019 = vmatpush3.bf16.msra.mxu1 %v3344_v50  ;;  %v3931_v50 = vsel %vm425_vm0, %v431_v13, %v433_v26  ;;  %v4006_v26 = vld [vmem:[%s4484_s1 + $0x210] sm:$0xff]   ;;  %v392_v62 = vrot.slane %v390_v45, 1 }
  0x61   : > { %3020 = vmatprep.subr.bf16.mxu1 %v3349_v4  ;;  %v640_v59 = vsel %vm309_vm1, %v635_v58, %v639_v33 }
  0x63   : > { %983 = vmatmul.mubr.bf16.gmra.mrb[28].mxu0 %v3696_v40  ;;  %1337 = vmatmul.mubr.bf16.gmra.mrb[28].mxu1 %v3769_v34  ;;  %v2452_v40 = vcombine.low %v233_v24, %v3773_v38  ;;  %v3364_v34 = vld [vmem:[%s4484_s1 + $0xa8] sm:$0xff]   ;;  %v3911_v38 = vsel %vm425_vm0, %v427_v25, %v429_v14 }
  0x64   : > { %990 = vmatprep.mubr.bf16.mxu0 %v624_v43  ;;  %1344 = vmatprep.mubr.bf16.mxu1 %v337_v5  ;;  %v1579_v5 = vld [vmem:[%s3557_s25 + $0x18] sm:$0xe]  ;;  %v3972_v24 = vld [vmem:[%s3557_s25 + $0x28] sm:$0xff]  }
  0x65   : > { %3021 = vmatpush3.bf16.msra.mxu1 %v3349_v4  ;;  %v426_v32 = vrot.slane %v2452_v40, 1  ;;  %v3374_v4 = vld [vmem:[%s4484_s1 + $0xb8] sm:$0xff]   ;;  %v372_v40 = vor.u32 %v370_v12, %v3850_v23  ;;  %v4049_v12 = vld [vmem:[%s3557_s25 + $0x60] ss:$0 sps:$4 sm:$0x11]  }
  0x66   : > { %3022 = vmatprep.subr.bf16.mxu1 %v3353_v31 }
  0x67   : > { %v3917_v36 = vsel %vm425_vm0, %v426_v32, %v427_v25 }
  0x69   : > { %3023 = vmatpush3.bf16.msra.mxu1 %v3353_v31  ;;  %v648_v31 = vsel %vm309_vm1, %v643_v42, %v647_v17  ;;  %v4025_v42 = vld [vmem:[%s3557_s25 + $0x40] sm:$0xff]  }
  0x6a   : > { %3024 = vmatprep.subr.bf16.mxu1 %v3360_v60  ;;  %v4031_v17 = vld [vmem:[%s4484_s1 + $0x220] sm:$0xff]  }
  0x6b   : > { %991 = vmatmul.mubr.bf16.gmra.mrb[32].mxu0 %v3703_v46  ;;  %1345 = vmatmul.mubr.bf16.gmra.mrb[32].mxu1 %v3816_v0  ;;  %v1555_v46 = vld [vmem:[%s3557_s25 + $0x1c] sm:$0xf]  ;;  %v3370_v0 = vld [vmem:[%s4484_s1 + $0xb0] sm:$0xff]  }
  0x6c   : > { %998 = vmatprep.mubr.bf16.mxu0 %v632_v15  ;;  %1352 = vmatprep.mubr.bf16.mxu1 %v345_v19  ;;  %v2563_v2 = vcombine.low %v1554_v28, %v1555_v46  ;;  %v2576_v7 = vcombine.low %v1579_v5, %v1555_v46  ;;  %v3984_v15 = vld [vmem:[%s3557_s25 + $0x30] sm:$0xff]   ;;  %v4001_v28 = vld [vmem:[%s3557_s25 + $0x38] sm:$0xff]   ;;  %v398_v5 = vshll.u32 %v3738_v8, 16 }
  0x6d   : > { %3025 = vmatpush3.bf16.msra.mxu1 %v3360_v60  ;;  %v1679_v23 = vshll.u32 %v3984_v15, 16  ;;  %v1683_v49 = vshrl.u32 %v3984_v15, 16  ;;  %v1687_v52 = vshll.u32 %v4001_v28, 16 }
  0x6e   : > { %3026 = vmatprep.subr.bf16.mxu1 %v3364_v34  ;;  %v1658_v43 = vshll.u32 %v2563_v2, 16  ;;  %v1656_v54 = vshrl.u32 %v2563_v2, 16  ;;  %v1770_v9 = vrot.slane %v2576_v7, 1 }
  0x6f   : > { %v1681_v39 = vrot.slane %v1679_v23, 1 }
  0x70   : > { %v3969_v10 = vsel %vm425_vm0, %v1770_v9, %v1771_v35 }
  0x71   : > { %3027 = vmatpush3.bf16.msra.mxu1 %v3364_v34 }
  0x72   : > { %3028 = vmatprep.subr.bf16.mxu1 %v3370_v0 }
  0x73   : > { %999 = vmatmul.mubr.bf16.gmra.mrb[36].mxu0 %v3724_v63  ;;  %1353 = vmatmul.mubr.bf16.gmra.mrb[36].mxu1 %v3844_v22  ;;  %v1660_v63 = vrot.slane %v1658_v43, 1  ;;  %v1663_v22 = vshll.u32 %v3956_v41, 16  ;;  %v394_v43 = vshrl.u32 %v3726_v1, 16 }
  0x74   : > { %1006 = vmatprep.mubr.bf16.mxu0 %v640_v59  ;;  %1360 = vmatprep.mubr.bf16.mxu1 %v353_v61  ;;  %v4019_v59 = vld [vmem:[%s4484_s1 + $0x218] sm:$0xff]  }
  0x75   : > { %3029 = vmatpush3.bf16.msra.mxu1 %v3370_v0  ;;  %v1661_v55 = vor.u32 %v1660_v63, %v1656_v54  ;;  %v1665_v60 = vrot.slane %v1663_v22, 1  ;;  %v1691_v54 = vshrl.u32 %v4001_v28, 16  ;;  %v1695_v63 = vshll.u32 %v4025_v42, 16  ;;  %v4044_v22 = vld [vmem:[%s4484_s1 + $0x228] sm:$0xff]  }
  0x76   : > { %3030 = vmatprep.subr.bf16.mxu1 %v3374_v4  ;;  %v396_v9 = vor.u32 %v394_v43, %v392_v62 }
  0x77   : > { %v1666_v25 = vsel %vm309_vm1, %v1661_v55, %v1665_v60  ;;  %v400_v55 = vrot.slane %v398_v5, 1 }
  0x79   : > { %3031 = vmatpush3.bf16.msra.mxu1 %v3374_v4  ;;  %v1689_v4 = vrot.slane %v1687_v52, 1 }
  0x7a   : > { %3096 = vmatprep.subr.bf16.mxu1 %v3859_v47 }
  0x7b   : > { %1007 = vmatmul.mubr.bf16.gmra.mrb[40].mxu0 %v3744_v11  ;;  %1361 = vmatmul.mubr.bf16.gmra.mrb[40].mxu1 %v3879_v3  ;;  %v374_v11 = vshll.u32 %v3700_v44, 16  ;;  %v1667_v3 = vshrl.u32 %v3956_v41, 16 }
  0x7c   : > { %1014 = vmatprep.mubr.bf16.mxu0 %v648_v31  ;;  %1368 = vmatprep.mubr.bf16.mxu1 %v3854_v30  ;;  %v1671_v30 = vshll.u32 %v3972_v24, 16 }
  0x7d   : > { %v376_v14 = vrot.slane %v374_v11, 1  ;;  %v1669_v19 = vor.u32 %v1667_v3, %v1665_v60  ;;  %v1693_v60 = vor.u32 %v1691_v54, %v1689_v4  ;;  %v4052_v11 = vld [vmem:[%s3557_s25 + $0x48] sm:$0xff]   ;;  %v4059_v3 = vld [vmem:[%s4484_s1 + $0x230] sm:$0xff]  }
  0x7e   : > { %v1673_v21 = vrot.slane %v1671_v30, 1  ;;  %v401_v30 = vsel %vm309_vm1, %v396_v9, %v400_v55  ;;  %v4122_v9 = vld [vmem:[%s3557_s25 + $0x70] sm:$0xff]  }
  0x7f   : > { %v377_v34 = vsel %vm309_vm1, %v372_v40, %v376_v14  ;;  %v380_v13 = vor.u32 %v378_v29, %v376_v14  ;;  %v402_v40 = vshrl.u32 %v3738_v8, 16  ;;  %v1703_v29 = vshll.u32 %v4052_v11, 16 }
  0x80   : > { %v1674_v32 = vsel %vm309_vm1, %v1669_v19, %v1673_v21  ;;  %v406_v19 = vshll.u32 %v4049_v12, 16 }
  0x83   : > { %1015 = vmatmul.mubr.bf16.gmra.mrb[44].mxu0 %v3758_v27  ;;  %1369 = vmatmul.mubr.bf16.gmra.mrb[44].mxu1 %v3812_v6  ;;  %v3991_v27 = vld [vmem:[%s4484_s1 + $0x208] sm:$0xff]   ;;  %v382_v6 = vshll.u32 %v3708_v48, 16 }
  0x84   : > { %1376 = vmatprep.mubr.bf16.mxu1 %v3871_v57  ;;  %2032 = vmatprep.mubr.bf16.mxu0 %v1666_v25  ;;  %v1675_v57 = vshrl.u32 %v3972_v24, 16  ;;  %v1697_v25 = vrot.slane %v1695_v63, 1 }
  0x85   : > { %v384_v33 = vrot.slane %v382_v6, 1  ;;  %v404_v6 = vor.u32 %v402_v40, %v400_v55 }
  0x86   : > { %v1677_v58 = vor.u32 %v1675_v57, %v1673_v21  ;;  %v1698_v14 = vsel %vm309_vm1, %v1693_v60, %v1697_v25  ;;  %v1699_v21 = vshrl.u32 %v4025_v42, 16  ;;  %v408_v57 = vrot.slane %v406_v19, 1 }
  0x87   : > { %v385_v46 = vsel %vm309_vm1, %v380_v13, %v384_v33  ;;  %v4077_v13 = vld [vmem:[%s3557_s25 + $0x50] sm:$0xff]  }
  0x88   : > { %v1682_v0 = vsel %vm309_vm1, %v1677_v58, %v1681_v39  ;;  %v1701_v23 = vor.u32 %v1699_v21, %v1697_v25  ;;  %v1715_v52 = vshrl.u32 %v4077_v13, 16 }
  0x8b   : > { %1377 = vmatmul.mubr.bf16.gmra.mrb[48].mxu1 %v3669_v16  ;;  %2033 = vmatmul.mubr.bf16.vlgmr.msra.gmra.mrb[48].mxu0 %v2563_v2  ;;  %v386_v16 = vshrl.u32 %v3708_v48, 16  ;;  %v1685_v2 = vor.u32 %v1683_v49, %v1681_v39  ;;  %v1707_v39 = vshrl.u32 %v4052_v11, 16 }
  0x8c   : > { %3057 = vmatpush3.bf16.msra.mxu0 %v3859_v47  ;;  %1384 = vmatprep.mubr.bf16.mxu1 %v377_v34  ;;  %v4072_v34 = vld [vmem:[%s4484_s1 + $0x238] sm:$0xff]  }
  0x8d   : > { %2040 = vmatprep.mubr.bf16.mxu0 %v1674_v32  ;;  %3058 = vmatprep.subr.bf16.mxu0 %v3991_v27  ;;  %v388_v61 = vor.u32 %v386_v16, %v384_v33  ;;  %v1690_v31 = vsel %vm309_vm1, %v1685_v2, %v1689_v4  ;;  %v1705_v32 = vrot.slane %v1703_v29, 1  ;;  %v409_v33 = vsel %vm309_vm1, %v404_v6, %v408_v57  ;;  %v4098_v4 = vld [vmem:[%s3557_s25 + $0x60] sm:$0xff]  }
  0x8e   : > { %v1711_v16 = vshll.u32 %v4077_v13, 16 }
  0x8f   : > { %v393_v7 = vsel %vm309_vm1, %v388_v61, %v392_v62  ;;  %v1706_v58 = vsel %vm309_vm1, %v1701_v23, %v1705_v32  ;;  %v1709_v45 = vor.u32 %v1707_v39, %v1705_v32 }
  0x90   : > { %3059 = vmatpush3.bf16.msra.mxu0 %v3991_v27 }
  0x91   : > { %3060 = vmatprep.subr.bf16.mxu0 %v4006_v26 }
  0x93   : > { %1385 = vmatmul.mubr.bf16.gmra.mrb[52].mxu1 %v3676_v20  ;;  %2041 = vmatmul.mubr.bf16.gmra.mrb[52].mxu0 %v3956_v41  ;;  %v445_v20 = vrot.slane %v3726_v1, 1  ;;  %v1791_v41 = vrot.slane %v4122_v9, 1 }
  0x94   : > { %1392 = vmatprep.mubr.bf16.mxu1 %v385_v46  ;;  %2048 = vmatprep.mubr.bf16.mxu0 %v1682_v0  ;;  %v1713_v46 = vrot.slane %v1711_v16, 1  ;;  %v4089_v0 = vld [vmem:[%s3557_s25 + $0x58] sm:$0xff]  }
  0x95   : > { %3061 = vmatpush3.bf16.msra.mxu0 %v4006_v26  ;;  %v1719_v61 = vshll.u32 %v4089_v0, 16  ;;  %v1723_v5 = vshrl.u32 %v4089_v0, 16  ;;  %v1785_v57 = vrot.slane %v4089_v0, 1 }
  0x96   : > { %3062 = vmatprep.subr.bf16.mxu0 %v4019_v59  ;;  %v1714_v49 = vsel %vm309_vm1, %v1709_v45, %v1713_v46  ;;  %v1717_v62 = vor.u32 %v1715_v52, %v1713_v46 }
  0x97   : > { %v1721_v2 = vrot.slane %v1719_v61, 1 }
  0x99   : > { %3063 = vmatpush3.bf16.msra.mxu0 %v4019_v59  ;;  %v1722_v43 = vsel %vm309_vm1, %v1717_v62, %v1721_v2 }
  0x9a   : > { %3064 = vmatprep.subr.bf16.mxu0 %v4031_v17 }
  0x9b   : > { %1393 = vmatmul.mubr.bf16.gmra.mrb[56].mxu1 %v3700_v44  ;;  %2049 = vmatmul.mubr.bf16.gmra.mrb[56].mxu0 %v3972_v24 }
  0x9c   : > { %1400 = vmatprep.mubr.bf16.mxu1 %v393_v7  ;;  %2056 = vmatprep.mubr.bf16.mxu0 %v1690_v31  ;;  %v1727_v7 = vshll.u32 %v4098_v4, 16  ;;  %v1725_v31 = vor.u32 %v1723_v5, %v1721_v2 }
  0x9d   : > { %3065 = vmatpush3.bf16.msra.mxu0 %v4031_v17 }
  0x9e   : > { %3066 = vmatprep.subr.bf16.mxu0 %v4044_v22  ;;  %v1729_v54 = vrot.slane %v1727_v7, 1 }
  0xa1   : > { %3067 = vmatpush3.bf16.msra.mxu0 %v4044_v22 }
  0xa2   : > { %3068 = vmatprep.subr.bf16.mxu0 %v4059_v3 }
  0xa3   : > { %1401 = vmatmul.mubr.bf16.gmra.mrb[60].mxu1 %v3708_v48  ;;  %2057 = vmatmul.mubr.bf16.gmra.mrb[60].mxu0 %v3984_v15 }
  0xa4   : > { %1408 = vmatprep.mubr.bf16.mxu1 %v401_v30  ;;  %2064 = vmatprep.mubr.bf16.mxu0 %v1698_v14  ;;  %v4136_v30 = vld [vmem:[%s3557_s25 + $0x78] ss:$0 sps:$4 sm:$0x11]  }
  0xa5   : > { %3069 = vmatpush3.bf16.msra.mxu0 %v4059_v3 }
  0xa6   : > { %3070 = vmatprep.subr.bf16.mxu0 %v4072_v34 }
  0xa9   : > { %3071 = vmatpush3.bf16.msra.mxu0 %v4072_v34 }
  0xab   : > { %1409 = vmatmul.mubr.bf16.gmra.mrb[64].mxu1 %v3726_v1  ;;  %2065 = vmatmul.mubr.bf16.gmra.mrb[64].mxu0 %v4001_v28  ;;  %v449_v1 = vrot.slane %v4049_v12, 1  ;;  %v1775_v12 = vrot.slane %v3984_v15, 1  ;;  %v1779_v15 = vrot.slane %v4025_v42, 1 }
  0xac   : > { %1416 = vmatprep.mubr.bf16.mxu1 %v409_v33  ;;  %2072 = vmatprep.mubr.bf16.mxu0 %v1706_v58 }
  0xb3   : > { %1417 = vmatmul.mubr.bf16.gmra.mrb[68].mxu1 %v3738_v8  ;;  %2073 = vmatmul.mubr.bf16.gmra.mrb[68].mxu0 %v4025_v42 }
  0xb4   : > { %3032 = vmatprep.mubr.bf16.mxu1 %v3917_v36  ;;  %2080 = vmatprep.mubr.bf16.mxu0 %v1714_v49  ;;  %v4109_v36 = vld [vmem:[%s3557_s25 + $0x68] sm:$0xff]   ;;  %s3234_s25 = smul.u32 24, %s4500_s12 }
  0xb5   : > { %v1735_v63 = vshll.u32 %v4109_v36, 16 }
  0xb6   : > { %s204_s9 = sadd.s32 %s3235_s8, %s3234_s25 }
  0xb7   : > { %s2438_s10 = sshll.u32 %s204_s9, 3 }
  0xb8   : > { %s4397_s20 = scalar_lea.vmem %s4486_s3, %s2438_s10 }
  0xbb   : > { %3033 = vmatmul.mubr.bf16.vlgmr.msra.gmra.mrb[0].mxu1 %v3911_v38  ;;  %2081 = vmatmul.mubr.bf16.gmra.mrb[72].mxu0 %v4052_v11  ;;  %v1731_v38 = vshrl.u32 %v4098_v4, 16 }
  0xbc   : > { %3104 = vmatpush3.bf16.msra.mxu1 %v3859_v47  ;;  %3036 = vmatprep.mubr.bf16.mxu1 %v3920_v37  ;;  %v1730_v47 = vsel %vm309_vm1, %v1725_v31, %v1729_v54 }
  0xbd   : > { %3097 = vmatprep.subr.bf16.mxu1 %v3991_v27  ;;  %2088 = vmatprep.mubr.bf16.mxu0 %v1722_v43  ;;  %v1733_v37 = vor.u32 %v1731_v38, %v1729_v54 }
  0xc0   : > { %3105 = vmatpush3.bf16.msra.mxu1 %v3991_v27  ;;  %v1737_v27 = vrot.slane %v1735_v63, 1 }
  0xc1   : > { %3098 = vmatprep.subr.bf16.mxu1 %v4006_v26 }
  0xc2   : > { %v1738_v55 = vsel %vm309_vm1, %v1733_v37, %v1737_v27 }
  0xc3   : > { %3037 = vmatmul.mubr.bf16.gmra.mrb[4].mxu1 %v3931_v50  ;;  %2089 = vmatmul.mubr.bf16.gmra.mrb[76].mxu0 %v4077_v13  ;;  %v1739_v50 = vshrl.u32 %v4109_v36, 16 }
  0xc4   : > { %3106 = vmatpush3.bf16.msra.mxu1 %v4006_v26  ;;  %3040 = vmatprep.mubr.bf16.mxu1 %v3934_v51  ;;  %v1743_v26 = vshll.u32 %v4122_v9, 16  ;;  %v441_v51 = vrot.slane %v3700_v44, 1  ;;  %v1747_v44 = vshrl.u32 %v4122_v9, 16 }
  0xc5   : > { %2096 = vmatprep.mubr.bf16.mxu0 %v1730_v47  ;;  %3099 = vmatprep.subr.bf16.mxu1 %v4019_v59  ;;  %v1741_v60 = vor.u32 %v1739_v50, %v1737_v27 }
  0xc6   : > { %v1745_v25 = vrot.slane %v1743_v26, 1 }
  0xc8   : > { %3107 = vmatpush3.bf16.msra.mxu1 %v4019_v59  ;;  %v443_v59 = vrot.slane %v3708_v48, 1  ;;  %v1751_v48 = vshll.u32 %v4136_v30, 16 }
  0xc9   : > { %3100 = vmatprep.subr.bf16.mxu1 %v4031_v17 }
  0xca   : > { %v444_v40 = vsel %vm425_vm0, %v441_v51, %v443_v59  ;;  %v1753_v14 = vrot.slane %v1751_v48, 1 }
  0xcb   : > { %3041 = vmatmul.mubr.bf16.gmra.mrb[8].mxu1 %v3938_v53  ;;  %2097 = vmatmul.mubr.bf16.gmra.mrb[80].mxu0 %v4089_v0  ;;  %v442_v53 = vsel %vm425_vm0, %v439_v56, %v441_v51  ;;  %v447_v56 = vrot.slane %v3738_v8, 1  ;;  %v1781_v8 = vrot.slane %v4052_v11, 1  ;;  %v1787_v11 = vrot.slane %v4098_v4, 1 }
  0xcc   : > { %3044 = vmatprep.mubr.bf16.mxu1 %v3951_v18  ;;  %2104 = vmatprep.mubr.bf16.mxu0 %v1738_v55  ;;  %v1746_v18 = vsel %vm309_vm1, %v1741_v60, %v1745_v25 }
  0xcd   : > { %3108 = vmatpush3.bf16.msra.mxu1 %v4031_v17  ;;  %v1749_v17 = vor.u32 %v1747_v44, %v1745_v25  ;;  %v448_v19 = vsel %vm425_vm0, %v445_v20, %v447_v56  ;;  %v450_v29 = vsel %vm425_vm0, %v447_v56, %v449_v1  ;;  %v1788_v33 = vsel %vm425_vm0, %v1785_v57, %v1787_v11 }
  0xce   : > { %3101 = vmatprep.subr.bf16.mxu1 %v4044_v22  ;;  %v1782_v45 = vsel %vm425_vm0, %v1779_v15, %v1781_v8 }
  0xcf   : > { %v1754_v21 = vsel %vm309_vm1, %v1749_v17, %v1753_v14 }
  0xd1   : > { %3109 = vmatpush3.bf16.msra.mxu1 %v4044_v22  ;;  %v446_v22 = vsel %vm425_vm0, %v443_v59, %v445_v20 }
  0xd2   : > { %3102 = vmatprep.subr.bf16.mxu1 %v4059_v3 }
  0xd3   : > { %3045 = vmatmul.mubr.bf16.gmra.mrb[12].mxu1 %v442_v53  ;;  %2105 = vmatmul.mubr.bf16.gmra.mrb[84].mxu0 %v4098_v4 }
  0xd4   : > { %3048 = vmatprep.mubr.bf16.mxu1 %v444_v40  ;;  %2112 = vmatprep.mubr.bf16.mxu0 %v1746_v18 }
  0xd5   : > { %3110 = vmatpush3.bf16.msra.mxu1 %v4059_v3  ;;  %v1783_v3 = vrot.slane %v4077_v13, 1 }
  0xd6   : > { %3103 = vmatprep.subr.bf16.mxu1 %v4072_v34 }
  0xd7   : > { %v1784_v6 = vsel %vm425_vm0, %v1781_v8, %v1783_v3  ;;  %v1786_v32 = vsel %vm425_vm0, %v1783_v3, %v1785_v57 }
  0xd9   : > { %3111 = vmatpush3.bf16.msra.mxu1 %v4072_v34  ;;  %v1773_v34 = vrot.slane %v3972_v24, 1  ;;  %v1789_v24 = vrot.slane %v4109_v36, 1 }
  0xdb   : > { %3049 = vmatmul.mubr.bf16.gmra.mrb[16].mxu1 %v446_v22  ;;  %2113 = vmatmul.mubr.bf16.gmra.mrb[88].mxu0 %v4109_v36  ;;  %v1774_v23 = vsel %vm425_vm0, %v1771_v35, %v1773_v34  ;;  %v1776_v13 = vsel %vm425_vm0, %v1773_v34, %v1775_v12  ;;  %v1790_v58 = vsel %vm425_vm0, %v1787_v11, %v1789_v24 }
  0xdc   : > { %3052 = vmatprep.mubr.bf16.mxu1 %v448_v19  ;;  %2120 = vmatprep.mubr.bf16.mxu0 %v1754_v21  ;;  %v1792_v16 = vsel %vm425_vm0, %v1789_v24, %v1791_v41 }
  0xe3   : > { %3053 = vmatmul.mubr.bf16.gmra.mrb[20].mxu1 %v450_v29  ;;  %2121 = vmatmul.mubr.bf16.gmra.mrb[92].mxu0 %v4122_v9 }
  0xe4   : > { %3072 = vmatprep.mubr.bf16.mxu0 %v3969_v10  ;;  %3084 = vmatprep.mubr.bf16.mxu1 %v1784_v6  ;;  %v1777_v10 = vrot.slane %v4001_v28, 1  ;;  %v1793_v28 = vrot.slane %v4136_v30, 1 }
  0xe6   : > { %v1778_v35 = vsel %vm425_vm0, %v1775_v12, %v1777_v10  ;;  %v1780_v39 = vsel %vm425_vm0, %v1777_v10, %v1779_v15  ;;  %v1794_v42 = vsel %vm425_vm0, %v1791_v41, %v1793_v28 }
  0xeb   : > { %3073 = vmatmul.mubr.bf16.vlgmr.msra.gmra.mrb[96].mxu0 %v1774_v23  ;;  %3085 = vmatmul.mubr.bf16.vlgmr.msra.gmra.mrb[12].mxu1 %v1786_v32 }
  0xec   : > { %3076 = vmatprep.mubr.bf16.mxu0 %v1776_v13  ;;  %3088 = vmatprep.mubr.bf16.mxu1 %v1788_v33 }
  0xf3   : > { %3077 = vmatmul.mubr.bf16.gmra.mrb[100].mxu0 %v1778_v35  ;;  %3089 = vmatmul.mubr.bf16.gmra.mrb[16].mxu1 %v1790_v58 }
  0xf4   : > { %3080 = vmatprep.mubr.bf16.mxu0 %v1780_v39  ;;  %3092 = vmatprep.mubr.bf16.mxu1 %v1792_v16 }
  0xfb   : > { %3081 = vmatmul.mubr.bf16.gmra.mrb[104].mxu0 %v1782_v45  ;;  %3093 = vmatmul.mubr.bf16.gmra.mrb[20].mxu1 %v1794_v42 }
  0xfe   : > { %v2668_v46 = vpop.f32.mrb[0].mxu0 }
  0xff   : > { %v2669_v0 = vpop.f32.mrb[1].mxu0 }
 0x100   : > { %v2670_v49 = vadd.f32 %v2669_v0, %v2668_v46  ;;  %v2671_v52 = vpop.f32.mrb[2].mxu0 }
 0x101   : > { %v2672_v61 = vpop.f32.mrb[3].mxu0 }
 0x102   : > { %v2673_v62 = vadd.f32 %v2672_v61, %v2671_v52 }
 0x106   : > { %v2674_v2 = vpop.f32.mrb[4].mxu0 }
 0x107   : > { %v2675_v4 = vpop.f32.mrb[5].mxu0 }
 0x108   : > { %v2676_v43 = vadd.f32 %v2675_v4, %v2674_v2  ;;  %v2677_v5 = vpop.f32.mrb[6].mxu0 }
 0x109   : > { %v2678_v7 = vpop.f32.mrb[7].mxu0 }
 0x10a   : > { %v2679_v36 = vadd.f32 %v2678_v7, %v2677_v5 }
 0x10e   : > { %v2680_v31 = vpop.f32.mrb[8].mxu0 }
 0x10f   : > { %v2681_v54 = vpop.f32.mrb[9].mxu0 }
 0x110   : > { %v2682_v38 = vadd.f32 %v2681_v54, %v2680_v31  ;;  %v2683_v63 = vpop.f32.mrb[10].mxu0 }
 0x111   : > { %v2684_v47 = vpop.f32.mrb[11].mxu0 }
 0x112   : > { %v2685_v37 = vadd.f32 %v2684_v47, %v2683_v63 }
 0x116   : > { %v2686_v27 = vpop.f32.mrb[12].mxu0 }
 0x117   : > { %v2687_v9 = vpop.f32.mrb[13].mxu0 }
 0x118   : > { %v4186_v55 = vadd.f32 %v2687_v9, %v2686_v27  ;;  %v2689_v50 = vpop.f32.mrb[14].mxu0 }
 0x119   : > { %v2690_v26 = vpop.f32.mrb[15].mxu0 }
 0x11a   : > { %v4188_v51 = vadd.f32 %v2690_v26, %v2689_v50 }
 0x11e   : > { %v2692_v59 = vpop.f32.mrb[16].mxu0 }
 0x11f   : > { %v2693_v60 = vpop.f32.mrb[17].mxu0 }
 0x120   : > { %v4190_v25 = vadd.f32 %v2693_v60, %v2692_v59  ;;  %v2695_v30 = vpop.f32.mrb[18].mxu0 }
 0x121   : > { %v2696_v53 = vpop.f32.mrb[19].mxu0 }
 0x122   : > { %v4192_v40 = vadd.f32 %v2696_v53, %v2695_v30 }
 0x126   : > { %v2698_v18 = vpop.f32.mrb[20].mxu0 }
 0x127   : > { %v2699_v44 = vpop.f32.mrb[21].mxu0 }
 0x128   : > { %v4194_v48 = vadd.f32 %v2699_v44, %v2698_v18  ;;  %v2701_v20 = vpop.f32.mrb[22].mxu0 }
 0x129   : > { %v2702_v56 = vpop.f32.mrb[23].mxu0 }
 0x12a   : > { %v4196_v17 = vadd.f32 %v2702_v56, %v2701_v20 }
 0x12e   : > { %v2704_v14 = vpop.f32.mrb[24].mxu0  ;;  %v2776_v22 = vpop.f32.mrb[24].mxu1 }
 0x12f   : > { %v2705_v19 = vpop.f32.mrb[25].mxu0  ;;  %v2777_v21 = vpop.f32.mrb[25].mxu1 }
 0x130   : > { %v4198_v1 = vadd.f32 %v2705_v19, %v2704_v14  ;;  %v2778_v8 = vadd.f32 %v2777_v21, %v2776_v22  ;;  %v2707_v3 = vpop.f32.mrb[26].mxu0  ;;  %v2779_v29 = vpop.f32.mrb[26].mxu1 }
 0x131   : > { %v2708_v6 = vpop.f32.mrb[27].mxu0  ;;  %v2780_v34 = vpop.f32.mrb[27].mxu1 }
 0x132   : > { %v4200_v57 = vadd.f32 %v2708_v6, %v2707_v3  ;;  %v2781_v12 = vadd.f32 %v2780_v34, %v2779_v29  ;;  %v4202_v11 = vadd.f32 %v2778_v8, %v2670_v49 }
 0x134   : > { %v4204_v23 = vadd.f32 %v2781_v12, %v2673_v62 }
 0x136   : > { %v2710_v32 = vpop.f32.mrb[28].mxu0  ;;  %v2782_v13 = vpop.f32.mrb[28].mxu1 }
 0x137   : > { %v2711_v33 = vpop.f32.mrb[29].mxu0  ;;  %v2783_v10 = vpop.f32.mrb[29].mxu1 }
 0x138   : > { %v4206_v24 = vadd.f32 %v2711_v33, %v2710_v32  ;;  %v2784_v15 = vadd.f32 %v2783_v10, %v2782_v13  ;;  %v2713_v41 = vpop.f32.mrb[30].mxu0  ;;  %v2785_v35 = vpop.f32.mrb[30].mxu1 }
 0x139   : > { %v2714_v58 = vpop.f32.mrb[31].mxu0  ;;  %v2786_v39 = vpop.f32.mrb[31].mxu1 }
 0x13a   : > { %v4208_v16 = vadd.f32 %v2714_v58, %v2713_v41  ;;  %v2787_v28 = vadd.f32 %v2786_v39, %v2785_v35  ;;  %v4210_v45 = vadd.f32 %v2784_v15, %v2676_v43 }
 0x13c   : > { %v4212_v42 = vadd.f32 %v2787_v28, %v2679_v36 }
 0x13e   : > { %v2716_v46 = vpop.f32.mrb[32].mxu0  ;;  %v2788_v0 = vpop.f32.mrb[32].mxu1 }
 0x13f   : > { %v2717_v49 = vpop.f32.mrb[33].mxu0  ;;  %v2789_v52 = vpop.f32.mrb[33].mxu1 }
 0x140   : > { %v4214_v61 = vadd.f32 %v2717_v49, %v2716_v46  ;;  %v2790_v62 = vadd.f32 %v2789_v52, %v2788_v0  ;;  %v2719_v2 = vpop.f32.mrb[34].mxu0  ;;  %v2791_v4 = vpop.f32.mrb[34].mxu1 }
 0x141   : > { %v2720_v5 = vpop.f32.mrb[35].mxu0  ;;  %v2792_v7 = vpop.f32.mrb[35].mxu1 }
 0x142   : > { %v4216_v31 = vadd.f32 %v2720_v5, %v2719_v2  ;;  %v2793_v54 = vadd.f32 %v2792_v7, %v2791_v4  ;;  %v4218_v63 = vadd.f32 %v2790_v62, %v2682_v38 }
 0x144   : > { %v4220_v43 = vadd.f32 %v2793_v54, %v2685_v37 }
 0x146   : > { %v2722_v36 = vpop.f32.mrb[36].mxu0  ;;  %v2794_v47 = vpop.f32.mrb[36].mxu1 }
 0x147   : > { %v2723_v27 = vpop.f32.mrb[37].mxu0  ;;  %v2795_v9 = vpop.f32.mrb[37].mxu1 }
 0x148   : > { %v4222_v50 = vadd.f32 %v2723_v27, %v2722_v36  ;;  %v2796_v26 = vadd.f32 %v2795_v9, %v2794_v47  ;;  %v2725_v59 = vpop.f32.mrb[38].mxu0  ;;  %v2797_v60 = vpop.f32.mrb[38].mxu1 }
 0x149   : > { %v2726_v30 = vpop.f32.mrb[39].mxu0  ;;  %v2798_v53 = vpop.f32.mrb[39].mxu1 }
 0x14a   : > { %v4224_v18 = vadd.f32 %v2726_v30, %v2725_v59  ;;  %v2799_v44 = vadd.f32 %v2798_v53, %v2797_v60  ;;  %v4227_v20 = vadd.f32 %v2796_v26, %v4186_v55 }
 0x14c   : > { %v4230_v38 = vadd.f32 %v2799_v44, %v4188_v51 }
 0x14e   : > { %v2728_v37 = vpop.f32.mrb[40].mxu0  ;;  %v2800_v56 = vpop.f32.mrb[40].mxu1 }
 0x14f   : > { %v2729_v14 = vpop.f32.mrb[41].mxu0  ;;  %v2801_v22 = vpop.f32.mrb[41].mxu1 }
 0x150   : > { %v4232_v19 = vadd.f32 %v2729_v14, %v2728_v37  ;;  %v2802_v21 = vadd.f32 %v2801_v22, %v2800_v56  ;;  %v2731_v8 = vpop.f32.mrb[42].mxu0  ;;  %v2803_v3 = vpop.f32.mrb[42].mxu1 }
 0x151   : > { %v2732_v29 = vpop.f32.mrb[43].mxu0  ;;  %v2804_v6 = vpop.f32.mrb[43].mxu1 }
 0x152   : > { %v4234_v34 = vadd.f32 %v2732_v29, %v2731_v8  ;;  %v2805_v12 = vadd.f32 %v2804_v6, %v2803_v3  ;;  %v4237_v55 = vadd.f32 %v2802_v21, %v4190_v25 }
 0x154   : > { %v4240_v51 = vadd.f32 %v2805_v12, %v4192_v40 }
 0x156   : > { %v2734_v32 = vpop.f32.mrb[44].mxu0  ;;  %v2806_v13 = vpop.f32.mrb[44].mxu1 }
 0x157   : > { %v2735_v33 = vpop.f32.mrb[45].mxu0  ;;  %v2807_v10 = vpop.f32.mrb[45].mxu1 }
 0x158   : > { %v4242_v15 = vadd.f32 %v2735_v33, %v2734_v32  ;;  %v2808_v41 = vadd.f32 %v2807_v10, %v2806_v13  ;;  %v2737_v35 = vpop.f32.mrb[46].mxu0  ;;  %v2809_v58 = vpop.f32.mrb[46].mxu1 }
 0x159   : > { %v2738_v39 = vpop.f32.mrb[47].mxu0  ;;  %v2810_v28 = vpop.f32.mrb[47].mxu1 }
 0x15a   : > { %v4244_v46 = vadd.f32 %v2738_v39, %v2737_v35  ;;  %v2811_v0 = vadd.f32 %v2810_v28, %v2809_v58  ;;  %v4247_v25 = vadd.f32 %v2808_v41, %v4194_v48 }
 0x15c   : > { %v4250_v40 = vadd.f32 %v2811_v0, %v4196_v17 }
 0x15e   : > { %v2812_v49 = vpop.f32.mrb[48].mxu1  ;;  %v2884_v52 = vpop.f32.mrb[48].mxu0 }
 0x15f   : > { %v2813_v62 = vpop.f32.mrb[49].mxu1  ;;  %v2885_v2 = vpop.f32.mrb[49].mxu0 }
 0x160   : > { %v2814_v4 = vadd.f32 %v2813_v62, %v2812_v49  ;;  %v4252_v5 = vadd.f32 %v2885_v2, %v2884_v52  ;;  %v2815_v7 = vpop.f32.mrb[50].mxu1  ;;  %v2887_v54 = vpop.f32.mrb[50].mxu0 }
 0x161   : > { %v2816_v36 = vpop.f32.mrb[51].mxu1  ;;  %v2888_v47 = vpop.f32.mrb[51].mxu0 }
 0x162   : > { %v4255_v27 = vadd.f32 %v2814_v4, %v4198_v1  ;;  %v2817_v9 = vadd.f32 %v2816_v36, %v2815_v7  ;;  %v4257_v48 = vadd.f32 %v2888_v47, %v2887_v54 }
 0x164   : > { %v4260_v17 = vadd.f32 %v2817_v9, %v4200_v57 }
 0x166   : > { %v2818_v26 = vpop.f32.mrb[52].mxu1  ;;  %v2890_v59 = vpop.f32.mrb[52].mxu0 }
 0x167   : > { %v2819_v60 = vpop.f32.mrb[53].mxu1  ;;  %v2891_v30 = vpop.f32.mrb[53].mxu0 }
 0x168   : > { %v2820_v53 = vadd.f32 %v2819_v60, %v2818_v26  ;;  %v4262_v44 = vadd.f32 %v2891_v30, %v2890_v59  ;;  %v2821_v37 = vpop.f32.mrb[54].mxu1  ;;  %v2893_v56 = vpop.f32.mrb[54].mxu0 }
 0x169   : > { %v2822_v14 = vpop.f32.mrb[55].mxu1  ;;  %v2894_v22 = vpop.f32.mrb[55].mxu0 }
 0x16a   : > { %v4265_v1 = vadd.f32 %v2820_v53, %v4206_v24  ;;  %v2823_v21 = vadd.f32 %v2822_v14, %v2821_v37  ;;  %v4267_v8 = vadd.f32 %v2894_v22, %v2893_v56 }
 0x16c   : > { %v4270_v57 = vadd.f32 %v2823_v21, %v4208_v16 }
 0x16e   : > { %v2824_v3 = vpop.f32.mrb[56].mxu1  ;;  %v2896_v29 = vpop.f32.mrb[56].mxu0 }
 0x16f   : > { %v2825_v6 = vpop.f32.mrb[57].mxu1  ;;  %v2897_v12 = vpop.f32.mrb[57].mxu0 }
 0x170   : > { %v2826_v32 = vadd.f32 %v2825_v6, %v2824_v3  ;;  %v4272_v13 = vadd.f32 %v2897_v12, %v2896_v29  ;;  %v2827_v33 = vpop.f32.mrb[58].mxu1  ;;  %v2899_v10 = vpop.f32.mrb[58].mxu0 }
 0x171   : > { %v2828_v41 = vpop.f32.mrb[59].mxu1  ;;  %v2900_v35 = vpop.f32.mrb[59].mxu0 }
 0x172   : > { %v4275_v24 = vadd.f32 %v2826_v32, %v4214_v61  ;;  %v2829_v58 = vadd.f32 %v2828_v41, %v2827_v33  ;;  %v4277_v39 = vadd.f32 %v2900_v35, %v2899_v10 }
 0x174   : > { %v4280_v16 = vadd.f32 %v2829_v58, %v4216_v31 }
 0x176   : > { %v2830_v28 = vpop.f32.mrb[60].mxu1  ;;  %v2902_v0 = vpop.f32.mrb[60].mxu0 }
 0x177   : > { %v2831_v49 = vpop.f32.mrb[61].mxu1  ;;  %v2903_v52 = vpop.f32.mrb[61].mxu0 }
 0x178   : > { %v2832_v62 = vadd.f32 %v2831_v49, %v2830_v28  ;;  %v4282_v2 = vadd.f32 %v2903_v52, %v2902_v0  ;;  %v2833_v4 = vpop.f32.mrb[62].mxu1  ;;  %v2905_v7 = vpop.f32.mrb[62].mxu0 }
 0x179   : > { %v2834_v54 = vpop.f32.mrb[63].mxu1  ;;  %v2906_v36 = vpop.f32.mrb[63].mxu0 }
 0x17a   : > { %v4285_v61 = vadd.f32 %v2832_v62, %v4222_v50  ;;  %v2835_v47 = vadd.f32 %v2834_v54, %v2833_v4  ;;  %v4287_v9 = vadd.f32 %v2906_v36, %v2905_v7 }
 0x17c   : > { %v4290_v31 = vadd.f32 %v2835_v47, %v4224_v18 }
 0x17e   : > { %v2836_v26 = vpop.f32.mrb[64].mxu1  ;;  %v2908_v59 = vpop.f32.mrb[64].mxu0 }
 0x17f   : > { %v2837_v60 = vpop.f32.mrb[65].mxu1  ;;  %v2909_v30 = vpop.f32.mrb[65].mxu0 }
 0x180   : > { %v2838_v53 = vadd.f32 %v2837_v60, %v2836_v26  ;;  %v4292_v37 = vadd.f32 %v2909_v30, %v2908_v59  ;;  %v2839_v56 = vpop.f32.mrb[66].mxu1  ;;  %v2911_v14 = vpop.f32.mrb[66].mxu0 }
 0x181   : > { %v2840_v22 = vpop.f32.mrb[67].mxu1  ;;  %v2912_v21 = vpop.f32.mrb[67].mxu0 }
 0x182   : > { %v4295_v50 = vadd.f32 %v2838_v53, %v4232_v19  ;;  %v2841_v3 = vadd.f32 %v2840_v22, %v2839_v56  ;;  %v4297_v29 = vadd.f32 %v2912_v21, %v2911_v14 }
 0x184   : > { %v4300_v18 = vadd.f32 %v2841_v3, %v4234_v34 }
 0x186   : > { %v2842_v6 = vpop.f32.mrb[68].mxu1  ;;  %v2914_v12 = vpop.f32.mrb[68].mxu0 }
 0x187   : > { %v2843_v32 = vpop.f32.mrb[69].mxu1  ;;  %v2915_v33 = vpop.f32.mrb[69].mxu0 }
 0x188   : > { %v2844_v10 = vadd.f32 %v2843_v32, %v2842_v6  ;;  %v2916_v41 = vadd.f32 %v2915_v33, %v2914_v12  ;;  %v2845_v35 = vpop.f32.mrb[70].mxu1  ;;  %v2917_v58 = vpop.f32.mrb[70].mxu0 }
 0x189   : > { %v2846_v28 = vpop.f32.mrb[71].mxu1  ;;  %v2918_v0 = vpop.f32.mrb[71].mxu0 }
 0x18a   : > { %v4303_v49 = vadd.f32 %v2844_v10, %v4242_v15  ;;  %v2847_v19 = vadd.f32 %v2846_v28, %v2845_v35  ;;  %v2919_v52 = vadd.f32 %v2918_v0, %v2917_v58 }
 0x18c   : > { %v4306_v62 = vadd.f32 %v2847_v19, %v4244_v46 }
 0x18e   : > { %v3034_v34 = vpop.f32.mrb[0].mxu1  ;;  %v2920_v4 = vpop.f32.mrb[72].mxu0 }
 0x18f   : > { %v3113_v7 = vadd.f32 %v4210_v45, %v3034_v34  ;;  %v1459_v54 = vpop.f32.mrb[1].mxu1  ;;  %v2921_v36 = vpop.f32.mrb[73].mxu0 }
 0x190   : > { %v3117_v47 = vadd.f32 %v4202_v11, %v1459_v54  ;;  %v2922_v26 = vadd.f32 %v2921_v36, %v2920_v4  ;;  %v3035_v59 = vpop.f32.mrb[2].mxu1  ;;  %v2923_v60 = vpop.f32.mrb[74].mxu0 }
 0x191   : > { %v3121_v30 = vadd.f32 %v4212_v42, %v3035_v59  ;;  %v1462_v15 = vpop.f32.mrb[3].mxu1  ;;  %v2924_v53 = vpop.f32.mrb[75].mxu0  ;;  %v4312_v56 = vadd.f32 %v3113_v7, %v4262_v44 }
 0x192   : > { %v3125_v46 = vadd.f32 %v4204_v23, %v1462_v15  ;;  %v2925_v14 = vadd.f32 %v2924_v53, %v2923_v60  ;;  %v4316_v22 = vadd.f32 %v3117_v47, %v4252_v5  ;;  %v4319_v45 = vadd.f32 %v4255_v27, %v2922_v26 }
 0x193   : > { %v4322_v11 = vadd.f32 %v3121_v30, %v4267_v8 }
 0x194   : > { %v4325_v21 = vadd.f32 %v3125_v46, %v4257_v48  ;;  %v4328_v42 = vadd.f32 %v4260_v17, %v2925_v14 }
 0x196   : > { %v3038_v44 = vpop.f32.mrb[4].mxu1  ;;  %v2926_v3 = vpop.f32.mrb[76].mxu0 }
 0x197   : > { %v3129_v23 = vadd.f32 %v4227_v20, %v3038_v44  ;;  %v1475_v6 = vpop.f32.mrb[5].mxu1  ;;  %v2927_v12 = vpop.f32.mrb[77].mxu0 }
 0x198   : > { %v3133_v5 = vadd.f32 %v4218_v63, %v1475_v6  ;;  %v2928_v32 = vadd.f32 %v2927_v12, %v2926_v3  ;;  %v3039_v27 = vpop.f32.mrb[6].mxu1  ;;  %v2929_v33 = vpop.f32.mrb[78].mxu0 }
 0x199   : > { %v3137_v8 = vadd.f32 %v4230_v38, %v3039_v27  ;;  %v1478_v10 = vpop.f32.mrb[7].mxu1  ;;  %v2930_v35 = vpop.f32.mrb[79].mxu0  ;;  %v4334_v48 = vadd.f32 %v3129_v23, %v4282_v2 }
 0x19a   : > { %v3141_v17 = vadd.f32 %v4220_v43, %v1478_v10  ;;  %v2931_v58 = vadd.f32 %v2930_v35, %v2929_v33  ;;  %v3161_v28 = vadd.f32 %v4265_v1, %v2928_v32  ;;  %v4339_v20 = vadd.f32 %v3133_v5, %v4272_v13 }
 0x19b   : > { %v4342_v63 = vadd.f32 %v3137_v8, %v4287_v9 }
 0x19c   : > { %v4345_v0 = vadd.f32 %v4270_v57, %v2931_v58  ;;  %v4348_v38 = vadd.f32 %v3141_v17, %v4277_v39 }
 0x19e   : > { %v3042_v19 = vpop.f32.mrb[8].mxu1  ;;  %v2932_v2 = vpop.f32.mrb[80].mxu0 }
 0x19f   : > { %v3145_v34 = vadd.f32 %v4247_v25, %v3042_v19  ;;  %v1491_v43 = vpop.f32.mrb[9].mxu1  ;;  %v2933_v4 = vpop.f32.mrb[81].mxu0 }
 0x1a0   : > { %v3149_v1 = vadd.f32 %v4237_v55, %v1491_v43  ;;  %v2934_v7 = vadd.f32 %v2933_v4, %v2932_v2  ;;  %v3043_v13 = vpop.f32.mrb[10].mxu1  ;;  %v2935_v54 = vpop.f32.mrb[82].mxu0 }
 0x1a1   : > { %v3153_v9 = vadd.f32 %v4250_v40, %v3043_v13  ;;  %v1494_v36 = vpop.f32.mrb[11].mxu1  ;;  %v2936_v47 = vpop.f32.mrb[83].mxu0  ;;  %v4353_v57 = vadd.f32 %v3145_v34, %v2916_v41 }
 0x1a2   : > { %v3157_v39 = vadd.f32 %v4240_v51, %v1494_v36  ;;  %v2937_v26 = vadd.f32 %v2936_v47, %v2935_v54  ;;  %v4357_v59 = vadd.f32 %v4275_v24, %v2934_v7  ;;  %v4360_v25 = vadd.f32 %v3149_v1, %v4292_v37 }
 0x1a3   : > { %v4362_v60 = vadd.f32 %v3153_v9, %v2919_v52 }
 0x1a4   : > { %v4365_v55 = vadd.f32 %v4280_v16, %v2937_v26  ;;  %v4368_v40 = vadd.f32 %v3157_v39, %v4297_v29 }
 0x1a6   : > { %v2938_v30 = vpop.f32.mrb[84].mxu0 }
 0x1a7   : > { %v2939_v41 = vpop.f32.mrb[85].mxu0 }
 0x1a8   : > { %v2940_v15 = vadd.f32 %v2939_v41, %v2938_v30  ;;  %v2941_v51 = vpop.f32.mrb[86].mxu0 }
 0x1a9   : > { %v2942_v53 = vpop.f32.mrb[87].mxu0 }
 0x1aa   : > { %v2943_v24 = vadd.f32 %v2942_v53, %v2941_v51  ;;  %v3173_v46 = vadd.f32 %v4285_v61, %v2940_v15 }
 0x1ac   : > { %v4372_v37 = vadd.f32 %v4290_v31, %v2943_v24 }
 0x1ae   : > { %v2944_v52 = vpop.f32.mrb[88].mxu0 }
 0x1af   : > { %v2945_v14 = vpop.f32.mrb[89].mxu0 }
 0x1b0   : > { %v2946_v16 = vadd.f32 %v2945_v14, %v2944_v52  ;;  %v2947_v44 = vpop.f32.mrb[90].mxu0 }
 0x1b1   : > { %v2948_v3 = vpop.f32.mrb[91].mxu0 }
 0x1b2   : > { %v2949_v29 = vadd.f32 %v2948_v3, %v2947_v44  ;;  %v4375_v23 = vadd.f32 %v4295_v50, %v2946_v16 }
 0x1b4   : > { %v4378_v6 = vadd.f32 %v4300_v18, %v2949_v29  ;;  %v4391_v18 = vld [vmem:[%s4485_s2] ss:$0 sm:$0xff] }
 0x1b6   : > { %v2950_v12 = vpop.f32.mrb[92].mxu0 }
 0x1b7   : > { %v2951_v5 = vpop.f32.mrb[93].mxu0 }
 0x1b8   : > { %v2952_v61 = vadd.f32 %v2951_v5, %v2950_v12  ;;  %v2953_v32 = vpop.f32.mrb[94].mxu0 }
 0x1b9   : > { %v2954_v31 = vpop.f32.mrb[95].mxu0 }
 0x1ba   : > { %v2955_v27 = vadd.f32 %v2954_v31, %v2953_v32  ;;  %v4383_v33 = vadd.f32 %v4303_v49, %v2952_v61 }
 0x1bc   : > { %v4386_v8 = vadd.f32 %v4306_v62, %v2955_v27 }
 0x1be   : > { %v3074_v50 = vpop.f32.mrb[96].mxu0  ;;  %v3086_v10 = vpop.f32.mrb[12].mxu1 }
 0x1bf   : > { %v3115_v35 = vadd.f32 %v4312_v56, %v3074_v50  ;;  %v3162_v17 = vadd.f32 %v3161_v28, %v3086_v10  ;;  %v2163_v58 = vpop.f32.mrb[97].mxu0  ;;  %v2211_v19 = vpop.f32.mrb[13].mxu1 }
 0x1c0   : > { %v3119_v49 = vadd.f32 %v4316_v22, %v2163_v58  ;;  %v3165_v62 = vadd.f32 %v4319_v45, %v2211_v19  ;;  %v3075_v2 = vpop.f32.mrb[98].mxu0  ;;  %v3087_v34 = vpop.f32.mrb[14].mxu1 }
 0x1c1   : > { %v2291_v56 = vadd.f32 %v3115_v35, %v4391_v18  ;;  %v2303_v28 = vadd.f32 %v3162_v17, %v4391_v18  ;;  %v3123_v43 = vadd.f32 %v4322_v11, %v3075_v2  ;;  %v3168_v4 = vadd.f32 %v4345_v0, %v3087_v34  ;;  %v2166_v1 = vpop.f32.mrb[99].mxu0  ;;  %v2214_v7 = vpop.f32.mrb[15].mxu1 }
 0x1c2   : > { %v2289_v22 = vadd.f32 %v3119_v49, %v4391_v18  ;;  %v2301_v45 = vadd.f32 %v3165_v62, %v4391_v18  ;;  %v3127_v13 = vadd.f32 %v4325_v21, %v2166_v1  ;;  %v3171_v54 = vadd.f32 %v4328_v42, %v2214_v7 }
 0x1c3   : > { %2315 = vst [vmem:[%s4397_s20 + $0x10] sm:$0xff] %v2291_v56  ;;  %2327 = vst [vmem:[%s4397_s20 + $0x70] sm:$0xff] %v2303_v28  ;;  %v2292_v11 = vadd.f32 %v3123_v43, %v4391_v18  ;;  %v2304_v9 = vadd.f32 %v3168_v4, %v4391_v18 }
 0x1c4   : > { %2313 = vst [vmem:[%s4397_s20] sm:$0xff] %v2289_v22  ;;  %2325 = vst [vmem:[%s4397_s20 + $0x60] sm:$0xff] %v2301_v45  ;;  %v2290_v0 = vadd.f32 %v3127_v13, %v4391_v18  ;;  %v2302_v36 = vadd.f32 %v3171_v54, %v4391_v18 }
 0x1c5   : > { %2316 = vst [vmem:[%s4397_s20 + $0x18] sm:$0xff] %v2292_v11  ;;  %2328 = vst [vmem:[%s4397_s20 + $0x78] sm:$0xff] %v2304_v9 }
 0x1c6   : > { %2314 = vst [vmem:[%s4397_s20 + $0x8] sm:$0xff] %v2290_v0  ;;  %2326 = vst [vmem:[%s4397_s20 + $0x68] sm:$0xff] %v2302_v36  ;;  %v3078_v47 = vpop.f32.mrb[100].mxu0  ;;  %v3090_v21 = vpop.f32.mrb[16].mxu1 }
 0x1c7   : > { %v3131_v42 = vadd.f32 %v4334_v48, %v3078_v47  ;;  %v3174_v39 = vadd.f32 %v3173_v46, %v3090_v21  ;;  %v2179_v26 = vpop.f32.mrb[101].mxu0  ;;  %v2227_v30 = vpop.f32.mrb[17].mxu1 }
 0x1c8   : > { %v3135_v41 = vadd.f32 %v4339_v20, %v2179_v26  ;;  %v3177_v15 = vadd.f32 %v4357_v59, %v2227_v30  ;;  %v3079_v51 = vpop.f32.mrb[102].mxu0  ;;  %v3091_v53 = vpop.f32.mrb[18].mxu1 }
 0x1c9   : > { %v2295_v24 = vadd.f32 %v3131_v42, %v4391_v18  ;;  %v2307_v52 = vadd.f32 %v3174_v39, %v4391_v18  ;;  %v3139_v14 = vadd.f32 %v4342_v63, %v3079_v51  ;;  %v3180_v48 = vadd.f32 %v4372_v37, %v3091_v53  ;;  %v2182_v46 = vpop.f32.mrb[103].mxu0  ;;  %v2230_v16 = vpop.f32.mrb[19].mxu1 }
 0x1ca   : > { %v2293_v20 = vadd.f32 %v3135_v41, %v4391_v18  ;;  %v2305_v59 = vadd.f32 %v3177_v15, %v4391_v18  ;;  %v3143_v44 = vadd.f32 %v4348_v38, %v2182_v46  ;;  %v3183_v3 = vadd.f32 %v4365_v55, %v2230_v16 }
 0x1cb   : > { %2319 = vst [vmem:[%s4397_s20 + $0x30] sm:$0xff] %v2295_v24  ;;  %2331 = vst [vmem:[%s4397_s20 + $0x90] sm:$0xff] %v2307_v52  ;;  %v2296_v63 = vadd.f32 %v3139_v14, %v4391_v18  ;;  %v2308_v29 = vadd.f32 %v3180_v48, %v4391_v18 }
 0x1cc   : > { %2317 = vst [vmem:[%s4397_s20 + $0x20] sm:$0xff] %v2293_v20  ;;  %2329 = vst [vmem:[%s4397_s20 + $0x80] sm:$0xff] %v2305_v59  ;;  %v2294_v37 = vadd.f32 %v3143_v44, %v4391_v18  ;;  %v2306_v12 = vadd.f32 %v3183_v3, %v4391_v18 }
 0x1cd   : > { %2320 = vst [vmem:[%s4397_s20 + $0x38] sm:$0xff] %v2296_v63  ;;  %2332 = vst [vmem:[%s4397_s20 + $0x98] sm:$0xff] %v2308_v29 }
 0x1ce   : > { %2318 = vst [vmem:[%s4397_s20 + $0x28] sm:$0xff] %v2294_v37  ;;  %2330 = vst [vmem:[%s4397_s20 + $0x88] sm:$0xff] %v2306_v12  ;;  %v3082_v5 = vpop.f32.mrb[104].mxu0  ;;  %v3094_v38 = vpop.f32.mrb[20].mxu1 }
 0x1cf   : > { %v3147_v55 = vadd.f32 %v4353_v57, %v3082_v5  ;;  %v3186_v61 = vadd.f32 %v4383_v33, %v3094_v38  ;;  %v2195_v32 = vpop.f32.mrb[105].mxu0  ;;  %v2243_v31 = vpop.f32.mrb[21].mxu1 }
 0x1d0   : > { %v3151_v27 = vadd.f32 %v4360_v25, %v2195_v32  ;;  %v3189_v50 = vadd.f32 %v4375_v23, %v2243_v31  ;;  %v3083_v10 = vpop.f32.mrb[106].mxu0  ;;  %v3095_v35 = vpop.f32.mrb[22].mxu1 }
 0x1d1   : > { %v2299_v17 = vadd.f32 %v3147_v55, %v4391_v18  ;;  %v2311_v58 = vadd.f32 %v3186_v61, %v4391_v18  ;;  %v3155_v57 = vadd.f32 %v4362_v60, %v3083_v10  ;;  %v3192_v33 = vadd.f32 %v4386_v8, %v3095_v35  ;;  %v2198_v19 = vpop.f32.mrb[107].mxu0  ;;  %v2246_v49 = vpop.f32.mrb[23].mxu1 }
 0x1d2   : > { %v2297_v25 = vadd.f32 %v3151_v27, %v4391_v18  ;;  %v2309_v23 = vadd.f32 %v3189_v50, %v4391_v18  ;;  %v3159_v62 = vadd.f32 %v4368_v40, %v2198_v19  ;;  %v3195_v2 = vadd.f32 %v4378_v6, %v2246_v49 }
 0x1d3   : > { %2323 = vst [vmem:[%s4397_s20 + $0x50] sm:$0xff] %v2299_v17  ;;  %2335 = vst [vmem:[%s4397_s20 + $0xb0] sm:$0xff] %v2311_v58  ;;  %v2300_v60 = vadd.f32 %v3155_v57, %v4391_v18  ;;  %v2312_v34 = vadd.f32 %v3192_v33, %v4391_v18 }
 0x1d4   : > { %2321 = vst [vmem:[%s4397_s20 + $0x40] sm:$0xff] %v2297_v25  ;;  %2333 = vst [vmem:[%s4397_s20 + $0xa0] sm:$0xff] %v2309_v23  ;;  %v2298_v8 = vadd.f32 %v3159_v62, %v4391_v18  ;;  %v2310_v56 = vadd.f32 %v3195_v2, %v4391_v18 }
 0x1d5   : > { %2324 = vst [vmem:[%s4397_s20 + $0x58] sm:$0xff] %v2300_v60  ;;  %2336 = vst [vmem:[%s4397_s20 + $0xb8] sm:$0xff] %v2312_v34 }
 0x1d6   : > { %2322 = vst [vmem:[%s4397_s20 + $0x48] sm:$0xff] %v2298_v8  ;;  %2334 = vst [vmem:[%s4397_s20 + $0xa8] sm:$0xff] %v2310_v56 }
 0x1d7 PF: > { %s13_s16 = sadd.s32 1, %s3428_s16   ;;  %s4487_s12 = smov %s3420_s14 }
 0x1d8   : > { %p10_p7 = scmp.ge.s32.totalorder %s13_s16, 6   ;;  %s4488_s13 = smov %s3424_s15 }
 0x1d9   : > { %s4489_s14 = smov %s4492_s17  ;;  %s4490_s15 = smov %s4496_s18 }
 0x1da   :  { %12 = sbr.rel (!%p10_p7) target bundleno = 3 (0x3), region = 64 }

</bundles_post_ra>
